<compile_context>
chip_gen: v7x
topology: tpu7x:2x2x1
jax: 0.10.0
libtpu: 0.0.40
codegen_flags: <defaults>
</compile_context>

<pallas_src>
import functools
import math

import jax
import jax.numpy as jnp
import numpy as np
from jax.experimental import pallas as pl
from jax.experimental.pallas import tpu as pltpu


# ----------------------------------------------------------------------------
# LSTM kernel: single grid step, in-kernel time loop; per-layer hidden/cell
# states persist in VMEM scratch.  Gate order follows PyTorch: i, f, g, o.
# gin0_ref already contains x@Wih0 + b0 for every timestep (hoisted).
# ----------------------------------------------------------------------------
def lstm_kernel(gin0_ref, whh0_ref, w1_ref, b1_ref, o_ref, h1, c1, h2, c2):
    T = gin0_ref.shape[0]
    H = h1.shape[1]

    h1[...] = jnp.zeros_like(h1)
    c1[...] = jnp.zeros_like(c1)
    h2[...] = jnp.zeros_like(h2)
    c2[...] = jnp.zeros_like(c2)

    def gates(g):
        sif = jax.nn.sigmoid(g[:, :2 * H])          # i|f contiguous slab
        i_g = sif[:, :H]
        f_g = sif[:, H:]
        g_g = jnp.tanh(g[:, 2 * H:3 * H])
        o_g = jax.nn.sigmoid(g[:, 3 * H:])
        return i_g, f_g, g_g, o_g

    def step(t, carry):
        # Layer 0: only the recurrent matmul is on the serial path.
        g0 = gin0_ref[t] + jnp.dot(h1[...], whh0_ref[...],
                                   preferred_element_type=jnp.float32)
        i0, f0, gg0, o0 = gates(g0)
        c1_new = f0 * c1[...] + i0 * gg0
        h1_new = o0 * jnp.tanh(c1_new)
        c1[...] = c1_new
        h1[...] = h1_new

        # TODO(synk): inter-layer LSTM dropout (train-mode only) skipped — identity at inference.
        # Layer 1: fused [x | h] @ [Wih; Whh] -> one K=2H matmul per step.
        xh = jnp.concatenate([h1_new, h2[...]], axis=1)
        g1 = (jnp.dot(xh, w1_ref[...], preferred_element_type=jnp.float32)
              + b1_ref[...])
        i1, f1, gg1, o1 = gates(g1)
        c2_new = f1 * c2[...] + i1 * gg1
        h2_new = o1 * jnp.tanh(c2_new)
        c2[...] = c2_new
        h2[...] = h2_new
        return carry

    jax.lax.fori_loop(0, T, step, 0, unroll=True)
    o_ref[...] = h2[...]                             # last timestep only


def run_lstm(gin0, whh0, w1, b1):
    T, B, G = gin0.shape
    H = whh0.shape[0]
    return pl.pallas_call(
        lstm_kernel,
        out_shape=jax.ShapeDtypeStruct((B, H), jnp.float32),
        grid=(1,),
        in_specs=[
            pl.BlockSpec((T, B, G), lambda i: (0, 0, 0)),
            pl.BlockSpec((H, G), lambda i: (0, 0)),
            pl.BlockSpec((2 * H, G), lambda i: (0, 0)),
            pl.BlockSpec((1, G), lambda i: (0, 0)),
        ],
        out_specs=pl.BlockSpec((B, H), lambda i: (0, 0)),
        scratch_shapes=[pltpu.VMEM((B, H), jnp.float32)] * 4,
        compiler_params=pltpu.CompilerParams(
            dimension_semantics=("arbitrary",)),
    )(gin0, whh0, w1, b1)


# ----------------------------------------------------------------------------
# Dueling heads: both 7-layer MLPs in one pallas_call, grid=(2,) over the head
# index ("parallel" -> 2 TensorCores on v7x; weight prefetch overlaps compute
# on single-TC chips).  Weights are bf16, accumulation in f32.  The feat
# concat is fused: feat@W1 = last_h@W1[:H] + status@W1[H:].
# ----------------------------------------------------------------------------
def head_kernel(h_ref, s_ref,
                w1h, w1s, b1, w2, b2, w3, b3, w4, b4, w5, b5, w6, b6, w7, b7,
                o_ref):
    f32 = jnp.float32
    x = (jnp.dot(h_ref[...], w1h[0].astype(f32), preferred_element_type=f32)
         + jnp.dot(s_ref[...], w1s[0].astype(f32), preferred_element_type=f32)
         + b1[0])
    x = jnp.maximum(x, 0.0)
    for w, b in ((w2, b2), (w3, b3), (w4, b4), (w5, b5), (w6, b6)):
        x = jnp.maximum(
            jnp.dot(x, w[0].astype(f32), preferred_element_type=f32) + b[0],
            0.0)
    o_ref[0] = jnp.dot(x, w7[0].astype(f32), preferred_element_type=f32) + b7[0]


def run_heads(last_h, status, head_flat):
    B, H = last_h.shape
    S = status.shape[1]
    A = head_flat[-1].shape[2]
    in_specs = [pl.BlockSpec((B, H), lambda i: (0, 0)),
                pl.BlockSpec((B, S), lambda i: (0, 0))]
    for arr in head_flat:
        in_specs.append(pl.BlockSpec((1,) + arr.shape[1:],
                                     lambda i: (i, 0, 0)))
    return pl.pallas_call(
        head_kernel,
        out_shape=jax.ShapeDtypeStruct((2, B, A), jnp.float32),
        grid=(2,),
        in_specs=in_specs,
        out_specs=pl.BlockSpec((1, B, A), lambda i: (i, 0, 0)),
        compiler_params=pltpu.CompilerParams(
            dimension_semantics=("parallel",)),
    )(last_h, status, *head_flat)


# ----------------------------------------------------------------------------
# Full forward (kernels do the hot path; transpose / input projection /
# dueling combine are cheap fused XLA glue).
# ----------------------------------------------------------------------------
def simple_lstm_forward(data_bti, status, params):
    lstm_params, head_flat = params
    (wih0, whh0, b0), (wih1, whh1, b1) = lstm_params
    # Hoisted layer-0 input projection, fused with batch_first -> time-major.
    gin0 = jnp.einsum('bti,io->tbo', data_bti, wih0,
                      precision=jax.lax.Precision.HIGHEST) + b0   # (T, B, 4H)
    w1 = jnp.concatenate([wih1, whh1], axis=0)                    # (2H, 4H)
    last_h = run_lstm(gin0, whh0, w1, b1)                         # (B, H)
    heads = run_heads(last_h, status, head_flat)                  # (2, B, A)
    val = heads[0, :, :1]      # val head padded to A cols; col 0 is real
    adv = heads[1]
    return val + adv - jnp.mean(adv, axis=1, keepdims=True)


# ----------------------------------------------------------------------------
# Deterministic parameter init (PyTorch-style uniform bounds).
# ----------------------------------------------------------------------------
def _uniform(key, shape, bound):
    return jax.random.uniform(key, shape, jnp.float32, -bound, bound)


def init_lstm_layer(key, in_dim, H):
    k = jax.random.split(key, 4)
    bound = 1.0 / math.sqrt(H)
    wih = _uniform(k[0], (in_dim, 4 * H), bound)   # stored transposed: (in, 4H)
    whh = _uniform(k[1], (H, 4 * H), bound)
    b = _uniform(k[2], (1, 4 * H), bound) + _uniform(k[3], (1, 4 * H), bound)
    return wih, whh, b


def init_head(key, dims):
    params = []
    keys = jax.random.split(key, len(dims) - 1)
    for i in range(len(dims) - 1):
        kw, kb = jax.random.split(keys[i])
        bound = 1.0 / math.sqrt(dims[i])
        w = _uniform(kw, (dims[i], dims[i + 1]), bound)  # (in, out)
        b = _uniform(kb, (1, dims[i + 1]), bound)
        params.append((w, b))
    return params


def pack_heads(val_params, adv_params, H, A):
    """Stack val/adv weights along a leading axis of size 2 (bf16 weights)."""
    flat = []
    n = len(val_params)
    for li, ((wv, bv), (wa, ba)) in enumerate(zip(val_params, adv_params)):
        if li == n - 1:                                  # pad val (·,1) -> (·,A)
            wv = jnp.pad(wv, ((0, 0), (0, A - wv.shape[1])))
            bv = jnp.pad(bv, ((0, 0), (0, A - bv.shape[1])))
        w = jnp.stack([wv, wa], axis=0)                  # bf16
        b = jnp.stack([bv, ba], axis=0).astype(jnp.float32)
        if li == 0:
            flat += [w[:, :H, :], w[:, H:, :], b]        # split for concat-fusion
        else:
            flat += [w, b]
    return flat


# ----------------------------------------------------------------------------
# Pure-JAX reference (same bf16-rounded head weights, f32 math).
# ----------------------------------------------------------------------------
def reference_forward(data_bti, status, lstm_params, val_params, adv_params):
    hp = jax.lax.Precision.HIGHEST
    B, T, I = data_bti.shape
    H = lstm_params[0][1].shape[0]
    h = [jnp.zeros((B, H), jnp.float32), jnp.zeros((B, H), jnp.float32)]
    c = [jnp.zeros((B, H), jnp.float32), jnp.zeros((B, H), jnp.float32)]
    for t in range(T):
        x = data_bti[:, t, :]
        for layer, (wih, whh, b) in enumerate(lstm_params):
            gates = (jnp.dot(x, wih, precision=hp)
                     + jnp.dot(h[layer], whh, precision=hp) + b)
            i_g = jax.nn.sigmoid(gates[:, 0:H])
            f_g = jax.nn.sigmoid(gates[:, H:2 * H])
            g_g = jnp.tanh(gates[:, 2 * H:3 * H])
            o_g = jax.nn.sigmoid(gates[:, 3 * H:4 * H])
            c[layer] = f_g * c[layer] + i_g * g_g
            h[layer] = o_g * jnp.tanh(c[layer])
            x = h[layer]
    feat = jnp.concatenate([h[-1], status], axis=1)

    def head(x, ps):
        for w, b in ps[:-1]:
            x = jnp.maximum(
                jnp.dot(x, w.astype(jnp.float32), precision=hp) + b, 0.0)
        w, b = ps[-1]
        return jnp.dot(x, w.astype(jnp.float32), precision=hp) + b

    val = head(feat, val_params)
    adv = head(feat, adv_params)
    return val + adv - jnp.mean(adv, axis=1, keepdims=True)


if __name__ == "__main__":
    # Small shapes consistent with the module's forward pass.
    B, T = 8, 8            # batch, sequence length
    INPUT_SIZE = 5         # LSTM input features (module default)
    H = 128                # n_hidden (scaled down from 512 for a small demo)
    STATUS = 32            # status_size
    ACTIONS = 3            # actions_n

    key = jax.random.PRNGKey(0)
    k_data, k_status, k_l0, k_l1, k_val, k_adv = jax.random.split(key, 6)

    data = jax.random.normal(k_data, (B, T, INPUT_SIZE), jnp.float32)
    status = jax.random.normal(k_status, (B, STATUS), jnp.float32)

    lstm_params = (init_lstm_layer(k_l0, INPUT_SIZE, H),
                   init_lstm_layer(k_l1, H, H))
    head_dims_val = [H + STATUS, 1024, 1024, 512, 512, 256, 128, 1]
    head_dims_adv = [H + STATUS, 1024, 1024, 512, 512, 256, 128, ACTIONS]
    # Head weights stored in bf16 (HBM-bandwidth bound); biases stay f32.
    val_params = [(w.astype(jnp.bfloat16), b)
                  for w, b in init_head(k_val, head_dims_val)]
    adv_params = [(w.astype(jnp.bfloat16), b)
                  for w, b in init_head(k_adv, head_dims_adv)]
    head_flat = pack_heads(val_params, adv_params, H, ACTIONS)
    kernel_params = (lstm_params, head_flat)

    fwd = jax.jit(functools.partial(simple_lstm_forward, params=kernel_params))
    q = jax.block_until_ready(fwd(data, status))

    q_ref = jax.block_until_ready(
        reference_forward(data, status, lstm_params, val_params, adv_params))
    np.testing.assert_allclose(np.asarray(q), np.asarray(q_ref),
                               rtol=2e-2, atol=2e-2)
    assert q.shape == (B, ACTIONS) and bool(jnp.all(jnp.isfinite(q)))

    print("KERNEL_OK")
</pallas_src>

<mosaic_0001>
module attributes {stable_mosaic.version = 11 : i64} {
  func.func @lstm_kernel(%arg0: i32, %arg1: memref<8x8x512xf32, #tpu.memory_space<vmem>>, %arg2: memref<128x512xf32, #tpu.memory_space<vmem>>, %arg3: memref<256x512xf32, #tpu.memory_space<vmem>>, %arg4: memref<1x512xf32, #tpu.memory_space<vmem>>, %arg5: memref<8x128xf32, #tpu.memory_space<vmem>>, %arg6: memref<8x128xf32, #tpu.memory_space<vmem>>, %arg7: memref<8x128xf32, #tpu.memory_space<vmem>>, %arg8: memref<8x128xf32, #tpu.memory_space<vmem>>, %arg9: memref<8x128xf32, #tpu.memory_space<vmem>>) attributes {dimension_semantics = [#tpu.dimension_semantics<arbitrary>], iteration_bounds = array<i64: 1>, scalar_prefetch = 0 : i64, scratch_operands = 4 : i64, tpu.core_type = #tpu.core_type<tc>, window_params = [{pipeline_mode = #tpu.pipeline_mode<synchronous>, transform_indices = @transform_0, window_bounds = array<i64: 8, 8, 512>}, {pipeline_mode = #tpu.pipeline_mode<synchronous>, transform_indices = @transform_1, window_bounds = array<i64: 128, 512>}, {pipeline_mode = #tpu.pipeline_mode<synchronous>, transform_indices = @transform_2, window_bounds = array<i64: 256, 512>}, {pipeline_mode = #tpu.pipeline_mode<synchronous>, transform_indices = @transform_3, window_bounds = array<i64: 1, 512>}, {pipeline_mode = #tpu.pipeline_mode<synchronous>, transform_indices = @transform_4, window_bounds = array<i64: 8, 128>}]} {
    %cst = arith.constant 0.000000e+00 : f32
    %0 = vector.broadcast %cst : f32 to vector<8x128xf32>
    %c0 = arith.constant 0 : index
    %c0_0 = arith.constant 0 : index
    %1 = vector.load %arg6[%c0, %c0_0] : memref<8x128xf32, #tpu.memory_space<vmem>>, vector<8x128xf32>
    tpu.vector_store %arg6[%c0, %c0_0], %0 {strides = array<i32>} : memref<8x128xf32, #tpu.memory_space<vmem>>, vector<8x128xf32>,
    %cst_1 = arith.constant 0.000000e+00 : f32
    %2 = vector.broadcast %cst_1 : f32 to vector<8x128xf32>
    %c0_2 = arith.constant 0 : index
    %c0_3 = arith.constant 0 : index
    %3 = vector.load %arg7[%c0_2, %c0_3] : memref<8x128xf32, #tpu.memory_space<vmem>>, vector<8x128xf32>
    tpu.vector_store %arg7[%c0_2, %c0_3], %2 {strides = array<i32>} : memref<8x128xf32, #tpu.memory_space<vmem>>, vector<8x128xf32>,
    %cst_4 = arith.constant 0.000000e+00 : f32
    %4 = vector.broadcast %cst_4 : f32 to vector<8x128xf32>
    %c0_5 = arith.constant 0 : index
    %c0_6 = arith.constant 0 : index
    %5 = vector.load %arg8[%c0_5, %c0_6] : memref<8x128xf32, #tpu.memory_space<vmem>>, vector<8x128xf32>
    tpu.vector_store %arg8[%c0_5, %c0_6], %4 {strides = array<i32>} : memref<8x128xf32, #tpu.memory_space<vmem>>, vector<8x128xf32>,
    %cst_7 = arith.constant 0.000000e+00 : f32
    %6 = vector.broadcast %cst_7 : f32 to vector<8x128xf32>
    %c0_8 = arith.constant 0 : index
    %c0_9 = arith.constant 0 : index
    %7 = vector.load %arg9[%c0_8, %c0_9] : memref<8x128xf32, #tpu.memory_space<vmem>>, vector<8x128xf32>
    tpu.vector_store %arg9[%c0_8, %c0_9], %6 {strides = array<i32>} : memref<8x128xf32, #tpu.memory_space<vmem>>, vector<8x128xf32>,
    %c0_i32 = arith.constant 0 : i32
    %8 = arith.index_cast %c0_i32 : i32 to index
    %c0_10 = arith.constant 0 : index
    %c0_11 = arith.constant 0 : index
    %9 = vector.load %arg1[%8, %c0_10, %c0_11] : memref<8x8x512xf32, #tpu.memory_space<vmem>>, vector<1x8x512xf32>
    %10 = vector.shape_cast %9 : vector<1x8x512xf32> to vector<8x512xf32>
    %c0_12 = arith.constant 0 : index
    %c0_13 = arith.constant 0 : index
    %11 = vector.load %arg6[%c0_12, %c0_13] : memref<8x128xf32, #tpu.memory_space<vmem>>, vector<8x128xf32>
    %c0_14 = arith.constant 0 : index
    %c0_15 = arith.constant 0 : index
    %12 = vector.load %arg2[%c0_14, %c0_15] : memref<128x512xf32, #tpu.memory_space<vmem>>, vector<128x512xf32>
    %cst_16 = arith.constant dense<0.000000e+00> : vector<8x512xf32>
    %13 = tpu.matmul %11, %12, %cst_16 {dimension_numbers = #tpu.dot_dimension_numbers<[1], [0], [0], [1], [0, 0, 1, 1], [], []>} : vector<8x128xf32>, vector<128x512xf32>, vector<8x512xf32> -> vector<8x512xf32>
    %14 = arith.addf %10, %13 : vector<8x512xf32>
    %15 = vector.extract_strided_slice %14 {offsets = [0, 0], sizes = [8, 256], strides = [1, 1]} : vector<8x512xf32> to vector<8x256xf32>
    %16 = arith.negf %15 : vector<8x256xf32>
    %17 = math.exp %16 : vector<8x256xf32>
    %cst_17 = arith.constant 1.000000e+00 : f32
    %18 = vector.broadcast %cst_17 : f32 to vector<8x256xf32>
    %19 = arith.addf %18, %17 : vector<8x256xf32>
    %20 = arith.divf %18, %19 : vector<8x256xf32>
    %21 = vector.extract_strided_slice %20 {offsets = [0, 0], sizes = [8, 128], strides = [1, 1]} : vector<8x256xf32> to vector<8x128xf32>
    %22 = vector.extract_strided_slice %20 {offsets = [0, 128], sizes = [8, 128], strides = [1, 1]} : vector<8x256xf32> to vector<8x128xf32>
    %23 = vector.extract_strided_slice %14 {offsets = [0, 256], sizes = [8, 128], strides = [1, 1]} : vector<8x512xf32> to vector<8x128xf32>
    %24 = math.tanh %23 : vector<8x128xf32>
    %25 = vector.extract_strided_slice %14 {offsets = [0, 384], sizes = [8, 128], strides = [1, 1]} : vector<8x512xf32> to vector<8x128xf32>
    %26 = arith.negf %25 : vector<8x128xf32>
    %27 = math.exp %26 : vector<8x128xf32>
    %cst_18 = arith.constant 1.000000e+00 : f32
    %28 = vector.broadcast %cst_18 : f32 to vector<8x128xf32>
    %29 = arith.addf %28, %27 : vector<8x128xf32>
    %30 = arith.divf %28, %29 : vector<8x128xf32>
    %c0_19 = arith.constant 0 : index
    %c0_20 = arith.constant 0 : index
    %31 = vector.load %arg7[%c0_19, %c0_20] : memref<8x128xf32, #tpu.memory_space<vmem>>, vector<8x128xf32>
    %32 = arith.mulf %22, %31 : vector<8x128xf32>
    %33 = arith.mulf %21, %24 : vector<8x128xf32>
    %34 = arith.addf %32, %33 : vector<8x128xf32>
    %35 = math.tanh %34 : vector<8x128xf32>
    %36 = arith.mulf %30, %35 : vector<8x128xf32>
    %c0_21 = arith.constant 0 : index
    %c0_22 = arith.constant 0 : index
    %37 = vector.load %arg7[%c0_21, %c0_22] : memref<8x128xf32, #tpu.memory_space<vmem>>, vector<8x128xf32>
    tpu.vector_store %arg7[%c0_21, %c0_22], %34 {strides = array<i32>} : memref<8x128xf32, #tpu.memory_space<vmem>>, vector<8x128xf32>,
    %c0_23 = arith.constant 0 : index
    %c0_24 = arith.constant 0 : index
    %38 = vector.load %arg6[%c0_23, %c0_24] : memref<8x128xf32, #tpu.memory_space<vmem>>, vector<8x128xf32>
    tpu.vector_store %arg6[%c0_23, %c0_24], %36 {strides = array<i32>} : memref<8x128xf32, #tpu.memory_space<vmem>>, vector<8x128xf32>,
    %c0_25 = arith.constant 0 : index
    %c0_26 = arith.constant 0 : index
    %39 = vector.load %arg8[%c0_25, %c0_26] : memref<8x128xf32, #tpu.memory_space<vmem>>, vector<8x128xf32>
    %40 = tpu.concatenate %36, %39 in 1 : vector<8x128xf32>, vector<8x128xf32> -> vector<8x256xf32>
    %c0_27 = arith.constant 0 : index
    %c0_28 = arith.constant 0 : index
    %41 = vector.load %arg3[%c0_27, %c0_28] : memref<256x512xf32, #tpu.memory_space<vmem>>, vector<256x512xf32>
    %cst_29 = arith.constant dense<0.000000e+00> : vector<8x512xf32>
    %42 = tpu.matmul %40, %41, %cst_29 {dimension_numbers = #tpu.dot_dimension_numbers<[1], [0], [0], [1], [0, 0, 1, 1], [], []>} : vector<8x256xf32>, vector<256x512xf32>, vector<8x512xf32> -> vector<8x512xf32>
    %c0_30 = arith.constant 0 : index
    %c0_31 = arith.constant 0 : index
    %43 = vector.load %arg4[%c0_30, %c0_31] : memref<1x512xf32, #tpu.memory_space<vmem>>, vector<1x512xf32>
    %44 = vector.broadcast %43 : vector<1x512xf32> to vector<8x512xf32>
    %45 = arith.addf %42, %44 : vector<8x512xf32>
    %46 = vector.extract_strided_slice %45 {offsets = [0, 0], sizes = [8, 256], strides = [1, 1]} : vector<8x512xf32> to vector<8x256xf32>
    %47 = arith.negf %46 : vector<8x256xf32>
    %48 = math.exp %47 : vector<8x256xf32>
    %cst_32 = arith.constant 1.000000e+00 : f32
    %49 = vector.broadcast %cst_32 : f32 to vector<8x256xf32>
    %50 = arith.addf %49, %48 : vector<8x256xf32>
    %51 = arith.divf %49, %50 : vector<8x256xf32>
    %52 = vector.extract_strided_slice %51 {offsets = [0, 0], sizes = [8, 128], strides = [1, 1]} : vector<8x256xf32> to vector<8x128xf32>
    %53 = vector.extract_strided_slice %51 {offsets = [0, 128], sizes = [8, 128], strides = [1, 1]} : vector<8x256xf32> to vector<8x128xf32>
    %54 = vector.extract_strided_slice %45 {offsets = [0, 256], sizes = [8, 128], strides = [1, 1]} : vector<8x512xf32> to vector<8x128xf32>
    %55 = math.tanh %54 : vector<8x128xf32>
    %56 = vector.extract_strided_slice %45 {offsets = [0, 384], sizes = [8, 128], strides = [1, 1]} : vector<8x512xf32> to vector<8x128xf32>
    %57 = arith.negf %56 : vector<8x128xf32>
    %58 = math.exp %57 : vector<8x128xf32>
    %cst_33 = arith.constant 1.000000e+00 : f32
    %59 = vector.broadcast %cst_33 : f32 to vector<8x128xf32>
    %60 = arith.addf %59, %58 : vector<8x128xf32>
    %61 = arith.divf %59, %60 : vector<8x128xf32>
    %c0_34 = arith.constant 0 : index
    %c0_35 = arith.constant 0 : index
    %62 = vector.load %arg9[%c0_34, %c0_35] : memref<8x128xf32, #tpu.memory_space<vmem>>, vector<8x128xf32>
    %63 = arith.mulf %53, %62 : vector<8x128xf32>
    %64 = arith.mulf %52, %55 : vector<8x128xf32>
    %65 = arith.addf %63, %64 : vector<8x128xf32>
    %66 = math.tanh %65 : vector<8x128xf32>
    %67 = arith.mulf %61, %66 : vector<8x128xf32>
    %c0_36 = arith.constant 0 : index
    %c0_37 = arith.constant 0 : index
    %68 = vector.load %arg9[%c0_36, %c0_37] : memref<8x128xf32, #tpu.memory_space<vmem>>, vector<8x128xf32>
    tpu.vector_store %arg9[%c0_36, %c0_37], %65 {strides = array<i32>} : memref<8x128xf32, #tpu.memory_space<vmem>>, vector<8x128xf32>,
    %c0_38 = arith.constant 0 : index
    %c0_39 = arith.constant 0 : index
    %69 = vector.load %arg8[%c0_38, %c0_39] : memref<8x128xf32, #tpu.memory_space<vmem>>, vector<8x128xf32>
    tpu.vector_store %arg8[%c0_38, %c0_39], %67 {strides = array<i32>} : memref<8x128xf32, #tpu.memory_space<vmem>>, vector<8x128xf32>,
    %c1_i32 = arith.constant 1 : i32
    %70 = arith.index_cast %c1_i32 : i32 to index
    %c0_40 = arith.constant 0 : index
    %c0_41 = arith.constant 0 : index
    %71 = vector.load %arg1[%70, %c0_40, %c0_41] : memref<8x8x512xf32, #tpu.memory_space<vmem>>, vector<1x8x512xf32>
    %72 = vector.shape_cast %71 : vector<1x8x512xf32> to vector<8x512xf32>
    %c0_42 = arith.constant 0 : index
    %c0_43 = arith.constant 0 : index
    %73 = vector.load %arg6[%c0_42, %c0_43] : memref<8x128xf32, #tpu.memory_space<vmem>>, vector<8x128xf32>
    %c0_44 = arith.constant 0 : index
    %c0_45 = arith.constant 0 : index
    %74 = vector.load %arg2[%c0_44, %c0_45] : memref<128x512xf32, #tpu.memory_space<vmem>>, vector<128x512xf32>
    %cst_46 = arith.constant dense<0.000000e+00> : vector<8x512xf32>
    %75 = tpu.matmul %73, %74, %cst_46 {dimension_numbers = #tpu.dot_dimension_numbers<[1], [0], [0], [1], [0, 0, 1, 1], [], []>} : vector<8x128xf32>, vector<128x512xf32>, vector<8x512xf32> -> vector<8x512xf32>
    %76 = arith.addf %72, %75 : vector<8x512xf32>
    %77 = vector.extract_strided_slice %76 {offsets = [0, 0], sizes = [8, 256], strides = [1, 1]} : vector<8x512xf32> to vector<8x256xf32>
    %78 = arith.negf %77 : vector<8x256xf32>
    %79 = math.exp %78 : vector<8x256xf32>
    %cst_47 = arith.constant 1.000000e+00 : f32
    %80 = vector.broadcast %cst_47 : f32 to vector<8x256xf32>
    %81 = arith.addf %80, %79 : vector<8x256xf32>
    %82 = arith.divf %80, %81 : vector<8x256xf32>
    %83 = vector.extract_strided_slice %82 {offsets = [0, 0], sizes = [8, 128], strides = [1, 1]} : vector<8x256xf32> to vector<8x128xf32>
    %84 = vector.extract_strided_slice %82 {offsets = [0, 128], sizes = [8, 128], strides = [1, 1]} : vector<8x256xf32> to vector<8x128xf32>
    %85 = vector.extract_strided_slice %76 {offsets = [0, 256], sizes = [8, 128], strides = [1, 1]} : vector<8x512xf32> to vector<8x128xf32>
    %86 = math.tanh %85 : vector<8x128xf32>
    %87 = vector.extract_strided_slice %76 {offsets = [0, 384], sizes = [8, 128], strides = [1, 1]} : vector<8x512xf32> to vector<8x128xf32>
    %88 = arith.negf %87 : vector<8x128xf32>
    %89 = math.exp %88 : vector<8x128xf32>
    %cst_48 = arith.constant 1.000000e+00 : f32
    %90 = vector.broadcast %cst_48 : f32 to vector<8x128xf32>
    %91 = arith.addf %90, %89 : vector<8x128xf32>
    %92 = arith.divf %90, %91 : vector<8x128xf32>
    %c0_49 = arith.constant 0 : index
    %c0_50 = arith.constant 0 : index
    %93 = vector.load %arg7[%c0_49, %c0_50] : memref<8x128xf32, #tpu.memory_space<vmem>>, vector<8x128xf32>
    %94 = arith.mulf %84, %93 : vector<8x128xf32>
    %95 = arith.mulf %83, %86 : vector<8x128xf32>
    %96 = arith.addf %94, %95 : vector<8x128xf32>
    %97 = math.tanh %96 : vector<8x128xf32>
    %98 = arith.mulf %92, %97 : vector<8x128xf32>
    %c0_51 = arith.constant 0 : index
    %c0_52 = arith.constant 0 : index
    %99 = vector.load %arg7[%c0_51, %c0_52] : memref<8x128xf32, #tpu.memory_space<vmem>>, vector<8x128xf32>
    tpu.vector_store %arg7[%c0_51, %c0_52], %96 {strides = array<i32>} : memref<8x128xf32, #tpu.memory_space<vmem>>, vector<8x128xf32>,
    %c0_53 = arith.constant 0 : index
    %c0_54 = arith.constant 0 : index
    %100 = vector.load %arg6[%c0_53, %c0_54] : memref<8x128xf32, #tpu.memory_space<vmem>>, vector<8x128xf32>
    tpu.vector_store %arg6[%c0_53, %c0_54], %98 {strides = array<i32>} : memref<8x128xf32, #tpu.memory_space<vmem>>, vector<8x128xf32>,
    %c0_55 = arith.constant 0 : index
    %c0_56 = arith.constant 0 : index
    %101 = vector.load %arg8[%c0_55, %c0_56] : memref<8x128xf32, #tpu.memory_space<vmem>>, vector<8x128xf32>
    %102 = tpu.concatenate %98, %101 in 1 : vector<8x128xf32>, vector<8x128xf32> -> vector<8x256xf32>
    %c0_57 = arith.constant 0 : index
    %c0_58 = arith.constant 0 : index
    %103 = vector.load %arg3[%c0_57, %c0_58] : memref<256x512xf32, #tpu.memory_space<vmem>>, vector<256x512xf32>
    %cst_59 = arith.constant dense<0.000000e+00> : vector<8x512xf32>
    %104 = tpu.matmul %102, %103, %cst_59 {dimension_numbers = #tpu.dot_dimension_numbers<[1], [0], [0], [1], [0, 0, 1, 1], [], []>} : vector<8x256xf32>, vector<256x512xf32>, vector<8x512xf32> -> vector<8x512xf32>
    %c0_60 = arith.constant 0 : index
    %c0_61 = arith.constant 0 : index
    %105 = vector.load %arg4[%c0_60, %c0_61] : memref<1x512xf32, #tpu.memory_space<vmem>>, vector<1x512xf32>
    %106 = vector.broadcast %105 : vector<1x512xf32> to vector<8x512xf32>
    %107 = arith.addf %104, %106 : vector<8x512xf32>
    %108 = vector.extract_strided_slice %107 {offsets = [0, 0], sizes = [8, 256], strides = [1, 1]} : vector<8x512xf32> to vector<8x256xf32>
    %109 = arith.negf %108 : vector<8x256xf32>
    %110 = math.exp %109 : vector<8x256xf32>
    %cst_62 = arith.constant 1.000000e+00 : f32
    %111 = vector.broadcast %cst_62 : f32 to vector<8x256xf32>
    %112 = arith.addf %111, %110 : vector<8x256xf32>
    %113 = arith.divf %111, %112 : vector<8x256xf32>
    %114 = vector.extract_strided_slice %113 {offsets = [0, 0], sizes = [8, 128], strides = [1, 1]} : vector<8x256xf32> to vector<8x128xf32>
    %115 = vector.extract_strided_slice %113 {offsets = [0, 128], sizes = [8, 128], strides = [1, 1]} : vector<8x256xf32> to vector<8x128xf32>
    %116 = vector.extract_strided_slice %107 {offsets = [0, 256], sizes = [8, 128], strides = [1, 1]} : vector<8x512xf32> to vector<8x128xf32>
    %117 = math.tanh %116 : vector<8x128xf32>
    %118 = vector.extract_strided_slice %107 {offsets = [0, 384], sizes = [8, 128], strides = [1, 1]} : vector<8x512xf32> to vector<8x128xf32>
    %119 = arith.negf %118 : vector<8x128xf32>
    %120 = math.exp %119 : vector<8x128xf32>
    %cst_63 = arith.constant 1.000000e+00 : f32
    %121 = vector.broadcast %cst_63 : f32 to vector<8x128xf32>
    %122 = arith.addf %121, %120 : vector<8x128xf32>
    %123 = arith.divf %121, %122 : vector<8x128xf32>
    %c0_64 = arith.constant 0 : index
    %c0_65 = arith.constant 0 : index
    %124 = vector.load %arg9[%c0_64, %c0_65] : memref<8x128xf32, #tpu.memory_space<vmem>>, vector<8x128xf32>
    %125 = arith.mulf %115, %124 : vector<8x128xf32>
    %126 = arith.mulf %114, %117 : vector<8x128xf32>
    %127 = arith.addf %125, %126 : vector<8x128xf32>
    %128 = math.tanh %127 : vector<8x128xf32>
    %129 = arith.mulf %123, %128 : vector<8x128xf32>
    %c0_66 = arith.constant 0 : index
    %c0_67 = arith.constant 0 : index
    %130 = vector.load %arg9[%c0_66, %c0_67] : memref<8x128xf32, #tpu.memory_space<vmem>>, vector<8x128xf32>
    tpu.vector_store %arg9[%c0_66, %c0_67], %127 {strides = array<i32>} : memref<8x128xf32, #tpu.memory_space<vmem>>, vector<8x128xf32>,
    %c0_68 = arith.constant 0 : index
    %c0_69 = arith.constant 0 : index
    %131 = vector.load %arg8[%c0_68, %c0_69] : memref<8x128xf32, #tpu.memory_space<vmem>>, vector<8x128xf32>
    tpu.vector_store %arg8[%c0_68, %c0_69], %129 {strides = array<i32>} : memref<8x128xf32, #tpu.memory_space<vmem>>, vector<8x128xf32>,
    %c2_i32 = arith.constant 2 : i32
    %132 = arith.index_cast %c2_i32 : i32 to index
    %c0_70 = arith.constant 0 : index
    %c0_71 = arith.constant 0 : index
    %133 = vector.load %arg1[%132, %c0_70, %c0_71] : memref<8x8x512xf32, #tpu.memory_space<vmem>>, vector<1x8x512xf32>
    %134 = vector.shape_cast %133 : vector<1x8x512xf32> to vector<8x512xf32>
    %c0_72 = arith.constant 0 : index
    %c0_73 = arith.constant 0 : index
    %135 = vector.load %arg6[%c0_72, %c0_73] : memref<8x128xf32, #tpu.memory_space<vmem>>, vector<8x128xf32>
    %c0_74 = arith.constant 0 : index
    %c0_75 = arith.constant 0 : index
    %136 = vector.load %arg2[%c0_74, %c0_75] : memref<128x512xf32, #tpu.memory_space<vmem>>, vector<128x512xf32>
    %cst_76 = arith.constant dense<0.000000e+00> : vector<8x512xf32>
    %137 = tpu.matmul %135, %136, %cst_76 {dimension_numbers = #tpu.dot_dimension_numbers<[1], [0], [0], [1], [0, 0, 1, 1], [], []>} : vector<8x128xf32>, vector<128x512xf32>, vector<8x512xf32> -> vector<8x512xf32>
    %138 = arith.addf %134, %137 : vector<8x512xf32>
    %139 = vector.extract_strided_slice %138 {offsets = [0, 0], sizes = [8, 256], strides = [1, 1]} : vector<8x512xf32> to vector<8x256xf32>
    %140 = arith.negf %139 : vector<8x256xf32>
    %141 = math.exp %140 : vector<8x256xf32>
    %cst_77 = arith.constant 1.000000e+00 : f32
    %142 = vector.broadcast %cst_77 : f32 to vector<8x256xf32>
    %143 = arith.addf %142, %141 : vector<8x256xf32>
    %144 = arith.divf %142, %143 : vector<8x256xf32>
    %145 = vector.extract_strided_slice %144 {offsets = [0, 0], sizes = [8, 128], strides = [1, 1]} : vector<8x256xf32> to vector<8x128xf32>
    %146 = vector.extract_strided_slice %144 {offsets = [0, 128], sizes = [8, 128], strides = [1, 1]} : vector<8x256xf32> to vector<8x128xf32>
    %147 = vector.extract_strided_slice %138 {offsets = [0, 256], sizes = [8, 128], strides = [1, 1]} : vector<8x512xf32> to vector<8x128xf32>
    %148 = math.tanh %147 : vector<8x128xf32>
    %149 = vector.extract_strided_slice %138 {offsets = [0, 384], sizes = [8, 128], strides = [1, 1]} : vector<8x512xf32> to vector<8x128xf32>
    %150 = arith.negf %149 : vector<8x128xf32>
    %151 = math.exp %150 : vector<8x128xf32>
    %cst_78 = arith.constant 1.000000e+00 : f32
    %152 = vector.broadcast %cst_78 : f32 to vector<8x128xf32>
    %153 = arith.addf %152, %151 : vector<8x128xf32>
    %154 = arith.divf %152, %153 : vector<8x128xf32>
    %c0_79 = arith.constant 0 : index
    %c0_80 = arith.constant 0 : index
    %155 = vector.load %arg7[%c0_79, %c0_80] : memref<8x128xf32, #tpu.memory_space<vmem>>, vector<8x128xf32>
    %156 = arith.mulf %146, %155 : vector<8x128xf32>
    %157 = arith.mulf %145, %148 : vector<8x128xf32>
    %158 = arith.addf %156, %157 : vector<8x128xf32>
    %159 = math.tanh %158 : vector<8x128xf32>
    %160 = arith.mulf %154, %159 : vector<8x128xf32>
    %c0_81 = arith.constant 0 : index
    %c0_82 = arith.constant 0 : index
    %161 = vector.load %arg7[%c0_81, %c0_82] : memref<8x128xf32, #tpu.memory_space<vmem>>, vector<8x128xf32>
    tpu.vector_store %arg7[%c0_81, %c0_82], %158 {strides = array<i32>} : memref<8x128xf32, #tpu.memory_space<vmem>>, vector<8x128xf32>,
    %c0_83 = arith.constant 0 : index
    %c0_84 = arith.constant 0 : index
    %162 = vector.load %arg6[%c0_83, %c0_84] : memref<8x128xf32, #tpu.memory_space<vmem>>, vector<8x128xf32>
    tpu.vector_store %arg6[%c0_83, %c0_84], %160 {strides = array<i32>} : memref<8x128xf32, #tpu.memory_space<vmem>>, vector<8x128xf32>,
    %c0_85 = arith.constant 0 : index
    %c0_86 = arith.constant 0 : index
    %163 = vector.load %arg8[%c0_85, %c0_86] : memref<8x128xf32, #tpu.memory_space<vmem>>, vector<8x128xf32>
    %164 = tpu.concatenate %160, %163 in 1 : vector<8x128xf32>, vector<8x128xf32> -> vector<8x256xf32>
    %c0_87 = arith.constant 0 : index
    %c0_88 = arith.constant 0 : index
    %165 = vector.load %arg3[%c0_87, %c0_88] : memref<256x512xf32, #tpu.memory_space<vmem>>, vector<256x512xf32>
    %cst_89 = arith.constant dense<0.000000e+00> : vector<8x512xf32>
    %166 = tpu.matmul %164, %165, %cst_89 {dimension_numbers = #tpu.dot_dimension_numbers<[1], [0], [0], [1], [0, 0, 1, 1], [], []>} : vector<8x256xf32>, vector<256x512xf32>, vector<8x512xf32> -> vector<8x512xf32>
    %c0_90 = arith.constant 0 : index
    %c0_91 = arith.constant 0 : index
    %167 = vector.load %arg4[%c0_90, %c0_91] : memref<1x512xf32, #tpu.memory_space<vmem>>, vector<1x512xf32>
    %168 = vector.broadcast %167 : vector<1x512xf32> to vector<8x512xf32>
    %169 = arith.addf %166, %168 : vector<8x512xf32>
    %170 = vector.extract_strided_slice %169 {offsets = [0, 0], sizes = [8, 256], strides = [1, 1]} : vector<8x512xf32> to vector<8x256xf32>
    %171 = arith.negf %170 : vector<8x256xf32>
    %172 = math.exp %171 : vector<8x256xf32>
    %cst_92 = arith.constant 1.000000e+00 : f32
    %173 = vector.broadcast %cst_92 : f32 to vector<8x256xf32>
    %174 = arith.addf %173, %172 : vector<8x256xf32>
    %175 = arith.divf %173, %174 : vector<8x256xf32>
    %176 = vector.extract_strided_slice %175 {offsets = [0, 0], sizes = [8, 128], strides = [1, 1]} : vector<8x256xf32> to vector<8x128xf32>
    %177 = vector.extract_strided_slice %175 {offsets = [0, 128], sizes = [8, 128], strides = [1, 1]} : vector<8x256xf32> to vector<8x128xf32>
    %178 = vector.extract_strided_slice %169 {offsets = [0, 256], sizes = [8, 128], strides = [1, 1]} : vector<8x512xf32> to vector<8x128xf32>
    %179 = math.tanh %178 : vector<8x128xf32>
    %180 = vector.extract_strided_slice %169 {offsets = [0, 384], sizes = [8, 128], strides = [1, 1]} : vector<8x512xf32> to vector<8x128xf32>
    %181 = arith.negf %180 : vector<8x128xf32>
    %182 = math.exp %181 : vector<8x128xf32>
    %cst_93 = arith.constant 1.000000e+00 : f32
    %183 = vector.broadcast %cst_93 : f32 to vector<8x128xf32>
    %184 = arith.addf %183, %182 : vector<8x128xf32>
    %185 = arith.divf %183, %184 : vector<8x128xf32>
    %c0_94 = arith.constant 0 : index
    %c0_95 = arith.constant 0 : index
    %186 = vector.load %arg9[%c0_94, %c0_95] : memref<8x128xf32, #tpu.memory_space<vmem>>, vector<8x128xf32>
    %187 = arith.mulf %177, %186 : vector<8x128xf32>
    %188 = arith.mulf %176, %179 : vector<8x128xf32>
    %189 = arith.addf %187, %188 : vector<8x128xf32>
    %190 = math.tanh %189 : vector<8x128xf32>
    %191 = arith.mulf %185, %190 : vector<8x128xf32>
    %c0_96 = arith.constant 0 : index
    %c0_97 = arith.constant 0 : index
    %192 = vector.load %arg9[%c0_96, %c0_97] : memref<8x128xf32, #tpu.memory_space<vmem>>, vector<8x128xf32>
    tpu.vector_store %arg9[%c0_96, %c0_97], %189 {strides = array<i32>} : memref<8x128xf32, #tpu.memory_space<vmem>>, vector<8x128xf32>,
    %c0_98 = arith.constant 0 : index
    %c0_99 = arith.constant 0 : index
    %193 = vector.load %arg8[%c0_98, %c0_99] : memref<8x128xf32, #tpu.memory_space<vmem>>, vector<8x128xf32>
    tpu.vector_store %arg8[%c0_98, %c0_99], %191 {strides = array<i32>} : memref<8x128xf32, #tpu.memory_space<vmem>>, vector<8x128xf32>,
    %c3_i32 = arith.constant 3 : i32
    %194 = arith.index_cast %c3_i32 : i32 to index
    %c0_100 = arith.constant 0 : index
    %c0_101 = arith.constant 0 : index
    %195 = vector.load %arg1[%194, %c0_100, %c0_101] : memref<8x8x512xf32, #tpu.memory_space<vmem>>, vector<1x8x512xf32>
    %196 = vector.shape_cast %195 : vector<1x8x512xf32> to vector<8x512xf32>
    %c0_102 = arith.constant 0 : index
    %c0_103 = arith.constant 0 : index
    %197 = vector.load %arg6[%c0_102, %c0_103] : memref<8x128xf32, #tpu.memory_space<vmem>>, vector<8x128xf32>
    %c0_104 = arith.constant 0 : index
    %c0_105 = arith.constant 0 : index
    %198 = vector.load %arg2[%c0_104, %c0_105] : memref<128x512xf32, #tpu.memory_space<vmem>>, vector<128x512xf32>
    %cst_106 = arith.constant dense<0.000000e+00> : vector<8x512xf32>
    %199 = tpu.matmul %197, %198, %cst_106 {dimension_numbers = #tpu.dot_dimension_numbers<[1], [0], [0], [1], [0, 0, 1, 1], [], []>} : vector<8x128xf32>, vector<128x512xf32>, vector<8x512xf32> -> vector<8x512xf32>
    %200 = arith.addf %196, %199 : vector<8x512xf32>
    %201 = vector.extract_strided_slice %200 {offsets = [0, 0], sizes = [8, 256], strides = [1, 1]} : vector<8x512xf32> to vector<8x256xf32>
    %202 = arith.negf %201 : vector<8x256xf32>
    %203 = math.exp %202 : vector<8x256xf32>
    %cst_107 = arith.constant 1.000000e+00 : f32
    %204 = vector.broadcast %cst_107 : f32 to vector<8x256xf32>
    %205 = arith.addf %204, %203 : vector<8x256xf32>
    %206 = arith.divf %204, %205 : vector<8x256xf32>
    %207 = vector.extract_strided_slice %206 {offsets = [0, 0], sizes = [8, 128], strides = [1, 1]} : vector<8x256xf32> to vector<8x128xf32>
    %208 = vector.extract_strided_slice %206 {offsets = [0, 128], sizes = [8, 128], strides = [1, 1]} : vector<8x256xf32> to vector<8x128xf32>
    %209 = vector.extract_strided_slice %200 {offsets = [0, 256], sizes = [8, 128], strides = [1, 1]} : vector<8x512xf32> to vector<8x128xf32>
    %210 = math.tanh %209 : vector<8x128xf32>
    %211 = vector.extract_strided_slice %200 {offsets = [0, 384], sizes = [8, 128], strides = [1, 1]} : vector<8x512xf32> to vector<8x128xf32>
    %212 = arith.negf %211 : vector<8x128xf32>
    %213 = math.exp %212 : vector<8x128xf32>
    %cst_108 = arith.constant 1.000000e+00 : f32
    %214 = vector.broadcast %cst_108 : f32 to vector<8x128xf32>
    %215 = arith.addf %214, %213 : vector<8x128xf32>
    %216 = arith.divf %214, %215 : vector<8x128xf32>
    %c0_109 = arith.constant 0 : index
    %c0_110 = arith.constant 0 : index
    %217 = vector.load %arg7[%c0_109, %c0_110] : memref<8x128xf32, #tpu.memory_space<vmem>>, vector<8x128xf32>
    %218 = arith.mulf %208, %217 : vector<8x128xf32>
    %219 = arith.mulf %207, %210 : vector<8x128xf32>
    %220 = arith.addf %218, %219 : vector<8x128xf32>
    %221 = math.tanh %220 : vector<8x128xf32>
    %222 = arith.mulf %216, %221 : vector<8x128xf32>
    %c0_111 = arith.constant 0 : index
    %c0_112 = arith.constant 0 : index
    %223 = vector.load %arg7[%c0_111, %c0_112] : memref<8x128xf32, #tpu.memory_space<vmem>>, vector<8x128xf32>
    tpu.vector_store %arg7[%c0_111, %c0_112], %220 {strides = array<i32>} : memref<8x128xf32, #tpu.memory_space<vmem>>, vector<8x128xf32>,
    %c0_113 = arith.constant 0 : index
    %c0_114 = arith.constant 0 : index
    %224 = vector.load %arg6[%c0_113, %c0_114] : memref<8x128xf32, #tpu.memory_space<vmem>>, vector<8x128xf32>
    tpu.vector_store %arg6[%c0_113, %c0_114], %222 {strides = array<i32>} : memref<8x128xf32, #tpu.memory_space<vmem>>, vector<8x128xf32>,
    %c0_115 = arith.constant 0 : index
    %c0_116 = arith.constant 0 : index
    %225 = vector.load %arg8[%c0_115, %c0_116] : memref<8x128xf32, #tpu.memory_space<vmem>>, vector<8x128xf32>
    %226 = tpu.concatenate %222, %225 in 1 : vector<8x128xf32>, vector<8x128xf32> -> vector<8x256xf32>
    %c0_117 = arith.constant 0 : index
    %c0_118 = arith.constant 0 : index
    %227 = vector.load %arg3[%c0_117, %c0_118] : memref<256x512xf32, #tpu.memory_space<vmem>>, vector<256x512xf32>
    %cst_119 = arith.constant dense<0.000000e+00> : vector<8x512xf32>
    %228 = tpu.matmul %226, %227, %cst_119 {dimension_numbers = #tpu.dot_dimension_numbers<[1], [0], [0], [1], [0, 0, 1, 1], [], []>} : vector<8x256xf32>, vector<256x512xf32>, vector<8x512xf32> -> vector<8x512xf32>
    %c0_120 = arith.constant 0 : index
    %c0_121 = arith.constant 0 : index
    %229 = vector.load %arg4[%c0_120, %c0_121] : memref<1x512xf32, #tpu.memory_space<vmem>>, vector<1x512xf32>
    %230 = vector.broadcast %229 : vector<1x512xf32> to vector<8x512xf32>
    %231 = arith.addf %228, %230 : vector<8x512xf32>
    %232 = vector.extract_strided_slice %231 {offsets = [0, 0], sizes = [8, 256], strides = [1, 1]} : vector<8x512xf32> to vector<8x256xf32>
    %233 = arith.negf %232 : vector<8x256xf32>
    %234 = math.exp %233 : vector<8x256xf32>
    %cst_122 = arith.constant 1.000000e+00 : f32
    %235 = vector.broadcast %cst_122 : f32 to vector<8x256xf32>
    %236 = arith.addf %235, %234 : vector<8x256xf32>
    %237 = arith.divf %235, %236 : vector<8x256xf32>
    %238 = vector.extract_strided_slice %237 {offsets = [0, 0], sizes = [8, 128], strides = [1, 1]} : vector<8x256xf32> to vector<8x128xf32>
    %239 = vector.extract_strided_slice %237 {offsets = [0, 128], sizes = [8, 128], strides = [1, 1]} : vector<8x256xf32> to vector<8x128xf32>
    %240 = vector.extract_strided_slice %231 {offsets = [0, 256], sizes = [8, 128], strides = [1, 1]} : vector<8x512xf32> to vector<8x128xf32>
    %241 = math.tanh %240 : vector<8x128xf32>
    %242 = vector.extract_strided_slice %231 {offsets = [0, 384], sizes = [8, 128], strides = [1, 1]} : vector<8x512xf32> to vector<8x128xf32>
    %243 = arith.negf %242 : vector<8x128xf32>
    %244 = math.exp %243 : vector<8x128xf32>
    %cst_123 = arith.constant 1.000000e+00 : f32
    %245 = vector.broadcast %cst_123 : f32 to vector<8x128xf32>
    %246 = arith.addf %245, %244 : vector<8x128xf32>
    %247 = arith.divf %245, %246 : vector<8x128xf32>
    %c0_124 = arith.constant 0 : index
    %c0_125 = arith.constant 0 : index
    %248 = vector.load %arg9[%c0_124, %c0_125] : memref<8x128xf32, #tpu.memory_space<vmem>>, vector<8x128xf32>
    %249 = arith.mulf %239, %248 : vector<8x128xf32>
    %250 = arith.mulf %238, %241 : vector<8x128xf32>
    %251 = arith.addf %249, %250 : vector<8x128xf32>
    %252 = math.tanh %251 : vector<8x128xf32>
    %253 = arith.mulf %247, %252 : vector<8x128xf32>
    %c0_126 = arith.constant 0 : index
    %c0_127 = arith.constant 0 : index
    %254 = vector.load %arg9[%c0_126, %c0_127] : memref<8x128xf32, #tpu.memory_space<vmem>>, vector<8x128xf32>
    tpu.vector_store %arg9[%c0_126, %c0_127], %251 {strides = array<i32>} : memref<8x128xf32, #tpu.memory_space<vmem>>, vector<8x128xf32>,
    %c0_128 = arith.constant 0 : index
    %c0_129 = arith.constant 0 : index
    %255 = vector.load %arg8[%c0_128, %c0_129] : memref<8x128xf32, #tpu.memory_space<vmem>>, vector<8x128xf32>
    tpu.vector_store %arg8[%c0_128, %c0_129], %253 {strides = array<i32>} : memref<8x128xf32, #tpu.memory_space<vmem>>, vector<8x128xf32>,
    %c4_i32 = arith.constant 4 : i32
    %256 = arith.index_cast %c4_i32 : i32 to index
    %c0_130 = arith.constant 0 : index
    %c0_131 = arith.constant 0 : index
    %257 = vector.load %arg1[%256, %c0_130, %c0_131] : memref<8x8x512xf32, #tpu.memory_space<vmem>>, vector<1x8x512xf32>
    %258 = vector.shape_cast %257 : vector<1x8x512xf32> to vector<8x512xf32>
    %c0_132 = arith.constant 0 : index
    %c0_133 = arith.constant 0 : index
    %259 = vector.load %arg6[%c0_132, %c0_133] : memref<8x128xf32, #tpu.memory_space<vmem>>, vector<8x128xf32>
    %c0_134 = arith.constant 0 : index
    %c0_135 = arith.constant 0 : index
    %260 = vector.load %arg2[%c0_134, %c0_135] : memref<128x512xf32, #tpu.memory_space<vmem>>, vector<128x512xf32>
    %cst_136 = arith.constant dense<0.000000e+00> : vector<8x512xf32>
    %261 = tpu.matmul %259, %260, %cst_136 {dimension_numbers = #tpu.dot_dimension_numbers<[1], [0], [0], [1], [0, 0, 1, 1], [], []>} : vector<8x128xf32>, vector<128x512xf32>, vector<8x512xf32> -> vector<8x512xf32>
    %262 = arith.addf %258, %261 : vector<8x512xf32>
    %263 = vector.extract_strided_slice %262 {offsets = [0, 0], sizes = [8, 256], strides = [1, 1]} : vector<8x512xf32> to vector<8x256xf32>
    %264 = arith.negf %263 : vector<8x256xf32>
    %265 = math.exp %264 : vector<8x256xf32>
    %cst_137 = arith.constant 1.000000e+00 : f32
    %266 = vector.broadcast %cst_137 : f32 to vector<8x256xf32>
    %267 = arith.addf %266, %265 : vector<8x256xf32>
    %268 = arith.divf %266, %267 : vector<8x256xf32>
    %269 = vector.extract_strided_slice %268 {offsets = [0, 0], sizes = [8, 128], strides = [1, 1]} : vector<8x256xf32> to vector<8x128xf32>
    %270 = vector.extract_strided_slice %268 {offsets = [0, 128], sizes = [8, 128], strides = [1, 1]} : vector<8x256xf32> to vector<8x128xf32>
    %271 = vector.extract_strided_slice %262 {offsets = [0, 256], sizes = [8, 128], strides = [1, 1]} : vector<8x512xf32> to vector<8x128xf32>
    %272 = math.tanh %271 : vector<8x128xf32>
    %273 = vector.extract_strided_slice %262 {offsets = [0, 384], sizes = [8, 128], strides = [1, 1]} : vector<8x512xf32> to vector<8x128xf32>
    %274 = arith.negf %273 : vector<8x128xf32>
    %275 = math.exp %274 : vector<8x128xf32>
    %cst_138 = arith.constant 1.000000e+00 : f32
    %276 = vector.broadcast %cst_138 : f32 to vector<8x128xf32>
    %277 = arith.addf %276, %275 : vector<8x128xf32>
    %278 = arith.divf %276, %277 : vector<8x128xf32>
    %c0_139 = arith.constant 0 : index
    %c0_140 = arith.constant 0 : index
    %279 = vector.load %arg7[%c0_139, %c0_140] : memref<8x128xf32, #tpu.memory_space<vmem>>, vector<8x128xf32>
    %280 = arith.mulf %270, %279 : vector<8x128xf32>
    %281 = arith.mulf %269, %272 : vector<8x128xf32>
    %282 = arith.addf %280, %281 : vector<8x128xf32>
    %283 = math.tanh %282 : vector<8x128xf32>
    %284 = arith.mulf %278, %283 : vector<8x128xf32>
    %c0_141 = arith.constant 0 : index
    %c0_142 = arith.constant 0 : index
    %285 = vector.load %arg7[%c0_141, %c0_142] : memref<8x128xf32, #tpu.memory_space<vmem>>, vector<8x128xf32>
    tpu.vector_store %arg7[%c0_141, %c0_142], %282 {strides = array<i32>} : memref<8x128xf32, #tpu.memory_space<vmem>>, vector<8x128xf32>,
    %c0_143 = arith.constant 0 : index
    %c0_144 = arith.constant 0 : index
    %286 = vector.load %arg6[%c0_143, %c0_144] : memref<8x128xf32, #tpu.memory_space<vmem>>, vector<8x128xf32>
    tpu.vector_store %arg6[%c0_143, %c0_144], %284 {strides = array<i32>} : memref<8x128xf32, #tpu.memory_space<vmem>>, vector<8x128xf32>,
    %c0_145 = arith.constant 0 : index
    %c0_146 = arith.constant 0 : index
    %287 = vector.load %arg8[%c0_145, %c0_146] : memref<8x128xf32, #tpu.memory_space<vmem>>, vector<8x128xf32>
    %288 = tpu.concatenate %284, %287 in 1 : vector<8x128xf32>, vector<8x128xf32> -> vector<8x256xf32>
    %c0_147 = arith.constant 0 : index
    %c0_148 = arith.constant 0 : index
    %289 = vector.load %arg3[%c0_147, %c0_148] : memref<256x512xf32, #tpu.memory_space<vmem>>, vector<256x512xf32>
    %cst_149 = arith.constant dense<0.000000e+00> : vector<8x512xf32>
    %290 = tpu.matmul %288, %289, %cst_149 {dimension_numbers = #tpu.dot_dimension_numbers<[1], [0], [0], [1], [0, 0, 1, 1], [], []>} : vector<8x256xf32>, vector<256x512xf32>, vector<8x512xf32> -> vector<8x512xf32>
    %c0_150 = arith.constant 0 : index
    %c0_151 = arith.constant 0 : index
    %291 = vector.load %arg4[%c0_150, %c0_151] : memref<1x512xf32, #tpu.memory_space<vmem>>, vector<1x512xf32>
    %292 = vector.broadcast %291 : vector<1x512xf32> to vector<8x512xf32>
    %293 = arith.addf %290, %292 : vector<8x512xf32>
    %294 = vector.extract_strided_slice %293 {offsets = [0, 0], sizes = [8, 256], strides = [1, 1]} : vector<8x512xf32> to vector<8x256xf32>
    %295 = arith.negf %294 : vector<8x256xf32>
    %296 = math.exp %295 : vector<8x256xf32>
    %cst_152 = arith.constant 1.000000e+00 : f32
    %297 = vector.broadcast %cst_152 : f32 to vector<8x256xf32>
    %298 = arith.addf %297, %296 : vector<8x256xf32>
    %299 = arith.divf %297, %298 : vector<8x256xf32>
    %300 = vector.extract_strided_slice %299 {offsets = [0, 0], sizes = [8, 128], strides = [1, 1]} : vector<8x256xf32> to vector<8x128xf32>
    %301 = vector.extract_strided_slice %299 {offsets = [0, 128], sizes = [8, 128], strides = [1, 1]} : vector<8x256xf32> to vector<8x128xf32>
    %302 = vector.extract_strided_slice %293 {offsets = [0, 256], sizes = [8, 128], strides = [1, 1]} : vector<8x512xf32> to vector<8x128xf32>
    %303 = math.tanh %302 : vector<8x128xf32>
    %304 = vector.extract_strided_slice %293 {offsets = [0, 384], sizes = [8, 128], strides = [1, 1]} : vector<8x512xf32> to vector<8x128xf32>
    %305 = arith.negf %304 : vector<8x128xf32>
    %306 = math.exp %305 : vector<8x128xf32>
    %cst_153 = arith.constant 1.000000e+00 : f32
    %307 = vector.broadcast %cst_153 : f32 to vector<8x128xf32>
    %308 = arith.addf %307, %306 : vector<8x128xf32>
    %309 = arith.divf %307, %308 : vector<8x128xf32>
    %c0_154 = arith.constant 0 : index
    %c0_155 = arith.constant 0 : index
    %310 = vector.load %arg9[%c0_154, %c0_155] : memref<8x128xf32, #tpu.memory_space<vmem>>, vector<8x128xf32>
    %311 = arith.mulf %301, %310 : vector<8x128xf32>
    %312 = arith.mulf %300, %303 : vector<8x128xf32>
    %313 = arith.addf %311, %312 : vector<8x128xf32>
    %314 = math.tanh %313 : vector<8x128xf32>
    %315 = arith.mulf %309, %314 : vector<8x128xf32>
    %c0_156 = arith.constant 0 : index
    %c0_157 = arith.constant 0 : index
    %316 = vector.load %arg9[%c0_156, %c0_157] : memref<8x128xf32, #tpu.memory_space<vmem>>, vector<8x128xf32>
    tpu.vector_store %arg9[%c0_156, %c0_157], %313 {strides = array<i32>} : memref<8x128xf32, #tpu.memory_space<vmem>>, vector<8x128xf32>,
    %c0_158 = arith.constant 0 : index
    %c0_159 = arith.constant 0 : index
    %317 = vector.load %arg8[%c0_158, %c0_159] : memref<8x128xf32, #tpu.memory_space<vmem>>, vector<8x128xf32>
    tpu.vector_store %arg8[%c0_158, %c0_159], %315 {strides = array<i32>} : memref<8x128xf32, #tpu.memory_space<vmem>>, vector<8x128xf32>,
    %c5_i32 = arith.constant 5 : i32
    %318 = arith.index_cast %c5_i32 : i32 to index
    %c0_160 = arith.constant 0 : index
    %c0_161 = arith.constant 0 : index
    %319 = vector.load %arg1[%318, %c0_160, %c0_161] : memref<8x8x512xf32, #tpu.memory_space<vmem>>, vector<1x8x512xf32>
    %320 = vector.shape_cast %319 : vector<1x8x512xf32> to vector<8x512xf32>
    %c0_162 = arith.constant 0 : index
    %c0_163 = arith.constant 0 : index
    %321 = vector.load %arg6[%c0_162, %c0_163] : memref<8x128xf32, #tpu.memory_space<vmem>>, vector<8x128xf32>
    %c0_164 = arith.constant 0 : index
    %c0_165 = arith.constant 0 : index
    %322 = vector.load %arg2[%c0_164, %c0_165] : memref<128x512xf32, #tpu.memory_space<vmem>>, vector<128x512xf32>
    %cst_166 = arith.constant dense<0.000000e+00> : vector<8x512xf32>
    %323 = tpu.matmul %321, %322, %cst_166 {dimension_numbers = #tpu.dot_dimension_numbers<[1], [0], [0], [1], [0, 0, 1, 1], [], []>} : vector<8x128xf32>, vector<128x512xf32>, vector<8x512xf32> -> vector<8x512xf32>
    %324 = arith.addf %320, %323 : vector<8x512xf32>
    %325 = vector.extract_strided_slice %324 {offsets = [0, 0], sizes = [8, 256], strides = [1, 1]} : vector<8x512xf32> to vector<8x256xf32>
    %326 = arith.negf %325 : vector<8x256xf32>
    %327 = math.exp %326 : vector<8x256xf32>
    %cst_167 = arith.constant 1.000000e+00 : f32
    %328 = vector.broadcast %cst_167 : f32 to vector<8x256xf32>
    %329 = arith.addf %328, %327 : vector<8x256xf32>
    %330 = arith.divf %328, %329 : vector<8x256xf32>
    %331 = vector.extract_strided_slice %330 {offsets = [0, 0], sizes = [8, 128], strides = [1, 1]} : vector<8x256xf32> to vector<8x128xf32>
    %332 = vector.extract_strided_slice %330 {offsets = [0, 128], sizes = [8, 128], strides = [1, 1]} : vector<8x256xf32> to vector<8x128xf32>
    %333 = vector.extract_strided_slice %324 {offsets = [0, 256], sizes = [8, 128], strides = [1, 1]} : vector<8x512xf32> to vector<8x128xf32>
    %334 = math.tanh %333 : vector<8x128xf32>
    %335 = vector.extract_strided_slice %324 {offsets = [0, 384], sizes = [8, 128], strides = [1, 1]} : vector<8x512xf32> to vector<8x128xf32>
    %336 = arith.negf %335 : vector<8x128xf32>
    %337 = math.exp %336 : vector<8x128xf32>
    %cst_168 = arith.constant 1.000000e+00 : f32
    %338 = vector.broadcast %cst_168 : f32 to vector<8x128xf32>
    %339 = arith.addf %338, %337 : vector<8x128xf32>
    %340 = arith.divf %338, %339 : vector<8x128xf32>
    %c0_169 = arith.constant 0 : index
    %c0_170 = arith.constant 0 : index
    %341 = vector.load %arg7[%c0_169, %c0_170] : memref<8x128xf32, #tpu.memory_space<vmem>>, vector<8x128xf32>
    %342 = arith.mulf %332, %341 : vector<8x128xf32>
    %343 = arith.mulf %331, %334 : vector<8x128xf32>
    %344 = arith.addf %342, %343 : vector<8x128xf32>
    %345 = math.tanh %344 : vector<8x128xf32>
    %346 = arith.mulf %340, %345 : vector<8x128xf32>
    %c0_171 = arith.constant 0 : index
    %c0_172 = arith.constant 0 : index
    %347 = vector.load %arg7[%c0_171, %c0_172] : memref<8x128xf32, #tpu.memory_space<vmem>>, vector<8x128xf32>
    tpu.vector_store %arg7[%c0_171, %c0_172], %344 {strides = array<i32>} : memref<8x128xf32, #tpu.memory_space<vmem>>, vector<8x128xf32>,
    %c0_173 = arith.constant 0 : index
    %c0_174 = arith.constant 0 : index
    %348 = vector.load %arg6[%c0_173, %c0_174] : memref<8x128xf32, #tpu.memory_space<vmem>>, vector<8x128xf32>
    tpu.vector_store %arg6[%c0_173, %c0_174], %346 {strides = array<i32>} : memref<8x128xf32, #tpu.memory_space<vmem>>, vector<8x128xf32>,
    %c0_175 = arith.constant 0 : index
    %c0_176 = arith.constant 0 : index
    %349 = vector.load %arg8[%c0_175, %c0_176] : memref<8x128xf32, #tpu.memory_space<vmem>>, vector<8x128xf32>
    %350 = tpu.concatenate %346, %349 in 1 : vector<8x128xf32>, vector<8x128xf32> -> vector<8x256xf32>
    %c0_177 = arith.constant 0 : index
    %c0_178 = arith.constant 0 : index
    %351 = vector.load %arg3[%c0_177, %c0_178] : memref<256x512xf32, #tpu.memory_space<vmem>>, vector<256x512xf32>
    %cst_179 = arith.constant dense<0.000000e+00> : vector<8x512xf32>
    %352 = tpu.matmul %350, %351, %cst_179 {dimension_numbers = #tpu.dot_dimension_numbers<[1], [0], [0], [1], [0, 0, 1, 1], [], []>} : vector<8x256xf32>, vector<256x512xf32>, vector<8x512xf32> -> vector<8x512xf32>
    %c0_180 = arith.constant 0 : index
    %c0_181 = arith.constant 0 : index
    %353 = vector.load %arg4[%c0_180, %c0_181] : memref<1x512xf32, #tpu.memory_space<vmem>>, vector<1x512xf32>
    %354 = vector.broadcast %353 : vector<1x512xf32> to vector<8x512xf32>
    %355 = arith.addf %352, %354 : vector<8x512xf32>
    %356 = vector.extract_strided_slice %355 {offsets = [0, 0], sizes = [8, 256], strides = [1, 1]} : vector<8x512xf32> to vector<8x256xf32>
    %357 = arith.negf %356 : vector<8x256xf32>
    %358 = math.exp %357 : vector<8x256xf32>
    %cst_182 = arith.constant 1.000000e+00 : f32
    %359 = vector.broadcast %cst_182 : f32 to vector<8x256xf32>
    %360 = arith.addf %359, %358 : vector<8x256xf32>
    %361 = arith.divf %359, %360 : vector<8x256xf32>
    %362 = vector.extract_strided_slice %361 {offsets = [0, 0], sizes = [8, 128], strides = [1, 1]} : vector<8x256xf32> to vector<8x128xf32>
    %363 = vector.extract_strided_slice %361 {offsets = [0, 128], sizes = [8, 128], strides = [1, 1]} : vector<8x256xf32> to vector<8x128xf32>
    %364 = vector.extract_strided_slice %355 {offsets = [0, 256], sizes = [8, 128], strides = [1, 1]} : vector<8x512xf32> to vector<8x128xf32>
    %365 = math.tanh %364 : vector<8x128xf32>
    %366 = vector.extract_strided_slice %355 {offsets = [0, 384], sizes = [8, 128], strides = [1, 1]} : vector<8x512xf32> to vector<8x128xf32>
    %367 = arith.negf %366 : vector<8x128xf32>
    %368 = math.exp %367 : vector<8x128xf32>
    %cst_183 = arith.constant 1.000000e+00 : f32
    %369 = vector.broadcast %cst_183 : f32 to vector<8x128xf32>
    %370 = arith.addf %369, %368 : vector<8x128xf32>
    %371 = arith.divf %369, %370 : vector<8x128xf32>
    %c0_184 = arith.constant 0 : index
    %c0_185 = arith.constant 0 : index
    %372 = vector.load %arg9[%c0_184, %c0_185] : memref<8x128xf32, #tpu.memory_space<vmem>>, vector<8x128xf32>
    %373 = arith.mulf %363, %372 : vector<8x128xf32>
    %374 = arith.mulf %362, %365 : vector<8x128xf32>
    %375 = arith.addf %373, %374 : vector<8x128xf32>
    %376 = math.tanh %375 : vector<8x128xf32>
    %377 = arith.mulf %371, %376 : vector<8x128xf32>
    %c0_186 = arith.constant 0 : index
    %c0_187 = arith.constant 0 : index
    %378 = vector.load %arg9[%c0_186, %c0_187] : memref<8x128xf32, #tpu.memory_space<vmem>>, vector<8x128xf32>
    tpu.vector_store %arg9[%c0_186, %c0_187], %375 {strides = array<i32>} : memref<8x128xf32, #tpu.memory_space<vmem>>, vector<8x128xf32>,
    %c0_188 = arith.constant 0 : index
    %c0_189 = arith.constant 0 : index
    %379 = vector.load %arg8[%c0_188, %c0_189] : memref<8x128xf32, #tpu.memory_space<vmem>>, vector<8x128xf32>
    tpu.vector_store %arg8[%c0_188, %c0_189], %377 {strides = array<i32>} : memref<8x128xf32, #tpu.memory_space<vmem>>, vector<8x128xf32>,
    %c6_i32 = arith.constant 6 : i32
    %380 = arith.index_cast %c6_i32 : i32 to index
    %c0_190 = arith.constant 0 : index
    %c0_191 = arith.constant 0 : index
    %381 = vector.load %arg1[%380, %c0_190, %c0_191] : memref<8x8x512xf32, #tpu.memory_space<vmem>>, vector<1x8x512xf32>
    %382 = vector.shape_cast %381 : vector<1x8x512xf32> to vector<8x512xf32>
    %c0_192 = arith.constant 0 : index
    %c0_193 = arith.constant 0 : index
    %383 = vector.load %arg6[%c0_192, %c0_193] : memref<8x128xf32, #tpu.memory_space<vmem>>, vector<8x128xf32>
    %c0_194 = arith.constant 0 : index
    %c0_195 = arith.constant 0 : index
    %384 = vector.load %arg2[%c0_194, %c0_195] : memref<128x512xf32, #tpu.memory_space<vmem>>, vector<128x512xf32>
    %cst_196 = arith.constant dense<0.000000e+00> : vector<8x512xf32>
    %385 = tpu.matmul %383, %384, %cst_196 {dimension_numbers = #tpu.dot_dimension_numbers<[1], [0], [0], [1], [0, 0, 1, 1], [], []>} : vector<8x128xf32>, vector<128x512xf32>, vector<8x512xf32> -> vector<8x512xf32>
    %386 = arith.addf %382, %385 : vector<8x512xf32>
    %387 = vector.extract_strided_slice %386 {offsets = [0, 0], sizes = [8, 256], strides = [1, 1]} : vector<8x512xf32> to vector<8x256xf32>
    %388 = arith.negf %387 : vector<8x256xf32>
    %389 = math.exp %388 : vector<8x256xf32>
    %cst_197 = arith.constant 1.000000e+00 : f32
    %390 = vector.broadcast %cst_197 : f32 to vector<8x256xf32>
    %391 = arith.addf %390, %389 : vector<8x256xf32>
    %392 = arith.divf %390, %391 : vector<8x256xf32>
    %393 = vector.extract_strided_slice %392 {offsets = [0, 0], sizes = [8, 128], strides = [1, 1]} : vector<8x256xf32> to vector<8x128xf32>
    %394 = vector.extract_strided_slice %392 {offsets = [0, 128], sizes = [8, 128], strides = [1, 1]} : vector<8x256xf32> to vector<8x128xf32>
    %395 = vector.extract_strided_slice %386 {offsets = [0, 256], sizes = [8, 128], strides = [1, 1]} : vector<8x512xf32> to vector<8x128xf32>
    %396 = math.tanh %395 : vector<8x128xf32>
    %397 = vector.extract_strided_slice %386 {offsets = [0, 384], sizes = [8, 128], strides = [1, 1]} : vector<8x512xf32> to vector<8x128xf32>
    %398 = arith.negf %397 : vector<8x128xf32>
    %399 = math.exp %398 : vector<8x128xf32>
    %cst_198 = arith.constant 1.000000e+00 : f32
    %400 = vector.broadcast %cst_198 : f32 to vector<8x128xf32>
    %401 = arith.addf %400, %399 : vector<8x128xf32>
    %402 = arith.divf %400, %401 : vector<8x128xf32>
    %c0_199 = arith.constant 0 : index
    %c0_200 = arith.constant 0 : index
    %403 = vector.load %arg7[%c0_199, %c0_200] : memref<8x128xf32, #tpu.memory_space<vmem>>, vector<8x128xf32>
    %404 = arith.mulf %394, %403 : vector<8x128xf32>
    %405 = arith.mulf %393, %396 : vector<8x128xf32>
    %406 = arith.addf %404, %405 : vector<8x128xf32>
    %407 = math.tanh %406 : vector<8x128xf32>
    %408 = arith.mulf %402, %407 : vector<8x128xf32>
    %c0_201 = arith.constant 0 : index
    %c0_202 = arith.constant 0 : index
    %409 = vector.load %arg7[%c0_201, %c0_202] : memref<8x128xf32, #tpu.memory_space<vmem>>, vector<8x128xf32>
    tpu.vector_store %arg7[%c0_201, %c0_202], %406 {strides = array<i32>} : memref<8x128xf32, #tpu.memory_space<vmem>>, vector<8x128xf32>,
    %c0_203 = arith.constant 0 : index
    %c0_204 = arith.constant 0 : index
    %410 = vector.load %arg6[%c0_203, %c0_204] : memref<8x128xf32, #tpu.memory_space<vmem>>, vector<8x128xf32>
    tpu.vector_store %arg6[%c0_203, %c0_204], %408 {strides = array<i32>} : memref<8x128xf32, #tpu.memory_space<vmem>>, vector<8x128xf32>,
    %c0_205 = arith.constant 0 : index
    %c0_206 = arith.constant 0 : index
    %411 = vector.load %arg8[%c0_205, %c0_206] : memref<8x128xf32, #tpu.memory_space<vmem>>, vector<8x128xf32>
    %412 = tpu.concatenate %408, %411 in 1 : vector<8x128xf32>, vector<8x128xf32> -> vector<8x256xf32>
    %c0_207 = arith.constant 0 : index
    %c0_208 = arith.constant 0 : index
    %413 = vector.load %arg3[%c0_207, %c0_208] : memref<256x512xf32, #tpu.memory_space<vmem>>, vector<256x512xf32>
    %cst_209 = arith.constant dense<0.000000e+00> : vector<8x512xf32>
    %414 = tpu.matmul %412, %413, %cst_209 {dimension_numbers = #tpu.dot_dimension_numbers<[1], [0], [0], [1], [0, 0, 1, 1], [], []>} : vector<8x256xf32>, vector<256x512xf32>, vector<8x512xf32> -> vector<8x512xf32>
    %c0_210 = arith.constant 0 : index
    %c0_211 = arith.constant 0 : index
    %415 = vector.load %arg4[%c0_210, %c0_211] : memref<1x512xf32, #tpu.memory_space<vmem>>, vector<1x512xf32>
    %416 = vector.broadcast %415 : vector<1x512xf32> to vector<8x512xf32>
    %417 = arith.addf %414, %416 : vector<8x512xf32>
    %418 = vector.extract_strided_slice %417 {offsets = [0, 0], sizes = [8, 256], strides = [1, 1]} : vector<8x512xf32> to vector<8x256xf32>
    %419 = arith.negf %418 : vector<8x256xf32>
    %420 = math.exp %419 : vector<8x256xf32>
    %cst_212 = arith.constant 1.000000e+00 : f32
    %421 = vector.broadcast %cst_212 : f32 to vector<8x256xf32>
    %422 = arith.addf %421, %420 : vector<8x256xf32>
    %423 = arith.divf %421, %422 : vector<8x256xf32>
    %424 = vector.extract_strided_slice %423 {offsets = [0, 0], sizes = [8, 128], strides = [1, 1]} : vector<8x256xf32> to vector<8x128xf32>
    %425 = vector.extract_strided_slice %423 {offsets = [0, 128], sizes = [8, 128], strides = [1, 1]} : vector<8x256xf32> to vector<8x128xf32>
    %426 = vector.extract_strided_slice %417 {offsets = [0, 256], sizes = [8, 128], strides = [1, 1]} : vector<8x512xf32> to vector<8x128xf32>
    %427 = math.tanh %426 : vector<8x128xf32>
    %428 = vector.extract_strided_slice %417 {offsets = [0, 384], sizes = [8, 128], strides = [1, 1]} : vector<8x512xf32> to vector<8x128xf32>
    %429 = arith.negf %428 : vector<8x128xf32>
    %430 = math.exp %429 : vector<8x128xf32>
    %cst_213 = arith.constant 1.000000e+00 : f32
    %431 = vector.broadcast %cst_213 : f32 to vector<8x128xf32>
    %432 = arith.addf %431, %430 : vector<8x128xf32>
    %433 = arith.divf %431, %432 : vector<8x128xf32>
    %c0_214 = arith.constant 0 : index
    %c0_215 = arith.constant 0 : index
    %434 = vector.load %arg9[%c0_214, %c0_215] : memref<8x128xf32, #tpu.memory_space<vmem>>, vector<8x128xf32>
    %435 = arith.mulf %425, %434 : vector<8x128xf32>
    %436 = arith.mulf %424, %427 : vector<8x128xf32>
    %437 = arith.addf %435, %436 : vector<8x128xf32>
    %438 = math.tanh %437 : vector<8x128xf32>
    %439 = arith.mulf %433, %438 : vector<8x128xf32>
    %c0_216 = arith.constant 0 : index
    %c0_217 = arith.constant 0 : index
    %440 = vector.load %arg9[%c0_216, %c0_217] : memref<8x128xf32, #tpu.memory_space<vmem>>, vector<8x128xf32>
    tpu.vector_store %arg9[%c0_216, %c0_217], %437 {strides = array<i32>} : memref<8x128xf32, #tpu.memory_space<vmem>>, vector<8x128xf32>,
    %c0_218 = arith.constant 0 : index
    %c0_219 = arith.constant 0 : index
    %441 = vector.load %arg8[%c0_218, %c0_219] : memref<8x128xf32, #tpu.memory_space<vmem>>, vector<8x128xf32>
    tpu.vector_store %arg8[%c0_218, %c0_219], %439 {strides = array<i32>} : memref<8x128xf32, #tpu.memory_space<vmem>>, vector<8x128xf32>,
    %c7_i32 = arith.constant 7 : i32
    %442 = arith.index_cast %c7_i32 : i32 to index
    %c0_220 = arith.constant 0 : index
    %c0_221 = arith.constant 0 : index
    %443 = vector.load %arg1[%442, %c0_220, %c0_221] : memref<8x8x512xf32, #tpu.memory_space<vmem>>, vector<1x8x512xf32>
    %444 = vector.shape_cast %443 : vector<1x8x512xf32> to vector<8x512xf32>
    %c0_222 = arith.constant 0 : index
    %c0_223 = arith.constant 0 : index
    %445 = vector.load %arg6[%c0_222, %c0_223] : memref<8x128xf32, #tpu.memory_space<vmem>>, vector<8x128xf32>
    %c0_224 = arith.constant 0 : index
    %c0_225 = arith.constant 0 : index
    %446 = vector.load %arg2[%c0_224, %c0_225] : memref<128x512xf32, #tpu.memory_space<vmem>>, vector<128x512xf32>
    %cst_226 = arith.constant dense<0.000000e+00> : vector<8x512xf32>
    %447 = tpu.matmul %445, %446, %cst_226 {dimension_numbers = #tpu.dot_dimension_numbers<[1], [0], [0], [1], [0, 0, 1, 1], [], []>} : vector<8x128xf32>, vector<128x512xf32>, vector<8x512xf32> -> vector<8x512xf32>
    %448 = arith.addf %444, %447 : vector<8x512xf32>
    %449 = vector.extract_strided_slice %448 {offsets = [0, 0], sizes = [8, 256], strides = [1, 1]} : vector<8x512xf32> to vector<8x256xf32>
    %450 = arith.negf %449 : vector<8x256xf32>
    %451 = math.exp %450 : vector<8x256xf32>
    %cst_227 = arith.constant 1.000000e+00 : f32
    %452 = vector.broadcast %cst_227 : f32 to vector<8x256xf32>
    %453 = arith.addf %452, %451 : vector<8x256xf32>
    %454 = arith.divf %452, %453 : vector<8x256xf32>
    %455 = vector.extract_strided_slice %454 {offsets = [0, 0], sizes = [8, 128], strides = [1, 1]} : vector<8x256xf32> to vector<8x128xf32>
    %456 = vector.extract_strided_slice %454 {offsets = [0, 128], sizes = [8, 128], strides = [1, 1]} : vector<8x256xf32> to vector<8x128xf32>
    %457 = vector.extract_strided_slice %448 {offsets = [0, 256], sizes = [8, 128], strides = [1, 1]} : vector<8x512xf32> to vector<8x128xf32>
    %458 = math.tanh %457 : vector<8x128xf32>
    %459 = vector.extract_strided_slice %448 {offsets = [0, 384], sizes = [8, 128], strides = [1, 1]} : vector<8x512xf32> to vector<8x128xf32>
    %460 = arith.negf %459 : vector<8x128xf32>
    %461 = math.exp %460 : vector<8x128xf32>
    %cst_228 = arith.constant 1.000000e+00 : f32
    %462 = vector.broadcast %cst_228 : f32 to vector<8x128xf32>
    %463 = arith.addf %462, %461 : vector<8x128xf32>
    %464 = arith.divf %462, %463 : vector<8x128xf32>
    %c0_229 = arith.constant 0 : index
    %c0_230 = arith.constant 0 : index
    %465 = vector.load %arg7[%c0_229, %c0_230] : memref<8x128xf32, #tpu.memory_space<vmem>>, vector<8x128xf32>
    %466 = arith.mulf %456, %465 : vector<8x128xf32>
    %467 = arith.mulf %455, %458 : vector<8x128xf32>
    %468 = arith.addf %466, %467 : vector<8x128xf32>
    %469 = math.tanh %468 : vector<8x128xf32>
    %470 = arith.mulf %464, %469 : vector<8x128xf32>
    %c0_231 = arith.constant 0 : index
    %c0_232 = arith.constant 0 : index
    %471 = vector.load %arg7[%c0_231, %c0_232] : memref<8x128xf32, #tpu.memory_space<vmem>>, vector<8x128xf32>
    tpu.vector_store %arg7[%c0_231, %c0_232], %468 {strides = array<i32>} : memref<8x128xf32, #tpu.memory_space<vmem>>, vector<8x128xf32>,
    %c0_233 = arith.constant 0 : index
    %c0_234 = arith.constant 0 : index
    %472 = vector.load %arg6[%c0_233, %c0_234] : memref<8x128xf32, #tpu.memory_space<vmem>>, vector<8x128xf32>
    tpu.vector_store %arg6[%c0_233, %c0_234], %470 {strides = array<i32>} : memref<8x128xf32, #tpu.memory_space<vmem>>, vector<8x128xf32>,
    %c0_235 = arith.constant 0 : index
    %c0_236 = arith.constant 0 : index
    %473 = vector.load %arg8[%c0_235, %c0_236] : memref<8x128xf32, #tpu.memory_space<vmem>>, vector<8x128xf32>
    %474 = tpu.concatenate %470, %473 in 1 : vector<8x128xf32>, vector<8x128xf32> -> vector<8x256xf32>
    %c0_237 = arith.constant 0 : index
    %c0_238 = arith.constant 0 : index
    %475 = vector.load %arg3[%c0_237, %c0_238] : memref<256x512xf32, #tpu.memory_space<vmem>>, vector<256x512xf32>
    %cst_239 = arith.constant dense<0.000000e+00> : vector<8x512xf32>
    %476 = tpu.matmul %474, %475, %cst_239 {dimension_numbers = #tpu.dot_dimension_numbers<[1], [0], [0], [1], [0, 0, 1, 1], [], []>} : vector<8x256xf32>, vector<256x512xf32>, vector<8x512xf32> -> vector<8x512xf32>
    %c0_240 = arith.constant 0 : index
    %c0_241 = arith.constant 0 : index
    %477 = vector.load %arg4[%c0_240, %c0_241] : memref<1x512xf32, #tpu.memory_space<vmem>>, vector<1x512xf32>
    %478 = vector.broadcast %477 : vector<1x512xf32> to vector<8x512xf32>
    %479 = arith.addf %476, %478 : vector<8x512xf32>
    %480 = vector.extract_strided_slice %479 {offsets = [0, 0], sizes = [8, 256], strides = [1, 1]} : vector<8x512xf32> to vector<8x256xf32>
    %481 = arith.negf %480 : vector<8x256xf32>
    %482 = math.exp %481 : vector<8x256xf32>
    %cst_242 = arith.constant 1.000000e+00 : f32
    %483 = vector.broadcast %cst_242 : f32 to vector<8x256xf32>
    %484 = arith.addf %483, %482 : vector<8x256xf32>
    %485 = arith.divf %483, %484 : vector<8x256xf32>
    %486 = vector.extract_strided_slice %485 {offsets = [0, 0], sizes = [8, 128], strides = [1, 1]} : vector<8x256xf32> to vector<8x128xf32>
    %487 = vector.extract_strided_slice %485 {offsets = [0, 128], sizes = [8, 128], strides = [1, 1]} : vector<8x256xf32> to vector<8x128xf32>
    %488 = vector.extract_strided_slice %479 {offsets = [0, 256], sizes = [8, 128], strides = [1, 1]} : vector<8x512xf32> to vector<8x128xf32>
    %489 = math.tanh %488 : vector<8x128xf32>
    %490 = vector.extract_strided_slice %479 {offsets = [0, 384], sizes = [8, 128], strides = [1, 1]} : vector<8x512xf32> to vector<8x128xf32>
    %491 = arith.negf %490 : vector<8x128xf32>
    %492 = math.exp %491 : vector<8x128xf32>
    %cst_243 = arith.constant 1.000000e+00 : f32
    %493 = vector.broadcast %cst_243 : f32 to vector<8x128xf32>
    %494 = arith.addf %493, %492 : vector<8x128xf32>
    %495 = arith.divf %493, %494 : vector<8x128xf32>
    %c0_244 = arith.constant 0 : index
    %c0_245 = arith.constant 0 : index
    %496 = vector.load %arg9[%c0_244, %c0_245] : memref<8x128xf32, #tpu.memory_space<vmem>>, vector<8x128xf32>
    %497 = arith.mulf %487, %496 : vector<8x128xf32>
    %498 = arith.mulf %486, %489 : vector<8x128xf32>
    %499 = arith.addf %497, %498 : vector<8x128xf32>
    %500 = math.tanh %499 : vector<8x128xf32>
    %501 = arith.mulf %495, %500 : vector<8x128xf32>
    %c0_246 = arith.constant 0 : index
    %c0_247 = arith.constant 0 : index
    %502 = vector.load %arg9[%c0_246, %c0_247] : memref<8x128xf32, #tpu.memory_space<vmem>>, vector<8x128xf32>
    tpu.vector_store %arg9[%c0_246, %c0_247], %499 {strides = array<i32>} : memref<8x128xf32, #tpu.memory_space<vmem>>, vector<8x128xf32>,
    %c0_248 = arith.constant 0 : index
    %c0_249 = arith.constant 0 : index
    %503 = vector.load %arg8[%c0_248, %c0_249] : memref<8x128xf32, #tpu.memory_space<vmem>>, vector<8x128xf32>
    tpu.vector_store %arg8[%c0_248, %c0_249], %501 {strides = array<i32>} : memref<8x128xf32, #tpu.memory_space<vmem>>, vector<8x128xf32>,
    %c8_i32 = arith.constant 8 : i32
    %c0_250 = arith.constant 0 : index
    %c0_251 = arith.constant 0 : index
    %504 = vector.load %arg8[%c0_250, %c0_251] : memref<8x128xf32, #tpu.memory_space<vmem>>, vector<8x128xf32>
    %c0_252 = arith.constant 0 : index
    %c0_253 = arith.constant 0 : index
    %505 = vector.load %arg5[%c0_252, %c0_253] : memref<8x128xf32, #tpu.memory_space<vmem>>, vector<8x128xf32>
    tpu.vector_store %arg5[%c0_252, %c0_253], %504 {strides = array<i32>} : memref<8x128xf32, #tpu.memory_space<vmem>>, vector<8x128xf32>,
    return
  }
  func.func @transform_0(%arg0: i32) -> (i32, i32, i32) {
    %c0_i32 = arith.constant 0 : i32
    %c0_i32_0 = arith.constant 0 : i32
    %c0_i32_1 = arith.constant 0 : i32
    %c0_i32_2 = arith.constant 0 : i32
    return %c0_i32, %c0_i32_0, %c0_i32_1 : i32, i32, i32
  }
  func.func @transform_1(%arg0: i32) -> (i32, i32) {
    %c0_i32 = arith.constant 0 : i32
    %c0_i32_0 = arith.constant 0 : i32
    %c0_i32_1 = arith.constant 0 : i32
    return %c0_i32, %c0_i32_0 : i32, i32
  }
  func.func @transform_2(%arg0: i32) -> (i32, i32) {
    %c0_i32 = arith.constant 0 : i32
    %c0_i32_0 = arith.constant 0 : i32
    %c0_i32_1 = arith.constant 0 : i32
    return %c0_i32, %c0_i32_0 : i32, i32
  }
  func.func @transform_3(%arg0: i32) -> (i32, i32) {
    %c0_i32 = arith.constant 0 : i32
    %c0_i32_0 = arith.constant 0 : i32
    %c0_i32_1 = arith.constant 0 : i32
    return %c0_i32, %c0_i32_0 : i32, i32
  }
  func.func @transform_4(%arg0: i32) -> (i32, i32) {
    %c0_i32 = arith.constant 0 : i32
    %c0_i32_0 = arith.constant 0 : i32
    %c0_i32_1 = arith.constant 0 : i32
    return %c0_i32, %c0_i32_0 : i32, i32
  }
}

module attributes {stable_mosaic.version = 11 : i64} {
  func.func @head_kernel(%arg0: i32, %arg1: memref<8x128xf32, #tpu.memory_space<vmem>>, %arg2: memref<8x32xf32, #tpu.memory_space<vmem>>, %arg3: memref<1x128x1024xbf16, #tpu.memory_space<vmem>>, %arg4: memref<1x32x1024xbf16, #tpu.memory_space<vmem>>, %arg5: memref<1x1x1024xf32, #tpu.memory_space<vmem>>, %arg6: memref<1x1024x1024xbf16, #tpu.memory_space<vmem>>, %arg7: memref<1x1x1024xf32, #tpu.memory_space<vmem>>, %arg8: memref<1x1024x512xbf16, #tpu.memory_space<vmem>>, %arg9: memref<1x1x512xf32, #tpu.memory_space<vmem>>, %arg10: memref<1x512x512xbf16, #tpu.memory_space<vmem>>, %arg11: memref<1x1x512xf32, #tpu.memory_space<vmem>>, %arg12: memref<1x512x256xbf16, #tpu.memory_space<vmem>>, %arg13: memref<1x1x256xf32, #tpu.memory_space<vmem>>, %arg14: memref<1x256x128xbf16, #tpu.memory_space<vmem>>, %arg15: memref<1x1x128xf32, #tpu.memory_space<vmem>>, %arg16: memref<1x128x3xbf16, #tpu.memory_space<vmem>>, %arg17: memref<1x1x3xf32, #tpu.memory_space<vmem>>, %arg18: memref<1x8x3xf32, #tpu.memory_space<vmem>>) attributes {dimension_semantics = [#tpu.dimension_semantics<parallel>], iteration_bounds = array<i64: 2>, scalar_prefetch = 0 : i64, scratch_operands = 0 : i64, tpu.core_type = #tpu.core_type<tc>, window_params = [{pipeline_mode = #tpu.pipeline_mode<synchronous>, transform_indices = @transform_0, window_bounds = array<i64: 8, 128>}, {pipeline_mode = #tpu.pipeline_mode<synchronous>, transform_indices = @transform_1, window_bounds = array<i64: 8, 32>}, {transform_indices = @transform_2, window_bounds = array<i64: 1, 128, 1024>}, {transform_indices = @transform_3, window_bounds = array<i64: 1, 32, 1024>}, {transform_indices = @transform_4, window_bounds = array<i64: 1, 1, 1024>}, {transform_indices = @transform_5, window_bounds = array<i64: 1, 1024, 1024>}, {transform_indices = @transform_6, window_bounds = array<i64: 1, 1, 1024>}, {transform_indices = @transform_7, window_bounds = array<i64: 1, 1024, 512>}, {transform_indices = @transform_8, window_bounds = array<i64: 1, 1, 512>}, {transform_indices = @transform_9, window_bounds = array<i64: 1, 512, 512>}, {transform_indices = @transform_10, window_bounds = array<i64: 1, 1, 512>}, {transform_indices = @transform_11, window_bounds = array<i64: 1, 512, 256>}, {transform_indices = @transform_12, window_bounds = array<i64: 1, 1, 256>}, {transform_indices = @transform_13, window_bounds = array<i64: 1, 256, 128>}, {transform_indices = @transform_14, window_bounds = array<i64: 1, 1, 128>}, {transform_indices = @transform_15, window_bounds = array<i64: 1, 128, 3>}, {transform_indices = @transform_16, window_bounds = array<i64: 1, 1, 3>}, {transform_indices = @transform_17, window_bounds = array<i64: 1, 8, 3>}]} {
    %c0 = arith.constant 0 : index
    %c0_0 = arith.constant 0 : index
    %0 = vector.load %arg1[%c0, %c0_0] : memref<8x128xf32, #tpu.memory_space<vmem>>, vector<8x128xf32>
    %c0_1 = arith.constant 0 : index
    %c0_2 = arith.constant 0 : index
    %c0_3 = arith.constant 0 : index
    %1 = vector.load %arg3[%c0_1, %c0_2, %c0_3] : memref<1x128x1024xbf16, #tpu.memory_space<vmem>>, vector<1x128x1024xbf16>
    %2 = vector.shape_cast %1 : vector<1x128x1024xbf16> to vector<128x1024xbf16>
    %3 = arith.extf %2 : vector<128x1024xbf16> to vector<128x1024xf32>
    %cst = arith.constant dense<0.000000e+00> : vector<8x1024xf32>
    %4 = tpu.matmul %0, %3, %cst {dimension_numbers = #tpu.dot_dimension_numbers<[1], [0], [0], [1], [0, 0, 1, 1], [], []>} : vector<8x128xf32>, vector<128x1024xf32>, vector<8x1024xf32> -> vector<8x1024xf32>
    %c0_4 = arith.constant 0 : index
    %c0_5 = arith.constant 0 : index
    %5 = vector.load %arg2[%c0_4, %c0_5] : memref<8x32xf32, #tpu.memory_space<vmem>>, vector<8x32xf32>
    %c0_6 = arith.constant 0 : index
    %c0_7 = arith.constant 0 : index
    %c0_8 = arith.constant 0 : index
    %6 = vector.load %arg4[%c0_6, %c0_7, %c0_8] : memref<1x32x1024xbf16, #tpu.memory_space<vmem>>, vector<1x32x1024xbf16>
    %7 = vector.shape_cast %6 : vector<1x32x1024xbf16> to vector<32x1024xbf16>
    %8 = arith.extf %7 : vector<32x1024xbf16> to vector<32x1024xf32>
    %cst_9 = arith.constant dense<0.000000e+00> : vector<8x1024xf32>
    %9 = tpu.matmul %5, %8, %cst_9 {dimension_numbers = #tpu.dot_dimension_numbers<[1], [0], [0], [1], [0, 0, 1, 1], [], []>} : vector<8x32xf32>, vector<32x1024xf32>, vector<8x1024xf32> -> vector<8x1024xf32>
    %10 = arith.addf %4, %9 : vector<8x1024xf32>
    %c0_10 = arith.constant 0 : index
    %c0_11 = arith.constant 0 : index
    %c0_12 = arith.constant 0 : index
    %11 = vector.load %arg5[%c0_10, %c0_11, %c0_12] : memref<1x1x1024xf32, #tpu.memory_space<vmem>>, vector<1x1x1024xf32>
    %12 = vector.shape_cast %11 : vector<1x1x1024xf32> to vector<1x1024xf32>
    %13 = vector.broadcast %12 : vector<1x1024xf32> to vector<8x1024xf32>
    %14 = arith.addf %10, %13 : vector<8x1024xf32>
    %cst_13 = arith.constant 0.000000e+00 : f32
    %15 = vector.broadcast %cst_13 : f32 to vector<8x1024xf32>
    %16 = arith.maximumf %14, %15 : vector<8x1024xf32>
    %c0_14 = arith.constant 0 : index
    %c0_15 = arith.constant 0 : index
    %c0_16 = arith.constant 0 : index
    %17 = vector.load %arg6[%c0_14, %c0_15, %c0_16] : memref<1x1024x1024xbf16, #tpu.memory_space<vmem>>, vector<1x1024x1024xbf16>
    %18 = vector.shape_cast %17 : vector<1x1024x1024xbf16> to vector<1024x1024xbf16>
    %19 = arith.extf %18 : vector<1024x1024xbf16> to vector<1024x1024xf32>
    %cst_17 = arith.constant dense<0.000000e+00> : vector<8x1024xf32>
    %20 = tpu.matmul %16, %19, %cst_17 {dimension_numbers = #tpu.dot_dimension_numbers<[1], [0], [0], [1], [0, 0, 1, 1], [], []>} : vector<8x1024xf32>, vector<1024x1024xf32>, vector<8x1024xf32> -> vector<8x1024xf32>
    %c0_18 = arith.constant 0 : index
    %c0_19 = arith.constant 0 : index
    %c0_20 = arith.constant 0 : index
    %21 = vector.load %arg7[%c0_18, %c0_19, %c0_20] : memref<1x1x1024xf32, #tpu.memory_space<vmem>>, vector<1x1x1024xf32>
    %22 = vector.shape_cast %21 : vector<1x1x1024xf32> to vector<1x1024xf32>
    %23 = vector.broadcast %22 : vector<1x1024xf32> to vector<8x1024xf32>
    %24 = arith.addf %20, %23 : vector<8x1024xf32>
    %cst_21 = arith.constant 0.000000e+00 : f32
    %25 = vector.broadcast %cst_21 : f32 to vector<8x1024xf32>
    %26 = arith.maximumf %24, %25 : vector<8x1024xf32>
    %c0_22 = arith.constant 0 : index
    %c0_23 = arith.constant 0 : index
    %c0_24 = arith.constant 0 : index
    %27 = vector.load %arg8[%c0_22, %c0_23, %c0_24] : memref<1x1024x512xbf16, #tpu.memory_space<vmem>>, vector<1x1024x512xbf16>
    %28 = vector.shape_cast %27 : vector<1x1024x512xbf16> to vector<1024x512xbf16>
    %29 = arith.extf %28 : vector<1024x512xbf16> to vector<1024x512xf32>
    %cst_25 = arith.constant dense<0.000000e+00> : vector<8x512xf32>
    %30 = tpu.matmul %26, %29, %cst_25 {dimension_numbers = #tpu.dot_dimension_numbers<[1], [0], [0], [1], [0, 0, 1, 1], [], []>} : vector<8x1024xf32>, vector<1024x512xf32>, vector<8x512xf32> -> vector<8x512xf32>
    %c0_26 = arith.constant 0 : index
    %c0_27 = arith.constant 0 : index
    %c0_28 = arith.constant 0 : index
    %31 = vector.load %arg9[%c0_26, %c0_27, %c0_28] : memref<1x1x512xf32, #tpu.memory_space<vmem>>, vector<1x1x512xf32>
    %32 = vector.shape_cast %31 : vector<1x1x512xf32> to vector<1x512xf32>
    %33 = vector.broadcast %32 : vector<1x512xf32> to vector<8x512xf32>
    %34 = arith.addf %30, %33 : vector<8x512xf32>
    %cst_29 = arith.constant 0.000000e+00 : f32
    %35 = vector.broadcast %cst_29 : f32 to vector<8x512xf32>
    %36 = arith.maximumf %34, %35 : vector<8x512xf32>
    %c0_30 = arith.constant 0 : index
    %c0_31 = arith.constant 0 : index
    %c0_32 = arith.constant 0 : index
    %37 = vector.load %arg10[%c0_30, %c0_31, %c0_32] : memref<1x512x512xbf16, #tpu.memory_space<vmem>>, vector<1x512x512xbf16>
    %38 = vector.shape_cast %37 : vector<1x512x512xbf16> to vector<512x512xbf16>
    %39 = arith.extf %38 : vector<512x512xbf16> to vector<512x512xf32>
    %cst_33 = arith.constant dense<0.000000e+00> : vector<8x512xf32>
    %40 = tpu.matmul %36, %39, %cst_33 {dimension_numbers = #tpu.dot_dimension_numbers<[1], [0], [0], [1], [0, 0, 1, 1], [], []>} : vector<8x512xf32>, vector<512x512xf32>, vector<8x512xf32> -> vector<8x512xf32>
    %c0_34 = arith.constant 0 : index
    %c0_35 = arith.constant 0 : index
    %c0_36 = arith.constant 0 : index
    %41 = vector.load %arg11[%c0_34, %c0_35, %c0_36] : memref<1x1x512xf32, #tpu.memory_space<vmem>>, vector<1x1x512xf32>
    %42 = vector.shape_cast %41 : vector<1x1x512xf32> to vector<1x512xf32>
    %43 = vector.broadcast %42 : vector<1x512xf32> to vector<8x512xf32>
    %44 = arith.addf %40, %43 : vector<8x512xf32>
    %cst_37 = arith.constant 0.000000e+00 : f32
    %45 = vector.broadcast %cst_37 : f32 to vector<8x512xf32>
    %46 = arith.maximumf %44, %45 : vector<8x512xf32>
    %c0_38 = arith.constant 0 : index
    %c0_39 = arith.constant 0 : index
    %c0_40 = arith.constant 0 : index
    %47 = vector.load %arg12[%c0_38, %c0_39, %c0_40] : memref<1x512x256xbf16, #tpu.memory_space<vmem>>, vector<1x512x256xbf16>
    %48 = vector.shape_cast %47 : vector<1x512x256xbf16> to vector<512x256xbf16>
    %49 = arith.extf %48 : vector<512x256xbf16> to vector<512x256xf32>
    %cst_41 = arith.constant dense<0.000000e+00> : vector<8x256xf32>
    %50 = tpu.matmul %46, %49, %cst_41 {dimension_numbers = #tpu.dot_dimension_numbers<[1], [0], [0], [1], [0, 0, 1, 1], [], []>} : vector<8x512xf32>, vector<512x256xf32>, vector<8x256xf32> -> vector<8x256xf32>
    %c0_42 = arith.constant 0 : index
    %c0_43 = arith.constant 0 : index
    %c0_44 = arith.constant 0 : index
    %51 = vector.load %arg13[%c0_42, %c0_43, %c0_44] : memref<1x1x256xf32, #tpu.memory_space<vmem>>, vector<1x1x256xf32>
    %52 = vector.shape_cast %51 : vector<1x1x256xf32> to vector<1x256xf32>
    %53 = vector.broadcast %52 : vector<1x256xf32> to vector<8x256xf32>
    %54 = arith.addf %50, %53 : vector<8x256xf32>
    %cst_45 = arith.constant 0.000000e+00 : f32
    %55 = vector.broadcast %cst_45 : f32 to vector<8x256xf32>
    %56 = arith.maximumf %54, %55 : vector<8x256xf32>
    %c0_46 = arith.constant 0 : index
    %c0_47 = arith.constant 0 : index
    %c0_48 = arith.constant 0 : index
    %57 = vector.load %arg14[%c0_46, %c0_47, %c0_48] : memref<1x256x128xbf16, #tpu.memory_space<vmem>>, vector<1x256x128xbf16>
    %58 = vector.shape_cast %57 : vector<1x256x128xbf16> to vector<256x128xbf16>
    %59 = arith.extf %58 : vector<256x128xbf16> to vector<256x128xf32>
    %cst_49 = arith.constant dense<0.000000e+00> : vector<8x128xf32>
    %60 = tpu.matmul %56, %59, %cst_49 {dimension_numbers = #tpu.dot_dimension_numbers<[1], [0], [0], [1], [0, 0, 1, 1], [], []>} : vector<8x256xf32>, vector<256x128xf32>, vector<8x128xf32> -> vector<8x128xf32>
    %c0_50 = arith.constant 0 : index
    %c0_51 = arith.constant 0 : index
    %c0_52 = arith.constant 0 : index
    %61 = vector.load %arg15[%c0_50, %c0_51, %c0_52] : memref<1x1x128xf32, #tpu.memory_space<vmem>>, vector<1x1x128xf32>
    %62 = vector.shape_cast %61 : vector<1x1x128xf32> to vector<1x128xf32>
    %63 = vector.broadcast %62 : vector<1x128xf32> to vector<8x128xf32>
    %64 = arith.addf %60, %63 : vector<8x128xf32>
    %cst_53 = arith.constant 0.000000e+00 : f32
    %65 = vector.broadcast %cst_53 : f32 to vector<8x128xf32>
    %66 = arith.maximumf %64, %65 : vector<8x128xf32>
    %c0_54 = arith.constant 0 : index
    %c0_55 = arith.constant 0 : index
    %c0_56 = arith.constant 0 : index
    %67 = vector.load %arg16[%c0_54, %c0_55, %c0_56] : memref<1x128x3xbf16, #tpu.memory_space<vmem>>, vector<1x128x3xbf16>
    %68 = vector.shape_cast %67 : vector<1x128x3xbf16> to vector<128x3xbf16>
    %69 = arith.extf %68 : vector<128x3xbf16> to vector<128x3xf32>
    %cst_57 = arith.constant dense<0.000000e+00> : vector<8x3xf32>
    %70 = tpu.matmul %66, %69, %cst_57 {dimension_numbers = #tpu.dot_dimension_numbers<[1], [0], [0], [1], [0, 0, 1, 1], [], []>} : vector<8x128xf32>, vector<128x3xf32>, vector<8x3xf32> -> vector<8x3xf32>
    %c0_58 = arith.constant 0 : index
    %c0_59 = arith.constant 0 : index
    %c0_60 = arith.constant 0 : index
    %71 = vector.load %arg17[%c0_58, %c0_59, %c0_60] : memref<1x1x3xf32, #tpu.memory_space<vmem>>, vector<1x1x3xf32>
    %72 = vector.shape_cast %71 : vector<1x1x3xf32> to vector<1x3xf32>
    %73 = vector.broadcast %72 : vector<1x3xf32> to vector<8x3xf32>
    %74 = arith.addf %70, %73 : vector<8x3xf32>
    %c0_61 = arith.constant 0 : index
    %c0_62 = arith.constant 0 : index
    %c0_63 = arith.constant 0 : index
    %75 = vector.load %arg18[%c0_61, %c0_62, %c0_63] : memref<1x8x3xf32, #tpu.memory_space<vmem>>, vector<1x8x3xf32>
    %76 = vector.shape_cast %75 : vector<1x8x3xf32> to vector<8x3xf32>
    %77 = vector.shape_cast %74 : vector<8x3xf32> to vector<1x8x3xf32>
    tpu.vector_store %arg18[%c0_61, %c0_62, %c0_63], %77 {strides = array<i32>} : memref<1x8x3xf32, #tpu.memory_space<vmem>>, vector<1x8x3xf32>,
    return
  }
  func.func @transform_0(%arg0: i32) -> (i32, i32) {
    %c0_i32 = arith.constant 0 : i32
    %c0_i32_0 = arith.constant 0 : i32
    %c0_i32_1 = arith.constant 0 : i32
    return %c0_i32, %c0_i32_0 : i32, i32
  }
  func.func @transform_1(%arg0: i32) -> (i32, i32) {
    %c0_i32 = arith.constant 0 : i32
    %c0_i32_0 = arith.constant 0 : i32
    %c0_i32_1 = arith.constant 0 : i32
    return %c0_i32, %c0_i32_0 : i32, i32
  }
  func.func @transform_2(%arg0: i32) -> (i32, i32, i32) {
    %c0_i32 = arith.constant 0 : i32
    %c0_i32_0 = arith.constant 0 : i32
    %c0_i32_1 = arith.constant 0 : i32
    return %arg0, %c0_i32, %c0_i32_0 : i32, i32, i32
  }
  func.func @transform_3(%arg0: i32) -> (i32, i32, i32) {
    %c0_i32 = arith.constant 0 : i32
    %c0_i32_0 = arith.constant 0 : i32
    %c0_i32_1 = arith.constant 0 : i32
    return %arg0, %c0_i32, %c0_i32_0 : i32, i32, i32
  }
  func.func @transform_4(%arg0: i32) -> (i32, i32, i32) {
    %c0_i32 = arith.constant 0 : i32
    %c0_i32_0 = arith.constant 0 : i32
    %c0_i32_1 = arith.constant 0 : i32
    return %arg0, %c0_i32, %c0_i32_0 : i32, i32, i32
  }
  func.func @transform_5(%arg0: i32) -> (i32, i32, i32) {
    %c0_i32 = arith.constant 0 : i32
    %c0_i32_0 = arith.constant 0 : i32
    %c0_i32_1 = arith.constant 0 : i32
    return %arg0, %c0_i32, %c0_i32_0 : i32, i32, i32
  }
  func.func @transform_6(%arg0: i32) -> (i32, i32, i32) {
    %c0_i32 = arith.constant 0 : i32
    %c0_i32_0 = arith.constant 0 : i32
    %c0_i32_1 = arith.constant 0 : i32
    return %arg0, %c0_i32, %c0_i32_0 : i32, i32, i32
  }
  func.func @transform_7(%arg0: i32) -> (i32, i32, i32) {
    %c0_i32 = arith.constant 0 : i32
    %c0_i32_0 = arith.constant 0 : i32
    %c0_i32_1 = arith.constant 0 : i32
    return %arg0, %c0_i32, %c0_i32_0 : i32, i32, i32
  }
  func.func @transform_8(%arg0: i32) -> (i32, i32, i32) {
    %c0_i32 = arith.constant 0 : i32
    %c0_i32_0 = arith.constant 0 : i32
    %c0_i32_1 = arith.constant 0 : i32
    return %arg0, %c0_i32, %c0_i32_0 : i32, i32, i32
  }
  func.func @transform_9(%arg0: i32) -> (i32, i32, i32) {
    %c0_i32 = arith.constant 0 : i32
    %c0_i32_0 = arith.constant 0 : i32
    %c0_i32_1 = arith.constant 0 : i32
    return %arg0, %c0_i32, %c0_i32_0 : i32, i32, i32
  }
  func.func @transform_10(%arg0: i32) -> (i32, i32, i32) {
    %c0_i32 = arith.constant 0 : i32
    %c0_i32_0 = arith.constant 0 : i32
    %c0_i32_1 = arith.constant 0 : i32
    return %arg0, %c0_i32, %c0_i32_0 : i32, i32, i32
  }
  func.func @transform_11(%arg0: i32) -> (i32, i32, i32) {
    %c0_i32 = arith.constant 0 : i32
    %c0_i32_0 = arith.constant 0 : i32
    %c0_i32_1 = arith.constant 0 : i32
    return %arg0, %c0_i32, %c0_i32_0 : i32, i32, i32
  }
  func.func @transform_12(%arg0: i32) -> (i32, i32, i32) {
    %c0_i32 = arith.constant 0 : i32
    %c0_i32_0 = arith.constant 0 : i32
    %c0_i32_1 = arith.constant 0 : i32
    return %arg0, %c0_i32, %c0_i32_0 : i32, i32, i32
  }
  func.func @transform_13(%arg0: i32) -> (i32, i32, i32) {
    %c0_i32 = arith.constant 0 : i32
    %c0_i32_0 = arith.constant 0 : i32
    %c0_i32_1 = arith.constant 0 : i32
    return %arg0, %c0_i32, %c0_i32_0 : i32, i32, i32
  }
  func.func @transform_14(%arg0: i32) -> (i32, i32, i32) {
    %c0_i32 = arith.constant 0 : i32
    %c0_i32_0 = arith.constant 0 : i32
    %c0_i32_1 = arith.constant 0 : i32
    return %arg0, %c0_i32, %c0_i32_0 : i32, i32, i32
  }
  func.func @transform_15(%arg0: i32) -> (i32, i32, i32) {
    %c0_i32 = arith.constant 0 : i32
    %c0_i32_0 = arith.constant 0 : i32
    %c0_i32_1 = arith.constant 0 : i32
    return %arg0, %c0_i32, %c0_i32_0 : i32, i32, i32
  }
  func.func @transform_16(%arg0: i32) -> (i32, i32, i32) {
    %c0_i32 = arith.constant 0 : i32
    %c0_i32_0 = arith.constant 0 : i32
    %c0_i32_1 = arith.constant 0 : i32
    return %arg0, %c0_i32, %c0_i32_0 : i32, i32, i32
  }
  func.func @transform_17(%arg0: i32) -> (i32, i32, i32) {
    %c0_i32 = arith.constant 0 : i32
    %c0_i32_0 = arith.constant 0 : i32
    %c0_i32_1 = arith.constant 0 : i32
    return %arg0, %c0_i32, %c0_i32_0 : i32, i32, i32
  }
}

</mosaic_0001>

<bundles_post_ra>
// kernel: simple_lstm_forward.2
= control target key start
LH: loop header
LB: loop body
LE: loop exit
PB: predicated region body
PF: predicated region fallthrough
CT: control target
= control target key end

     0   :  { %9 = vsyncpa [#allocation7], 0  ;;  %s8358_s0 = inlined_call_operand.vmem [shape: f32[8,8,512], index: 0, kind: input, shape index: {}]   ;;  %s8359_s1 = inlined_call_operand.hbm [shape: f32[128,512], index: 1, kind: input, shape index: {}]   ;;  %s8360_s2 = inlined_call_operand.hbm [shape: f32[256,512], index: 2, kind: input, shape index: {}]   ;;  %s8361_s3 = inlined_call_operand.hbm [shape: f32[1,512], index: 3, kind: input, shape index: {}]   ;;  %s8362_s4 = inlined_call_operand.vmem [shape: f32[8,128], index: 4, kind: output, shape index: {}]  }
   0x1   :  { %10 = vsyncpa [#allocation9], 0  ;;  %s6515_s15 = smov [#allocation8]   ;;  %s6516_s17 = smov [#allocation6]  }
   0x2   :  { %s30_s16 = sshll.u32 %s6515_s15, 4  ;;  %s18_s18 = sshll.u32 %s6516_s17, 4  ;;  %s31_s16 = int_to_ptr.vmem [resolvable:$true] %s30_s16  ;;  %s6546_s18 = int_to_ptr.vmem [resolvable:$true] %s18_s18 }
   0x3   :  { %s6445_s21 = scalar_lea.hbm %s8360_s2, 16384 }
   0x4   :  { %p6446_p0 = scmp.ne.s32.totalorder %s8360_s2, %s6445_s21  ;;  %p6449_p1 = scmp.lt.u32.totalorder %s6445_s21, %s8360_s2 }
   0x6   :  { %p6451_p2 = pnand %p6449_p1, %p6446_p0 }
   0x8   :  { %6454 = shalt.err (!%p6451_p2)
}
   0x9   :  { %s6455_s26 = scalar_lea.vmem %s31_s16, 16384  ;;  %p6460_p4 = scmp.lt.s32.totalorder %s31_s16, %s31_s16 }
   0xa   :  { %p6456_p3 = scmp.ne.s32.totalorder %s31_s16, %s6455_s26  ;;  %p6461_p5 = scmp.lt.s32.totalorder %s6455_s26, %s6455_s26 }
   0xc   :  { %p6462_p6 = por %p6461_p5, %p6460_p4 }
   0xe   :  { %p6463_p7 = pnand %p6462_p6, %p6456_p3 }
  0x10   :  { %6466 = shalt.err (!%p6463_p7)
}
  0x11   :  { %s6517_s27 = smov 512   ;;  %s6518_s28 = smov 32  }
  0x12   :  { %36 = dma.hbm_to_vmem [thread:$0]  %s8360_s2, 16384, %s31_s16, [#allocation9], %s6517_s27, %s6517_s27, %s6518_s28  }
  0x13   :  { %s6467_s7 = scalar_lea.hbm %s8359_s1, 8192 }
  0x14   :  { %p6468_p8 = scmp.ne.s32.totalorder %s8359_s1, %s6467_s7  ;;  %p6471_p9 = scmp.lt.u32.totalorder %s6467_s7, %s8359_s1 }
  0x16   :  { %p6473_p10 = pnand %p6471_p9, %p6468_p8 }
  0x18   :  { %6476 = shalt.err (!%p6473_p10)
}
  0x19   :  { %s6477_s12 = scalar_lea.vmem %s6546_s18, 8192  ;;  %p6482_p12 = scmp.lt.s32.totalorder %s6546_s18, %s6546_s18 }
  0x1a   :  { %p6478_p11 = scmp.ne.s32.totalorder %s6546_s18, %s6477_s12  ;;  %p6483_p13 = scmp.lt.s32.totalorder %s6477_s12, %s6477_s12 }
  0x1c   :  { %p6484_p0 = por %p6483_p13, %p6482_p12 }
  0x1e   :  { %p6485_p1 = pnand %p6484_p0, %p6478_p11 }
  0x20   :  { %6488 = shalt.err (!%p6485_p1)
}
  0x21   :  { %24 = dma.hbm_to_vmem [thread:$0]  %s8359_s1, 8192, %s6546_s18, [#allocation7], %s6517_s27, %s6517_s27, %s6518_s28  }
  0x22   :  { %s6519_s14 = smov [#allocation10]   ;;  %s6489_s19 = scalar_lea.hbm %s8361_s3, 64 }
  0x23   :  { %s43_s15 = sshll.u32 %s6519_s14, 4  ;;  %p6490_p2 = scmp.ne.s32.totalorder %s8361_s3, %s6489_s19  ;;  %s44_s15 = int_to_ptr.vmem [resolvable:$true] %s43_s15 }
  0x24   :  { %p6493_p3 = scmp.lt.u32.totalorder %s6489_s19, %s8361_s3 }
  0x26   :  { %p6495_p4 = pnand %p6493_p3, %p6490_p2 }
  0x28   :  { %6498 = shalt.err (!%p6495_p4)
}
  0x29   :  { %s6499_s24 = scalar_lea.vmem %s44_s15, 64  ;;  %p6504_p6 = scmp.lt.s32.totalorder %s44_s15, %s44_s15 }
  0x2a   :  { %p6500_p5 = scmp.ne.s32.totalorder %s44_s15, %s6499_s24  ;;  %p6505_p7 = scmp.lt.s32.totalorder %s6499_s24, %s6499_s24 }
  0x2c   :  { %p6506_p8 = por %p6505_p7, %p6504_p6 }
  0x2e   :  { %p6507_p9 = pnand %p6506_p8, %p6500_p5 }
  0x30   :  { %6510 = shalt.err (!%p6507_p9)
}
  0x31   :  { %46 = dma.hbm_to_vmem [thread:$0]  %s8361_s3, 64, %s44_s15, [#allocation9]  }
  0x32   :  { %6511 = dma.done.wait [#allocation7], 8192  }
  0x33   :  { %6512 = vsyncadd [#allocation7], 4294959104 }
  0x34   :  { %6513 = dma.done.wait [#allocation9], 16448  }
  0x35   :  { %6514 = vsyncadd [#allocation9], 4294950848  ;;  %v8363_v0 = vmov 0.0   ;;  %v66_v1 = vld [vmem:[#allocation6 + $0x8] sm:$0xff]  ;;  %v65_v3 = vld [vmem:[#allocation6] sm:$0xff] }
  0x36   :  { %193 = vmatprep.mubr.f32.mxu0 %v8363_v0  ;;  %264 = vmatprep.mubr.f32.mxu1 %v8363_v0  ;;  %v70_v2 = vld [vmem:[#allocation6 + $0x28] sm:$0xff]  ;;  %v69_v5 = vld [vmem:[#allocation6 + $0x20] sm:$0xff]  ;;  %v68_v19 = vld [vmem:[#allocation6 + $0x18] sm:$0xff] }
  0x37   :  { %v6591_v4 = vpack.c.bf16 %v70_v2, %v66_v1  ;;  %v74_v6 = vld [vmem:[#allocation6 + $0x48] sm:$0xff]  ;;  %v6593_v8 = vpack.c.bf16 %v69_v5, %v65_v3  ;;  %v73_v10 = vld [vmem:[#allocation6 + $0x40] sm:$0xff]  ;;  %v72_v20 = vld [vmem:[#allocation6 + $0x38] sm:$0xff] }
  0x38   :  { %v78_v7 = vld [vmem:[#allocation6 + $0x68] sm:$0xff]  ;;  %v77_v11 = vld [vmem:[#allocation6 + $0x60] sm:$0xff]  ;;  %v6604_v22 = vpack.c.bf16 %v72_v20, %v68_v19  ;;  %v67_v23 = vld [vmem:[#allocation6 + $0x10] sm:$0xff] }
  0x39   :  { %v6595_v9 = vpack.c.bf16 %v78_v7, %v74_v6  ;;  %v82_v12 = vld [vmem:[#allocation6 + $0x88] sm:$0xff]  ;;  %4648 = vmatprep.subr.bf16.mxu0 %v6591_v4  ;;  %v6599_v14 = vpack.c.bf16 %v77_v11, %v73_v10  ;;  %v81_v15 = vld [vmem:[#allocation6 + $0x80] sm:$0xff]  ;;  %v71_v24 = vld [vmem:[#allocation6 + $0x30] sm:$0xff] }
  0x3a   :  { %v86_v13 = vld [vmem:[#allocation6 + $0xa8] sm:$0xff]  ;;  %4650 = vmatpush1.bf16.msra.mxu0 %v6593_v8  ;;  %v85_v16 = vld [vmem:[#allocation6 + $0xa0] sm:$0xff]  ;;  %v6606_v25 = vpack.c.bf16 %v71_v24, %v67_v23  ;;  %4680 = vmatprep.subr.bf16.mxu1 %v6604_v22  ;;  %v76_v27 = vld [vmem:[#allocation6 + $0x58] sm:$0xff] }
  0x3b   :  { %4652 = vmatprep.subr.bf16.mxu0 %v6595_v9  ;;  %v6602_v17 = vpack.c.bf16 %v86_v13, %v82_v12  ;;  %v90_v18 = vld [vmem:[#allocation6 + $0xc8] sm:$0xff]  ;;  %v6609_v26 = vpack.c.bf16 %v85_v16, %v81_v15  ;;  %v80_v28 = vld [vmem:[#allocation6 + $0x78] sm:$0xff]  ;;  %v75_v29 = vld [vmem:[#allocation6 + $0x50] sm:$0xff] }
  0x3c   :  { %v94_v21 = vld [vmem:[#allocation6 + $0xe8] sm:$0xff]  ;;  %v89_v31 = vld [vmem:[#allocation6 + $0xc0] sm:$0xff]  ;;  %4682 = vmatpush1.bf16.msra.mxu1 %v6606_v25  ;;  %v6616_v33 = vpack.c.bf16 %v80_v28, %v76_v27  ;;  %v79_v34 = vld [vmem:[#allocation6 + $0x70] sm:$0xff] }
  0x3d   :  { %v6613_v30 = vpack.c.bf16 %v94_v21, %v90_v18  ;;  %v93_v32 = vld [vmem:[#allocation6 + $0xe0] sm:$0xff]  ;;  %v98_v35 = vld [vmem:[#allocation6 + $0x108] sm:$0xff]  ;;  %v6618_v37 = vpack.c.bf16 %v79_v34, %v75_v29  ;;  %v84_v38 = vld [vmem:[#allocation6 + $0x98] sm:$0xff] }
  0x3e   :  { %4654 = vmatpush1.bf16.msra.mxu0 %v6599_v14  ;;  %v102_v36 = vld [vmem:[#allocation6 + $0x128] sm:$0xff]  ;;  %4684 = vmatprep.subr.bf16.mxu1 %v6616_v33  ;;  %v88_v39 = vld [vmem:[#allocation6 + $0xb8] sm:$0xff]  ;;  %v83_v40 = vld [vmem:[#allocation6 + $0x90] sm:$0xff]  ;;  %v6622_v42 = vpack.c.bf16 %v93_v32, %v89_v31 }
  0x3f   :  { %4656 = vmatprep.subr.bf16.mxu0 %v6602_v17  ;;  %v87_v41 = vld [vmem:[#allocation6 + $0xb0] sm:$0xff]  ;;  %v97_v43 = vld [vmem:[#allocation6 + $0x100] sm:$0xff]  ;;  %v6624_v45 = vpack.c.bf16 %v88_v39, %v84_v38  ;;  %v6627_v46 = vpack.c.bf16 %v102_v36, %v98_v35  ;;  %v106_v47 = vld [vmem:[#allocation6 + $0x148] sm:$0xff] }
  0x40   :  { %v101_v44 = vld [vmem:[#allocation6 + $0x120] sm:$0xff]  ;;  %4686 = vmatpush1.bf16.msra.mxu1 %v6618_v37  ;;  %v6630_v48 = vpack.c.bf16 %v87_v41, %v83_v40  ;;  %v92_v49 = vld [vmem:[#allocation6 + $0xd8] sm:$0xff]  ;;  %v110_v51 = vld [vmem:[#allocation6 + $0x168] sm:$0xff] }
  0x41   :  { %v96_v50 = vld [vmem:[#allocation6 + $0xf8] sm:$0xff]  ;;  %4688 = vmatprep.subr.bf16.mxu1 %v6624_v45  ;;  %v91_v53 = vld [vmem:[#allocation6 + $0xd0] sm:$0xff]  ;;  %v6636_v55 = vpack.c.bf16 %v101_v44, %v97_v43  ;;  %v6639_v58 = vpack.c.bf16 %v110_v51, %v106_v47  ;;  %v105_v59 = vld [vmem:[#allocation6 + $0x140] sm:$0xff] }
  0x42   :  { %4658 = vmatpush1.bf16.msra.mxu0 %v6609_v26  ;;  %v6633_v52 = vpack.c.bf16 %v96_v50, %v92_v49  ;;  %v95_v54 = vld [vmem:[#allocation6 + $0xf0] sm:$0xff]  ;;  %v100_v56 = vld [vmem:[#allocation6 + $0x118] sm:$0xff]  ;;  %v109_v60 = vld [vmem:[#allocation6 + $0x160] sm:$0xff] }
  0x43   :  { %4660 = vmatprep.subr.bf16.mxu0 %v6613_v30  ;;  %v104_v57 = vld [vmem:[#allocation6 + $0x138] sm:$0xff]  ;;  %v114_v61 = vld [vmem:[#allocation6 + $0x188] sm:$0xff]  ;;  %v6642_v62 = vpack.c.bf16 %v95_v54, %v91_v53  ;;  %v99_v2 = vld [vmem:[#allocation6 + $0x110] sm:$0xff]  ;;  %v6648_v7 = vpack.c.bf16 %v109_v60, %v105_v59 }
  0x44   :  { %4690 = vmatpush1.bf16.msra.mxu1 %v6630_v48  ;;  %v118_v63 = vld [vmem:[#allocation6 + $0x1a8] sm:$0xff]  ;;  %v6645_v1 = vpack.c.bf16 %v104_v57, %v100_v56  ;;  %v103_v3 = vld [vmem:[#allocation6 + $0x130] sm:$0xff]  ;;  %v108_v5 = vld [vmem:[#allocation6 + $0x158] sm:$0xff] }
  0x45   :  { %4692 = vmatprep.subr.bf16.mxu1 %v6633_v52  ;;  %v112_v6 = vld [vmem:[#allocation6 + $0x178] sm:$0xff]  ;;  %v6651_v10 = vpack.c.bf16 %v118_v63, %v114_v61  ;;  %v113_v11 = vld [vmem:[#allocation6 + $0x180] sm:$0xff]  ;;  %v122_v13 = vld [vmem:[#allocation6 + $0x1c8] sm:$0xff]  ;;  %v6654_v15 = vpack.c.bf16 %v103_v3, %v99_v2 }
  0x46   :  { %4662 = vmatpush1.bf16.msra.mxu0 %v6622_v42  ;;  %v117_v12 = vld [vmem:[#allocation6 + $0x1a0] sm:$0xff]  ;;  %v126_v16 = vld [vmem:[#allocation6 + $0x1e8] sm:$0xff]  ;;  %v6657_v18 = vpack.c.bf16 %v112_v6, %v108_v5  ;;  %v107_v19 = vld [vmem:[#allocation6 + $0x150] sm:$0xff] }
  0x47   :  { %4664 = vmatprep.subr.bf16.mxu0 %v6627_v46  ;;  %v111_v20 = vld [vmem:[#allocation6 + $0x170] sm:$0xff]  ;;  %v116_v21 = vld [vmem:[#allocation6 + $0x198] sm:$0xff]  ;;  %v6660_v24 = vpack.c.bf16 %v117_v12, %v113_v11  ;;  %v6663_v27 = vpack.c.bf16 %v126_v16, %v122_v13  ;;  %v121_v28 = vld [vmem:[#allocation6 + $0x1c0] sm:$0xff] }
  0x48   :  { %4694 = vmatpush1.bf16.msra.mxu1 %v6642_v62  ;;  %v120_v23 = vld [vmem:[#allocation6 + $0x1b8] sm:$0xff]  ;;  %v125_v29 = vld [vmem:[#allocation6 + $0x1e0] sm:$0xff]  ;;  %v6666_v31 = vpack.c.bf16 %v111_v20, %v107_v19  ;;  %v115_v32 = vld [vmem:[#allocation6 + $0x190] sm:$0xff] }
  0x49   :  { %4696 = vmatprep.subr.bf16.mxu1 %v6645_v1  ;;  %v6669_v34 = vpack.c.bf16 %v120_v23, %v116_v21  ;;  %v119_v35 = vld [vmem:[#allocation6 + $0x1b0] sm:$0xff]  ;;  %v304_v36 = vld [vmem:[#allocation8 + $0x8] sm:$0xff]  ;;  %v124_v39 = vld [vmem:[#allocation6 + $0x1d8] sm:$0xff]  ;;  %v6672_v41 = vpack.c.bf16 %v125_v29, %v121_v28 }
  0x4a   :  { %4666 = vmatpush1.bf16.msra.mxu0 %v6636_v55  ;;  %v308_v38 = vld [vmem:[#allocation8 + $0x28] sm:$0xff]  ;;  %v128_v40 = vld [vmem:[#allocation6 + $0x1f8] sm:$0xff]  ;;  %v6676_v43 = vpack.c.bf16 %v119_v35, %v115_v32  ;;  %v123_v44 = vld [vmem:[#allocation6 + $0x1d0] sm:$0xff] }
  0x4b   :  { %4668 = vmatprep.subr.bf16.mxu0 %v6639_v58  ;;  %v6678_v47 = vpack.c.bf16 %v308_v38, %v304_v36  ;;  %v303_v49 = vld [vmem:[#allocation8] sm:$0xff]  ;;  %v6681_v51 = vpack.c.bf16 %v128_v40, %v124_v39  ;;  %v127_v53 = vld [vmem:[#allocation6 + $0x1f0] sm:$0xff]  ;;  %v312_v54 = vld [vmem:[#allocation8 + $0x48] sm:$0xff] }
  0x4c   :  { %4698 = vmatpush1.bf16.msra.mxu1 %v6654_v15  ;;  %v307_v50 = vld [vmem:[#allocation8 + $0x20] sm:$0xff]  ;;  %v316_v56 = vld [vmem:[#allocation8 + $0x68] sm:$0xff]  ;;  %v306_v57 = vld [vmem:[#allocation8 + $0x18] sm:$0xff]  ;;  %v6687_v61 = vpack.c.bf16 %v127_v53, %v123_v44 }
  0x4d   :  { %4700 = vmatprep.subr.bf16.mxu1 %v6657_v18  ;;  %v310_v59 = vld [vmem:[#allocation8 + $0x38] sm:$0xff]  ;;  %v6684_v60 = vpack.c.bf16 %v307_v50, %v303_v49  ;;  %v305_v63 = vld [vmem:[#allocation8 + $0x10] sm:$0xff]  ;;  %v6690_v2 = vpack.c.bf16 %v316_v56, %v312_v54  ;;  %v311_v3 = vld [vmem:[#allocation8 + $0x40] sm:$0xff] }
  0x4e   :  { %4670 = vmatpush1.bf16.msra.mxu0 %v6648_v7  ;;  %v315_v5 = vld [vmem:[#allocation8 + $0x60] sm:$0xff]  ;;  %v6693_v6 = vpack.c.bf16 %v310_v59, %v306_v57  ;;  %v309_v11 = vld [vmem:[#allocation8 + $0x30] sm:$0xff]  ;;  %v320_v12 = vld [vmem:[#allocation8 + $0x88] sm:$0xff] }
  0x4f   :  { %4672 = vmatprep.subr.bf16.mxu0 %v6651_v10  ;;  %v324_v13 = vld [vmem:[#allocation8 + $0xa8] sm:$0xff]  ;;  %v314_v16 = vld [vmem:[#allocation8 + $0x58] sm:$0xff]  ;;  %v6697_v20 = vpack.c.bf16 %v315_v5, %v311_v3  ;;  %v6701_v21 = vpack.c.bf16 %v309_v11, %v305_v63  ;;  %v313_v23 = vld [vmem:[#allocation8 + $0x50] sm:$0xff] }
  0x50   :  { %4702 = vmatpush1.bf16.msra.mxu1 %v6666_v31  ;;  %v318_v19 = vld [vmem:[#allocation8 + $0x78] sm:$0xff]  ;;  %v6704_v28 = vpack.c.bf16 %v324_v13, %v320_v12  ;;  %v319_v29 = vld [vmem:[#allocation8 + $0x80] sm:$0xff]  ;;  %v317_v36 = vld [vmem:[#allocation8 + $0x70] sm:$0xff] }
  0x51   :  { %4704 = vmatprep.subr.bf16.mxu1 %v6669_v34  ;;  %v323_v32 = vld [vmem:[#allocation8 + $0xa0] sm:$0xff]  ;;  %v6707_v35 = vpack.c.bf16 %v318_v19, %v314_v16  ;;  %v328_v38 = vld [vmem:[#allocation8 + $0xc8] sm:$0xff]  ;;  %v322_v40 = vld [vmem:[#allocation8 + $0x98] sm:$0xff]  ;;  %v6714_v50 = vpack.c.bf16 %v317_v36, %v313_v23 }
  0x52   :  { %4674 = vmatpush1.bf16.msra.mxu0 %v6660_v24  ;;  %v332_v39 = vld [vmem:[#allocation8 + $0xe8] sm:$0xff]  ;;  %v326_v44 = vld [vmem:[#allocation8 + $0xb8] sm:$0xff]  ;;  %v6711_v49 = vpack.c.bf16 %v323_v32, %v319_v29  ;;  %v321_v53 = vld [vmem:[#allocation8 + $0x90] sm:$0xff] }
  0x53   :  { %4676 = vmatprep.subr.bf16.mxu0 %v6663_v27  ;;  %v6717_v54 = vpack.c.bf16 %v332_v39, %v328_v38  ;;  %v327_v56 = vld [vmem:[#allocation8 + $0xc0] sm:$0xff]  ;;  %v6720_v59 = vpack.c.bf16 %v326_v44, %v322_v40  ;;  %v325_v63 = vld [vmem:[#allocation8 + $0xb0] sm:$0xff]  ;;  %v336_v3 = vld [vmem:[#allocation8 + $0x108] sm:$0xff] }
  0x54   :  { %4706 = vmatpush1.bf16.msra.mxu1 %v6676_v43  ;;  %v331_v57 = vld [vmem:[#allocation8 + $0xe0] sm:$0xff]  ;;  %v340_v5 = vld [vmem:[#allocation8 + $0x128] sm:$0xff]  ;;  %v330_v11 = vld [vmem:[#allocation8 + $0xd8] sm:$0xff]  ;;  %v6727_v16 = vpack.c.bf16 %v325_v63, %v321_v53 }
  0x55   :  { %4708 = vmatprep.subr.bf16.mxu1 %v6681_v51  ;;  %v334_v12 = vld [vmem:[#allocation8 + $0xf8] sm:$0xff]  ;;  %v6724_v13 = vpack.c.bf16 %v331_v57, %v327_v56  ;;  %v6730_v19 = vpack.c.bf16 %v340_v5, %v336_v3  ;;  %v335_v23 = vld [vmem:[#allocation8 + $0x100] sm:$0xff]  ;;  %v329_v36 = vld [vmem:[#allocation8 + $0xd0] sm:$0xff] }
  0x56   :  { %4678 = vmatpush1.bf16.msra.mxu0 %v6672_v41  ;;  %v339_v29 = vld [vmem:[#allocation8 + $0x120] sm:$0xff]  ;;  %v6733_v32 = vpack.c.bf16 %v334_v12, %v330_v11  ;;  %v333_v38 = vld [vmem:[#allocation8 + $0xf0] sm:$0xff]  ;;  %v338_v39 = vld [vmem:[#allocation8 + $0x118] sm:$0xff] }
  0x57   :  { %4712 = vmatprep.subr.bf16.mxu0 %v6678_v47  ;;  %8582 = vst [vmem:[#allocation13_spill] sm:$0xff] %v6730_v19  ;;  %v342_v40 = vld [vmem:[#allocation8 + $0x138] sm:$0xff]  ;;  %v6736_v44 = vpack.c.bf16 %v339_v29, %v335_v23  ;;  %v6739_v53 = vpack.c.bf16 %v333_v38, %v329_v36  ;;  %v337_v57 = vld [vmem:[#allocation8 + $0x110] sm:$0xff]  ;;  %v344_v5 = vld [vmem:[#allocation8 + $0x148] sm:$0xff] }
  0x58   :  { %4710 = vmatpush1.bf16.msra.mxu1 %v6687_v61  ;;  %v6743_v56 = vpack.c.bf16 %v342_v40, %v338_v39  ;;  %v341_v63 = vld [vmem:[#allocation8 + $0x130] sm:$0xff]  ;;  %v348_v11 = vld [vmem:[#allocation8 + $0x168] sm:$0xff]  ;;  %v346_v12 = vld [vmem:[#allocation8 + $0x158] sm:$0xff] }
  0x59   :  { %194 = vmatmul.mubr.f32.vlgmr.msra.gmra.mrb[0].mxu0 %v8363_v0  ;;  %4776 = vmatprep.subr.bf16.mxu1 %v6693_v6  ;;  %8583 = vst [vmem:[#allocation14_spill] sm:$0xff] %v6736_v44  ;;  %8584 = vst [vmem:[#allocation15_spill] sm:$0xff] %v6739_v53  ;;  %v6747_v3 = vpack.c.bf16 %v341_v63, %v337_v57  ;;  %v6751_v23 = vpack.c.bf16 %v348_v11, %v344_v5  ;;  %v350_v29 = vld [vmem:[#allocation8 + $0x178] sm:$0xff]  ;;  %v343_v36 = vld [vmem:[#allocation8 + $0x140] sm:$0xff] }
  0x5a   :  { %4714 = vmatpush1.bf16.msra.mxu0 %v6684_v60  ;;  %517 = vmatprep.mubr.f32.mxu0 %v8363_v0  ;;  %8585 = vst [vmem:[#allocation16_spill] sm:$0xff] %v6743_v56  ;;  %v347_v38 = vld [vmem:[#allocation8 + $0x160] sm:$0xff]  ;;  %v6753_v39 = vpack.c.bf16 %v350_v29, %v346_v12  ;;  %v352_v63 = vld [vmem:[#allocation8 + $0x188] sm:$0xff]  ;;  %v354_v11 = vld [vmem:[#allocation8 + $0x198] sm:$0xff] }
  0x5b   :  { %4716 = vmatprep.subr.bf16.mxu0 %v6690_v2  ;;  %265 = vmatmul.mubr.f32.vlgmr.msra.gmra.mrb[0].mxu1 %v8363_v0  ;;  %8586 = vst [vmem:[#allocation17_spill] sm:$0xff] %v6747_v3  ;;  %8587 = vst [vmem:[#allocation18_spill] sm:$0xff] %v6751_v23  ;;  %v6755_v40 = vpack.c.bf16 %v347_v38, %v343_v36  ;;  %v356_v5 = vld [vmem:[#allocation8 + $0x1a8] sm:$0xff]  ;;  %v358_v12 = vld [vmem:[#allocation8 + $0x1b8] sm:$0xff] }
  0x5c   :  { %4778 = vmatpush1.bf16.msra.mxu1 %v6701_v21  ;;  %588 = vmatprep.mubr.f32.mxu1 %v8363_v0  ;;  %8588 = vst [vmem:[#allocation19_spill] sm:$0xff] %v6753_v39  ;;  %v345_v0 = vld [vmem:[#allocation8 + $0x150] sm:$0xff]  ;;  %v351_v29 = vld [vmem:[#allocation8 + $0x180] sm:$0xff]  ;;  %v6765_v38 = vpack.c.bf16 %v358_v12, %v354_v11  ;;  %v366_v11 = vld [vmem:[#allocation8 + $0x1f8] sm:$0xff] }
  0x5d   :  { %4780 = vmatprep.subr.bf16.mxu1 %v6707_v35  ;;  %8589 = vst [vmem:[#allocation20_spill] sm:$0xff] %v6755_v40  ;;  %v355_v36 = vld [vmem:[#allocation8 + $0x1a0] sm:$0xff] }
  0x5e   :  { %4718 = vmatpush1.bf16.msra.mxu0 %v6697_v20  ;;  %8592 = vst [vmem:[#allocation23_spill] sm:$0xff] %v6765_v38  ;;  %v359_v12 = vld [vmem:[#allocation8 + $0x1c0] sm:$0xff] }
  0x5f   :  { %4720 = vmatprep.subr.bf16.mxu0 %v6704_v28 }
  0x60   :  { %4782 = vmatpush1.bf16.msra.mxu1 %v6714_v50 }
  0x61   :  { %4784 = vmatprep.subr.bf16.mxu1 %v6720_v59 }
  0x62   :  { %4722 = vmatpush1.bf16.msra.mxu0 %v6711_v49 }
  0x63   :  { %4724 = vmatprep.subr.bf16.mxu0 %v6717_v54 }
  0x64   :  { %4786 = vmatpush1.bf16.msra.mxu1 %v6727_v16 }
  0x65   :  { %4788 = vmatprep.subr.bf16.mxu1 %v6733_v32 }
  0x66   :  { %4726 = vmatpush1.bf16.msra.mxu0 %v6724_v13 }
  0x67   :  { %4728 = vmatprep.subr.bf16.mxu0 %v6730_v19  ;;  %v420_v19 = vld [vmem:[#allocation8 + $0x3a8] sm:$0xff] }
  0x68   :  { %4790 = vmatpush1.bf16.msra.mxu1 %v6739_v53  ;;  %v415_v53 = vld [vmem:[#allocation8 + $0x380] sm:$0xff] }
  0x69   :  { %4792 = vmatprep.subr.bf16.mxu1 %v6743_v56  ;;  %v6767_v56 = vpack.c.bf16 %v355_v36, %v351_v29  ;;  %v363_v29 = vld [vmem:[#allocation8 + $0x1e0] sm:$0xff] }
  0x6a   :  { %4730 = vmatpush1.bf16.msra.mxu0 %v6736_v44  ;;  %v349_v44 = vld [vmem:[#allocation8 + $0x170] sm:$0xff] }
  0x6b   :  { %4732 = vmatprep.subr.bf16.mxu0 %v6751_v23  ;;  %v6758_v57 = vpack.c.bf16 %v349_v44, %v345_v0  ;;  %8593 = vst [vmem:[#allocation24_spill] sm:$0xff] %v6767_v56  ;;  %v353_v0 = vld [vmem:[#allocation8 + $0x190] sm:$0xff]  ;;  %v6779_v23 = vpack.c.bf16 %v363_v29, %v359_v12  ;;  %v371_v12 = vld [vmem:[#allocation8 + $0x220] sm:$0xff] }
  0x6c   :  { %4794 = vmatpush1.bf16.msra.mxu1 %v6747_v3  ;;  %v6763_v3 = vpack.c.bf16 %v356_v5, %v352_v63  ;;  %v357_v44 = vld [vmem:[#allocation8 + $0x1b0] sm:$0xff]  ;;  %v364_v63 = vld [vmem:[#allocation8 + $0x1e8] sm:$0xff]  ;;  %v362_v5 = vld [vmem:[#allocation8 + $0x1d8] sm:$0xff] }
  0x6d   :  { %8590 = vst [vmem:[#allocation21_spill] sm:$0xff] %v6758_v57  ;;  %4796 = vmatprep.subr.bf16.mxu1 %v6753_v39  ;;  %v6770_v39 = vpack.c.bf16 %v357_v44, %v353_v0  ;;  %v6777_v36 = vpack.c.bf16 %v366_v11, %v362_v5  ;;  %8597 = vst [vmem:[#allocation28_spill] sm:$0xff] %v6779_v23  ;;  %v361_v0 = vld [vmem:[#allocation8 + $0x1d0] sm:$0xff]  ;;  %v374_v5 = vld [vmem:[#allocation8 + $0x238] sm:$0xff] }
  0x6e   :  { %4734 = vmatpush1.bf16.msra.mxu0 %v6755_v40  ;;  %8591 = vst [vmem:[#allocation22_spill] sm:$0xff] %v6763_v3  ;;  %v365_v44 = vld [vmem:[#allocation8 + $0x1f0] sm:$0xff]  ;;  %v367_v11 = vld [vmem:[#allocation8 + $0x200] sm:$0xff] }
  0x6f   :  { %4736 = vmatprep.subr.bf16.mxu0 %v6763_v3  ;;  %8594 = vst [vmem:[#allocation25_spill] sm:$0xff] %v6770_v39  ;;  %8596 = vst [vmem:[#allocation27_spill] sm:$0xff] %v6777_v36  ;;  %v6791_v3 = vpack.c.bf16 %v371_v12, %v367_v11  ;;  %v375_v11 = vld [vmem:[#allocation8 + $0x240] sm:$0xff] }
  0x70   :  { %4798 = vmatpush1.bf16.msra.mxu1 %v6758_v57  ;;  %v360_v57 = vld [vmem:[#allocation8 + $0x1c8] sm:$0xff]  ;;  %v379_v12 = vld [vmem:[#allocation8 + $0x260] sm:$0xff] }
  0x71   :  { %4800 = vmatprep.subr.bf16.mxu1 %v6765_v38  ;;  %v6775_v40 = vpack.c.bf16 %v364_v63, %v360_v57  ;;  %v6782_v38 = vpack.c.bf16 %v365_v44, %v361_v0  ;;  %v372_v57 = vld [vmem:[#allocation8 + $0x228] sm:$0xff]  ;;  %v370_v63 = vld [vmem:[#allocation8 + $0x218] sm:$0xff]  ;;  %8601 = vst [vmem:[#allocation32_spill] sm:$0xff] %v6791_v3  ;;  %v369_v0 = vld [vmem:[#allocation8 + $0x210] sm:$0xff] }
  0x72   :  { %4738 = vmatpush1.bf16.msra.mxu0 %v6767_v56  ;;  %v6789_v29 = vpack.c.bf16 %v374_v5, %v370_v63  ;;  %v373_v44 = vld [vmem:[#allocation8 + $0x230] sm:$0xff] }
  0x73   :  { %8595 = vst [vmem:[#allocation26_spill] sm:$0xff] %v6775_v40  ;;  %4740 = vmatprep.subr.bf16.mxu0 %v6775_v40  ;;  %8598 = vst [vmem:[#allocation29_spill] sm:$0xff] %v6782_v38  ;;  %v377_v40 = vld [vmem:[#allocation8 + $0x250] sm:$0xff] }
  0x74   :  { %4802 = vmatpush1.bf16.msra.mxu1 %v6770_v39  ;;  %v368_v39 = vld [vmem:[#allocation8 + $0x208] sm:$0xff]  ;;  %8600 = vst [vmem:[#allocation31_spill] sm:$0xff] %v6789_v29 }
  0x75   :  { %4804 = vmatprep.subr.bf16.mxu1 %v6777_v36  ;;  %v6787_v56 = vpack.c.bf16 %v372_v57, %v368_v39  ;;  %v6794_v36 = vpack.c.bf16 %v373_v44, %v369_v0  ;;  %v380_v39 = vld [vmem:[#allocation8 + $0x268] sm:$0xff]  ;;  %v378_v57 = vld [vmem:[#allocation8 + $0x258] sm:$0xff]  ;;  %v381_v0 = vld [vmem:[#allocation8 + $0x270] sm:$0xff] }
  0x76   :  { %4742 = vmatpush1.bf16.msra.mxu0 %v6779_v23  ;;  %v382_v23 = vld [vmem:[#allocation8 + $0x278] sm:$0xff]  ;;  %v6807_v44 = vpack.c.bf16 %v381_v0, %v377_v40  ;;  %v392_v0 = vld [vmem:[#allocation8 + $0x2c8] sm:$0xff] }
  0x77   :  { %8599 = vst [vmem:[#allocation30_spill] sm:$0xff] %v6787_v56  ;;  %4744 = vmatprep.subr.bf16.mxu0 %v6787_v56  ;;  %8602 = vst [vmem:[#allocation33_spill] sm:$0xff] %v6794_v36  ;;  %v6801_v5 = vpack.c.bf16 %v382_v23, %v378_v57  ;;  %v6803_v56 = vpack.c.bf16 %v379_v12, %v375_v11  ;;  %v390_v23 = vld [vmem:[#allocation8 + $0x2b8] sm:$0xff]  ;;  %v387_v57 = vld [vmem:[#allocation8 + $0x2a0] sm:$0xff] }
  0x78   :  { %4806 = vmatpush1.bf16.msra.mxu1 %v6782_v38  ;;  %v376_v38 = vld [vmem:[#allocation8 + $0x248] sm:$0xff]  ;;  %8606 = vst [vmem:[#allocation37_spill] sm:$0xff] %v6807_v44 }
  0x79   :  { %4808 = vmatprep.subr.bf16.mxu1 %v6789_v29  ;;  %v6799_v63 = vpack.c.bf16 %v380_v39, %v376_v38  ;;  %8604 = vst [vmem:[#allocation35_spill] sm:$0xff] %v6801_v5  ;;  %8605 = vst [vmem:[#allocation36_spill] sm:$0xff] %v6803_v56  ;;  %v386_v29 = vld [vmem:[#allocation8 + $0x298] sm:$0xff]  ;;  %v383_v39 = vld [vmem:[#allocation8 + $0x280] sm:$0xff] }
  0x7a   :  { %4746 = vmatpush1.bf16.msra.mxu0 %v6791_v3  ;;  %v388_v3 = vld [vmem:[#allocation8 + $0x2a8] sm:$0xff]  ;;  %v6813_v11 = vpack.c.bf16 %v390_v23, %v386_v29  ;;  %v6815_v12 = vpack.c.bf16 %v387_v57, %v383_v39  ;;  %v391_v29 = vld [vmem:[#allocation8 + $0x2c0] sm:$0xff] }
  0x7b   :  { %8603 = vst [vmem:[#allocation34_spill] sm:$0xff] %v6799_v63  ;;  %4748 = vmatprep.subr.bf16.mxu0 %v6799_v63  ;;  %v385_v63 = vld [vmem:[#allocation8 + $0x290] sm:$0xff]  ;;  %v395_v23 = vld [vmem:[#allocation8 + $0x2e0] sm:$0xff] }
  0x7c   :  { %4810 = vmatpush1.bf16.msra.mxu1 %v6794_v36  ;;  %v384_v36 = vld [vmem:[#allocation8 + $0x288] sm:$0xff]  ;;  %8608 = vst [vmem:[#allocation39_spill] sm:$0xff] %v6813_v11  ;;  %8609 = vst [vmem:[#allocation40_spill] sm:$0xff] %v6815_v12  ;;  %v6827_v57 = vpack.c.bf16 %v395_v23, %v391_v29 }
  0x7d   :  { %4812 = vmatprep.subr.bf16.mxu1 %v6801_v5  ;;  %v6810_v38 = vpack.c.bf16 %v388_v3, %v384_v36  ;;  %v389_v5 = vld [vmem:[#allocation8 + $0x2b0] sm:$0xff]  ;;  %v396_v3 = vld [vmem:[#allocation8 + $0x2e8] sm:$0xff]  ;;  %v394_v36 = vld [vmem:[#allocation8 + $0x2d8] sm:$0xff] }
  0x7e   :  { %4750 = vmatpush1.bf16.msra.mxu0 %v6803_v56  ;;  %v6818_v40 = vpack.c.bf16 %v389_v5, %v385_v63  ;;  %v6822_v56 = vpack.c.bf16 %v396_v3, %v392_v0  ;;  %8613 = vst [vmem:[#allocation44_spill] sm:$0xff] %v6827_v57  ;;  %v393_v63 = vld [vmem:[#allocation8 + $0x2d0] sm:$0xff]  ;;  %v404_v0 = vld [vmem:[#allocation8 + $0x328] sm:$0xff]  ;;  %v402_v3 = vld [vmem:[#allocation8 + $0x318] sm:$0xff] }
  0x7f   :  { %8607 = vst [vmem:[#allocation38_spill] sm:$0xff] %v6810_v38  ;;  %4752 = vmatprep.subr.bf16.mxu0 %v6810_v38  ;;  %v397_v5 = vld [vmem:[#allocation8 + $0x2f0] sm:$0xff] }
  0x80   :  { %4814 = vmatpush1.bf16.msra.mxu1 %v6807_v44  ;;  %8610 = vst [vmem:[#allocation41_spill] sm:$0xff] %v6818_v40  ;;  %8611 = vst [vmem:[#allocation42_spill] sm:$0xff] %v6822_v56  ;;  %v398_v44 = vld [vmem:[#allocation8 + $0x2f8] sm:$0xff] }
  0x81   :  { %4816 = vmatprep.subr.bf16.mxu1 %v6813_v11  ;;  %v6825_v39 = vpack.c.bf16 %v398_v44, %v394_v36  ;;  %v6830_v11 = vpack.c.bf16 %v397_v5, %v393_v63  ;;  %v399_v44 = vld [vmem:[#allocation8 + $0x300] sm:$0xff]  ;;  %v401_v63 = vld [vmem:[#allocation8 + $0x310] sm:$0xff] }
  0x82   :  { %4754 = vmatpush1.bf16.msra.mxu0 %v6815_v12  ;;  %v400_v12 = vld [vmem:[#allocation8 + $0x308] sm:$0xff]  ;;  %v403_v36 = vld [vmem:[#allocation8 + $0x320] sm:$0xff]  ;;  %v405_v5 = vld [vmem:[#allocation8 + $0x330] sm:$0xff] }
  0x83   :  { %8612 = vst [vmem:[#allocation43_spill] sm:$0xff] %v6825_v39  ;;  %4756 = vmatprep.subr.bf16.mxu0 %v6822_v56  ;;  %8614 = vst [vmem:[#allocation45_spill] sm:$0xff] %v6830_v11  ;;  %v6834_v38 = vpack.c.bf16 %v404_v0, %v400_v12  ;;  %v6839_v23 = vpack.c.bf16 %v403_v36, %v399_v44  ;;  %v412_v12 = vld [vmem:[#allocation8 + $0x368] sm:$0xff]  ;;  %v410_v0 = vld [vmem:[#allocation8 + $0x358] sm:$0xff] }
  0x84   :  { %4818 = vmatpush1.bf16.msra.mxu1 %v6818_v40  ;;  %v406_v40 = vld [vmem:[#allocation8 + $0x338] sm:$0xff] }
  0x85   :  { %4820 = vmatprep.subr.bf16.mxu1 %v6825_v39  ;;  %8615 = vst [vmem:[#allocation46_spill] sm:$0xff] %v6834_v38  ;;  %v6837_v29 = vpack.c.bf16 %v406_v40, %v402_v3  ;;  %8617 = vst [vmem:[#allocation48_spill] sm:$0xff] %v6839_v23  ;;  %v6842_v39 = vpack.c.bf16 %v405_v5, %v401_v63  ;;  %v407_v40 = vld [vmem:[#allocation8 + $0x340] sm:$0xff]  ;;  %v409_v63 = vld [vmem:[#allocation8 + $0x350] sm:$0xff] }
  0x86   :  { %4758 = vmatpush1.bf16.msra.mxu0 %v6827_v57  ;;  %v408_v57 = vld [vmem:[#allocation8 + $0x348] sm:$0xff]  ;;  %v411_v3 = vld [vmem:[#allocation8 + $0x360] sm:$0xff]  ;;  %v413_v5 = vld [vmem:[#allocation8 + $0x370] sm:$0xff] }
  0x87   :  { %8616 = vst [vmem:[#allocation47_spill] sm:$0xff] %v6837_v29  ;;  %4760 = vmatprep.subr.bf16.mxu0 %v6834_v38  ;;  %8618 = vst [vmem:[#allocation49_spill] sm:$0xff] %v6842_v39  ;;  %v6846_v56 = vpack.c.bf16 %v412_v12, %v408_v57  ;;  %v6851_v36 = vpack.c.bf16 %v411_v3, %v407_v40  ;;  %v416_v38 = vld [vmem:[#allocation8 + $0x388] sm:$0xff]  ;;  %v422_v12 = vld [vmem:[#allocation8 + $0x3b8] sm:$0xff] }
  0x88   :  { %4822 = vmatpush1.bf16.msra.mxu1 %v6830_v11  ;;  %v414_v11 = vld [vmem:[#allocation8 + $0x378] sm:$0xff]  ;;  %v6857_v57 = vpack.c.bf16 %v420_v19, %v416_v38  ;;  %v417_v40 = vld [vmem:[#allocation8 + $0x390] sm:$0xff]  ;;  %v428_v19 = vld [vmem:[#allocation8 + $0x3e8] sm:$0xff] }
  0x89   :  { %4824 = vmatprep.subr.bf16.mxu1 %v6837_v29  ;;  %8619 = vst [vmem:[#allocation50_spill] sm:$0xff] %v6846_v56  ;;  %v6849_v44 = vpack.c.bf16 %v414_v11, %v410_v0  ;;  %8621 = vst [vmem:[#allocation52_spill] sm:$0xff] %v6851_v36  ;;  %v6854_v29 = vpack.c.bf16 %v413_v5, %v409_v63  ;;  %v421_v3 = vld [vmem:[#allocation8 + $0x3b0] sm:$0xff]  ;;  %v424_v63 = vld [vmem:[#allocation8 + $0x3c8] sm:$0xff] }
  0x8a   :  { %4762 = vmatpush1.bf16.msra.mxu0 %v6839_v23  ;;  %v418_v23 = vld [vmem:[#allocation8 + $0x398] sm:$0xff]  ;;  %v6866_v5 = vpack.c.bf16 %v421_v3, %v417_v40  ;;  %v61_v3 = vld [vmem:[%s8358_s0 + $0x8] sm:$0xff] }
  0x8b   :  { %8620 = vst [vmem:[#allocation51_spill] sm:$0xff] %v6849_v44  ;;  %4764 = vmatprep.subr.bf16.mxu0 %v6846_v56  ;;  %8622 = vst [vmem:[#allocation53_spill] sm:$0xff] %v6854_v29  ;;  %v6860_v11 = vpack.c.bf16 %v422_v12, %v418_v23  ;;  %v426_v38 = vld [vmem:[#allocation8 + $0x3d8] sm:$0xff]  ;;  %v6869_v56 = vpack.c.bf16 %v428_v19, %v424_v63  ;;  %v425_v12 = vld [vmem:[#allocation8 + $0x3d0] sm:$0xff] }
  0x8c   :  { %4826 = vmatpush1.bf16.msra.mxu1 %v6842_v39  ;;  %v419_v39 = vld [vmem:[#allocation8 + $0x3a0] sm:$0xff]  ;;  %8624 = vst [vmem:[#allocation55_spill] sm:$0xff] %v6866_v5 }
  0x8d   :  { %4828 = vmatprep.subr.bf16.mxu1 %v6849_v44  ;;  %v6862_v0 = vpack.c.bf16 %v419_v39, %v415_v53  ;;  %v430_v44 = vld [vmem:[#allocation8 + $0x3f8] sm:$0xff]  ;;  %8625 = vst [vmem:[#allocation56_spill] sm:$0xff] %v6869_v56  ;;  %v423_v53 = vld [vmem:[#allocation8 + $0x3c0] sm:$0xff] }
  0x8e   :  { %4766 = vmatpush1.bf16.msra.mxu0 %v6851_v36  ;;  %v6871_v23 = vpack.c.bf16 %v430_v44, %v426_v38  ;;  %v427_v39 = vld [vmem:[#allocation8 + $0x3e0] sm:$0xff]  ;;  %v429_v36 = vld [vmem:[#allocation8 + $0x3f0] sm:$0xff] }
  0x8f   :  { %8623 = vst [vmem:[#allocation54_spill] sm:$0xff] %v6862_v0  ;;  %4768 = vmatprep.subr.bf16.mxu0 %v6857_v57  ;;  %v6878_v40 = vpack.c.bf16 %v429_v36, %v425_v12  ;;  %v60_v44 = vld [vmem:[%s8358_s0] sm:$0xff] }
  0x90   :  { %4830 = vmatpush1.bf16.msra.mxu1 %v6854_v29  ;;  %8626 = vst [vmem:[#allocation57_spill] sm:$0xff] %v6871_v23  ;;  %v6874_v29 = vpack.c.bf16 %v427_v39, %v423_v53 }
  0x91   :  { %4832 = vmatprep.subr.bf16.mxu1 %v6860_v11  ;;  %8628 = vst [vmem:[#allocation59_spill] sm:$0xff] %v6878_v40 }
  0x92   :  { %4770 = vmatpush1.bf16.msra.mxu0 %v6862_v0  ;;  %8627 = vst [vmem:[#allocation58_spill] sm:$0xff] %v6874_v29 }
  0x93   :  { %4772 = vmatprep.subr.bf16.mxu0 %v6869_v56 }
  0x94   :  { %4834 = vmatpush1.bf16.msra.mxu1 %v6866_v5 }
  0x95   :  { %4836 = vmatprep.subr.bf16.mxu1 %v6871_v23 }
  0x96   :  { %4774 = vmatpush1.bf16.msra.mxu0 %v6874_v29  ;;  %v62_v29 = vld [vmem:[%s8358_s0 + $0x10] sm:$0xff] }
  0x97   :  { %4840 = vmatprep.subr.bf16.mxu0 %v6591_v4  ;;  %v63_v4 = vld [vmem:[%s8358_s0 + $0x18] sm:$0xff] }
  0x98   :  { %4838 = vmatpush1.bf16.msra.mxu1 %v6878_v40 }
  0x99   :  { %4872 = vmatprep.subr.bf16.mxu1 %v6604_v22 }
 0x12c   :  { %v195_v36 = vpop.f32.mrb[0].mxu0 }
 0x12d   :  { %v271_v63 = vadd.f32 %v195_v36, %v60_v44  ;;  %v197_v19 = vpop.f32.mrb[1].mxu0 }
 0x12e   :  { %v272_v38 = vadd.f32 %v197_v19, %v61_v3  ;;  %v266_v22 = vpop.f32.mrb[0].mxu1 }
 0x12f   :  { %v4571_v53 = vmul.f32 -1.442695, %v271_v63  ;;  %v268_v12 = vpop.f32.mrb[1].mxu1  ;;  %v273_v56 = vadd.f32 %v266_v22, %v62_v29  ;;  %v8676_v22 = vld [vmem:[#allocation59_spill] sm:$0xff] }
 0x130   :  { %v4572_v39 = vmul.f32 -1.442695, %v272_v38  ;;  %v274_v40 = vadd.f32 %v268_v12, %v63_v4 }
 0x131   :  { %6189 = vpow2.f32 %v4571_v53 }
 0x132   :  { %6191 = vpow2.f32 %v4572_v39  ;;  %v4573_v23 = vmul.f32 -1.442695, %v274_v40 }
 0x134   :  { %6193 = vpow2.f32 %v4573_v23 }
 0x135   :  { %6195 = vtanh.f32 %v273_v56  ;;  %v8629_v56 = vmov 0.0  }
 0x13b   :  { %v6190_v44 = vpop.eup %6189 }
 0x13c   :  { %v6192_v3 = vpop.eup %6191  ;;  %v281_v36 = vadd.f32 1.0, %v6190_v44  ;;  %v1192_v44 = vld [vmem:[#allocation6 + $0x8] sm:$0xff] }
 0x13d   :  { %v282_v63 = vadd.f32 1.0, %v6192_v3  ;;  %v1196_v3 = vld [vmem:[#allocation6 + $0x28] sm:$0xff] }
 0x13e   :  { %6197 = vrcp.f32 %v281_v36  ;;  %v6194_v19 = vpop.eup %6193  ;;  %v1194_v36 = vld [vmem:[#allocation6 + $0x18] sm:$0xff] }
 0x13f   :  { %6199 = vrcp.f32 %v282_v63  ;;  %v6196_v38 = vpop.eup %6195  ;;  %v291_v39 = vadd.f32 1.0, %v6194_v19  ;;  %v6996_v63 = vpack.c.bf16 %v1196_v3, %v1192_v44 }
 0x141   :  { %6201 = vrcp.f32 %v291_v39  ;;  %v431_v39 = vld [vmem:[#allocation10] sm:$0xf] }
 0x148   :  { %v6198_v53 = vpop.eup %6197 }
 0x149   :  { %v6200_v5 = vpop.eup %6199  ;;  %v296_v4 = vmul.f32 %v6198_v53, %v6196_v38 }
 0x14a   :  { %v295_v12 = vmul.f32 0.0, %v6200_v5  ;;  %v8675_v5 = vld [vmem:[#allocation58_spill] sm:$0xff] }
 0x14b   :  { %v6202_v29 = vpop.eup %6201 }
 0x14c   :  { %v6897_v0 = vadd.f32 %v296_v4, %v295_v12 }
 0x14e   :  { %6203 = vtanh.f32 %v6897_v0 }
 0x158   :  { %v6204_v23 = vpop.eup %6203 }
 0x159   :  { %v299_v40 = vmul.f32 %v6204_v23, %v6202_v29 }
 0x15b   :  { %518 = vmatmul.mubr.f32.vlgmr.msra.gmra.mrb[2].mxu0 %v299_v40  ;;  %589 = vmatmul.mubr.f32.vlgmr.msra.gmra.mrb[2].mxu1 %v299_v40 }
 0x15c   :  { %4842 = vmatpush1.bf16.msra.mxu0 %v6593_v8  ;;  %4874 = vmatpush1.bf16.msra.mxu1 %v6606_v25  ;;  %v8630_v8 = vld [vmem:[#allocation15_spill] sm:$0xff]  ;;  %v8634_v25 = vld [vmem:[#allocation17_spill] sm:$0xff] }
 0x15d   :  { %4844 = vmatprep.subr.bf16.mxu0 %v6595_v9  ;;  %4876 = vmatprep.subr.bf16.mxu1 %v6616_v33  ;;  %v8631_v9 = vld [vmem:[#allocation13_spill] sm:$0xff]  ;;  %v8637_v33 = vld [vmem:[#allocation20_spill] sm:$0xff] }
 0x15e   :  { %756 = vmatprep.mubr.f32.mxu0 %v8629_v56  ;;  %827 = vmatprep.mubr.f32.mxu1 %v8629_v56 }
 0x160   :  { %4846 = vmatpush1.bf16.msra.mxu0 %v6599_v14  ;;  %4878 = vmatpush1.bf16.msra.mxu1 %v6618_v37  ;;  %v8632_v14 = vld [vmem:[#allocation16_spill] sm:$0xff]  ;;  %v8638_v37 = vld [vmem:[#allocation21_spill] sm:$0xff] }
 0x161   :  { %4848 = vmatprep.subr.bf16.mxu0 %v6602_v17  ;;  %4880 = vmatprep.subr.bf16.mxu1 %v6624_v45  ;;  %v8633_v17 = vld [vmem:[#allocation14_spill] sm:$0xff]  ;;  %v8640_v45 = vld [vmem:[#allocation23_spill] sm:$0xff] }
 0x164   :  { %4850 = vmatpush1.bf16.msra.mxu0 %v6609_v26  ;;  %4882 = vmatpush1.bf16.msra.mxu1 %v6630_v48  ;;  %v8635_v26 = vld [vmem:[#allocation18_spill] sm:$0xff]  ;;  %v8642_v48 = vld [vmem:[#allocation25_spill] sm:$0xff] }
 0x165   :  { %4852 = vmatprep.subr.bf16.mxu0 %v6613_v30  ;;  %4884 = vmatprep.subr.bf16.mxu1 %v6633_v52  ;;  %v8636_v30 = vld [vmem:[#allocation19_spill] sm:$0xff]  ;;  %v8643_v52 = vld [vmem:[#allocation26_spill] sm:$0xff] }
 0x168   :  { %4854 = vmatpush1.bf16.msra.mxu0 %v6622_v42  ;;  %4886 = vmatpush1.bf16.msra.mxu1 %v6642_v62  ;;  %v8639_v42 = vld [vmem:[#allocation22_spill] sm:$0xff]  ;;  %v8646_v62 = vld [vmem:[#allocation29_spill] sm:$0xff] }
 0x169   :  { %4856 = vmatprep.subr.bf16.mxu0 %v6627_v46  ;;  %4888 = vmatprep.subr.bf16.mxu1 %v6645_v1  ;;  %v8641_v46 = vld [vmem:[#allocation24_spill] sm:$0xff]  ;;  %v8647_v1 = vld [vmem:[#allocation30_spill] sm:$0xff] }
 0x16c   :  { %4858 = vmatpush1.bf16.msra.mxu0 %v6636_v55  ;;  %4890 = vmatpush1.bf16.msra.mxu1 %v6654_v15  ;;  %v8644_v55 = vld [vmem:[#allocation27_spill] sm:$0xff]  ;;  %v8650_v15 = vld [vmem:[#allocation33_spill] sm:$0xff] }
 0x16d   :  { %4860 = vmatprep.subr.bf16.mxu0 %v6639_v58  ;;  %4892 = vmatprep.subr.bf16.mxu1 %v6657_v18  ;;  %v8645_v58 = vld [vmem:[#allocation28_spill] sm:$0xff]  ;;  %v8651_v18 = vld [vmem:[#allocation34_spill] sm:$0xff] }
 0x170   :  { %4862 = vmatpush1.bf16.msra.mxu0 %v6648_v7  ;;  %4894 = vmatpush1.bf16.msra.mxu1 %v6666_v31  ;;  %v8648_v7 = vld [vmem:[#allocation31_spill] sm:$0xff]  ;;  %v8654_v31 = vld [vmem:[#allocation37_spill] sm:$0xff] }
 0x171   :  { %4864 = vmatprep.subr.bf16.mxu0 %v6651_v10  ;;  %4896 = vmatprep.subr.bf16.mxu1 %v6669_v34  ;;  %v8649_v10 = vld [vmem:[#allocation32_spill] sm:$0xff]  ;;  %v8655_v34 = vld [vmem:[#allocation38_spill] sm:$0xff] }
 0x174   :  { %4866 = vmatpush1.bf16.msra.mxu0 %v6660_v24  ;;  %4898 = vmatpush1.bf16.msra.mxu1 %v6676_v43  ;;  %v8652_v24 = vld [vmem:[#allocation35_spill] sm:$0xff]  ;;  %v8657_v43 = vld [vmem:[#allocation40_spill] sm:$0xff] }
 0x175   :  { %4868 = vmatprep.subr.bf16.mxu0 %v6663_v27  ;;  %4900 = vmatprep.subr.bf16.mxu1 %v6681_v51  ;;  %v8653_v27 = vld [vmem:[#allocation36_spill] sm:$0xff]  ;;  %v8659_v51 = vld [vmem:[#allocation42_spill] sm:$0xff] }
 0x178   :  { %4870 = vmatpush1.bf16.msra.mxu0 %v6672_v41  ;;  %4902 = vmatpush1.bf16.msra.mxu1 %v6687_v61  ;;  %v8656_v41 = vld [vmem:[#allocation39_spill] sm:$0xff]  ;;  %v8661_v61 = vld [vmem:[#allocation44_spill] sm:$0xff] }
 0x179   :  { %4904 = vmatprep.subr.bf16.mxu0 %v6678_v47  ;;  %4968 = vmatprep.subr.bf16.mxu1 %v6693_v6  ;;  %v8658_v47 = vld [vmem:[#allocation41_spill] sm:$0xff]  ;;  %v8663_v6 = vld [vmem:[#allocation46_spill] sm:$0xff] }
 0x17b   :  { %757 = vmatmul.mubr.f32.vlgmr.msra.gmra.mrb[4].mxu0 %v299_v40  ;;  %828 = vmatmul.mubr.f32.vlgmr.msra.gmra.mrb[4].mxu1 %v299_v40 }
 0x17c   :  { %4906 = vmatpush1.bf16.msra.mxu0 %v6684_v60  ;;  %4970 = vmatpush1.bf16.msra.mxu1 %v6701_v21  ;;  %v8660_v60 = vld [vmem:[#allocation43_spill] sm:$0xff]  ;;  %v8665_v21 = vld [vmem:[#allocation48_spill] sm:$0xff] }
 0x17d   :  { %4908 = vmatprep.subr.bf16.mxu0 %v6690_v2  ;;  %4972 = vmatprep.subr.bf16.mxu1 %v6707_v35  ;;  %v8662_v2 = vld [vmem:[#allocation45_spill] sm:$0xff]  ;;  %v8667_v35 = vld [vmem:[#allocation50_spill] sm:$0xff] }
 0x180   :  { %4910 = vmatpush1.bf16.msra.mxu0 %v6697_v20  ;;  %4974 = vmatpush1.bf16.msra.mxu1 %v6714_v50  ;;  %v8664_v20 = vld [vmem:[#allocation47_spill] sm:$0xff]  ;;  %v8669_v50 = vld [vmem:[#allocation52_spill] sm:$0xff] }
 0x181   :  { %4912 = vmatprep.subr.bf16.mxu0 %v6704_v28  ;;  %4976 = vmatprep.subr.bf16.mxu1 %v6720_v59  ;;  %v8666_v28 = vld [vmem:[#allocation49_spill] sm:$0xff]  ;;  %v8671_v59 = vld [vmem:[#allocation54_spill] sm:$0xff] }
 0x184   :  { %4914 = vmatpush1.bf16.msra.mxu0 %v6711_v49  ;;  %4978 = vmatpush1.bf16.msra.mxu1 %v6727_v16  ;;  %v8668_v49 = vld [vmem:[#allocation51_spill] sm:$0xff]  ;;  %v8673_v16 = vld [vmem:[#allocation56_spill] sm:$0xff] }
 0x185   :  { %4916 = vmatprep.subr.bf16.mxu0 %v6717_v54  ;;  %4980 = vmatprep.subr.bf16.mxu1 %v6733_v32  ;;  %v8670_v54 = vld [vmem:[#allocation53_spill] sm:$0xff] }
 0x186   :  { %v8674_v32 = vld [vmem:[#allocation57_spill] sm:$0xff] }
 0x188   :  { %4918 = vmatpush1.bf16.msra.mxu0 %v6724_v13  ;;  %4982 = vmatpush1.bf16.msra.mxu1 %v8630_v8  ;;  %v8672_v13 = vld [vmem:[#allocation55_spill] sm:$0xff] }
 0x189   :  { %4920 = vmatprep.subr.bf16.mxu0 %v8631_v9  ;;  %4984 = vmatprep.subr.bf16.mxu1 %v8632_v14 }
 0x18c   :  { %4922 = vmatpush1.bf16.msra.mxu0 %v8633_v17  ;;  %4986 = vmatpush1.bf16.msra.mxu1 %v8634_v25 }
 0x18d   :  { %4924 = vmatprep.subr.bf16.mxu0 %v8635_v26  ;;  %4988 = vmatprep.subr.bf16.mxu1 %v8636_v30 }
 0x190   :  { %4926 = vmatpush1.bf16.msra.mxu0 %v8637_v33  ;;  %4990 = vmatpush1.bf16.msra.mxu1 %v8638_v37 }
 0x191   :  { %4928 = vmatprep.subr.bf16.mxu0 %v8639_v42  ;;  %4992 = vmatprep.subr.bf16.mxu1 %v8640_v45 }
 0x194   :  { %4930 = vmatpush1.bf16.msra.mxu0 %v8641_v46  ;;  %4994 = vmatpush1.bf16.msra.mxu1 %v8642_v48 }
 0x195   :  { %4932 = vmatprep.subr.bf16.mxu0 %v8643_v52  ;;  %4996 = vmatprep.subr.bf16.mxu1 %v8644_v55 }
 0x198   :  { %4934 = vmatpush1.bf16.msra.mxu0 %v8645_v58  ;;  %4998 = vmatpush1.bf16.msra.mxu1 %v8646_v62 }
 0x199   :  { %4936 = vmatprep.subr.bf16.mxu0 %v8647_v1  ;;  %5000 = vmatprep.subr.bf16.mxu1 %v8648_v7 }
 0x19c   :  { %4938 = vmatpush1.bf16.msra.mxu0 %v8649_v10  ;;  %5002 = vmatpush1.bf16.msra.mxu1 %v8650_v15 }
 0x19d   :  { %4940 = vmatprep.subr.bf16.mxu0 %v8651_v18  ;;  %5004 = vmatprep.subr.bf16.mxu1 %v8652_v24 }
 0x1a0   :  { %4942 = vmatpush1.bf16.msra.mxu0 %v8653_v27  ;;  %5006 = vmatpush1.bf16.msra.mxu1 %v8654_v31  ;;  %v4577_v31 = vld [vmem:[%s8358_s0 + $0x20] sm:$0xff] }
 0x1a1   :  { %4944 = vmatprep.subr.bf16.mxu0 %v8655_v34  ;;  %5008 = vmatprep.subr.bf16.mxu1 %v8656_v41  ;;  %v4578_v34 = vld [vmem:[%s8358_s0 + $0x28] sm:$0xff] }
 0x1a4   :  { %4946 = vmatpush1.bf16.msra.mxu0 %v8657_v43  ;;  %5010 = vmatpush1.bf16.msra.mxu1 %v8658_v47 }
 0x1a5   :  { %4948 = vmatprep.subr.bf16.mxu0 %v8659_v51  ;;  %5012 = vmatprep.subr.bf16.mxu1 %v8660_v60 }
 0x1a8   :  { %4950 = vmatpush1.bf16.msra.mxu0 %v8661_v61  ;;  %5014 = vmatpush1.bf16.msra.mxu1 %v8662_v2 }
 0x1a9   :  { %4952 = vmatprep.subr.bf16.mxu0 %v8663_v6  ;;  %5016 = vmatprep.subr.bf16.mxu1 %v8664_v20 }
 0x1ac   :  { %4954 = vmatpush1.bf16.msra.mxu0 %v8665_v21  ;;  %5018 = vmatpush1.bf16.msra.mxu1 %v8666_v28  ;;  %v4580_v21 = vld [vmem:[%s8358_s0 + $0x38] sm:$0xff] }
 0x1ad   :  { %4956 = vmatprep.subr.bf16.mxu0 %v8667_v35  ;;  %5020 = vmatprep.subr.bf16.mxu1 %v8668_v49  ;;  %v4579_v35 = vld [vmem:[%s8358_s0 + $0x30] sm:$0xff] }
 0x1b0   :  { %4958 = vmatpush1.bf16.msra.mxu0 %v8669_v50  ;;  %5022 = vmatpush1.bf16.msra.mxu1 %v8670_v54 }
 0x1b1   :  { %4960 = vmatprep.subr.bf16.mxu0 %v6857_v57  ;;  %5024 = vmatprep.subr.bf16.mxu1 %v6860_v11  ;;  %v1198_v57 = vld [vmem:[#allocation6 + $0x38] sm:$0xff]  ;;  %v433_v11 = vlaneseq }
 0x1b2   :  { %v6998_v19 = vpack.c.bf16 %v1198_v57, %v1194_v36 }
 0x1b3   :  { %v434_v38 = vshrl.u32 %v433_v11, 7 }
 0x1b4   :  { %4962 = vmatpush1.bf16.msra.mxu0 %v8671_v59  ;;  %5026 = vmatpush1.bf16.msra.mxu1 %v8672_v13 }
 0x1b5   :  { %4964 = vmatprep.subr.bf16.mxu0 %v8673_v16  ;;  %5028 = vmatprep.subr.bf16.mxu1 %v8674_v32  ;;  %v7002_v53 = vsub.s32 0, %v434_v38  ;;  %v7004_v4 = vsub.s32 1, %v434_v38  ;;  %v7008_v8 = vsub.s32 3, %v434_v38  ;;  %v7011_v37 = vsub.s32 2, %v434_v38 }
 0x1b7   :  { %8677 = vst [vmem:[#allocation15_spill] sm:$0xff] %v7002_v53  ;;  %8678 = vst [vmem:[#allocation13_spill] sm:$0xff] %v7004_v4  ;;  %v436_v12 = vrot.slane %v431_v39, %v7002_v53  ;;  %v440_v29 = vrot.slane %v431_v39, %v7004_v4  ;;  %v448_v33 = vrot.slane %v431_v39, %v7008_v8 }
 0x1b8   :  { %4966 = vmatpush1.bf16.msra.mxu0 %v8675_v5  ;;  %5030 = vmatpush1.bf16.msra.mxu1 %v8676_v22  ;;  %v444_v45 = vrot.slane %v431_v39, %v7011_v37 }
 0x1b9   :  { %5032 = vmatprep.subr.bf16.mxu0 %v6996_v63  ;;  %5064 = vmatprep.subr.bf16.mxu1 %v6998_v19 }
 0x22e   :  { %v519_v23 = vpop.f32.mrb[2].mxu0  ;;  %v590_v40 = vpop.f32.mrb[2].mxu1 }
 0x22f   :  { %v520_v9 = vadd.f32 %v519_v23, %v436_v12  ;;  %v521_v14 = vpop.f32.mrb[3].mxu0  ;;  %v592_v17 = vpop.f32.mrb[3].mxu1  ;;  %v591_v48 = vadd.f32 %v590_v40, %v444_v45  ;;  %v1195_v23 = vld [vmem:[#allocation6 + $0x20] sm:$0xff]  ;;  %v1193_v40 = vld [vmem:[#allocation6 + $0x10] sm:$0xff] }
 0x230   :  { %v522_v25 = vadd.f32 %v521_v14, %v440_v29  ;;  %v593_v42 = vadd.f32 %v592_v17, %v448_v33  ;;  %v1191_v29 = vld [vmem:[#allocation6] sm:$0xff]  ;;  %v1200_v14 = vld [vmem:[#allocation6 + $0x48] sm:$0xff] }
 0x231   :  { %v4574_v26 = vmul.f32 -1.442695, %v520_v9  ;;  %v1197_v9 = vld [vmem:[#allocation6 + $0x30] sm:$0xff]  ;;  %v1204_v17 = vld [vmem:[#allocation6 + $0x68] sm:$0xff] }
 0x232   :  { %v4575_v30 = vmul.f32 -1.442695, %v522_v25  ;;  %v4576_v46 = vmul.f32 -1.442695, %v593_v42  ;;  %v1202_v25 = vld [vmem:[#allocation6 + $0x58] sm:$0xff]  ;;  %v7033_v42 = vpack.c.bf16 %v1195_v23, %v1191_v29  ;;  %v7035_v45 = vpack.c.bf16 %v1197_v9, %v1193_v40  ;;  %v1232_v29 = vld [vmem:[#allocation6 + $0x148] sm:$0xff] }
 0x233   :  { %6205 = vpow2.f32 %v4574_v26  ;;  %v1206_v26 = vld [vmem:[#allocation6 + $0x78] sm:$0xff]  ;;  %v1236_v23 = vld [vmem:[#allocation6 + $0x168] sm:$0xff] }
 0x234   :  { %6207 = vpow2.f32 %v4575_v30  ;;  %v1234_v40 = vld [vmem:[#allocation6 + $0x158] sm:$0xff] }
 0x235   :  { %6209 = vpow2.f32 %v4576_v46  ;;  %v1203_v46 = vld [vmem:[#allocation6 + $0x60] sm:$0xff]  ;;  %v1238_v9 = vld [vmem:[#allocation6 + $0x178] sm:$0xff] }
 0x236   :  { %6211 = vtanh.f32 %v591_v48 }
 0x23d   :  { %v6206_v52 = vpop.eup %6205 }
 0x23e   :  { %v6208_v55 = vpop.eup %6207  ;;  %v601_v58 = vadd.f32 1.0, %v6206_v52  ;;  %v7039_v52 = vpack.c.bf16 %v1204_v17, %v1200_v14 }
 0x23f   :  { %v602_v62 = vadd.f32 1.0, %v6208_v55  ;;  %v6210_v1 = vpop.eup %6209  ;;  %v7041_v55 = vpack.c.bf16 %v1206_v26, %v1202_v25  ;;  %v1231_v25 = vld [vmem:[#allocation6 + $0x140] sm:$0xff] }
 0x240   :  { %6213 = vrcp.f32 %v601_v58  ;;  %v6212_v7 = vpop.eup %6211  ;;  %v611_v24 = vadd.f32 1.0, %v6210_v1  ;;  %v1201_v58 = vld [vmem:[#allocation6 + $0x50] sm:$0xff]  ;;  %v1208_v1 = vld [vmem:[#allocation6 + $0x88] sm:$0xff]  ;;  %v1235_v26 = vld [vmem:[#allocation6 + $0x160] sm:$0xff] }
 0x241   :  { %6215 = vrcp.f32 %v602_v62  ;;  %v1205_v62 = vld [vmem:[#allocation6 + $0x70] sm:$0xff] }
 0x242   :  { %6217 = vrcp.f32 %v611_v24  ;;  %v7049_v24 = vpack.c.bf16 %v1205_v62, %v1201_v58  ;;  %v1240_v58 = vld [vmem:[#allocation6 + $0x188] sm:$0xff] }
 0x243   :  { %v1244_v62 = vld [vmem:[#allocation6 + $0x1a8] sm:$0xff] }
 0x24a   :  { %v6214_v10 = vpop.eup %6213 }
 0x24b   :  { %v6216_v15 = vpop.eup %6215  ;;  %v616_v18 = vmul.f32 %v6214_v10, %v6212_v7  ;;  %v1212_v7 = vld [vmem:[#allocation6 + $0xa8] sm:$0xff]  ;;  %v1210_v10 = vld [vmem:[#allocation6 + $0x98] sm:$0xff] }
 0x24c   :  { %v615_v27 = vmul.f32 0.0, %v6216_v15  ;;  %v6218_v49 = vpop.eup %6217  ;;  %v1214_v15 = vld [vmem:[#allocation6 + $0xb8] sm:$0xff] }
 0x24e   :  { %v7020_v41 = vadd.f32 %v616_v18, %v615_v27  ;;  %v758_v43 = vpop.f32.mrb[4].mxu0  ;;  %v829_v47 = vpop.f32.mrb[4].mxu1  ;;  %v1207_v27 = vld [vmem:[#allocation6 + $0x80] sm:$0xff] }
 0x24f   :  { %v834_v51 = vadd.f32 %v4577_v31, %v758_v43  ;;  %v760_v60 = vpop.f32.mrb[5].mxu0  ;;  %v831_v61 = vpop.f32.mrb[5].mxu1  ;;  %v836_v59 = vadd.f32 %v4579_v35, %v829_v47  ;;  %v1211_v31 = vld [vmem:[#allocation6 + $0xa0] sm:$0xff]  ;;  %v7055_v43 = vpack.c.bf16 %v1214_v15, %v1210_v10  ;;  %v1209_v47 = vld [vmem:[#allocation6 + $0x90] sm:$0xff]  ;;  %v7097_v10 = vpack.c.bf16 %v1235_v26, %v1231_v25  ;;  %v1436_v25 = vld [vmem:[#allocation8 + $0x38] sm:$0xff] }
 0x250   :  { %6219 = vtanh.f32 %v7020_v41  ;;  %v835_v2 = vadd.f32 %v4578_v34, %v760_v60  ;;  %v837_v28 = vadd.f32 %v4580_v21, %v831_v61  ;;  %v7053_v34 = vpack.c.bf16 %v1212_v7, %v1208_v1  ;;  %v1216_v60 = vld [vmem:[#allocation6 + $0xc8] sm:$0xff]  ;;  %v1219_v35 = vld [vmem:[#allocation6 + $0xe0] sm:$0xff]  ;;  %v1242_v1 = vld [vmem:[#allocation6 + $0x198] sm:$0xff] }
 0x251   :  { %v4581_v6 = vmul.f32 -1.442695, %v834_v51  ;;  %v1213_v51 = vld [vmem:[#allocation6 + $0xb0] sm:$0xff]  ;;  %v1220_v61 = vld [vmem:[#allocation6 + $0xe8] sm:$0xff]  ;;  %v1246_v7 = vld [vmem:[#allocation6 + $0x1b8] sm:$0xff] }
 0x252   :  { %v4582_v20 = vmul.f32 -1.442695, %v835_v2  ;;  %v4583_v54 = vmul.f32 -1.442695, %v837_v28  ;;  %v1218_v2 = vld [vmem:[#allocation6 + $0xd8] sm:$0xff]  ;;  %v7063_v21 = vpack.c.bf16 %v1213_v51, %v1209_v47  ;;  %v1215_v28 = vld [vmem:[#allocation6 + $0xc0] sm:$0xff]  ;;  %v7103_v47 = vpack.c.bf16 %v1244_v62, %v1240_v58 }
 0x253   :  { %6221 = vpow2.f32 %v4581_v6  ;;  %v1222_v6 = vld [vmem:[#allocation6 + $0xf8] sm:$0xff]  ;;  %v7105_v51 = vpack.c.bf16 %v1246_v7, %v1242_v1  ;;  %v1429_v26 = vld [vmem:[#allocation8] sm:$0xff]  ;;  %v1431_v62 = vld [vmem:[#allocation8 + $0x10] sm:$0xff] }
 0x254   :  { %6223 = vpow2.f32 %v4582_v20  ;;  %v7061_v20 = vpack.c.bf16 %v1211_v31, %v1207_v27  ;;  %v1239_v27 = vld [vmem:[#allocation6 + $0x180] sm:$0xff]  ;;  %v1435_v1 = vld [vmem:[#allocation8 + $0x30] sm:$0xff] }
 0x255   :  { %6225 = vpow2.f32 %v4583_v54  ;;  %v1217_v54 = vld [vmem:[#allocation6 + $0xd0] sm:$0xff]  ;;  %v1243_v31 = vld [vmem:[#allocation6 + $0x1a0] sm:$0xff]  ;;  %v7138_v7 = vpack.c.bf16 %v1435_v1, %v1431_v62 }
 0x256   :  { %6227 = vtanh.f32 %v836_v59  ;;  %v1221_v59 = vld [vmem:[#allocation6 + $0xf0] sm:$0xff] }
 0x25a   :  { %v6220_v50 = vpop.eup %6219 }
 0x25b   :  { %v619_v13 = vmul.f32 %v6220_v50, %v6218_v49  ;;  %v7067_v49 = vpack.c.bf16 %v1220_v61, %v1216_v60  ;;  %v7069_v50 = vpack.c.bf16 %v1222_v6, %v1218_v2  ;;  %v1241_v60 = vld [vmem:[#allocation6 + $0x190] sm:$0xff]  ;;  %v1248_v2 = vld [vmem:[#allocation6 + $0x1c8] sm:$0xff] }
 0x25c   :  { %v1245_v61 = vld [vmem:[#allocation6 + $0x1b0] sm:$0xff]  ;;  %v1252_v6 = vld [vmem:[#allocation6 + $0x1e8] sm:$0xff] }
 0x25d   :  { %v6222_v16 = vpop.eup %6221  ;;  %1080 = vmatprep.mubr.f32.mxu0 %v619_v13  ;;  %1151 = vmatprep.mubr.f32.mxu1 %v619_v13  ;;  %v1224_v13 = vld [vmem:[#allocation6 + $0x108] sm:$0xff] }
 0x25e   :  { %v6224_v32 = vpop.eup %6223  ;;  %v844_v5 = vadd.f32 1.0, %v6222_v16  ;;  %v1228_v16 = vld [vmem:[#allocation6 + $0x128] sm:$0xff] }
 0x25f   :  { %v845_v22 = vadd.f32 1.0, %v6224_v32  ;;  %v6226_v44 = vpop.eup %6225  ;;  %v1226_v32 = vld [vmem:[#allocation6 + $0x118] sm:$0xff] }
 0x260   :  { %6229 = vrcp.f32 %v844_v5  ;;  %v6228_v3 = vpop.eup %6227  ;;  %v854_v38 = vadd.f32 1.0, %v6226_v44  ;;  %v1230_v5 = vld [vmem:[#allocation6 + $0x138] sm:$0xff]  ;;  %v7075_v44 = vpack.c.bf16 %v1221_v59, %v1217_v54  ;;  %v7109_v54 = vpack.c.bf16 %v1243_v31, %v1239_v27  ;;  %v1442_v27 = vld [vmem:[#allocation8 + $0x68] sm:$0xff] }
 0x261   :  { %6231 = vrcp.f32 %v845_v22  ;;  %v7073_v22 = vpack.c.bf16 %v1219_v35, %v1215_v28  ;;  %v1250_v28 = vld [vmem:[#allocation6 + $0x1d8] sm:$0xff]  ;;  %v7111_v59 = vpack.c.bf16 %v1245_v61, %v1241_v60 }
 0x262   :  { %6233 = vrcp.f32 %v854_v38  ;;  %v1225_v38 = vld [vmem:[#allocation6 + $0x110] sm:$0xff]  ;;  %v1254_v35 = vld [vmem:[#allocation6 + $0x1f8] sm:$0xff] }
 0x263   :  { %v1440_v31 = vld [vmem:[#allocation8 + $0x58] sm:$0xff] }
 0x264   :  { %v1444_v61 = vld [vmem:[#allocation8 + $0x78] sm:$0xff] }
 0x26a   :  { %v6230_v36 = vpop.eup %6229 }
 0x26b   :  { %v6232_v57 = vpop.eup %6231  ;;  %v859_v11 = vmul.f32 %v6230_v36, %v6228_v3  ;;  %v1223_v3 = vld [vmem:[#allocation6 + $0x100] sm:$0xff] }
 0x26c   :  { %v858_v39 = vmul.f32 %v6232_v57, %v6897_v0  ;;  %v6234_v30 = vpop.eup %6233  ;;  %v1199_v0 = vld [vmem:[#allocation6 + $0x40] sm:$0xff]  ;;  %v7079_v57 = vpack.c.bf16 %v1228_v16, %v1224_v13  ;;  %v7115_v16 = vpack.c.bf16 %v1252_v6, %v1248_v2 }
 0x26d   :  { %v7047_v18 = vpack.c.bf16 %v1203_v46, %v1199_v0  ;;  %v1227_v36 = vld [vmem:[#allocation6 + $0x120] sm:$0xff]  ;;  %v1233_v0 = vld [vmem:[#allocation6 + $0x150] sm:$0xff] }
 0x26e   :  { %v7030_v12 = vadd.f32 %v859_v11, %v858_v39  ;;  %v7081_v11 = vpack.c.bf16 %v1230_v5, %v1226_v32  ;;  %v1229_v39 = vld [vmem:[#allocation6 + $0x130] sm:$0xff]  ;;  %v7085_v14 = vpack.c.bf16 %v1227_v36, %v1223_v3  ;;  %v1247_v13 = vld [vmem:[#allocation6 + $0x1c0] sm:$0xff]  ;;  %v7117_v32 = vpack.c.bf16 %v1254_v35, %v1250_v28 }
 0x26f   :  { %v7087_v17 = vpack.c.bf16 %v1229_v39, %v1225_v38  ;;  %v1237_v46 = vld [vmem:[#allocation6 + $0x170] sm:$0xff]  ;;  %v1251_v5 = vld [vmem:[#allocation6 + $0x1e0] sm:$0xff]  ;;  %v7145_v28 = vpack.c.bf16 %v1444_v61, %v1440_v31  ;;  %v1454_v61 = vld [vmem:[#allocation8 + $0xc8] sm:$0xff] }
 0x270   :  { %6235 = vtanh.f32 %v7030_v12  ;;  %v7099_v15 = vpack.c.bf16 %v1237_v46, %v1233_v0  ;;  %v1249_v3 = vld [vmem:[#allocation6 + $0x1d0] sm:$0xff]  ;;  %v7121_v38 = vpack.c.bf16 %v1251_v5, %v1247_v13  ;;  %v1433_v0 = vld [vmem:[#allocation8 + $0x20] sm:$0xff] }
 0x271   :  { %v1253_v36 = vld [vmem:[#allocation6 + $0x1f0] sm:$0xff]  ;;  %v7135_v58 = vpack.c.bf16 %v1433_v0, %v1429_v26  ;;  %v1437_v2 = vld [vmem:[#allocation8 + $0x40] sm:$0xff] }
 0x272   :  { %v7123_v39 = vpack.c.bf16 %v1253_v36, %v1249_v3  ;;  %v1441_v6 = vld [vmem:[#allocation8 + $0x60] sm:$0xff]  ;;  %v1439_v13 = vld [vmem:[#allocation8 + $0x50] sm:$0xff]  ;;  %v1446_v36 = vld [vmem:[#allocation8 + $0x88] sm:$0xff] }
 0x273   :  { %v7147_v35 = vpack.c.bf16 %v1441_v6, %v1437_v2  ;;  %v1443_v5 = vld [vmem:[#allocation8 + $0x70] sm:$0xff]  ;;  %v1445_v26 = vld [vmem:[#allocation8 + $0x80] sm:$0xff]  ;;  %v1458_v2 = vld [vmem:[#allocation8 + $0xe8] sm:$0xff] }
 0x274   :  { %v7150_v3 = vpack.c.bf16 %v1443_v5, %v1439_v13  ;;  %v1449_v0 = vld [vmem:[#allocation8 + $0xa0] sm:$0xff]  ;;  %v1456_v6 = vld [vmem:[#allocation8 + $0xd8] sm:$0xff]  ;;  %v7167_v13 = vpack.c.bf16 %v1458_v2, %v1454_v61  ;;  %v1466_v61 = vld [vmem:[#allocation8 + $0x128] sm:$0xff] }
 0x275   :  { %v7159_v1 = vpack.c.bf16 %v1449_v0, %v1445_v26  ;;  %v1460_v5 = vld [vmem:[#allocation8 + $0xf8] sm:$0xff]  ;;  %v1455_v26 = vld [vmem:[#allocation8 + $0xd0] sm:$0xff] }
 0x276   :  { %8679 = vst [vmem:[#allocation16_spill] sm:$0xff] %v7150_v3  ;;  %8684 = vst [vmem:[#allocation20_spill] sm:$0xff] %v7167_v13  ;;  %v1459_v0 = vld [vmem:[#allocation8 + $0xf0] sm:$0xff]  ;;  %v1464_v2 = vld [vmem:[#allocation8 + $0x118] sm:$0xff] }
 0x277   :  { %8682 = vst [vmem:[#allocation18_spill] sm:$0xff] %v7159_v1 }
 0x27a   :  { %v6236_v33 = vpop.eup %6235 }
 0x27b   :  { %v7037_v48 = vmul.f32 %v6236_v33, %v6234_v30  ;;  %v7091_v30 = vpack.c.bf16 %v1236_v23, %v1232_v29  ;;  %v7093_v33 = vpack.c.bf16 %v1238_v9, %v1234_v40  ;;  %v1430_v29 = vld [vmem:[#allocation8 + $0x8] sm:$0xff]  ;;  %v1432_v40 = vld [vmem:[#allocation8 + $0x18] sm:$0xff] }
 0x27c   :  { %v1434_v23 = vld [vmem:[#allocation8 + $0x28] sm:$0xff]  ;;  %v7133_v46 = vpack.c.bf16 %v1436_v25, %v1432_v40  ;;  %v1452_v25 = vld [vmem:[#allocation8 + $0xb8] sm:$0xff] }
 0x27d   :  { %1081 = vmatmul.mubr.f32.vlgmr.msra.gmra.mrb[6].mxu0 %v7037_v48  ;;  %1152 = vmatmul.mubr.f32.vlgmr.msra.gmra.mrb[6].mxu1 %v7037_v48  ;;  %v7131_v9 = vpack.c.bf16 %v1434_v23, %v1430_v29  ;;  %v1450_v29 = vld [vmem:[#allocation8 + $0xa8] sm:$0xff]  ;;  %v1448_v23 = vld [vmem:[#allocation8 + $0x98] sm:$0xff] }
 0x27e   :  { %5034 = vmatpush1.bf16.msra.mxu0 %v7033_v42  ;;  %5066 = vmatpush1.bf16.msra.mxu1 %v7035_v45  ;;  %v7155_v40 = vpack.c.bf16 %v1450_v29, %v1446_v36  ;;  %v7157_v62 = vpack.c.bf16 %v1452_v25, %v1448_v23  ;;  %v1453_v36 = vld [vmem:[#allocation8 + $0xc0] sm:$0xff]  ;;  %v7169_v23 = vpack.c.bf16 %v1460_v5, %v1456_v6  ;;  %v1468_v6 = vld [vmem:[#allocation8 + $0x138] sm:$0xff] }
 0x27f   :  { %5036 = vmatprep.subr.bf16.mxu0 %v7039_v52  ;;  %5068 = vmatprep.subr.bf16.mxu1 %v7041_v55  ;;  %v1457_v29 = vld [vmem:[#allocation8 + $0xe0] sm:$0xff] }
 0x280   :  { %1319 = vmatprep.mubr.f32.mxu0 %v8629_v56  ;;  %1390 = vmatprep.mubr.f32.mxu1 %v8629_v56  ;;  %8680 = vst [vmem:[#allocation14_spill] sm:$0xff] %v7155_v40  ;;  %8681 = vst [vmem:[#allocation17_spill] sm:$0xff] %v7157_v62  ;;  %v7171_v25 = vpack.c.bf16 %v1457_v29, %v1453_v36  ;;  %v1461_v5 = vld [vmem:[#allocation8 + $0x100] sm:$0xff]  ;;  %v7181_v29 = vpack.c.bf16 %v1468_v6, %v1464_v2  ;;  %v1472_v2 = vld [vmem:[#allocation8 + $0x158] sm:$0xff] }
 0x281   :  { %8685 = vst [vmem:[#allocation21_spill] sm:$0xff] %v7169_v23  ;;  %v1465_v36 = vld [vmem:[#allocation8 + $0x120] sm:$0xff]  ;;  %v1476_v6 = vld [vmem:[#allocation8 + $0x178] sm:$0xff] }
 0x282   :  { %5038 = vmatpush1.bf16.msra.mxu0 %v7047_v18  ;;  %5070 = vmatpush1.bf16.msra.mxu1 %v7049_v24  ;;  %8686 = vst [vmem:[#allocation22_spill] sm:$0xff] %v7171_v25  ;;  %8689 = vst [vmem:[#allocation25_spill] sm:$0xff] %v7181_v29 }
 0x283   :  { %5040 = vmatprep.subr.bf16.mxu0 %v7053_v34  ;;  %5072 = vmatprep.subr.bf16.mxu1 %v7055_v43 }
 0x286   :  { %5042 = vmatpush1.bf16.msra.mxu0 %v7061_v20  ;;  %5074 = vmatpush1.bf16.msra.mxu1 %v7063_v21 }
 0x287   :  { %5044 = vmatprep.subr.bf16.mxu0 %v7067_v49  ;;  %5076 = vmatprep.subr.bf16.mxu1 %v7069_v50 }
 0x28a   :  { %5046 = vmatpush1.bf16.msra.mxu0 %v7073_v22  ;;  %5078 = vmatpush1.bf16.msra.mxu1 %v7075_v44 }
 0x28b   :  { %5048 = vmatprep.subr.bf16.mxu0 %v7079_v57  ;;  %5080 = vmatprep.subr.bf16.mxu1 %v7081_v11 }
 0x28e   :  { %5050 = vmatpush1.bf16.msra.mxu0 %v7085_v14  ;;  %5082 = vmatpush1.bf16.msra.mxu1 %v7087_v17 }
 0x28f   :  { %5052 = vmatprep.subr.bf16.mxu0 %v7091_v30  ;;  %5084 = vmatprep.subr.bf16.mxu1 %v7093_v33 }
 0x292   :  { %5054 = vmatpush1.bf16.msra.mxu0 %v7097_v10  ;;  %5086 = vmatpush1.bf16.msra.mxu1 %v7099_v15 }
 0x293   :  { %5056 = vmatprep.subr.bf16.mxu0 %v7103_v47  ;;  %5088 = vmatprep.subr.bf16.mxu1 %v7105_v51 }
 0x296   :  { %5058 = vmatpush1.bf16.msra.mxu0 %v7109_v54  ;;  %5090 = vmatpush1.bf16.msra.mxu1 %v7111_v59 }
 0x297   :  { %5060 = vmatprep.subr.bf16.mxu0 %v7115_v16  ;;  %5092 = vmatprep.subr.bf16.mxu1 %v7117_v32 }
 0x29a   :  { %5062 = vmatpush1.bf16.msra.mxu0 %v7121_v38  ;;  %5094 = vmatpush1.bf16.msra.mxu1 %v7123_v39 }
 0x29b   :  { %5096 = vmatprep.subr.bf16.mxu0 %v7131_v9  ;;  %5160 = vmatprep.subr.bf16.mxu1 %v7133_v46 }
 0x29d   :  { %1320 = vmatmul.mubr.f32.vlgmr.msra.gmra.mrb[8].mxu0 %v7037_v48  ;;  %1391 = vmatmul.mubr.f32.vlgmr.msra.gmra.mrb[8].mxu1 %v7037_v48  ;;  %v1438_v48 = vld [vmem:[#allocation8 + $0x48] sm:$0xff] }
 0x29e   :  { %5098 = vmatpush1.bf16.msra.mxu0 %v7135_v58  ;;  %5162 = vmatpush1.bf16.msra.mxu1 %v7138_v7  ;;  %v7143_v60 = vpack.c.bf16 %v1442_v27, %v1438_v48  ;;  %v1447_v48 = vld [vmem:[#allocation8 + $0x90] sm:$0xff] }
 0x29f   :  { %5164 = vmatprep.subr.bf16.mxu1 %v7145_v28  ;;  %v1451_v27 = vld [vmem:[#allocation8 + $0xb0] sm:$0xff] }
 0x2a0   :  { %5100 = vmatprep.subr.bf16.mxu0 %v7143_v60  ;;  %v7162_v31 = vpack.c.bf16 %v1451_v27, %v1447_v48  ;;  %v7174_v48 = vpack.c.bf16 %v1459_v0, %v1455_v26  ;;  %v1462_v27 = vld [vmem:[#allocation8 + $0x108] sm:$0xff]  ;;  %v1463_v26 = vld [vmem:[#allocation8 + $0x110] sm:$0xff] }
 0x2a1   :  { %v1467_v0 = vld [vmem:[#allocation8 + $0x130] sm:$0xff] }
 0x2a2   :  { %5102 = vmatpush1.bf16.msra.mxu0 %v7147_v35  ;;  %5166 = vmatpush1.bf16.msra.mxu1 %v7150_v3  ;;  %8683 = vst [vmem:[#allocation19_spill] sm:$0xff] %v7162_v31  ;;  %8687 = vst [vmem:[#allocation23_spill] sm:$0xff] %v7174_v48 }
 0x2a3   :  { %5104 = vmatprep.subr.bf16.mxu0 %v7155_v40  ;;  %5168 = vmatprep.subr.bf16.mxu1 %v7157_v62  ;;  %v1477_v62 = vld [vmem:[#allocation8 + $0x180] sm:$0xff] }
 0x2a6   :  { %5106 = vmatpush1.bf16.msra.mxu0 %v7159_v1  ;;  %5170 = vmatpush1.bf16.msra.mxu1 %v7162_v31  ;;  %v7179_v31 = vpack.c.bf16 %v1466_v61, %v1462_v27  ;;  %v7183_v1 = vpack.c.bf16 %v1465_v36, %v1461_v5  ;;  %v1470_v27 = vld [vmem:[#allocation8 + $0x148] sm:$0xff]  ;;  %v1469_v5 = vld [vmem:[#allocation8 + $0x140] sm:$0xff] }
 0x2a7   :  { %5108 = vmatprep.subr.bf16.mxu0 %v7167_v13  ;;  %5172 = vmatprep.subr.bf16.mxu1 %v7169_v23  ;;  %v7186_v23 = vpack.c.bf16 %v1467_v0, %v1463_v26  ;;  %v1474_v61 = vld [vmem:[#allocation8 + $0x168] sm:$0xff]  ;;  %v1473_v36 = vld [vmem:[#allocation8 + $0x160] sm:$0xff]  ;;  %v1471_v0 = vld [vmem:[#allocation8 + $0x150] sm:$0xff] }
 0x2a8   :  { %8688 = vst [vmem:[#allocation24_spill] sm:$0xff] %v7179_v31  ;;  %8690 = vst [vmem:[#allocation26_spill] sm:$0xff] %v7183_v1  ;;  %v7196_v26 = vpack.c.bf16 %v1473_v36, %v1469_v5  ;;  %v1480_v13 = vld [vmem:[#allocation8 + $0x198] sm:$0xff]  ;;  %v1483_v5 = vld [vmem:[#allocation8 + $0x1b0] sm:$0xff] }
 0x2a9   :  { %8691 = vst [vmem:[#allocation27_spill] sm:$0xff] %v7186_v23 }
 0x2aa   :  { %5110 = vmatpush1.bf16.msra.mxu0 %v7171_v25  ;;  %5174 = vmatpush1.bf16.msra.mxu1 %v7174_v48  ;;  %v7191_v48 = vpack.c.bf16 %v1474_v61, %v1470_v27  ;;  %v7194_v25 = vpack.c.bf16 %v1476_v6, %v1472_v2  ;;  %8694 = vst [vmem:[#allocation30_spill] sm:$0xff] %v7196_v26  ;;  %v1484_v61 = vld [vmem:[#allocation8 + $0x1b8] sm:$0xff] }
 0x2ab   :  { %5112 = vmatprep.subr.bf16.mxu0 %v7179_v31  ;;  %5176 = vmatprep.subr.bf16.mxu1 %v7181_v29  ;;  %v1475_v29 = vld [vmem:[#allocation8 + $0x170] sm:$0xff]  ;;  %v7205_v2 = vpack.c.bf16 %v1484_v61, %v1480_v13  ;;  %v1485_v13 = vld [vmem:[#allocation8 + $0x1c0] sm:$0xff] }
 0x2ac   :  { %8692 = vst [vmem:[#allocation28_spill] sm:$0xff] %v7191_v48  ;;  %8693 = vst [vmem:[#allocation29_spill] sm:$0xff] %v7194_v25  ;;  %v7198_v31 = vpack.c.bf16 %v1475_v29, %v1471_v0  ;;  %v1479_v29 = vld [vmem:[#allocation8 + $0x190] sm:$0xff]  ;;  %v1486_v0 = vld [vmem:[#allocation8 + $0x1c8] sm:$0xff] }
 0x2ad   :  { %8697 = vst [vmem:[#allocation33_spill] sm:$0xff] %v7205_v2  ;;  %v7210_v36 = vpack.c.bf16 %v1483_v5, %v1479_v29  ;;  %v1489_v61 = vld [vmem:[#allocation8 + $0x1e0] sm:$0xff]  ;;  %v1487_v29 = vld [vmem:[#allocation8 + $0x1d0] sm:$0xff] }
 0x2ae   :  { %5114 = vmatpush1.bf16.msra.mxu0 %v7183_v1  ;;  %5178 = vmatpush1.bf16.msra.mxu1 %v7186_v23  ;;  %8695 = vst [vmem:[#allocation31_spill] sm:$0xff] %v7198_v31  ;;  %v1478_v1 = vld [vmem:[#allocation8 + $0x188] sm:$0xff]  ;;  %v1491_v5 = vld [vmem:[#allocation8 + $0x1f0] sm:$0xff] }
 0x2af   :  { %5116 = vmatprep.subr.bf16.mxu0 %v7191_v48  ;;  %v1482_v23 = vld [vmem:[#allocation8 + $0x1a8] sm:$0xff]  ;;  %5180 = vmatprep.subr.bf16.mxu1 %v7194_v25  ;;  %v1481_v48 = vld [vmem:[#allocation8 + $0x1a0] sm:$0xff]  ;;  %8699 = vst [vmem:[#allocation35_spill] sm:$0xff] %v7210_v36 }
 0x2b0   :  { %v7202_v27 = vpack.c.bf16 %v1482_v23, %v1478_v1  ;;  %v7207_v6 = vpack.c.bf16 %v1481_v48, %v1477_v62  ;;  %v1490_v1 = vld [vmem:[#allocation8 + $0x1e8] sm:$0xff]  ;;  %v1488_v23 = vld [vmem:[#allocation8 + $0x1d8] sm:$0xff]  ;;  %v7219_v48 = vpack.c.bf16 %v1489_v61, %v1485_v13 }
 0x2b1   :  { %v1546_v25 = vld [vmem:[#allocation8 + $0x3a8] sm:$0xff] }
 0x2b2   :  { %5118 = vmatpush1.bf16.msra.mxu0 %v7196_v26  ;;  %8696 = vst [vmem:[#allocation32_spill] sm:$0xff] %v7202_v27  ;;  %5182 = vmatpush1.bf16.msra.mxu1 %v7198_v31  ;;  %8698 = vst [vmem:[#allocation34_spill] sm:$0xff] %v7207_v6  ;;  %v7214_v26 = vpack.c.bf16 %v1490_v1, %v1486_v0  ;;  %v1492_v31 = vld [vmem:[#allocation8 + $0x1f8] sm:$0xff]  ;;  %v1498_v0 = vld [vmem:[#allocation8 + $0x228] sm:$0xff] }
 0x2b3   :  { %5120 = vmatprep.subr.bf16.mxu0 %v7202_v27  ;;  %5184 = vmatprep.subr.bf16.mxu1 %v7205_v2  ;;  %v7217_v62 = vpack.c.bf16 %v1492_v31, %v1488_v23  ;;  %8702 = vst [vmem:[#allocation38_spill] sm:$0xff] %v7219_v48  ;;  %v7222_v2 = vpack.c.bf16 %v1491_v5, %v1487_v29  ;;  %v1496_v1 = vld [vmem:[#allocation8 + $0x218] sm:$0xff]  ;;  %v1493_v31 = vld [vmem:[#allocation8 + $0x200] sm:$0xff]  ;;  %v1495_v29 = vld [vmem:[#allocation8 + $0x210] sm:$0xff] }
 0x2b4   :  { %8700 = vst [vmem:[#allocation36_spill] sm:$0xff] %v7214_v26  ;;  %v1497_v23 = vld [vmem:[#allocation8 + $0x220] sm:$0xff]  ;;  %v1499_v5 = vld [vmem:[#allocation8 + $0x230] sm:$0xff] }
 0x2b5   :  { %8701 = vst [vmem:[#allocation37_spill] sm:$0xff] %v7217_v62  ;;  %8703 = vst [vmem:[#allocation39_spill] sm:$0xff] %v7222_v2  ;;  %v7231_v61 = vpack.c.bf16 %v1497_v23, %v1493_v31 }
 0x2b6   :  { %5122 = vmatpush1.bf16.msra.mxu0 %v7207_v6  ;;  %5186 = vmatpush1.bf16.msra.mxu1 %v7210_v36  ;;  %v1494_v6 = vld [vmem:[#allocation8 + $0x208] sm:$0xff]  ;;  %v1500_v36 = vld [vmem:[#allocation8 + $0x238] sm:$0xff] }
 0x2b7   :  { %5124 = vmatprep.subr.bf16.mxu0 %v7214_v26  ;;  %5188 = vmatprep.subr.bf16.mxu1 %v7217_v62  ;;  %v7226_v27 = vpack.c.bf16 %v1498_v0, %v1494_v6  ;;  %v7229_v13 = vpack.c.bf16 %v1500_v36, %v1496_v1  ;;  %8706 = vst [vmem:[#allocation42_spill] sm:$0xff] %v7231_v61  ;;  %v1506_v6 = vld [vmem:[#allocation8 + $0x268] sm:$0xff]  ;;  %v1504_v0 = vld [vmem:[#allocation8 + $0x258] sm:$0xff]  ;;  %v1501_v36 = vld [vmem:[#allocation8 + $0x240] sm:$0xff] }
 0x2b8   :  { %v7234_v62 = vpack.c.bf16 %v1499_v5, %v1495_v29  ;;  %v1505_v1 = vld [vmem:[#allocation8 + $0x260] sm:$0xff]  ;;  %v1503_v29 = vld [vmem:[#allocation8 + $0x250] sm:$0xff] }
 0x2b9   :  { %8704 = vst [vmem:[#allocation40_spill] sm:$0xff] %v7226_v27  ;;  %8705 = vst [vmem:[#allocation41_spill] sm:$0xff] %v7229_v13  ;;  %v7243_v23 = vpack.c.bf16 %v1505_v1, %v1501_v36  ;;  %v1507_v5 = vld [vmem:[#allocation8 + $0x270] sm:$0xff] }
 0x2ba   :  { %5126 = vmatpush1.bf16.msra.mxu0 %v7219_v48  ;;  %5190 = vmatpush1.bf16.msra.mxu1 %v7222_v2  ;;  %8707 = vst [vmem:[#allocation43_spill] sm:$0xff] %v7234_v62  ;;  %v1502_v48 = vld [vmem:[#allocation8 + $0x248] sm:$0xff]  ;;  %v1508_v2 = vld [vmem:[#allocation8 + $0x278] sm:$0xff] }
 0x2bb   :  { %5128 = vmatprep.subr.bf16.mxu0 %v7226_v27  ;;  %5192 = vmatprep.subr.bf16.mxu1 %v7229_v13  ;;  %v7238_v26 = vpack.c.bf16 %v1506_v6, %v1502_v48  ;;  %v7241_v31 = vpack.c.bf16 %v1508_v2, %v1504_v0  ;;  %8710 = vst [vmem:[#allocation46_spill] sm:$0xff] %v7243_v23  ;;  %v1514_v48 = vld [vmem:[#allocation8 + $0x2a8] sm:$0xff]  ;;  %v1512_v6 = vld [vmem:[#allocation8 + $0x298] sm:$0xff]  ;;  %v1509_v2 = vld [vmem:[#allocation8 + $0x280] sm:$0xff] }
 0x2bc   :  { %v7246_v13 = vpack.c.bf16 %v1507_v5, %v1503_v29  ;;  %v1513_v0 = vld [vmem:[#allocation8 + $0x2a0] sm:$0xff]  ;;  %v1511_v29 = vld [vmem:[#allocation8 + $0x290] sm:$0xff] }
 0x2bd   :  { %8708 = vst [vmem:[#allocation44_spill] sm:$0xff] %v7238_v26  ;;  %8709 = vst [vmem:[#allocation45_spill] sm:$0xff] %v7241_v31  ;;  %v7255_v1 = vpack.c.bf16 %v1513_v0, %v1509_v2  ;;  %v1515_v5 = vld [vmem:[#allocation8 + $0x2b0] sm:$0xff] }
 0x2be   :  { %5130 = vmatpush1.bf16.msra.mxu0 %v7231_v61  ;;  %5194 = vmatpush1.bf16.msra.mxu1 %v7234_v62  ;;  %8711 = vst [vmem:[#allocation47_spill] sm:$0xff] %v7246_v13  ;;  %v1510_v61 = vld [vmem:[#allocation8 + $0x288] sm:$0xff]  ;;  %v1516_v62 = vld [vmem:[#allocation8 + $0x2b8] sm:$0xff] }
 0x2bf   :  { %5132 = vmatprep.subr.bf16.mxu0 %v7238_v26  ;;  %5196 = vmatprep.subr.bf16.mxu1 %v7241_v31  ;;  %v7250_v27 = vpack.c.bf16 %v1514_v48, %v1510_v61  ;;  %v7253_v36 = vpack.c.bf16 %v1516_v62, %v1512_v6  ;;  %8714 = vst [vmem:[#allocation50_spill] sm:$0xff] %v7255_v1  ;;  %v1522_v61 = vld [vmem:[#allocation8 + $0x2e8] sm:$0xff]  ;;  %v1520_v48 = vld [vmem:[#allocation8 + $0x2d8] sm:$0xff]  ;;  %v1517_v62 = vld [vmem:[#allocation8 + $0x2c0] sm:$0xff] }
 0x2c0   :  { %v7258_v31 = vpack.c.bf16 %v1515_v5, %v1511_v29  ;;  %v1521_v6 = vld [vmem:[#allocation8 + $0x2e0] sm:$0xff]  ;;  %v1519_v29 = vld [vmem:[#allocation8 + $0x2d0] sm:$0xff] }
 0x2c1   :  { %8712 = vst [vmem:[#allocation48_spill] sm:$0xff] %v7250_v27  ;;  %8713 = vst [vmem:[#allocation49_spill] sm:$0xff] %v7253_v36  ;;  %v7267_v0 = vpack.c.bf16 %v1521_v6, %v1517_v62  ;;  %v1523_v5 = vld [vmem:[#allocation8 + $0x2f0] sm:$0xff] }
 0x2c2   :  { %5134 = vmatpush1.bf16.msra.mxu0 %v7243_v23  ;;  %5198 = vmatpush1.bf16.msra.mxu1 %v7246_v13  ;;  %8715 = vst [vmem:[#allocation51_spill] sm:$0xff] %v7258_v31  ;;  %v1518_v23 = vld [vmem:[#allocation8 + $0x2c8] sm:$0xff]  ;;  %v1524_v13 = vld [vmem:[#allocation8 + $0x2f8] sm:$0xff] }
 0x2c3   :  { %5136 = vmatprep.subr.bf16.mxu0 %v7250_v27  ;;  %5200 = vmatprep.subr.bf16.mxu1 %v7253_v36  ;;  %v7262_v26 = vpack.c.bf16 %v1522_v61, %v1518_v23  ;;  %v7265_v2 = vpack.c.bf16 %v1524_v13, %v1520_v48  ;;  %8718 = vst [vmem:[#allocation54_spill] sm:$0xff] %v7267_v0  ;;  %v1530_v23 = vld [vmem:[#allocation8 + $0x328] sm:$0xff]  ;;  %v1528_v61 = vld [vmem:[#allocation8 + $0x318] sm:$0xff]  ;;  %v1525_v13 = vld [vmem:[#allocation8 + $0x300] sm:$0xff] }
 0x2c4   :  { %v7270_v36 = vpack.c.bf16 %v1523_v5, %v1519_v29  ;;  %v1529_v48 = vld [vmem:[#allocation8 + $0x320] sm:$0xff]  ;;  %v1527_v29 = vld [vmem:[#allocation8 + $0x310] sm:$0xff] }
 0x2c5   :  { %8716 = vst [vmem:[#allocation52_spill] sm:$0xff] %v7262_v26  ;;  %8717 = vst [vmem:[#allocation53_spill] sm:$0xff] %v7265_v2  ;;  %v7279_v6 = vpack.c.bf16 %v1529_v48, %v1525_v13  ;;  %v1531_v5 = vld [vmem:[#allocation8 + $0x330] sm:$0xff] }
 0x2c6   :  { %5138 = vmatpush1.bf16.msra.mxu0 %v7255_v1  ;;  %5202 = vmatpush1.bf16.msra.mxu1 %v7258_v31  ;;  %8719 = vst [vmem:[#allocation55_spill] sm:$0xff] %v7270_v36  ;;  %v1526_v1 = vld [vmem:[#allocation8 + $0x308] sm:$0xff]  ;;  %v1532_v31 = vld [vmem:[#allocation8 + $0x338] sm:$0xff] }
 0x2c7   :  { %5140 = vmatprep.subr.bf16.mxu0 %v7262_v26  ;;  %5204 = vmatprep.subr.bf16.mxu1 %v7265_v2  ;;  %v7274_v27 = vpack.c.bf16 %v1530_v23, %v1526_v1  ;;  %v7277_v62 = vpack.c.bf16 %v1532_v31, %v1528_v61  ;;  %8722 = vst [vmem:[#allocation58_spill] sm:$0xff] %v7279_v6  ;;  %v1538_v1 = vld [vmem:[#allocation8 + $0x368] sm:$0xff]  ;;  %v1536_v23 = vld [vmem:[#allocation8 + $0x358] sm:$0xff]  ;;  %v1533_v31 = vld [vmem:[#allocation8 + $0x340] sm:$0xff] }
 0x2c8   :  { %v7282_v2 = vpack.c.bf16 %v1531_v5, %v1527_v29  ;;  %v1537_v61 = vld [vmem:[#allocation8 + $0x360] sm:$0xff]  ;;  %v1535_v29 = vld [vmem:[#allocation8 + $0x350] sm:$0xff] }
 0x2c9   :  { %8720 = vst [vmem:[#allocation56_spill] sm:$0xff] %v7274_v27  ;;  %8721 = vst [vmem:[#allocation57_spill] sm:$0xff] %v7277_v62  ;;  %v7291_v48 = vpack.c.bf16 %v1537_v61, %v1533_v31  ;;  %v1539_v5 = vld [vmem:[#allocation8 + $0x370] sm:$0xff] }
 0x2ca   :  { %5142 = vmatpush1.bf16.msra.mxu0 %v7267_v0  ;;  %5206 = vmatpush1.bf16.msra.mxu1 %v7270_v36  ;;  %8723 = vst [vmem:[#allocation59_spill] sm:$0xff] %v7282_v2  ;;  %v1534_v0 = vld [vmem:[#allocation8 + $0x348] sm:$0xff]  ;;  %v1540_v36 = vld [vmem:[#allocation8 + $0x378] sm:$0xff]  ;;  %v1543_v31 = vld [vmem:[#allocation8 + $0x390] sm:$0xff] }
 0x2cb   :  { %5144 = vmatprep.subr.bf16.mxu0 %v7274_v27  ;;  %5208 = vmatprep.subr.bf16.mxu1 %v7277_v62  ;;  %v7286_v26 = vpack.c.bf16 %v1538_v1, %v1534_v0  ;;  %v7289_v13 = vpack.c.bf16 %v1540_v36, %v1536_v23  ;;  %8726 = vst [vmem:[#allocation62_spill] sm:$0xff] %v7291_v48  ;;  %v1542_v27 = vld [vmem:[#allocation8 + $0x388] sm:$0xff]  ;;  %v1548_v0 = vld [vmem:[#allocation8 + $0x3b8] sm:$0xff]  ;;  %v1541_v36 = vld [vmem:[#allocation8 + $0x380] sm:$0xff] }
 0x2cc   :  { %v7294_v62 = vpack.c.bf16 %v1539_v5, %v1535_v29  ;;  %v7297_v1 = vpack.c.bf16 %v1546_v25, %v1542_v27  ;;  %v1545_v23 = vld [vmem:[#allocation8 + $0x3a0] sm:$0xff]  ;;  %v1554_v29 = vld [vmem:[#allocation8 + $0x3e8] sm:$0xff]  ;;  %v1552_v27 = vld [vmem:[#allocation8 + $0x3d8] sm:$0xff] }
 0x2cd   :  { %8724 = vst [vmem:[#allocation60_spill] sm:$0xff] %v7286_v26  ;;  %8725 = vst [vmem:[#allocation61_spill] sm:$0xff] %v7289_v13  ;;  %v7302_v61 = vpack.c.bf16 %v1545_v23, %v1541_v36  ;;  %v1553_v36 = vld [vmem:[#allocation8 + $0x3e0] sm:$0xff]  ;;  %v1551_v23 = vld [vmem:[#allocation8 + $0x3d0] sm:$0xff] }
 0x2ce   :  { %5146 = vmatpush1.bf16.msra.mxu0 %v7279_v6  ;;  %5210 = vmatpush1.bf16.msra.mxu1 %v7282_v2  ;;  %v1544_v6 = vld [vmem:[#allocation8 + $0x398] sm:$0xff]  ;;  %v1547_v2 = vld [vmem:[#allocation8 + $0x3b0] sm:$0xff] }
 0x2cf   :  { %5148 = vmatprep.subr.bf16.mxu0 %v7286_v26  ;;  %5212 = vmatprep.subr.bf16.mxu1 %v7289_v13  ;;  %v7299_v40 = vpack.c.bf16 %v1548_v0, %v1544_v6  ;;  %8727 = vst [vmem:[#allocation63_spill] sm:$0xff] %v7302_v61  ;;  %v1550_v26 = vld [vmem:[#allocation8 + $0x3c8] sm:$0xff]  ;;  %v7306_v5 = vpack.c.bf16 %v1547_v2, %v1543_v31  ;;  %v1556_v6 = vld [vmem:[#allocation8 + $0x3f8] sm:$0xff]  ;;  %v1549_v0 = vld [vmem:[#allocation8 + $0x3c0] sm:$0xff] }
 0x2d0   :  { %v7308_v25 = vpack.c.bf16 %v1554_v29, %v1550_v26  ;;  %v7311_v13 = vpack.c.bf16 %v1556_v6, %v1552_v27  ;;  %v7314_v3 = vpack.c.bf16 %v1553_v36, %v1549_v0  ;;  %v994_v2 = vld [vmem:[#allocation10] sm:$0xf] }
 0x2d1   :  { %8728 = vst [vmem:[#allocation64_spill] sm:$0xff] %v7306_v5  ;;  %v999_v31 = vrot.slane %v994_v2, %v7002_v53  ;;  %v1003_v29 = vrot.slane %v994_v2, %v7004_v4 }
 0x2d2   :  { %5150 = vmatpush1.bf16.msra.mxu0 %v7291_v48  ;;  %5214 = vmatpush1.bf16.msra.mxu1 %v7294_v62  ;;  %8729 = vst [vmem:[#allocation65_spill] sm:$0xff] %v7308_v25  ;;  %8730 = vst [vmem:[#allocation66_spill] sm:$0xff] %v7311_v13  ;;  %v1555_v48 = vld [vmem:[#allocation8 + $0x3f0] sm:$0xff] }
 0x2d3   :  { %5152 = vmatprep.subr.bf16.mxu0 %v7297_v1  ;;  %5216 = vmatprep.subr.bf16.mxu1 %v7299_v40  ;;  %8731 = vst [vmem:[#allocation67_spill] sm:$0xff] %v7314_v3  ;;  %v7318_v26 = vpack.c.bf16 %v1555_v48, %v1551_v23 }
 0x2d5   :  { %8732 = vst [vmem:[#allocation68_spill] sm:$0xff] %v7318_v26 }
 0x2d6   :  { %5154 = vmatpush1.bf16.msra.mxu0 %v7302_v61  ;;  %5218 = vmatpush1.bf16.msra.mxu1 %v7306_v5 }
 0x2d7   :  { %5156 = vmatprep.subr.bf16.mxu0 %v7308_v25  ;;  %5220 = vmatprep.subr.bf16.mxu1 %v7311_v13 }
 0x2da   :  { %5158 = vmatpush1.bf16.msra.mxu0 %v7314_v3  ;;  %5222 = vmatpush1.bf16.msra.mxu1 %v7318_v26  ;;  %v1011_v3 = vrot.slane %v994_v2, %v7008_v8 }
 0x2db   :  { %5224 = vmatprep.subr.bf16.mxu0 %v6996_v63  ;;  %5256 = vmatprep.subr.bf16.mxu1 %v6998_v19  ;;  %v1007_v19 = vrot.slane %v994_v2, %v7011_v37 }
 0x350   :  { %v1082_v27 = vpop.f32.mrb[6].mxu0  ;;  %v1153_v6 = vpop.f32.mrb[6].mxu1 }
 0x351   :  { %v1083_v0 = vadd.f32 %v1082_v27, %v999_v31  ;;  %v1084_v48 = vpop.f32.mrb[7].mxu0  ;;  %v1155_v36 = vpop.f32.mrb[7].mxu1  ;;  %v1154_v5 = vadd.f32 %v1153_v6, %v1007_v19  ;;  %v4590_v19 = vld [vmem:[%s8358_s0 + $0x58] sm:$0xff] }
 0x352   :  { %v1085_v23 = vadd.f32 %v1084_v48, %v1003_v29  ;;  %v1156_v63 = vadd.f32 %v1155_v36, %v1011_v3 }
 0x353   :  { %v4584_v13 = vmul.f32 -1.442695, %v1083_v0 }
 0x354   :  { %v4585_v25 = vmul.f32 -1.442695, %v1085_v23  ;;  %v4586_v26 = vmul.f32 -1.442695, %v1156_v63 }
 0x355   :  { %6237 = vpow2.f32 %v4584_v13 }
 0x356   :  { %6239 = vpow2.f32 %v4585_v25  ;;  %v4587_v25 = vld [vmem:[%s8358_s0 + $0x40] sm:$0xff] }
 0x357   :  { %6241 = vpow2.f32 %v4586_v26 }
 0x358   :  { %6243 = vtanh.f32 %v1154_v5 }
 0x35f   :  { %v6238_v53 = vpop.eup %6237 }
 0x360   :  { %v6240_v61 = vpop.eup %6239  ;;  %v1164_v4 = vadd.f32 1.0, %v6238_v53  ;;  %v4588_v53 = vld [vmem:[%s8358_s0 + $0x48] sm:$0xff] }
 0x361   :  { %v1165_v31 = vadd.f32 1.0, %v6240_v61  ;;  %v6242_v29 = vpop.eup %6241 }
 0x362   :  { %6245 = vrcp.f32 %v1164_v4  ;;  %v6244_v27 = vpop.eup %6243  ;;  %v1174_v13 = vadd.f32 1.0, %v6242_v29  ;;  %v4589_v29 = vld [vmem:[%s8358_s0 + $0x50] sm:$0xff] }
 0x363   :  { %6247 = vrcp.f32 %v1165_v31 }
 0x364   :  { %6249 = vrcp.f32 %v1174_v13 }
 0x36c   :  { %v6246_v0 = vpop.eup %6245 }
 0x36d   :  { %v6248_v48 = vpop.eup %6247  ;;  %v1179_v23 = vmul.f32 %v6246_v0, %v6244_v27 }
 0x36e   :  { %v1178_v3 = vmul.f32 %v6248_v48, %v7020_v41  ;;  %v6250_v27 = vpop.eup %6249 }
 0x370   :  { %v1321_v5 = vpop.f32.mrb[8].mxu0  ;;  %v1392_v61 = vpop.f32.mrb[8].mxu1  ;;  %v7336_v4 = vadd.f32 %v1179_v23, %v1178_v3 }
 0x371   :  { %v1397_v26 = vadd.f32 %v4587_v25, %v1321_v5  ;;  %v1323_v2 = vpop.f32.mrb[9].mxu0  ;;  %v1394_v6 = vpop.f32.mrb[9].mxu1  ;;  %v1399_v23 = vadd.f32 %v4589_v29, %v1392_v61 }
 0x372   :  { %v1398_v36 = vadd.f32 %v4588_v53, %v1323_v2  ;;  %6251 = vtanh.f32 %v7336_v4  ;;  %v1400_v31 = vadd.f32 %v4590_v19, %v1394_v6 }
 0x373   :  { %v4591_v41 = vmul.f32 -1.442695, %v1397_v26 }
 0x374   :  { %v4592_v63 = vmul.f32 -1.442695, %v1398_v36  ;;  %v4593_v48 = vmul.f32 -1.442695, %v1400_v31 }
 0x375   :  { %6253 = vpow2.f32 %v4591_v41 }
 0x376   :  { %6255 = vpow2.f32 %v4592_v63 }
 0x377   :  { %6257 = vpow2.f32 %v4593_v48  ;;  %v8772_v48 = vld [vmem:[#allocation54_spill] sm:$0xff] }
 0x378   :  { %6259 = vtanh.f32 %v1399_v23  ;;  %v8773_v23 = vld [vmem:[#allocation55_spill] sm:$0xff] }
 0x37c   :  { %v6252_v0 = vpop.eup %6251 }
 0x37d   :  { %v1182_v13 = vmul.f32 %v6252_v0, %v6250_v27  ;;  %v8771_v0 = vld [vmem:[#allocation53_spill] sm:$0xff] }
 0x37f   :  { %v6254_v3 = vpop.eup %6253  ;;  %1643 = vmatprep.mubr.f32.mxu0 %v1182_v13  ;;  %1714 = vmatprep.mubr.f32.mxu1 %v1182_v13  ;;  %v8774_v13 = vld [vmem:[#allocation56_spill] sm:$0xff] }
 0x380   :  { %v6256_v25 = vpop.eup %6255  ;;  %v1407_v53 = vadd.f32 1.0, %v6254_v3  ;;  %v8775_v3 = vld [vmem:[#allocation57_spill] sm:$0xff] }
 0x381   :  { %v1408_v5 = vadd.f32 1.0, %v6256_v25  ;;  %v6258_v26 = vpop.eup %6257  ;;  %v8776_v25 = vld [vmem:[#allocation58_spill] sm:$0xff] }
 0x382   :  { %6261 = vrcp.f32 %v1407_v53  ;;  %v6260_v2 = vpop.eup %6259  ;;  %v1417_v63 = vadd.f32 1.0, %v6258_v26  ;;  %v8777_v53 = vld [vmem:[#allocation59_spill] sm:$0xff]  ;;  %v8779_v26 = vld [vmem:[#allocation61_spill] sm:$0xff] }
 0x383   :  { %6263 = vrcp.f32 %v1408_v5  ;;  %v8778_v5 = vld [vmem:[#allocation60_spill] sm:$0xff] }
 0x384   :  { %6265 = vrcp.f32 %v1417_v63  ;;  %v8784_v63 = vld [vmem:[#allocation66_spill] sm:$0xff] }
 0x38c   :  { %v6262_v6 = vpop.eup %6261 }
 0x38d   :  { %v6264_v36 = vpop.eup %6263  ;;  %v1422_v41 = vmul.f32 %v6262_v6, %v6260_v2  ;;  %v8780_v2 = vld [vmem:[#allocation62_spill] sm:$0xff]  ;;  %v8781_v6 = vld [vmem:[#allocation63_spill] sm:$0xff] }
 0x38e   :  { %v1421_v19 = vmul.f32 %v6264_v36, %v7030_v12  ;;  %v6266_v31 = vpop.eup %6265  ;;  %v8733_v12 = vld [vmem:[#allocation16_spill] sm:$0xff] }
 0x38f   :  { %v8782_v36 = vld [vmem:[#allocation64_spill] sm:$0xff] }
 0x390   :  { %v7346_v61 = vadd.f32 %v1422_v41, %v1421_v19  ;;  %v8783_v41 = vld [vmem:[#allocation65_spill] sm:$0xff]  ;;  %v8785_v19 = vld [vmem:[#allocation67_spill] sm:$0xff] }
 0x392   :  { %6267 = vtanh.f32 %v7346_v61 }
 0x39c   :  { %v6268_v29 = vpop.eup %6267 }
 0x39d   :  { %v1425_v27 = vmul.f32 %v6268_v29, %v6266_v31  ;;  %v8786_v31 = vld [vmem:[#allocation68_spill] sm:$0xff]  ;;  %v2318_v29 = vld [vmem:[#allocation6 + $0x8] sm:$0xff] }
 0x39f   :  { %1644 = vmatmul.mubr.f32.vlgmr.msra.gmra.mrb[10].mxu0 %v1425_v27  ;;  %1715 = vmatmul.mubr.f32.vlgmr.msra.gmra.mrb[10].mxu1 %v1425_v27 }
 0x3a0   :  { %5226 = vmatpush1.bf16.msra.mxu0 %v7033_v42  ;;  %5258 = vmatpush1.bf16.msra.mxu1 %v7035_v45  ;;  %v8734_v42 = vld [vmem:[#allocation14_spill] sm:$0xff]  ;;  %v8735_v45 = vld [vmem:[#allocation17_spill] sm:$0xff] }
 0x3a1   :  { %5228 = vmatprep.subr.bf16.mxu0 %v7039_v52  ;;  %5260 = vmatprep.subr.bf16.mxu1 %v7041_v55  ;;  %v8736_v52 = vld [vmem:[#allocation18_spill] sm:$0xff]  ;;  %v8737_v55 = vld [vmem:[#allocation19_spill] sm:$0xff] }
 0x3a2   :  { %1882 = vmatprep.mubr.f32.mxu0 %v8629_v56  ;;  %1953 = vmatprep.mubr.f32.mxu1 %v8629_v56 }
 0x3a4   :  { %5230 = vmatpush1.bf16.msra.mxu0 %v7047_v18  ;;  %5262 = vmatpush1.bf16.msra.mxu1 %v7049_v24  ;;  %v8738_v18 = vld [vmem:[#allocation20_spill] sm:$0xff]  ;;  %v8739_v24 = vld [vmem:[#allocation21_spill] sm:$0xff] }
 0x3a5   :  { %5232 = vmatprep.subr.bf16.mxu0 %v7053_v34  ;;  %5264 = vmatprep.subr.bf16.mxu1 %v7055_v43  ;;  %v8740_v34 = vld [vmem:[#allocation22_spill] sm:$0xff]  ;;  %v8741_v43 = vld [vmem:[#allocation23_spill] sm:$0xff] }
 0x3a8   :  { %5234 = vmatpush1.bf16.msra.mxu0 %v7061_v20  ;;  %5266 = vmatpush1.bf16.msra.mxu1 %v7063_v21  ;;  %v8742_v20 = vld [vmem:[#allocation24_spill] sm:$0xff]  ;;  %v8743_v21 = vld [vmem:[#allocation25_spill] sm:$0xff] }
 0x3a9   :  { %5236 = vmatprep.subr.bf16.mxu0 %v7067_v49  ;;  %5268 = vmatprep.subr.bf16.mxu1 %v7069_v50  ;;  %v8744_v49 = vld [vmem:[#allocation26_spill] sm:$0xff]  ;;  %v8745_v50 = vld [vmem:[#allocation27_spill] sm:$0xff] }
 0x3ac   :  { %5238 = vmatpush1.bf16.msra.mxu0 %v7073_v22  ;;  %5270 = vmatpush1.bf16.msra.mxu1 %v7075_v44  ;;  %v8746_v22 = vld [vmem:[#allocation28_spill] sm:$0xff]  ;;  %v8747_v44 = vld [vmem:[#allocation29_spill] sm:$0xff] }
 0x3ad   :  { %5240 = vmatprep.subr.bf16.mxu0 %v7079_v57  ;;  %5272 = vmatprep.subr.bf16.mxu1 %v7081_v11  ;;  %v8748_v57 = vld [vmem:[#allocation30_spill] sm:$0xff]  ;;  %v8749_v11 = vld [vmem:[#allocation31_spill] sm:$0xff] }
 0x3b0   :  { %5242 = vmatpush1.bf16.msra.mxu0 %v7085_v14  ;;  %5274 = vmatpush1.bf16.msra.mxu1 %v7087_v17  ;;  %v8750_v14 = vld [vmem:[#allocation32_spill] sm:$0xff]  ;;  %v8751_v17 = vld [vmem:[#allocation33_spill] sm:$0xff] }
 0x3b1   :  { %5244 = vmatprep.subr.bf16.mxu0 %v7091_v30  ;;  %5276 = vmatprep.subr.bf16.mxu1 %v7093_v33  ;;  %v8752_v30 = vld [vmem:[#allocation34_spill] sm:$0xff]  ;;  %v8753_v33 = vld [vmem:[#allocation35_spill] sm:$0xff] }
 0x3b4   :  { %5246 = vmatpush1.bf16.msra.mxu0 %v7097_v10  ;;  %5278 = vmatpush1.bf16.msra.mxu1 %v7099_v15  ;;  %v8754_v10 = vld [vmem:[#allocation36_spill] sm:$0xff]  ;;  %v8755_v15 = vld [vmem:[#allocation37_spill] sm:$0xff] }
 0x3b5   :  { %5248 = vmatprep.subr.bf16.mxu0 %v7103_v47  ;;  %5280 = vmatprep.subr.bf16.mxu1 %v7105_v51  ;;  %v8756_v47 = vld [vmem:[#allocation38_spill] sm:$0xff]  ;;  %v8757_v51 = vld [vmem:[#allocation39_spill] sm:$0xff] }
 0x3b8   :  { %5250 = vmatpush1.bf16.msra.mxu0 %v7109_v54  ;;  %5282 = vmatpush1.bf16.msra.mxu1 %v7111_v59  ;;  %v8758_v54 = vld [vmem:[#allocation40_spill] sm:$0xff]  ;;  %v8759_v59 = vld [vmem:[#allocation41_spill] sm:$0xff] }
 0x3b9   :  { %5252 = vmatprep.subr.bf16.mxu0 %v7115_v16  ;;  %5284 = vmatprep.subr.bf16.mxu1 %v7117_v32  ;;  %v8760_v16 = vld [vmem:[#allocation42_spill] sm:$0xff]  ;;  %v8761_v32 = vld [vmem:[#allocation43_spill] sm:$0xff] }
 0x3bc   :  { %5254 = vmatpush1.bf16.msra.mxu0 %v7121_v38  ;;  %5286 = vmatpush1.bf16.msra.mxu1 %v7123_v39  ;;  %v8762_v38 = vld [vmem:[#allocation44_spill] sm:$0xff]  ;;  %v8763_v39 = vld [vmem:[#allocation45_spill] sm:$0xff] }
 0x3bd   :  { %5288 = vmatprep.subr.bf16.mxu0 %v7131_v9  ;;  %5352 = vmatprep.subr.bf16.mxu1 %v7133_v46  ;;  %v8764_v9 = vld [vmem:[#allocation46_spill] sm:$0xff]  ;;  %v8765_v46 = vld [vmem:[#allocation47_spill] sm:$0xff] }
 0x3bf   :  { %1883 = vmatmul.mubr.f32.vlgmr.msra.gmra.mrb[12].mxu0 %v1425_v27  ;;  %1954 = vmatmul.mubr.f32.vlgmr.msra.gmra.mrb[12].mxu1 %v1425_v27  ;;  %v2322_v27 = vld [vmem:[#allocation6 + $0x28] sm:$0xff] }
 0x3c0   :  { %5290 = vmatpush1.bf16.msra.mxu0 %v7135_v58  ;;  %5354 = vmatpush1.bf16.msra.mxu1 %v7138_v7  ;;  %v8766_v58 = vld [vmem:[#allocation48_spill] sm:$0xff]  ;;  %v8767_v7 = vld [vmem:[#allocation49_spill] sm:$0xff] }
 0x3c1   :  { %5292 = vmatprep.subr.bf16.mxu0 %v7143_v60  ;;  %5356 = vmatprep.subr.bf16.mxu1 %v7145_v28  ;;  %v8768_v60 = vld [vmem:[#allocation50_spill] sm:$0xff]  ;;  %v8769_v28 = vld [vmem:[#allocation51_spill] sm:$0xff] }
 0x3c4   :  { %5294 = vmatpush1.bf16.msra.mxu0 %v7147_v35  ;;  %5358 = vmatpush1.bf16.msra.mxu1 %v8733_v12  ;;  %v8770_v35 = vld [vmem:[#allocation52_spill] sm:$0xff] }
 0x3c5   :  { %5296 = vmatprep.subr.bf16.mxu0 %v8734_v42  ;;  %5360 = vmatprep.subr.bf16.mxu1 %v8735_v45  ;;  %v2320_v12 = vld [vmem:[#allocation6 + $0x18] sm:$0xff] }
 0x3c6   :  { %v8787_v45 = vld [vmem:[#allocation15_spill] sm:$0xff] }
 0x3c8   :  { %5298 = vmatpush1.bf16.msra.mxu0 %v8736_v52  ;;  %5362 = vmatpush1.bf16.msra.mxu1 %v8737_v55  ;;  %v8788_v55 = vld [vmem:[#allocation13_spill] sm:$0xff] }
 0x3c9   :  { %5300 = vmatprep.subr.bf16.mxu0 %v8738_v18  ;;  %5364 = vmatprep.subr.bf16.mxu1 %v8739_v24 }
 0x3cc   :  { %5302 = vmatpush1.bf16.msra.mxu0 %v8740_v34  ;;  %5366 = vmatpush1.bf16.msra.mxu1 %v8741_v43 }
 0x3cd   :  { %5304 = vmatprep.subr.bf16.mxu0 %v8742_v20  ;;  %5368 = vmatprep.subr.bf16.mxu1 %v8743_v21 }
 0x3d0   :  { %5306 = vmatpush1.bf16.msra.mxu0 %v8744_v49  ;;  %5370 = vmatpush1.bf16.msra.mxu1 %v8745_v50 }
 0x3d1   :  { %5308 = vmatprep.subr.bf16.mxu0 %v8746_v22  ;;  %5372 = vmatprep.subr.bf16.mxu1 %v8747_v44 }
 0x3d4   :  { %5310 = vmatpush1.bf16.msra.mxu0 %v8748_v57  ;;  %5374 = vmatpush1.bf16.msra.mxu1 %v8749_v11 }
 0x3d5   :  { %5312 = vmatprep.subr.bf16.mxu0 %v8750_v14  ;;  %5376 = vmatprep.subr.bf16.mxu1 %v8751_v17 }
 0x3d8   :  { %5314 = vmatpush1.bf16.msra.mxu0 %v8752_v30  ;;  %5378 = vmatpush1.bf16.msra.mxu1 %v8753_v33 }
 0x3d9   :  { %5316 = vmatprep.subr.bf16.mxu0 %v8754_v10  ;;  %5380 = vmatprep.subr.bf16.mxu1 %v8755_v15 }
 0x3dc   :  { %5318 = vmatpush1.bf16.msra.mxu0 %v8756_v47  ;;  %5382 = vmatpush1.bf16.msra.mxu1 %v8757_v51 }
 0x3dd   :  { %5320 = vmatprep.subr.bf16.mxu0 %v8758_v54  ;;  %5384 = vmatprep.subr.bf16.mxu1 %v8759_v59 }
 0x3e0   :  { %5322 = vmatpush1.bf16.msra.mxu0 %v8760_v16  ;;  %5386 = vmatpush1.bf16.msra.mxu1 %v8761_v32 }
 0x3e1   :  { %5324 = vmatprep.subr.bf16.mxu0 %v8762_v38  ;;  %5388 = vmatprep.subr.bf16.mxu1 %v8763_v39  ;;  %v4597_v39 = vld [vmem:[%s8358_s0 + $0x60] sm:$0xff] }
 0x3e4   :  { %5326 = vmatpush1.bf16.msra.mxu0 %v8764_v9  ;;  %5390 = vmatpush1.bf16.msra.mxu1 %v8765_v46  ;;  %v4598_v9 = vld [vmem:[%s8358_s0 + $0x68] sm:$0xff] }
 0x3e5   :  { %5328 = vmatprep.subr.bf16.mxu0 %v8766_v58  ;;  %5392 = vmatprep.subr.bf16.mxu1 %v8767_v7 }
 0x3e8   :  { %5330 = vmatpush1.bf16.msra.mxu0 %v8768_v60  ;;  %5394 = vmatpush1.bf16.msra.mxu1 %v8769_v28 }
 0x3e9   :  { %5332 = vmatprep.subr.bf16.mxu0 %v8770_v35  ;;  %5396 = vmatprep.subr.bf16.mxu1 %v8771_v0 }
 0x3ec   :  { %5334 = vmatpush1.bf16.msra.mxu0 %v8772_v48  ;;  %5398 = vmatpush1.bf16.msra.mxu1 %v8773_v23  ;;  %v4600_v23 = vld [vmem:[%s8358_s0 + $0x78] sm:$0xff] }
 0x3ed   :  { %5336 = vmatprep.subr.bf16.mxu0 %v8774_v13  ;;  %5400 = vmatprep.subr.bf16.mxu1 %v8775_v3  ;;  %v4599_v3 = vld [vmem:[%s8358_s0 + $0x70] sm:$0xff] }
 0x3f0   :  { %5338 = vmatpush1.bf16.msra.mxu0 %v8776_v25  ;;  %5402 = vmatpush1.bf16.msra.mxu1 %v8777_v53 }
 0x3f1   :  { %5340 = vmatprep.subr.bf16.mxu0 %v8778_v5  ;;  %5404 = vmatprep.subr.bf16.mxu1 %v8779_v26 }
 0x3f4   :  { %5342 = vmatpush1.bf16.msra.mxu0 %v8780_v2  ;;  %5406 = vmatpush1.bf16.msra.mxu1 %v7294_v62  ;;  %v7445_v62 = vpack.c.bf16 %v2322_v27, %v2318_v29 }
 0x3f5   :  { %5344 = vmatprep.subr.bf16.mxu0 %v7297_v1  ;;  %5408 = vmatprep.subr.bf16.mxu1 %v7299_v40  ;;  %v2324_v1 = vld [vmem:[#allocation6 + $0x38] sm:$0xff]  ;;  %v1557_v40 = vld [vmem:[#allocation10] sm:$0xf] }
 0x3f6   :  { %v7447_v42 = vpack.c.bf16 %v2324_v1, %v2320_v12  ;;  %v1562_v52 = vrot.slane %v1557_v40, %v8787_v45  ;;  %v1566_v18 = vrot.slane %v1557_v40, %v8788_v55  ;;  %v1574_v44 = vrot.slane %v1557_v40, %v7008_v8 }
 0x3f7   :  { %v1570_v11 = vrot.slane %v1557_v40, %v7011_v37 }
 0x3f8   :  { %5346 = vmatpush1.bf16.msra.mxu0 %v8781_v6  ;;  %5410 = vmatpush1.bf16.msra.mxu1 %v8782_v36 }
 0x3f9   :  { %5348 = vmatprep.subr.bf16.mxu0 %v8783_v41  ;;  %5412 = vmatprep.subr.bf16.mxu1 %v8784_v63 }
 0x3fc   :  { %5350 = vmatpush1.bf16.msra.mxu0 %v8785_v19  ;;  %5414 = vmatpush1.bf16.msra.mxu1 %v8786_v31 }
 0x3fd   :  { %5416 = vmatprep.subr.bf16.mxu0 %v7445_v62  ;;  %5448 = vmatprep.subr.bf16.mxu1 %v7447_v42 }
 0x472   :  { %v1645_v24 = vpop.f32.mrb[10].mxu0  ;;  %v1716_v34 = vpop.f32.mrb[10].mxu1 }
 0x473   :  { %v1646_v43 = vadd.f32 %v1645_v24, %v1562_v52  ;;  %v1647_v20 = vpop.f32.mrb[11].mxu0  ;;  %v1718_v21 = vpop.f32.mrb[11].mxu1  ;;  %v1717_v17 = vadd.f32 %v1716_v34, %v1570_v11  ;;  %v2321_v24 = vld [vmem:[#allocation6 + $0x20] sm:$0xff]  ;;  %v2319_v34 = vld [vmem:[#allocation6 + $0x10] sm:$0xff] }
 0x474   :  { %v1648_v49 = vadd.f32 %v1647_v20, %v1566_v18  ;;  %v1719_v57 = vadd.f32 %v1718_v21, %v1574_v44  ;;  %v2317_v18 = vld [vmem:[#allocation6] sm:$0xff]  ;;  %v2326_v20 = vld [vmem:[#allocation6 + $0x48] sm:$0xff] }
 0x475   :  { %v4594_v50 = vmul.f32 -1.442695, %v1646_v43  ;;  %v2323_v43 = vld [vmem:[#allocation6 + $0x30] sm:$0xff]  ;;  %v2330_v21 = vld [vmem:[#allocation6 + $0x68] sm:$0xff] }
 0x476   :  { %v4595_v22 = vmul.f32 -1.442695, %v1648_v49  ;;  %v4596_v14 = vmul.f32 -1.442695, %v1719_v57  ;;  %v2328_v49 = vld [vmem:[#allocation6 + $0x58] sm:$0xff]  ;;  %v7475_v57 = vpack.c.bf16 %v2321_v24, %v2317_v18  ;;  %v7477_v11 = vpack.c.bf16 %v2323_v43, %v2319_v34  ;;  %v2358_v18 = vld [vmem:[#allocation6 + $0x148] sm:$0xff] }
 0x477   :  { %6269 = vpow2.f32 %v4594_v50  ;;  %v2332_v50 = vld [vmem:[#allocation6 + $0x78] sm:$0xff]  ;;  %v2362_v24 = vld [vmem:[#allocation6 + $0x168] sm:$0xff] }
 0x478   :  { %6271 = vpow2.f32 %v4595_v22  ;;  %v2360_v34 = vld [vmem:[#allocation6 + $0x158] sm:$0xff] }
 0x479   :  { %6273 = vpow2.f32 %v4596_v14  ;;  %v2329_v14 = vld [vmem:[#allocation6 + $0x60] sm:$0xff]  ;;  %v2364_v43 = vld [vmem:[#allocation6 + $0x178] sm:$0xff] }
 0x47a   :  { %6275 = vtanh.f32 %v1717_v17 }
 0x481   :  { %v6270_v30 = vpop.eup %6269 }
 0x482   :  { %v6272_v33 = vpop.eup %6271  ;;  %v1727_v10 = vadd.f32 1.0, %v6270_v30  ;;  %v7481_v30 = vpack.c.bf16 %v2330_v21, %v2326_v20 }
 0x483   :  { %v1728_v15 = vadd.f32 1.0, %v6272_v33  ;;  %v6274_v47 = vpop.eup %6273  ;;  %v7483_v33 = vpack.c.bf16 %v2332_v50, %v2328_v49  ;;  %v2357_v49 = vld [vmem:[#allocation6 + $0x140] sm:$0xff] }
 0x484   :  { %6277 = vrcp.f32 %v1727_v10  ;;  %v6276_v51 = vpop.eup %6275  ;;  %v1737_v32 = vadd.f32 1.0, %v6274_v47  ;;  %v2327_v10 = vld [vmem:[#allocation6 + $0x50] sm:$0xff]  ;;  %v2334_v47 = vld [vmem:[#allocation6 + $0x88] sm:$0xff]  ;;  %v2361_v50 = vld [vmem:[#allocation6 + $0x160] sm:$0xff] }
 0x485   :  { %6279 = vrcp.f32 %v1728_v15  ;;  %v2331_v15 = vld [vmem:[#allocation6 + $0x70] sm:$0xff] }
 0x486   :  { %6281 = vrcp.f32 %v1737_v32  ;;  %v7491_v32 = vpack.c.bf16 %v2331_v15, %v2327_v10  ;;  %v2366_v10 = vld [vmem:[#allocation6 + $0x188] sm:$0xff] }
 0x487   :  { %v2370_v15 = vld [vmem:[#allocation6 + $0x1a8] sm:$0xff] }
 0x48e   :  { %v6278_v54 = vpop.eup %6277 }
 0x48f   :  { %v6280_v59 = vpop.eup %6279  ;;  %v1742_v16 = vmul.f32 %v6278_v54, %v6276_v51  ;;  %v2338_v51 = vld [vmem:[#allocation6 + $0xa8] sm:$0xff]  ;;  %v2336_v54 = vld [vmem:[#allocation6 + $0x98] sm:$0xff] }
 0x490   :  { %v1741_v38 = vmul.f32 %v6280_v59, %v7336_v4  ;;  %v6282_v25 = vpop.eup %6281  ;;  %v2340_v59 = vld [vmem:[#allocation6 + $0xb8] sm:$0xff] }
 0x492   :  { %v1884_v46 = vpop.f32.mrb[12].mxu0  ;;  %v1955_v58 = vpop.f32.mrb[12].mxu1  ;;  %v7462_v7 = vadd.f32 %v1742_v16, %v1741_v38  ;;  %v2333_v38 = vld [vmem:[#allocation6 + $0x80] sm:$0xff] }
 0x493   :  { %v1960_v60 = vadd.f32 %v4597_v39, %v1884_v46  ;;  %v1886_v28 = vpop.f32.mrb[13].mxu0  ;;  %v1957_v35 = vpop.f32.mrb[13].mxu1  ;;  %v1962_v26 = vadd.f32 %v4599_v3, %v1955_v58  ;;  %v2337_v39 = vld [vmem:[#allocation6 + $0xa0] sm:$0xff]  ;;  %v7497_v46 = vpack.c.bf16 %v2340_v59, %v2336_v54  ;;  %v2335_v58 = vld [vmem:[#allocation6 + $0x90] sm:$0xff]  ;;  %v7539_v54 = vpack.c.bf16 %v2361_v50, %v2357_v49  ;;  %v2562_v49 = vld [vmem:[#allocation8 + $0x38] sm:$0xff] }
 0x494   :  { %v1961_v0 = vadd.f32 %v4598_v9, %v1886_v28  ;;  %6283 = vtanh.f32 %v7462_v7  ;;  %v1963_v13 = vadd.f32 %v4600_v23, %v1957_v35  ;;  %v7495_v9 = vpack.c.bf16 %v2338_v51, %v2334_v47  ;;  %v2342_v28 = vld [vmem:[#allocation6 + $0xc8] sm:$0xff]  ;;  %v2345_v3 = vld [vmem:[#allocation6 + $0xe0] sm:$0xff]  ;;  %v2368_v47 = vld [vmem:[#allocation6 + $0x198] sm:$0xff] }
 0x495   :  { %v4601_v4 = vmul.f32 -1.442695, %v1960_v60  ;;  %v2339_v60 = vld [vmem:[#allocation6 + $0xb0] sm:$0xff]  ;;  %v2346_v35 = vld [vmem:[#allocation6 + $0xe8] sm:$0xff]  ;;  %v2372_v51 = vld [vmem:[#allocation6 + $0x1b8] sm:$0xff] }
 0x496   :  { %v4602_v48 = vmul.f32 -1.442695, %v1961_v0  ;;  %v4603_v5 = vmul.f32 -1.442695, %v1963_v13  ;;  %v2344_v0 = vld [vmem:[#allocation6 + $0xd8] sm:$0xff]  ;;  %v7505_v23 = vpack.c.bf16 %v2339_v60, %v2335_v58  ;;  %v2341_v13 = vld [vmem:[#allocation6 + $0xc0] sm:$0xff]  ;;  %v7545_v58 = vpack.c.bf16 %v2370_v15, %v2366_v10 }
 0x497   :  { %6285 = vpow2.f32 %v4601_v4  ;;  %v2348_v4 = vld [vmem:[#allocation6 + $0xf8] sm:$0xff]  ;;  %v7547_v60 = vpack.c.bf16 %v2372_v51, %v2368_v47  ;;  %v2555_v50 = vld [vmem:[#allocation8] sm:$0xff]  ;;  %v2557_v15 = vld [vmem:[#allocation8 + $0x10] sm:$0xff] }
 0x498   :  { %6287 = vpow2.f32 %v4602_v48  ;;  %v7503_v48 = vpack.c.bf16 %v2337_v39, %v2333_v38  ;;  %v2365_v38 = vld [vmem:[#allocation6 + $0x180] sm:$0xff]  ;;  %v2561_v47 = vld [vmem:[#allocation8 + $0x30] sm:$0xff] }
 0x499   :  { %6289 = vpow2.f32 %v4603_v5  ;;  %v2343_v5 = vld [vmem:[#allocation6 + $0xd0] sm:$0xff]  ;;  %v2369_v39 = vld [vmem:[#allocation6 + $0x1a0] sm:$0xff]  ;;  %v7580_v51 = vpack.c.bf16 %v2561_v47, %v2557_v15 }
 0x49a   :  { %6291 = vtanh.f32 %v1962_v26  ;;  %v2347_v26 = vld [vmem:[#allocation6 + $0xf0] sm:$0xff] }
 0x49e   :  { %v6284_v53 = vpop.eup %6283 }
 0x49f   :  { %v1745_v2 = vmul.f32 %v6284_v53, %v6282_v25  ;;  %v7509_v25 = vpack.c.bf16 %v2346_v35, %v2342_v28  ;;  %v7511_v53 = vpack.c.bf16 %v2348_v4, %v2344_v0  ;;  %v2367_v28 = vld [vmem:[#allocation6 + $0x190] sm:$0xff]  ;;  %v2374_v0 = vld [vmem:[#allocation6 + $0x1c8] sm:$0xff] }
 0x4a0   :  { %v2371_v35 = vld [vmem:[#allocation6 + $0x1b0] sm:$0xff]  ;;  %v2378_v4 = vld [vmem:[#allocation6 + $0x1e8] sm:$0xff] }
 0x4a1   :  { %v6286_v6 = vpop.eup %6285  ;;  %2206 = vmatprep.mubr.f32.mxu0 %v1745_v2  ;;  %2277 = vmatprep.mubr.f32.mxu1 %v1745_v2  ;;  %v2350_v2 = vld [vmem:[#allocation6 + $0x108] sm:$0xff] }
 0x4a2   :  { %v6288_v36 = vpop.eup %6287  ;;  %v1970_v41 = vadd.f32 1.0, %v6286_v6  ;;  %v2354_v6 = vld [vmem:[#allocation6 + $0x128] sm:$0xff] }
 0x4a3   :  { %v1971_v63 = vadd.f32 1.0, %v6288_v36  ;;  %v6290_v19 = vpop.eup %6289  ;;  %v2352_v36 = vld [vmem:[#allocation6 + $0x118] sm:$0xff] }
 0x4a4   :  { %6293 = vrcp.f32 %v1970_v41  ;;  %v6292_v31 = vpop.eup %6291  ;;  %v1980_v1 = vadd.f32 1.0, %v6290_v19  ;;  %v2356_v41 = vld [vmem:[#allocation6 + $0x138] sm:$0xff]  ;;  %v7517_v19 = vpack.c.bf16 %v2347_v26, %v2343_v5  ;;  %v7551_v5 = vpack.c.bf16 %v2369_v39, %v2365_v38  ;;  %v2568_v38 = vld [vmem:[#allocation8 + $0x68] sm:$0xff] }
 0x4a5   :  { %6295 = vrcp.f32 %v1971_v63  ;;  %v7515_v63 = vpack.c.bf16 %v2345_v3, %v2341_v13  ;;  %v2376_v13 = vld [vmem:[#allocation6 + $0x1d8] sm:$0xff]  ;;  %v7553_v26 = vpack.c.bf16 %v2371_v35, %v2367_v28 }
 0x4a6   :  { %6297 = vrcp.f32 %v1980_v1  ;;  %v2351_v1 = vld [vmem:[#allocation6 + $0x110] sm:$0xff]  ;;  %v2380_v3 = vld [vmem:[#allocation6 + $0x1f8] sm:$0xff] }
 0x4a7   :  { %v2566_v39 = vld [vmem:[#allocation8 + $0x58] sm:$0xff] }
 0x4a8   :  { %v2570_v35 = vld [vmem:[#allocation8 + $0x78] sm:$0xff] }
 0x4ae   :  { %v6294_v29 = vpop.eup %6293 }
 0x4af   :  { %v6296_v27 = vpop.eup %6295  ;;  %v1985_v12 = vmul.f32 %v6294_v29, %v6292_v31  ;;  %v2349_v31 = vld [vmem:[#allocation6 + $0x100] sm:$0xff] }
 0x4b0   :  { %v1984_v40 = vmul.f32 %v6296_v27, %v7346_v61  ;;  %v6298_v22 = vpop.eup %6297  ;;  %v2325_v61 = vld [vmem:[#allocation6 + $0x40] sm:$0xff]  ;;  %v7521_v27 = vpack.c.bf16 %v2354_v6, %v2350_v2  ;;  %v7557_v6 = vpack.c.bf16 %v2378_v4, %v2374_v0 }
 0x4b1   :  { %v7489_v16 = vpack.c.bf16 %v2329_v14, %v2325_v61  ;;  %v2353_v29 = vld [vmem:[#allocation6 + $0x120] sm:$0xff]  ;;  %v2359_v61 = vld [vmem:[#allocation6 + $0x150] sm:$0xff] }
 0x4b2   :  { %v7472_v52 = vadd.f32 %v1985_v12, %v1984_v40  ;;  %v7523_v12 = vpack.c.bf16 %v2356_v41, %v2352_v36  ;;  %v2355_v40 = vld [vmem:[#allocation6 + $0x130] sm:$0xff]  ;;  %v7527_v20 = vpack.c.bf16 %v2353_v29, %v2349_v31  ;;  %v2373_v2 = vld [vmem:[#allocation6 + $0x1c0] sm:$0xff]  ;;  %v7559_v36 = vpack.c.bf16 %v2380_v3, %v2376_v13 }
 0x4b3   :  { %v7529_v21 = vpack.c.bf16 %v2355_v40, %v2351_v1  ;;  %v2363_v14 = vld [vmem:[#allocation6 + $0x170] sm:$0xff]  ;;  %v2377_v41 = vld [vmem:[#allocation6 + $0x1e0] sm:$0xff]  ;;  %v7587_v13 = vpack.c.bf16 %v2570_v35, %v2566_v39  ;;  %v2580_v35 = vld [vmem:[#allocation8 + $0xc8] sm:$0xff] }
 0x4b4   :  { %6299 = vtanh.f32 %v7472_v52  ;;  %v7541_v59 = vpack.c.bf16 %v2363_v14, %v2359_v61  ;;  %v2375_v31 = vld [vmem:[#allocation6 + $0x1d0] sm:$0xff]  ;;  %v7563_v1 = vpack.c.bf16 %v2377_v41, %v2373_v2  ;;  %v2559_v61 = vld [vmem:[#allocation8 + $0x20] sm:$0xff] }
 0x4b5   :  { %v2379_v29 = vld [vmem:[#allocation6 + $0x1f0] sm:$0xff]  ;;  %v7577_v10 = vpack.c.bf16 %v2559_v61, %v2555_v50  ;;  %v2563_v0 = vld [vmem:[#allocation8 + $0x40] sm:$0xff] }
 0x4b6   :  { %v7565_v40 = vpack.c.bf16 %v2379_v29, %v2375_v31  ;;  %v2567_v4 = vld [vmem:[#allocation8 + $0x60] sm:$0xff]  ;;  %v2565_v2 = vld [vmem:[#allocation8 + $0x50] sm:$0xff]  ;;  %v2572_v29 = vld [vmem:[#allocation8 + $0x88] sm:$0xff] }
 0x4b7   :  { %v7589_v3 = vpack.c.bf16 %v2567_v4, %v2563_v0  ;;  %v2569_v41 = vld [vmem:[#allocation8 + $0x70] sm:$0xff]  ;;  %v2571_v50 = vld [vmem:[#allocation8 + $0x80] sm:$0xff]  ;;  %v2584_v0 = vld [vmem:[#allocation8 + $0xe8] sm:$0xff] }
 0x4b8   :  { %v7592_v31 = vpack.c.bf16 %v2569_v41, %v2565_v2  ;;  %v2575_v61 = vld [vmem:[#allocation8 + $0xa0] sm:$0xff]  ;;  %v2582_v4 = vld [vmem:[#allocation8 + $0xd8] sm:$0xff]  ;;  %v7609_v2 = vpack.c.bf16 %v2584_v0, %v2580_v35  ;;  %v2592_v35 = vld [vmem:[#allocation8 + $0x128] sm:$0xff] }
 0x4b9   :  { %v7601_v47 = vpack.c.bf16 %v2575_v61, %v2571_v50  ;;  %v2586_v41 = vld [vmem:[#allocation8 + $0xf8] sm:$0xff]  ;;  %v2581_v50 = vld [vmem:[#allocation8 + $0xd0] sm:$0xff] }
 0x4ba   :  { %8789 = vst [vmem:[#allocation16_spill] sm:$0xff] %v7592_v31  ;;  %8794 = vst [vmem:[#allocation20_spill] sm:$0xff] %v7609_v2  ;;  %v2585_v61 = vld [vmem:[#allocation8 + $0xf0] sm:$0xff]  ;;  %v2590_v0 = vld [vmem:[#allocation8 + $0x118] sm:$0xff] }
 0x4bb   :  { %8792 = vst [vmem:[#allocation18_spill] sm:$0xff] %v7601_v47 }
 0x4be   :  { %v6300_v44 = vpop.eup %6299 }
 0x4bf   :  { %v7479_v17 = vmul.f32 %v6300_v44, %v6298_v22  ;;  %v7533_v22 = vpack.c.bf16 %v2362_v24, %v2358_v18  ;;  %v7535_v44 = vpack.c.bf16 %v2364_v43, %v2360_v34  ;;  %v2556_v18 = vld [vmem:[#allocation8 + $0x8] sm:$0xff]  ;;  %v2558_v34 = vld [vmem:[#allocation8 + $0x18] sm:$0xff] }
 0x4c0   :  { %v2560_v24 = vld [vmem:[#allocation8 + $0x28] sm:$0xff]  ;;  %v7575_v14 = vpack.c.bf16 %v2562_v49, %v2558_v34  ;;  %v2578_v49 = vld [vmem:[#allocation8 + $0xb8] sm:$0xff] }
 0x4c1   :  { %2207 = vmatmul.mubr.f32.vlgmr.msra.gmra.mrb[14].mxu0 %v7479_v17  ;;  %2278 = vmatmul.mubr.f32.vlgmr.msra.gmra.mrb[14].mxu1 %v7479_v17  ;;  %v7573_v43 = vpack.c.bf16 %v2560_v24, %v2556_v18  ;;  %v2576_v18 = vld [vmem:[#allocation8 + $0xa8] sm:$0xff]  ;;  %v2574_v24 = vld [vmem:[#allocation8 + $0x98] sm:$0xff] }
 0x4c2   :  { %5418 = vmatpush1.bf16.msra.mxu0 %v7475_v57  ;;  %5450 = vmatpush1.bf16.msra.mxu1 %v7477_v11  ;;  %v7597_v34 = vpack.c.bf16 %v2576_v18, %v2572_v29  ;;  %v7599_v15 = vpack.c.bf16 %v2578_v49, %v2574_v24  ;;  %v2579_v29 = vld [vmem:[#allocation8 + $0xc0] sm:$0xff]  ;;  %v7611_v24 = vpack.c.bf16 %v2586_v41, %v2582_v4  ;;  %v2594_v4 = vld [vmem:[#allocation8 + $0x138] sm:$0xff] }
 0x4c3   :  { %5420 = vmatprep.subr.bf16.mxu0 %v7481_v30  ;;  %5452 = vmatprep.subr.bf16.mxu1 %v7483_v33  ;;  %v2583_v18 = vld [vmem:[#allocation8 + $0xe0] sm:$0xff] }
 0x4c4   :  { %2445 = vmatprep.mubr.f32.mxu0 %v8629_v56  ;;  %2516 = vmatprep.mubr.f32.mxu1 %v8629_v56  ;;  %8790 = vst [vmem:[#allocation14_spill] sm:$0xff] %v7597_v34  ;;  %8791 = vst [vmem:[#allocation17_spill] sm:$0xff] %v7599_v15  ;;  %v7613_v49 = vpack.c.bf16 %v2583_v18, %v2579_v29  ;;  %v2587_v41 = vld [vmem:[#allocation8 + $0x100] sm:$0xff]  ;;  %v7623_v18 = vpack.c.bf16 %v2594_v4, %v2590_v0  ;;  %v2598_v0 = vld [vmem:[#allocation8 + $0x158] sm:$0xff] }
 0x4c5   :  { %8795 = vst [vmem:[#allocation21_spill] sm:$0xff] %v7611_v24  ;;  %v2591_v29 = vld [vmem:[#allocation8 + $0x120] sm:$0xff]  ;;  %v2602_v4 = vld [vmem:[#allocation8 + $0x178] sm:$0xff] }
 0x4c6   :  { %5422 = vmatpush1.bf16.msra.mxu0 %v7489_v16  ;;  %5454 = vmatpush1.bf16.msra.mxu1 %v7491_v32  ;;  %8796 = vst [vmem:[#allocation22_spill] sm:$0xff] %v7613_v49  ;;  %8799 = vst [vmem:[#allocation25_spill] sm:$0xff] %v7623_v18 }
 0x4c7   :  { %5424 = vmatprep.subr.bf16.mxu0 %v7495_v9  ;;  %5456 = vmatprep.subr.bf16.mxu1 %v7497_v46 }
 0x4ca   :  { %5426 = vmatpush1.bf16.msra.mxu0 %v7503_v48  ;;  %5458 = vmatpush1.bf16.msra.mxu1 %v7505_v23 }
 0x4cb   :  { %5428 = vmatprep.subr.bf16.mxu0 %v7509_v25  ;;  %5460 = vmatprep.subr.bf16.mxu1 %v7511_v53 }
 0x4ce   :  { %5430 = vmatpush1.bf16.msra.mxu0 %v7515_v63  ;;  %5462 = vmatpush1.bf16.msra.mxu1 %v7517_v19 }
 0x4cf   :  { %5432 = vmatprep.subr.bf16.mxu0 %v7521_v27  ;;  %5464 = vmatprep.subr.bf16.mxu1 %v7523_v12 }
 0x4d2   :  { %5434 = vmatpush1.bf16.msra.mxu0 %v7527_v20  ;;  %5466 = vmatpush1.bf16.msra.mxu1 %v7529_v21 }
 0x4d3   :  { %5436 = vmatprep.subr.bf16.mxu0 %v7533_v22  ;;  %5468 = vmatprep.subr.bf16.mxu1 %v7535_v44 }
 0x4d6   :  { %5438 = vmatpush1.bf16.msra.mxu0 %v7539_v54  ;;  %5470 = vmatpush1.bf16.msra.mxu1 %v7541_v59 }
 0x4d7   :  { %5440 = vmatprep.subr.bf16.mxu0 %v7545_v58  ;;  %5472 = vmatprep.subr.bf16.mxu1 %v7547_v60 }
 0x4da   :  { %5442 = vmatpush1.bf16.msra.mxu0 %v7551_v5  ;;  %5474 = vmatpush1.bf16.msra.mxu1 %v7553_v26 }
 0x4db   :  { %5444 = vmatprep.subr.bf16.mxu0 %v7557_v6  ;;  %5476 = vmatprep.subr.bf16.mxu1 %v7559_v36 }
 0x4de   :  { %5446 = vmatpush1.bf16.msra.mxu0 %v7563_v1  ;;  %5478 = vmatpush1.bf16.msra.mxu1 %v7565_v40 }
 0x4df   :  { %5480 = vmatprep.subr.bf16.mxu0 %v7573_v43  ;;  %5544 = vmatprep.subr.bf16.mxu1 %v7575_v14 }
 0x4e1   :  { %2446 = vmatmul.mubr.f32.vlgmr.msra.gmra.mrb[16].mxu0 %v7479_v17  ;;  %2517 = vmatmul.mubr.f32.vlgmr.msra.gmra.mrb[16].mxu1 %v7479_v17  ;;  %v2564_v17 = vld [vmem:[#allocation8 + $0x48] sm:$0xff] }
 0x4e2   :  { %5482 = vmatpush1.bf16.msra.mxu0 %v7577_v10  ;;  %5546 = vmatpush1.bf16.msra.mxu1 %v7580_v51  ;;  %v7585_v28 = vpack.c.bf16 %v2568_v38, %v2564_v17  ;;  %v2573_v17 = vld [vmem:[#allocation8 + $0x90] sm:$0xff] }
 0x4e3   :  { %5548 = vmatprep.subr.bf16.mxu1 %v7587_v13  ;;  %v2577_v38 = vld [vmem:[#allocation8 + $0xb0] sm:$0xff] }
 0x4e4   :  { %5484 = vmatprep.subr.bf16.mxu0 %v7585_v28  ;;  %v7604_v39 = vpack.c.bf16 %v2577_v38, %v2573_v17  ;;  %v7616_v17 = vpack.c.bf16 %v2585_v61, %v2581_v50  ;;  %v2588_v38 = vld [vmem:[#allocation8 + $0x108] sm:$0xff]  ;;  %v2589_v50 = vld [vmem:[#allocation8 + $0x110] sm:$0xff] }
 0x4e5   :  { %v2593_v61 = vld [vmem:[#allocation8 + $0x130] sm:$0xff] }
 0x4e6   :  { %5486 = vmatpush1.bf16.msra.mxu0 %v7589_v3  ;;  %5550 = vmatpush1.bf16.msra.mxu1 %v7592_v31  ;;  %8793 = vst [vmem:[#allocation19_spill] sm:$0xff] %v7604_v39  ;;  %8797 = vst [vmem:[#allocation23_spill] sm:$0xff] %v7616_v17 }
 0x4e7   :  { %5488 = vmatprep.subr.bf16.mxu0 %v7597_v34  ;;  %5552 = vmatprep.subr.bf16.mxu1 %v7599_v15  ;;  %v2603_v15 = vld [vmem:[#allocation8 + $0x180] sm:$0xff] }
 0x4ea   :  { %5490 = vmatpush1.bf16.msra.mxu0 %v7601_v47  ;;  %5554 = vmatpush1.bf16.msra.mxu1 %v7604_v39  ;;  %v7621_v39 = vpack.c.bf16 %v2592_v35, %v2588_v38  ;;  %v7625_v47 = vpack.c.bf16 %v2591_v29, %v2587_v41  ;;  %v2596_v38 = vld [vmem:[#allocation8 + $0x148] sm:$0xff]  ;;  %v2595_v41 = vld [vmem:[#allocation8 + $0x140] sm:$0xff] }
 0x4eb   :  { %5492 = vmatprep.subr.bf16.mxu0 %v7609_v2  ;;  %5556 = vmatprep.subr.bf16.mxu1 %v7611_v24  ;;  %v7628_v24 = vpack.c.bf16 %v2593_v61, %v2589_v50  ;;  %v2600_v35 = vld [vmem:[#allocation8 + $0x168] sm:$0xff]  ;;  %v2599_v29 = vld [vmem:[#allocation8 + $0x160] sm:$0xff]  ;;  %v2597_v61 = vld [vmem:[#allocation8 + $0x150] sm:$0xff] }
 0x4ec   :  { %8798 = vst [vmem:[#allocation24_spill] sm:$0xff] %v7621_v39  ;;  %8800 = vst [vmem:[#allocation26_spill] sm:$0xff] %v7625_v47  ;;  %v7638_v50 = vpack.c.bf16 %v2599_v29, %v2595_v41  ;;  %v2606_v2 = vld [vmem:[#allocation8 + $0x198] sm:$0xff]  ;;  %v2609_v41 = vld [vmem:[#allocation8 + $0x1b0] sm:$0xff] }
 0x4ed   :  { %8801 = vst [vmem:[#allocation27_spill] sm:$0xff] %v7628_v24 }
 0x4ee   :  { %5494 = vmatpush1.bf16.msra.mxu0 %v7613_v49  ;;  %5558 = vmatpush1.bf16.msra.mxu1 %v7616_v17  ;;  %v7633_v17 = vpack.c.bf16 %v2600_v35, %v2596_v38  ;;  %v7636_v49 = vpack.c.bf16 %v2602_v4, %v2598_v0  ;;  %8804 = vst [vmem:[#allocation30_spill] sm:$0xff] %v7638_v50  ;;  %v2610_v35 = vld [vmem:[#allocation8 + $0x1b8] sm:$0xff] }
 0x4ef   :  { %5496 = vmatprep.subr.bf16.mxu0 %v7621_v39  ;;  %5560 = vmatprep.subr.bf16.mxu1 %v7623_v18  ;;  %v2601_v18 = vld [vmem:[#allocation8 + $0x170] sm:$0xff]  ;;  %v7647_v0 = vpack.c.bf16 %v2610_v35, %v2606_v2  ;;  %v2611_v2 = vld [vmem:[#allocation8 + $0x1c0] sm:$0xff] }
 0x4f0   :  { %8802 = vst [vmem:[#allocation28_spill] sm:$0xff] %v7633_v17  ;;  %8803 = vst [vmem:[#allocation29_spill] sm:$0xff] %v7636_v49  ;;  %v7640_v39 = vpack.c.bf16 %v2601_v18, %v2597_v61  ;;  %v2605_v18 = vld [vmem:[#allocation8 + $0x190] sm:$0xff]  ;;  %v2612_v61 = vld [vmem:[#allocation8 + $0x1c8] sm:$0xff] }
 0x4f1   :  { %8807 = vst [vmem:[#allocation33_spill] sm:$0xff] %v7647_v0  ;;  %v7652_v29 = vpack.c.bf16 %v2609_v41, %v2605_v18  ;;  %v2615_v35 = vld [vmem:[#allocation8 + $0x1e0] sm:$0xff]  ;;  %v2613_v18 = vld [vmem:[#allocation8 + $0x1d0] sm:$0xff] }
 0x4f2   :  { %5498 = vmatpush1.bf16.msra.mxu0 %v7625_v47  ;;  %5562 = vmatpush1.bf16.msra.mxu1 %v7628_v24  ;;  %8805 = vst [vmem:[#allocation31_spill] sm:$0xff] %v7640_v39  ;;  %v2604_v47 = vld [vmem:[#allocation8 + $0x188] sm:$0xff]  ;;  %v2617_v41 = vld [vmem:[#allocation8 + $0x1f0] sm:$0xff] }
 0x4f3   :  { %5500 = vmatprep.subr.bf16.mxu0 %v7633_v17  ;;  %v2608_v24 = vld [vmem:[#allocation8 + $0x1a8] sm:$0xff]  ;;  %5564 = vmatprep.subr.bf16.mxu1 %v7636_v49  ;;  %v2607_v17 = vld [vmem:[#allocation8 + $0x1a0] sm:$0xff]  ;;  %8809 = vst [vmem:[#allocation35_spill] sm:$0xff] %v7652_v29 }
 0x4f4   :  { %v7644_v38 = vpack.c.bf16 %v2608_v24, %v2604_v47  ;;  %v7649_v4 = vpack.c.bf16 %v2607_v17, %v2603_v15  ;;  %v2616_v47 = vld [vmem:[#allocation8 + $0x1e8] sm:$0xff]  ;;  %v2614_v24 = vld [vmem:[#allocation8 + $0x1d8] sm:$0xff]  ;;  %v7661_v17 = vpack.c.bf16 %v2615_v35, %v2611_v2 }
 0x4f5   :  { %v2672_v49 = vld [vmem:[#allocation8 + $0x3a8] sm:$0xff] }
 0x4f6   :  { %5502 = vmatpush1.bf16.msra.mxu0 %v7638_v50  ;;  %8806 = vst [vmem:[#allocation32_spill] sm:$0xff] %v7644_v38  ;;  %5566 = vmatpush1.bf16.msra.mxu1 %v7640_v39  ;;  %8808 = vst [vmem:[#allocation34_spill] sm:$0xff] %v7649_v4  ;;  %v7656_v50 = vpack.c.bf16 %v2616_v47, %v2612_v61  ;;  %v2618_v39 = vld [vmem:[#allocation8 + $0x1f8] sm:$0xff]  ;;  %v2624_v61 = vld [vmem:[#allocation8 + $0x228] sm:$0xff] }
 0x4f7   :  { %5504 = vmatprep.subr.bf16.mxu0 %v7644_v38  ;;  %5568 = vmatprep.subr.bf16.mxu1 %v7647_v0  ;;  %v7659_v15 = vpack.c.bf16 %v2618_v39, %v2614_v24  ;;  %8812 = vst [vmem:[#allocation38_spill] sm:$0xff] %v7661_v17  ;;  %v7664_v0 = vpack.c.bf16 %v2617_v41, %v2613_v18  ;;  %v2622_v47 = vld [vmem:[#allocation8 + $0x218] sm:$0xff]  ;;  %v2619_v39 = vld [vmem:[#allocation8 + $0x200] sm:$0xff]  ;;  %v2621_v18 = vld [vmem:[#allocation8 + $0x210] sm:$0xff] }
 0x4f8   :  { %8810 = vst [vmem:[#allocation36_spill] sm:$0xff] %v7656_v50  ;;  %v2623_v24 = vld [vmem:[#allocation8 + $0x220] sm:$0xff]  ;;  %v2625_v41 = vld [vmem:[#allocation8 + $0x230] sm:$0xff] }
 0x4f9   :  { %8811 = vst [vmem:[#allocation37_spill] sm:$0xff] %v7659_v15  ;;  %8813 = vst [vmem:[#allocation39_spill] sm:$0xff] %v7664_v0  ;;  %v7673_v35 = vpack.c.bf16 %v2623_v24, %v2619_v39 }
 0x4fa   :  { %5506 = vmatpush1.bf16.msra.mxu0 %v7649_v4  ;;  %5570 = vmatpush1.bf16.msra.mxu1 %v7652_v29  ;;  %v2620_v4 = vld [vmem:[#allocation8 + $0x208] sm:$0xff]  ;;  %v2626_v29 = vld [vmem:[#allocation8 + $0x238] sm:$0xff] }
 0x4fb   :  { %5508 = vmatprep.subr.bf16.mxu0 %v7656_v50  ;;  %5572 = vmatprep.subr.bf16.mxu1 %v7659_v15  ;;  %v7668_v38 = vpack.c.bf16 %v2624_v61, %v2620_v4  ;;  %v7671_v2 = vpack.c.bf16 %v2626_v29, %v2622_v47  ;;  %8816 = vst [vmem:[#allocation42_spill] sm:$0xff] %v7673_v35  ;;  %v2632_v4 = vld [vmem:[#allocation8 + $0x268] sm:$0xff]  ;;  %v2630_v61 = vld [vmem:[#allocation8 + $0x258] sm:$0xff]  ;;  %v2627_v29 = vld [vmem:[#allocation8 + $0x240] sm:$0xff] }
 0x4fc   :  { %v7676_v15 = vpack.c.bf16 %v2625_v41, %v2621_v18  ;;  %v2631_v47 = vld [vmem:[#allocation8 + $0x260] sm:$0xff]  ;;  %v2629_v18 = vld [vmem:[#allocation8 + $0x250] sm:$0xff] }
 0x4fd   :  { %8814 = vst [vmem:[#allocation40_spill] sm:$0xff] %v7668_v38  ;;  %8815 = vst [vmem:[#allocation41_spill] sm:$0xff] %v7671_v2  ;;  %v7685_v24 = vpack.c.bf16 %v2631_v47, %v2627_v29  ;;  %v2633_v41 = vld [vmem:[#allocation8 + $0x270] sm:$0xff] }
 0x4fe   :  { %5510 = vmatpush1.bf16.msra.mxu0 %v7661_v17  ;;  %5574 = vmatpush1.bf16.msra.mxu1 %v7664_v0  ;;  %8817 = vst [vmem:[#allocation43_spill] sm:$0xff] %v7676_v15  ;;  %v2628_v17 = vld [vmem:[#allocation8 + $0x248] sm:$0xff]  ;;  %v2634_v0 = vld [vmem:[#allocation8 + $0x278] sm:$0xff] }
 0x4ff   :  { %5512 = vmatprep.subr.bf16.mxu0 %v7668_v38  ;;  %5576 = vmatprep.subr.bf16.mxu1 %v7671_v2  ;;  %v7680_v50 = vpack.c.bf16 %v2632_v4, %v2628_v17  ;;  %v7683_v39 = vpack.c.bf16 %v2634_v0, %v2630_v61  ;;  %8820 = vst [vmem:[#allocation46_spill] sm:$0xff] %v7685_v24  ;;  %v2640_v17 = vld [vmem:[#allocation8 + $0x2a8] sm:$0xff]  ;;  %v2638_v4 = vld [vmem:[#allocation8 + $0x298] sm:$0xff]  ;;  %v2635_v0 = vld [vmem:[#allocation8 + $0x280] sm:$0xff] }
 0x500   :  { %v7688_v2 = vpack.c.bf16 %v2633_v41, %v2629_v18  ;;  %v2639_v61 = vld [vmem:[#allocation8 + $0x2a0] sm:$0xff]  ;;  %v2637_v18 = vld [vmem:[#allocation8 + $0x290] sm:$0xff] }
 0x501   :  { %8818 = vst [vmem:[#allocation44_spill] sm:$0xff] %v7680_v50  ;;  %8819 = vst [vmem:[#allocation45_spill] sm:$0xff] %v7683_v39  ;;  %v7697_v47 = vpack.c.bf16 %v2639_v61, %v2635_v0  ;;  %v2641_v41 = vld [vmem:[#allocation8 + $0x2b0] sm:$0xff] }
 0x502   :  { %5514 = vmatpush1.bf16.msra.mxu0 %v7673_v35  ;;  %5578 = vmatpush1.bf16.msra.mxu1 %v7676_v15  ;;  %8821 = vst [vmem:[#allocation47_spill] sm:$0xff] %v7688_v2  ;;  %v2636_v35 = vld [vmem:[#allocation8 + $0x288] sm:$0xff]  ;;  %v2642_v15 = vld [vmem:[#allocation8 + $0x2b8] sm:$0xff] }
 0x503   :  { %5516 = vmatprep.subr.bf16.mxu0 %v7680_v50  ;;  %5580 = vmatprep.subr.bf16.mxu1 %v7683_v39  ;;  %v7692_v38 = vpack.c.bf16 %v2640_v17, %v2636_v35  ;;  %v7695_v29 = vpack.c.bf16 %v2642_v15, %v2638_v4  ;;  %8824 = vst [vmem:[#allocation50_spill] sm:$0xff] %v7697_v47  ;;  %v2648_v35 = vld [vmem:[#allocation8 + $0x2e8] sm:$0xff]  ;;  %v2646_v17 = vld [vmem:[#allocation8 + $0x2d8] sm:$0xff]  ;;  %v2643_v15 = vld [vmem:[#allocation8 + $0x2c0] sm:$0xff] }
 0x504   :  { %v7700_v39 = vpack.c.bf16 %v2641_v41, %v2637_v18  ;;  %v2647_v4 = vld [vmem:[#allocation8 + $0x2e0] sm:$0xff]  ;;  %v2645_v18 = vld [vmem:[#allocation8 + $0x2d0] sm:$0xff] }
 0x505   :  { %8822 = vst [vmem:[#allocation48_spill] sm:$0xff] %v7692_v38  ;;  %8823 = vst [vmem:[#allocation49_spill] sm:$0xff] %v7695_v29  ;;  %v7709_v61 = vpack.c.bf16 %v2647_v4, %v2643_v15  ;;  %v2649_v41 = vld [vmem:[#allocation8 + $0x2f0] sm:$0xff] }
 0x506   :  { %5518 = vmatpush1.bf16.msra.mxu0 %v7685_v24  ;;  %5582 = vmatpush1.bf16.msra.mxu1 %v7688_v2  ;;  %8825 = vst [vmem:[#allocation51_spill] sm:$0xff] %v7700_v39  ;;  %v2644_v24 = vld [vmem:[#allocation8 + $0x2c8] sm:$0xff]  ;;  %v2650_v2 = vld [vmem:[#allocation8 + $0x2f8] sm:$0xff] }
 0x507   :  { %5520 = vmatprep.subr.bf16.mxu0 %v7692_v38  ;;  %5584 = vmatprep.subr.bf16.mxu1 %v7695_v29  ;;  %v7704_v50 = vpack.c.bf16 %v2648_v35, %v2644_v24  ;;  %v7707_v0 = vpack.c.bf16 %v2650_v2, %v2646_v17  ;;  %8828 = vst [vmem:[#allocation54_spill] sm:$0xff] %v7709_v61  ;;  %v2656_v24 = vld [vmem:[#allocation8 + $0x328] sm:$0xff]  ;;  %v2654_v35 = vld [vmem:[#allocation8 + $0x318] sm:$0xff]  ;;  %v2651_v2 = vld [vmem:[#allocation8 + $0x300] sm:$0xff] }
 0x508   :  { %v7712_v29 = vpack.c.bf16 %v2649_v41, %v2645_v18  ;;  %v2655_v17 = vld [vmem:[#allocation8 + $0x320] sm:$0xff]  ;;  %v2653_v18 = vld [vmem:[#allocation8 + $0x310] sm:$0xff] }
 0x509   :  { %8826 = vst [vmem:[#allocation52_spill] sm:$0xff] %v7704_v50  ;;  %8827 = vst [vmem:[#allocation53_spill] sm:$0xff] %v7707_v0  ;;  %v7721_v4 = vpack.c.bf16 %v2655_v17, %v2651_v2  ;;  %v2657_v41 = vld [vmem:[#allocation8 + $0x330] sm:$0xff] }
 0x50a   :  { %5522 = vmatpush1.bf16.msra.mxu0 %v7697_v47  ;;  %5586 = vmatpush1.bf16.msra.mxu1 %v7700_v39  ;;  %8829 = vst [vmem:[#allocation55_spill] sm:$0xff] %v7712_v29  ;;  %v2652_v47 = vld [vmem:[#allocation8 + $0x308] sm:$0xff]  ;;  %v2658_v39 = vld [vmem:[#allocation8 + $0x338] sm:$0xff] }
 0x50b   :  { %5524 = vmatprep.subr.bf16.mxu0 %v7704_v50  ;;  %5588 = vmatprep.subr.bf16.mxu1 %v7707_v0  ;;  %v7716_v38 = vpack.c.bf16 %v2656_v24, %v2652_v47  ;;  %v7719_v15 = vpack.c.bf16 %v2658_v39, %v2654_v35  ;;  %8832 = vst [vmem:[#allocation58_spill] sm:$0xff] %v7721_v4  ;;  %v2664_v47 = vld [vmem:[#allocation8 + $0x368] sm:$0xff]  ;;  %v2662_v24 = vld [vmem:[#allocation8 + $0x358] sm:$0xff]  ;;  %v2659_v39 = vld [vmem:[#allocation8 + $0x340] sm:$0xff] }
 0x50c   :  { %v7724_v0 = vpack.c.bf16 %v2657_v41, %v2653_v18  ;;  %v2663_v35 = vld [vmem:[#allocation8 + $0x360] sm:$0xff]  ;;  %v2661_v18 = vld [vmem:[#allocation8 + $0x350] sm:$0xff] }
 0x50d   :  { %8830 = vst [vmem:[#allocation56_spill] sm:$0xff] %v7716_v38  ;;  %8831 = vst [vmem:[#allocation57_spill] sm:$0xff] %v7719_v15  ;;  %v7733_v17 = vpack.c.bf16 %v2663_v35, %v2659_v39  ;;  %v2665_v41 = vld [vmem:[#allocation8 + $0x370] sm:$0xff] }
 0x50e   :  { %5526 = vmatpush1.bf16.msra.mxu0 %v7709_v61  ;;  %5590 = vmatpush1.bf16.msra.mxu1 %v7712_v29  ;;  %8833 = vst [vmem:[#allocation59_spill] sm:$0xff] %v7724_v0  ;;  %v2660_v61 = vld [vmem:[#allocation8 + $0x348] sm:$0xff]  ;;  %v2666_v29 = vld [vmem:[#allocation8 + $0x378] sm:$0xff]  ;;  %v2669_v39 = vld [vmem:[#allocation8 + $0x390] sm:$0xff] }
 0x50f   :  { %5528 = vmatprep.subr.bf16.mxu0 %v7716_v38  ;;  %5592 = vmatprep.subr.bf16.mxu1 %v7719_v15  ;;  %v7728_v50 = vpack.c.bf16 %v2664_v47, %v2660_v61  ;;  %v7731_v2 = vpack.c.bf16 %v2666_v29, %v2662_v24  ;;  %8836 = vst [vmem:[#allocation62_spill] sm:$0xff] %v7733_v17  ;;  %v2668_v38 = vld [vmem:[#allocation8 + $0x388] sm:$0xff]  ;;  %v2674_v61 = vld [vmem:[#allocation8 + $0x3b8] sm:$0xff]  ;;  %v2667_v29 = vld [vmem:[#allocation8 + $0x380] sm:$0xff] }
 0x510   :  { %v7736_v15 = vpack.c.bf16 %v2665_v41, %v2661_v18  ;;  %v7739_v47 = vpack.c.bf16 %v2672_v49, %v2668_v38  ;;  %v2671_v24 = vld [vmem:[#allocation8 + $0x3a0] sm:$0xff]  ;;  %v2680_v18 = vld [vmem:[#allocation8 + $0x3e8] sm:$0xff]  ;;  %v2678_v38 = vld [vmem:[#allocation8 + $0x3d8] sm:$0xff] }
 0x511   :  { %8834 = vst [vmem:[#allocation60_spill] sm:$0xff] %v7728_v50  ;;  %8835 = vst [vmem:[#allocation61_spill] sm:$0xff] %v7731_v2  ;;  %v7744_v35 = vpack.c.bf16 %v2671_v24, %v2667_v29  ;;  %v2679_v29 = vld [vmem:[#allocation8 + $0x3e0] sm:$0xff]  ;;  %v2677_v24 = vld [vmem:[#allocation8 + $0x3d0] sm:$0xff] }
 0x512   :  { %5530 = vmatpush1.bf16.msra.mxu0 %v7721_v4  ;;  %5594 = vmatpush1.bf16.msra.mxu1 %v7724_v0  ;;  %v2670_v4 = vld [vmem:[#allocation8 + $0x398] sm:$0xff]  ;;  %v2673_v0 = vld [vmem:[#allocation8 + $0x3b0] sm:$0xff] }
 0x513   :  { %5532 = vmatprep.subr.bf16.mxu0 %v7728_v50  ;;  %5596 = vmatprep.subr.bf16.mxu1 %v7731_v2  ;;  %v7741_v34 = vpack.c.bf16 %v2674_v61, %v2670_v4  ;;  %8837 = vst [vmem:[#allocation63_spill] sm:$0xff] %v7744_v35  ;;  %v2676_v50 = vld [vmem:[#allocation8 + $0x3c8] sm:$0xff]  ;;  %v7748_v41 = vpack.c.bf16 %v2673_v0, %v2669_v39  ;;  %v2682_v4 = vld [vmem:[#allocation8 + $0x3f8] sm:$0xff]  ;;  %v2675_v61 = vld [vmem:[#allocation8 + $0x3c0] sm:$0xff] }
 0x514   :  { %v7750_v49 = vpack.c.bf16 %v2680_v18, %v2676_v50  ;;  %v7753_v2 = vpack.c.bf16 %v2682_v4, %v2678_v38  ;;  %v7756_v31 = vpack.c.bf16 %v2679_v29, %v2675_v61  ;;  %v2120_v0 = vld [vmem:[#allocation10] sm:$0xf] }
 0x515   :  { %8838 = vst [vmem:[#allocation64_spill] sm:$0xff] %v7748_v41  ;;  %v2125_v39 = vrot.slane %v2120_v0, %v8787_v45  ;;  %v2129_v18 = vrot.slane %v2120_v0, %v8788_v55 }
 0x516   :  { %5534 = vmatpush1.bf16.msra.mxu0 %v7733_v17  ;;  %5598 = vmatpush1.bf16.msra.mxu1 %v7736_v15  ;;  %8839 = vst [vmem:[#allocation65_spill] sm:$0xff] %v7750_v49  ;;  %8840 = vst [vmem:[#allocation66_spill] sm:$0xff] %v7753_v2  ;;  %v2681_v17 = vld [vmem:[#allocation8 + $0x3f0] sm:$0xff] }
 0x517   :  { %5536 = vmatprep.subr.bf16.mxu0 %v7739_v47  ;;  %5600 = vmatprep.subr.bf16.mxu1 %v7741_v34  ;;  %8841 = vst [vmem:[#allocation67_spill] sm:$0xff] %v7756_v31  ;;  %v7760_v50 = vpack.c.bf16 %v2681_v17, %v2677_v24 }
 0x519   :  { %8842 = vst [vmem:[#allocation68_spill] sm:$0xff] %v7760_v50 }
 0x51a   :  { %5538 = vmatpush1.bf16.msra.mxu0 %v7744_v35  ;;  %5602 = vmatpush1.bf16.msra.mxu1 %v7748_v41 }
 0x51b   :  { %5540 = vmatprep.subr.bf16.mxu0 %v7750_v49  ;;  %5604 = vmatprep.subr.bf16.mxu1 %v7753_v2 }
 0x51e   :  { %5542 = vmatpush1.bf16.msra.mxu0 %v7756_v31  ;;  %5606 = vmatpush1.bf16.msra.mxu1 %v7760_v50  ;;  %v2137_v31 = vrot.slane %v2120_v0, %v7008_v8 }
 0x51f   :  { %5608 = vmatprep.subr.bf16.mxu0 %v7445_v62  ;;  %5640 = vmatprep.subr.bf16.mxu1 %v7447_v42  ;;  %v2133_v42 = vrot.slane %v2120_v0, %v7011_v37 }
 0x594   :  { %v2208_v38 = vpop.f32.mrb[14].mxu0  ;;  %v2279_v4 = vpop.f32.mrb[14].mxu1 }
 0x595   :  { %v2209_v61 = vadd.f32 %v2208_v38, %v2125_v39  ;;  %v2210_v17 = vpop.f32.mrb[15].mxu0  ;;  %v2281_v29 = vpop.f32.mrb[15].mxu1  ;;  %v2280_v41 = vadd.f32 %v2279_v4, %v2133_v42  ;;  %v4610_v42 = vld [vmem:[%s8358_s0 + $0x98] sm:$0xff] }
 0x596   :  { %v2211_v24 = vadd.f32 %v2210_v17, %v2129_v18  ;;  %v2282_v62 = vadd.f32 %v2281_v29, %v2137_v31 }
 0x597   :  { %v4604_v2 = vmul.f32 -1.442695, %v2209_v61 }
 0x598   :  { %v4605_v49 = vmul.f32 -1.442695, %v2211_v24  ;;  %v4606_v50 = vmul.f32 -1.442695, %v2282_v62 }
 0x599   :  { %6301 = vpow2.f32 %v4604_v2 }
 0x59a   :  { %6303 = vpow2.f32 %v4605_v49  ;;  %v4607_v49 = vld [vmem:[%s8358_s0 + $0x80] sm:$0xff] }
 0x59b   :  { %6305 = vpow2.f32 %v4606_v50 }
 0x59c   :  { %6307 = vtanh.f32 %v2280_v41 }
 0x5a3   :  { %v6302_v45 = vpop.eup %6301 }
 0x5a4   :  { %v6304_v35 = vpop.eup %6303  ;;  %v2290_v55 = vadd.f32 1.0, %v6302_v45  ;;  %v4608_v45 = vld [vmem:[%s8358_s0 + $0x88] sm:$0xff] }
 0x5a5   :  { %v2291_v39 = vadd.f32 1.0, %v6304_v35  ;;  %v6306_v18 = vpop.eup %6305 }
 0x5a6   :  { %6309 = vrcp.f32 %v2290_v55  ;;  %v6308_v38 = vpop.eup %6307  ;;  %v2300_v2 = vadd.f32 1.0, %v6306_v18  ;;  %v4609_v18 = vld [vmem:[%s8358_s0 + $0x90] sm:$0xff] }
 0x5a7   :  { %6311 = vrcp.f32 %v2291_v39 }
 0x5a8   :  { %6313 = vrcp.f32 %v2300_v2 }
 0x5b0   :  { %v6310_v61 = vpop.eup %6309 }
 0x5b1   :  { %v6312_v17 = vpop.eup %6311  ;;  %v2305_v24 = vmul.f32 %v6310_v61, %v6308_v38 }
 0x5b2   :  { %v2304_v31 = vmul.f32 %v6312_v17, %v7462_v7  ;;  %v6314_v38 = vpop.eup %6313 }
 0x5b4   :  { %v2447_v41 = vpop.f32.mrb[16].mxu0  ;;  %v2518_v35 = vpop.f32.mrb[16].mxu1  ;;  %v7778_v55 = vadd.f32 %v2305_v24, %v2304_v31 }
 0x5b5   :  { %v2523_v50 = vadd.f32 %v4607_v49, %v2447_v41  ;;  %v2449_v0 = vpop.f32.mrb[17].mxu0  ;;  %v2520_v4 = vpop.f32.mrb[17].mxu1  ;;  %v2525_v24 = vadd.f32 %v4609_v18, %v2518_v35 }
 0x5b6   :  { %v2524_v29 = vadd.f32 %v4608_v45, %v2449_v0  ;;  %6315 = vtanh.f32 %v7778_v55  ;;  %v2526_v39 = vadd.f32 %v4610_v42, %v2520_v4 }
 0x5b7   :  { %v4611_v7 = vmul.f32 -1.442695, %v2523_v50 }
 0x5b8   :  { %v4612_v62 = vmul.f32 -1.442695, %v2524_v29  ;;  %v4613_v17 = vmul.f32 -1.442695, %v2526_v39 }
 0x5b9   :  { %6317 = vpow2.f32 %v4611_v7 }
 0x5ba   :  { %6319 = vpow2.f32 %v4612_v62 }
 0x5bb   :  { %6321 = vpow2.f32 %v4613_v17  ;;  %v8882_v17 = vld [vmem:[#allocation54_spill] sm:$0xff] }
 0x5bc   :  { %6323 = vtanh.f32 %v2525_v24  ;;  %v8883_v24 = vld [vmem:[#allocation55_spill] sm:$0xff] }
 0x5c0   :  { %v6316_v61 = vpop.eup %6315 }
 0x5c1   :  { %v2308_v2 = vmul.f32 %v6316_v61, %v6314_v38  ;;  %v8881_v61 = vld [vmem:[#allocation53_spill] sm:$0xff] }
 0x5c3   :  { %v6318_v31 = vpop.eup %6317  ;;  %2769 = vmatprep.mubr.f32.mxu0 %v2308_v2  ;;  %2840 = vmatprep.mubr.f32.mxu1 %v2308_v2  ;;  %v8884_v2 = vld [vmem:[#allocation56_spill] sm:$0xff] }
 0x5c4   :  { %v6320_v49 = vpop.eup %6319  ;;  %v2533_v45 = vadd.f32 1.0, %v6318_v31  ;;  %v8885_v31 = vld [vmem:[#allocation57_spill] sm:$0xff] }
 0x5c5   :  { %v2534_v41 = vadd.f32 1.0, %v6320_v49  ;;  %v6322_v50 = vpop.eup %6321  ;;  %v8886_v49 = vld [vmem:[#allocation58_spill] sm:$0xff] }
 0x5c6   :  { %6325 = vrcp.f32 %v2533_v45  ;;  %v6324_v0 = vpop.eup %6323  ;;  %v2543_v62 = vadd.f32 1.0, %v6322_v50  ;;  %v8887_v45 = vld [vmem:[#allocation59_spill] sm:$0xff]  ;;  %v8889_v50 = vld [vmem:[#allocation61_spill] sm:$0xff] }
 0x5c7   :  { %6327 = vrcp.f32 %v2534_v41  ;;  %v8888_v41 = vld [vmem:[#allocation60_spill] sm:$0xff] }
 0x5c8   :  { %6329 = vrcp.f32 %v2543_v62  ;;  %v8894_v62 = vld [vmem:[#allocation66_spill] sm:$0xff] }
 0x5d0   :  { %v6326_v4 = vpop.eup %6325 }
 0x5d1   :  { %v6328_v29 = vpop.eup %6327  ;;  %v2548_v7 = vmul.f32 %v6326_v4, %v6324_v0  ;;  %v8890_v0 = vld [vmem:[#allocation62_spill] sm:$0xff]  ;;  %v8891_v4 = vld [vmem:[#allocation63_spill] sm:$0xff] }
 0x5d2   :  { %v2547_v42 = vmul.f32 %v6328_v29, %v7472_v52  ;;  %v6330_v39 = vpop.eup %6329  ;;  %v8843_v52 = vld [vmem:[#allocation16_spill] sm:$0xff] }
 0x5d3   :  { %v8892_v29 = vld [vmem:[#allocation64_spill] sm:$0xff] }
 0x5d4   :  { %v7788_v35 = vadd.f32 %v2548_v7, %v2547_v42  ;;  %v8893_v7 = vld [vmem:[#allocation65_spill] sm:$0xff]  ;;  %v8895_v42 = vld [vmem:[#allocation67_spill] sm:$0xff] }
 0x5d6   :  { %6331 = vtanh.f32 %v7788_v35 }
 0x5e0   :  { %v6332_v18 = vpop.eup %6331 }
 0x5e1   :  { %v2551_v38 = vmul.f32 %v6332_v18, %v6330_v39  ;;  %v8896_v39 = vld [vmem:[#allocation68_spill] sm:$0xff]  ;;  %v3444_v18 = vld [vmem:[#allocation6 + $0x8] sm:$0xff] }
 0x5e3   :  { %2770 = vmatmul.mubr.f32.vlgmr.msra.gmra.mrb[18].mxu0 %v2551_v38  ;;  %2841 = vmatmul.mubr.f32.vlgmr.msra.gmra.mrb[18].mxu1 %v2551_v38 }
 0x5e4   :  { %5610 = vmatpush1.bf16.msra.mxu0 %v7475_v57  ;;  %5642 = vmatpush1.bf16.msra.mxu1 %v7477_v11  ;;  %v8844_v57 = vld [vmem:[#allocation14_spill] sm:$0xff]  ;;  %v8845_v11 = vld [vmem:[#allocation17_spill] sm:$0xff] }
 0x5e5   :  { %5612 = vmatprep.subr.bf16.mxu0 %v7481_v30  ;;  %5644 = vmatprep.subr.bf16.mxu1 %v7483_v33  ;;  %v8846_v30 = vld [vmem:[#allocation18_spill] sm:$0xff]  ;;  %v8847_v33 = vld [vmem:[#allocation19_spill] sm:$0xff] }
 0x5e6   :  { %3008 = vmatprep.mubr.f32.mxu0 %v8629_v56  ;;  %3079 = vmatprep.mubr.f32.mxu1 %v8629_v56 }
 0x5e8   :  { %5614 = vmatpush1.bf16.msra.mxu0 %v7489_v16  ;;  %5646 = vmatpush1.bf16.msra.mxu1 %v7491_v32  ;;  %v8848_v16 = vld [vmem:[#allocation20_spill] sm:$0xff]  ;;  %v8849_v32 = vld [vmem:[#allocation21_spill] sm:$0xff] }
 0x5e9   :  { %5616 = vmatprep.subr.bf16.mxu0 %v7495_v9  ;;  %5648 = vmatprep.subr.bf16.mxu1 %v7497_v46  ;;  %v8850_v9 = vld [vmem:[#allocation22_spill] sm:$0xff]  ;;  %v8851_v46 = vld [vmem:[#allocation23_spill] sm:$0xff] }
 0x5ec   :  { %5618 = vmatpush1.bf16.msra.mxu0 %v7503_v48  ;;  %5650 = vmatpush1.bf16.msra.mxu1 %v7505_v23  ;;  %v8852_v48 = vld [vmem:[#allocation24_spill] sm:$0xff]  ;;  %v8853_v23 = vld [vmem:[#allocation25_spill] sm:$0xff] }
 0x5ed   :  { %5620 = vmatprep.subr.bf16.mxu0 %v7509_v25  ;;  %5652 = vmatprep.subr.bf16.mxu1 %v7511_v53  ;;  %v8854_v25 = vld [vmem:[#allocation26_spill] sm:$0xff]  ;;  %v8855_v53 = vld [vmem:[#allocation27_spill] sm:$0xff] }
 0x5f0   :  { %5622 = vmatpush1.bf16.msra.mxu0 %v7515_v63  ;;  %5654 = vmatpush1.bf16.msra.mxu1 %v7517_v19  ;;  %v8856_v63 = vld [vmem:[#allocation28_spill] sm:$0xff]  ;;  %v8857_v19 = vld [vmem:[#allocation29_spill] sm:$0xff] }
 0x5f1   :  { %5624 = vmatprep.subr.bf16.mxu0 %v7521_v27  ;;  %5656 = vmatprep.subr.bf16.mxu1 %v7523_v12  ;;  %v8858_v27 = vld [vmem:[#allocation30_spill] sm:$0xff]  ;;  %v8859_v12 = vld [vmem:[#allocation31_spill] sm:$0xff] }
 0x5f4   :  { %5626 = vmatpush1.bf16.msra.mxu0 %v7527_v20  ;;  %5658 = vmatpush1.bf16.msra.mxu1 %v7529_v21  ;;  %v8860_v20 = vld [vmem:[#allocation32_spill] sm:$0xff]  ;;  %v8861_v21 = vld [vmem:[#allocation33_spill] sm:$0xff] }
 0x5f5   :  { %5628 = vmatprep.subr.bf16.mxu0 %v7533_v22  ;;  %5660 = vmatprep.subr.bf16.mxu1 %v7535_v44  ;;  %v8862_v22 = vld [vmem:[#allocation34_spill] sm:$0xff]  ;;  %v8863_v44 = vld [vmem:[#allocation35_spill] sm:$0xff] }
 0x5f8   :  { %5630 = vmatpush1.bf16.msra.mxu0 %v7539_v54  ;;  %5662 = vmatpush1.bf16.msra.mxu1 %v7541_v59  ;;  %v8864_v54 = vld [vmem:[#allocation36_spill] sm:$0xff]  ;;  %v8865_v59 = vld [vmem:[#allocation37_spill] sm:$0xff] }
 0x5f9   :  { %5632 = vmatprep.subr.bf16.mxu0 %v7545_v58  ;;  %5664 = vmatprep.subr.bf16.mxu1 %v7547_v60  ;;  %v8866_v58 = vld [vmem:[#allocation38_spill] sm:$0xff]  ;;  %v8867_v60 = vld [vmem:[#allocation39_spill] sm:$0xff] }
 0x5fc   :  { %5634 = vmatpush1.bf16.msra.mxu0 %v7551_v5  ;;  %5666 = vmatpush1.bf16.msra.mxu1 %v7553_v26  ;;  %v8868_v5 = vld [vmem:[#allocation40_spill] sm:$0xff]  ;;  %v8869_v26 = vld [vmem:[#allocation41_spill] sm:$0xff] }
 0x5fd   :  { %5636 = vmatprep.subr.bf16.mxu0 %v7557_v6  ;;  %5668 = vmatprep.subr.bf16.mxu1 %v7559_v36  ;;  %v8870_v6 = vld [vmem:[#allocation42_spill] sm:$0xff]  ;;  %v8871_v36 = vld [vmem:[#allocation43_spill] sm:$0xff] }
 0x600   :  { %5638 = vmatpush1.bf16.msra.mxu0 %v7563_v1  ;;  %5670 = vmatpush1.bf16.msra.mxu1 %v7565_v40  ;;  %v8872_v1 = vld [vmem:[#allocation44_spill] sm:$0xff]  ;;  %v8873_v40 = vld [vmem:[#allocation45_spill] sm:$0xff] }
 0x601   :  { %5672 = vmatprep.subr.bf16.mxu0 %v7573_v43  ;;  %5736 = vmatprep.subr.bf16.mxu1 %v7575_v14  ;;  %v8874_v43 = vld [vmem:[#allocation46_spill] sm:$0xff]  ;;  %v8875_v14 = vld [vmem:[#allocation47_spill] sm:$0xff] }
 0x603   :  { %3009 = vmatmul.mubr.f32.vlgmr.msra.gmra.mrb[20].mxu0 %v2551_v38  ;;  %3080 = vmatmul.mubr.f32.vlgmr.msra.gmra.mrb[20].mxu1 %v2551_v38  ;;  %v3448_v38 = vld [vmem:[#allocation6 + $0x28] sm:$0xff] }
 0x604   :  { %5674 = vmatpush1.bf16.msra.mxu0 %v7577_v10  ;;  %5738 = vmatpush1.bf16.msra.mxu1 %v7580_v51  ;;  %v8876_v10 = vld [vmem:[#allocation48_spill] sm:$0xff]  ;;  %v8877_v51 = vld [vmem:[#allocation49_spill] sm:$0xff] }
 0x605   :  { %5676 = vmatprep.subr.bf16.mxu0 %v7585_v28  ;;  %5740 = vmatprep.subr.bf16.mxu1 %v7587_v13  ;;  %v8878_v28 = vld [vmem:[#allocation50_spill] sm:$0xff]  ;;  %v8879_v13 = vld [vmem:[#allocation51_spill] sm:$0xff] }
 0x608   :  { %5678 = vmatpush1.bf16.msra.mxu0 %v7589_v3  ;;  %5742 = vmatpush1.bf16.msra.mxu1 %v8843_v52  ;;  %v8880_v3 = vld [vmem:[#allocation52_spill] sm:$0xff] }
 0x609   :  { %5680 = vmatprep.subr.bf16.mxu0 %v8844_v57  ;;  %5744 = vmatprep.subr.bf16.mxu1 %v8845_v11  ;;  %v3446_v52 = vld [vmem:[#allocation6 + $0x18] sm:$0xff] }
 0x60a   :  { %v8897_v11 = vld [vmem:[#allocation15_spill] sm:$0xff] }
 0x60c   :  { %5682 = vmatpush1.bf16.msra.mxu0 %v8846_v30  ;;  %5746 = vmatpush1.bf16.msra.mxu1 %v8847_v33  ;;  %v8898_v33 = vld [vmem:[#allocation13_spill] sm:$0xff] }
 0x60d   :  { %5684 = vmatprep.subr.bf16.mxu0 %v8848_v16  ;;  %5748 = vmatprep.subr.bf16.mxu1 %v8849_v32 }
 0x610   :  { %5686 = vmatpush1.bf16.msra.mxu0 %v8850_v9  ;;  %5750 = vmatpush1.bf16.msra.mxu1 %v8851_v46 }
 0x611   :  { %5688 = vmatprep.subr.bf16.mxu0 %v8852_v48  ;;  %5752 = vmatprep.subr.bf16.mxu1 %v8853_v23 }
 0x614   :  { %5690 = vmatpush1.bf16.msra.mxu0 %v8854_v25  ;;  %5754 = vmatpush1.bf16.msra.mxu1 %v8855_v53 }
 0x615   :  { %5692 = vmatprep.subr.bf16.mxu0 %v8856_v63  ;;  %5756 = vmatprep.subr.bf16.mxu1 %v8857_v19 }
 0x618   :  { %5694 = vmatpush1.bf16.msra.mxu0 %v8858_v27  ;;  %5758 = vmatpush1.bf16.msra.mxu1 %v8859_v12 }
 0x619   :  { %5696 = vmatprep.subr.bf16.mxu0 %v8860_v20  ;;  %5760 = vmatprep.subr.bf16.mxu1 %v8861_v21 }
 0x61c   :  { %5698 = vmatpush1.bf16.msra.mxu0 %v8862_v22  ;;  %5762 = vmatpush1.bf16.msra.mxu1 %v8863_v44 }
 0x61d   :  { %5700 = vmatprep.subr.bf16.mxu0 %v8864_v54  ;;  %5764 = vmatprep.subr.bf16.mxu1 %v8865_v59 }
 0x620   :  { %5702 = vmatpush1.bf16.msra.mxu0 %v8866_v58  ;;  %5766 = vmatpush1.bf16.msra.mxu1 %v8867_v60 }
 0x621   :  { %5704 = vmatprep.subr.bf16.mxu0 %v8868_v5  ;;  %5768 = vmatprep.subr.bf16.mxu1 %v8869_v26 }
 0x624   :  { %5706 = vmatpush1.bf16.msra.mxu0 %v8870_v6  ;;  %5770 = vmatpush1.bf16.msra.mxu1 %v8871_v36 }
 0x625   :  { %5708 = vmatprep.subr.bf16.mxu0 %v8872_v1  ;;  %5772 = vmatprep.subr.bf16.mxu1 %v8873_v40  ;;  %v4617_v40 = vld [vmem:[%s8358_s0 + $0xa0] sm:$0xff] }
 0x628   :  { %5710 = vmatpush1.bf16.msra.mxu0 %v8874_v43  ;;  %5774 = vmatpush1.bf16.msra.mxu1 %v8875_v14  ;;  %v4618_v43 = vld [vmem:[%s8358_s0 + $0xa8] sm:$0xff] }
 0x629   :  { %5712 = vmatprep.subr.bf16.mxu0 %v8876_v10  ;;  %5776 = vmatprep.subr.bf16.mxu1 %v8877_v51 }
 0x62c   :  { %5714 = vmatpush1.bf16.msra.mxu0 %v8878_v28  ;;  %5778 = vmatpush1.bf16.msra.mxu1 %v8879_v13 }
 0x62d   :  { %5716 = vmatprep.subr.bf16.mxu0 %v8880_v3  ;;  %5780 = vmatprep.subr.bf16.mxu1 %v8881_v61 }
 0x630   :  { %5718 = vmatpush1.bf16.msra.mxu0 %v8882_v17  ;;  %5782 = vmatpush1.bf16.msra.mxu1 %v8883_v24  ;;  %v4620_v24 = vld [vmem:[%s8358_s0 + $0xb8] sm:$0xff] }
 0x631   :  { %5720 = vmatprep.subr.bf16.mxu0 %v8884_v2  ;;  %5784 = vmatprep.subr.bf16.mxu1 %v8885_v31  ;;  %v4619_v31 = vld [vmem:[%s8358_s0 + $0xb0] sm:$0xff] }
 0x634   :  { %5722 = vmatpush1.bf16.msra.mxu0 %v8886_v49  ;;  %5786 = vmatpush1.bf16.msra.mxu1 %v8887_v45 }
 0x635   :  { %5724 = vmatprep.subr.bf16.mxu0 %v8888_v41  ;;  %5788 = vmatprep.subr.bf16.mxu1 %v8889_v50 }
 0x638   :  { %5726 = vmatpush1.bf16.msra.mxu0 %v8890_v0  ;;  %5790 = vmatpush1.bf16.msra.mxu1 %v7736_v15  ;;  %v7887_v15 = vpack.c.bf16 %v3448_v38, %v3444_v18 }
 0x639   :  { %5728 = vmatprep.subr.bf16.mxu0 %v7739_v47  ;;  %5792 = vmatprep.subr.bf16.mxu1 %v7741_v34  ;;  %v3450_v47 = vld [vmem:[#allocation6 + $0x38] sm:$0xff]  ;;  %v2683_v34 = vld [vmem:[#allocation10] sm:$0xf] }
 0x63a   :  { %v7889_v57 = vpack.c.bf16 %v3450_v47, %v3446_v52  ;;  %v2688_v30 = vrot.slane %v2683_v34, %v8897_v11  ;;  %v2692_v16 = vrot.slane %v2683_v34, %v8898_v33  ;;  %v2700_v19 = vrot.slane %v2683_v34, %v7008_v8 }
 0x63b   :  { %v2696_v12 = vrot.slane %v2683_v34, %v7011_v37 }
 0x63c   :  { %5730 = vmatpush1.bf16.msra.mxu0 %v8891_v4  ;;  %5794 = vmatpush1.bf16.msra.mxu1 %v8892_v29 }
 0x63d   :  { %5732 = vmatprep.subr.bf16.mxu0 %v8893_v7  ;;  %5796 = vmatprep.subr.bf16.mxu1 %v8894_v62 }
 0x640   :  { %5734 = vmatpush1.bf16.msra.mxu0 %v8895_v42  ;;  %5798 = vmatpush1.bf16.msra.mxu1 %v8896_v39 }
 0x641   :  { %5800 = vmatprep.subr.bf16.mxu0 %v7887_v15  ;;  %5832 = vmatprep.subr.bf16.mxu1 %v7889_v57 }
 0x6b6   :  { %v2771_v32 = vpop.f32.mrb[18].mxu0  ;;  %v2842_v9 = vpop.f32.mrb[18].mxu1 }
 0x6b7   :  { %v2772_v46 = vadd.f32 %v2771_v32, %v2688_v30  ;;  %v2773_v48 = vpop.f32.mrb[19].mxu0  ;;  %v2844_v23 = vpop.f32.mrb[19].mxu1  ;;  %v2843_v21 = vadd.f32 %v2842_v9, %v2696_v12  ;;  %v3447_v32 = vld [vmem:[#allocation6 + $0x20] sm:$0xff]  ;;  %v3445_v9 = vld [vmem:[#allocation6 + $0x10] sm:$0xff] }
 0x6b8   :  { %v2774_v25 = vadd.f32 %v2773_v48, %v2692_v16  ;;  %v2845_v27 = vadd.f32 %v2844_v23, %v2700_v19  ;;  %v3443_v16 = vld [vmem:[#allocation6] sm:$0xff]  ;;  %v3452_v48 = vld [vmem:[#allocation6 + $0x48] sm:$0xff] }
 0x6b9   :  { %v4614_v53 = vmul.f32 -1.442695, %v2772_v46  ;;  %v3449_v46 = vld [vmem:[#allocation6 + $0x30] sm:$0xff]  ;;  %v3456_v23 = vld [vmem:[#allocation6 + $0x68] sm:$0xff] }
 0x6ba   :  { %v4615_v63 = vmul.f32 -1.442695, %v2774_v25  ;;  %v4616_v20 = vmul.f32 -1.442695, %v2845_v27  ;;  %v3454_v25 = vld [vmem:[#allocation6 + $0x58] sm:$0xff]  ;;  %v7917_v27 = vpack.c.bf16 %v3447_v32, %v3443_v16  ;;  %v7919_v12 = vpack.c.bf16 %v3449_v46, %v3445_v9  ;;  %v3484_v16 = vld [vmem:[#allocation6 + $0x148] sm:$0xff] }
 0x6bb   :  { %6333 = vpow2.f32 %v4614_v53  ;;  %v3458_v53 = vld [vmem:[#allocation6 + $0x78] sm:$0xff]  ;;  %v3488_v32 = vld [vmem:[#allocation6 + $0x168] sm:$0xff] }
 0x6bc   :  { %6335 = vpow2.f32 %v4615_v63  ;;  %v3486_v9 = vld [vmem:[#allocation6 + $0x158] sm:$0xff] }
 0x6bd   :  { %6337 = vpow2.f32 %v4616_v20  ;;  %v3455_v20 = vld [vmem:[#allocation6 + $0x60] sm:$0xff]  ;;  %v3490_v46 = vld [vmem:[#allocation6 + $0x178] sm:$0xff] }
 0x6be   :  { %6339 = vtanh.f32 %v2843_v21 }
 0x6c5   :  { %v6334_v22 = vpop.eup %6333 }
 0x6c6   :  { %v6336_v44 = vpop.eup %6335  ;;  %v2853_v54 = vadd.f32 1.0, %v6334_v22  ;;  %v7923_v22 = vpack.c.bf16 %v3456_v23, %v3452_v48 }
 0x6c7   :  { %v2854_v59 = vadd.f32 1.0, %v6336_v44  ;;  %v6338_v58 = vpop.eup %6337  ;;  %v7925_v44 = vpack.c.bf16 %v3458_v53, %v3454_v25  ;;  %v3483_v25 = vld [vmem:[#allocation6 + $0x140] sm:$0xff] }
 0x6c8   :  { %6341 = vrcp.f32 %v2853_v54  ;;  %v6340_v60 = vpop.eup %6339  ;;  %v2863_v36 = vadd.f32 1.0, %v6338_v58  ;;  %v3453_v54 = vld [vmem:[#allocation6 + $0x50] sm:$0xff]  ;;  %v3460_v58 = vld [vmem:[#allocation6 + $0x88] sm:$0xff]  ;;  %v3487_v53 = vld [vmem:[#allocation6 + $0x160] sm:$0xff] }
 0x6c9   :  { %6343 = vrcp.f32 %v2854_v59  ;;  %v3457_v59 = vld [vmem:[#allocation6 + $0x70] sm:$0xff] }
 0x6ca   :  { %6345 = vrcp.f32 %v2863_v36  ;;  %v7933_v36 = vpack.c.bf16 %v3457_v59, %v3453_v54  ;;  %v3492_v54 = vld [vmem:[#allocation6 + $0x188] sm:$0xff] }
 0x6cb   :  { %v3496_v59 = vld [vmem:[#allocation6 + $0x1a8] sm:$0xff] }
 0x6d2   :  { %v6342_v5 = vpop.eup %6341 }
 0x6d3   :  { %v6344_v26 = vpop.eup %6343  ;;  %v2868_v6 = vmul.f32 %v6342_v5, %v6340_v60  ;;  %v3464_v60 = vld [vmem:[#allocation6 + $0xa8] sm:$0xff]  ;;  %v3462_v5 = vld [vmem:[#allocation6 + $0x98] sm:$0xff] }
 0x6d4   :  { %v2867_v1 = vmul.f32 %v6344_v26, %v7778_v55  ;;  %v6346_v49 = vpop.eup %6345  ;;  %v3466_v26 = vld [vmem:[#allocation6 + $0xb8] sm:$0xff] }
 0x6d6   :  { %v3010_v14 = vpop.f32.mrb[20].mxu0  ;;  %v3081_v10 = vpop.f32.mrb[20].mxu1  ;;  %v7904_v51 = vadd.f32 %v2868_v6, %v2867_v1  ;;  %v3459_v1 = vld [vmem:[#allocation6 + $0x80] sm:$0xff] }
 0x6d7   :  { %v3086_v28 = vadd.f32 %v4617_v40, %v3010_v14  ;;  %v3012_v13 = vpop.f32.mrb[21].mxu0  ;;  %v3083_v3 = vpop.f32.mrb[21].mxu1  ;;  %v3088_v50 = vadd.f32 %v4619_v31, %v3081_v10  ;;  %v3463_v40 = vld [vmem:[#allocation6 + $0xa0] sm:$0xff]  ;;  %v7939_v14 = vpack.c.bf16 %v3466_v26, %v3462_v5  ;;  %v3461_v10 = vld [vmem:[#allocation6 + $0x90] sm:$0xff]  ;;  %v7981_v5 = vpack.c.bf16 %v3487_v53, %v3483_v25  ;;  %v3688_v25 = vld [vmem:[#allocation8 + $0x38] sm:$0xff] }
 0x6d8   :  { %v3087_v61 = vadd.f32 %v4618_v43, %v3012_v13  ;;  %6347 = vtanh.f32 %v7904_v51  ;;  %v3089_v2 = vadd.f32 %v4620_v24, %v3083_v3  ;;  %v7937_v43 = vpack.c.bf16 %v3464_v60, %v3460_v58  ;;  %v3468_v13 = vld [vmem:[#allocation6 + $0xc8] sm:$0xff]  ;;  %v3471_v31 = vld [vmem:[#allocation6 + $0xe0] sm:$0xff]  ;;  %v3494_v58 = vld [vmem:[#allocation6 + $0x198] sm:$0xff] }
 0x6d9   :  { %v4621_v55 = vmul.f32 -1.442695, %v3086_v28  ;;  %v3465_v28 = vld [vmem:[#allocation6 + $0xb0] sm:$0xff]  ;;  %v3472_v3 = vld [vmem:[#allocation6 + $0xe8] sm:$0xff]  ;;  %v3498_v60 = vld [vmem:[#allocation6 + $0x1b8] sm:$0xff] }
 0x6da   :  { %v4622_v17 = vmul.f32 -1.442695, %v3087_v61  ;;  %v4623_v41 = vmul.f32 -1.442695, %v3089_v2  ;;  %v3470_v61 = vld [vmem:[#allocation6 + $0xd8] sm:$0xff]  ;;  %v7947_v24 = vpack.c.bf16 %v3465_v28, %v3461_v10  ;;  %v3467_v2 = vld [vmem:[#allocation6 + $0xc0] sm:$0xff]  ;;  %v7987_v10 = vpack.c.bf16 %v3496_v59, %v3492_v54 }
 0x6db   :  { %6349 = vpow2.f32 %v4621_v55  ;;  %v3474_v55 = vld [vmem:[#allocation6 + $0xf8] sm:$0xff]  ;;  %v7989_v28 = vpack.c.bf16 %v3498_v60, %v3494_v58  ;;  %v3681_v53 = vld [vmem:[#allocation8] sm:$0xff]  ;;  %v3683_v59 = vld [vmem:[#allocation8 + $0x10] sm:$0xff] }
 0x6dc   :  { %6351 = vpow2.f32 %v4622_v17  ;;  %v7945_v17 = vpack.c.bf16 %v3463_v40, %v3459_v1  ;;  %v3491_v1 = vld [vmem:[#allocation6 + $0x180] sm:$0xff]  ;;  %v3687_v58 = vld [vmem:[#allocation8 + $0x30] sm:$0xff] }
 0x6dd   :  { %6353 = vpow2.f32 %v4623_v41  ;;  %v3469_v41 = vld [vmem:[#allocation6 + $0xd0] sm:$0xff]  ;;  %v3495_v40 = vld [vmem:[#allocation6 + $0x1a0] sm:$0xff]  ;;  %v8022_v60 = vpack.c.bf16 %v3687_v58, %v3683_v59 }
 0x6de   :  { %6355 = vtanh.f32 %v3088_v50  ;;  %v3473_v50 = vld [vmem:[#allocation6 + $0xf0] sm:$0xff] }
 0x6e2   :  { %v6348_v45 = vpop.eup %6347 }
 0x6e3   :  { %v2871_v0 = vmul.f32 %v6348_v45, %v6346_v49  ;;  %v7951_v49 = vpack.c.bf16 %v3472_v3, %v3468_v13  ;;  %v7953_v45 = vpack.c.bf16 %v3474_v55, %v3470_v61  ;;  %v3493_v13 = vld [vmem:[#allocation6 + $0x190] sm:$0xff]  ;;  %v3500_v61 = vld [vmem:[#allocation6 + $0x1c8] sm:$0xff] }
 0x6e4   :  { %v3497_v3 = vld [vmem:[#allocation6 + $0x1b0] sm:$0xff]  ;;  %v3504_v55 = vld [vmem:[#allocation6 + $0x1e8] sm:$0xff] }
 0x6e5   :  { %v6350_v4 = vpop.eup %6349  ;;  %3332 = vmatprep.mubr.f32.mxu0 %v2871_v0  ;;  %3403 = vmatprep.mubr.f32.mxu1 %v2871_v0  ;;  %v3476_v0 = vld [vmem:[#allocation6 + $0x108] sm:$0xff] }
 0x6e6   :  { %v6352_v29 = vpop.eup %6351  ;;  %v3096_v7 = vadd.f32 1.0, %v6350_v4  ;;  %v3480_v4 = vld [vmem:[#allocation6 + $0x128] sm:$0xff] }
 0x6e7   :  { %v3097_v62 = vadd.f32 1.0, %v6352_v29  ;;  %v6354_v42 = vpop.eup %6353  ;;  %v3478_v29 = vld [vmem:[#allocation6 + $0x118] sm:$0xff] }
 0x6e8   :  { %6357 = vrcp.f32 %v3096_v7  ;;  %v6356_v39 = vpop.eup %6355  ;;  %v3106_v47 = vadd.f32 1.0, %v6354_v42  ;;  %v3482_v7 = vld [vmem:[#allocation6 + $0x138] sm:$0xff]  ;;  %v7959_v42 = vpack.c.bf16 %v3473_v50, %v3469_v41  ;;  %v7993_v41 = vpack.c.bf16 %v3495_v40, %v3491_v1  ;;  %v3694_v1 = vld [vmem:[#allocation8 + $0x68] sm:$0xff] }
 0x6e9   :  { %6359 = vrcp.f32 %v3097_v62  ;;  %v7957_v62 = vpack.c.bf16 %v3471_v31, %v3467_v2  ;;  %v3502_v2 = vld [vmem:[#allocation6 + $0x1d8] sm:$0xff]  ;;  %v7995_v50 = vpack.c.bf16 %v3497_v3, %v3493_v13 }
 0x6ea   :  { %6361 = vrcp.f32 %v3106_v47  ;;  %v3477_v47 = vld [vmem:[#allocation6 + $0x110] sm:$0xff]  ;;  %v3506_v31 = vld [vmem:[#allocation6 + $0x1f8] sm:$0xff] }
 0x6eb   :  { %v3692_v40 = vld [vmem:[#allocation8 + $0x58] sm:$0xff] }
 0x6ec   :  { %v3696_v3 = vld [vmem:[#allocation8 + $0x78] sm:$0xff] }
 0x6f2   :  { %v6358_v18 = vpop.eup %6357 }
 0x6f3   :  { %v6360_v38 = vpop.eup %6359  ;;  %v3111_v52 = vmul.f32 %v6358_v18, %v6356_v39  ;;  %v3475_v39 = vld [vmem:[#allocation6 + $0x100] sm:$0xff] }
 0x6f4   :  { %v3110_v34 = vmul.f32 %v6360_v38, %v7788_v35  ;;  %v6362_v63 = vpop.eup %6361  ;;  %v3451_v35 = vld [vmem:[#allocation6 + $0x40] sm:$0xff]  ;;  %v7963_v38 = vpack.c.bf16 %v3480_v4, %v3476_v0  ;;  %v7999_v4 = vpack.c.bf16 %v3504_v55, %v3500_v61 }
 0x6f5   :  { %v7931_v6 = vpack.c.bf16 %v3455_v20, %v3451_v35  ;;  %v3479_v18 = vld [vmem:[#allocation6 + $0x120] sm:$0xff]  ;;  %v3485_v35 = vld [vmem:[#allocation6 + $0x150] sm:$0xff] }
 0x6f6   :  { %v7914_v30 = vadd.f32 %v3111_v52, %v3110_v34  ;;  %v7965_v52 = vpack.c.bf16 %v3482_v7, %v3478_v29  ;;  %v3481_v34 = vld [vmem:[#allocation6 + $0x130] sm:$0xff]  ;;  %v7969_v48 = vpack.c.bf16 %v3479_v18, %v3475_v39  ;;  %v3499_v0 = vld [vmem:[#allocation6 + $0x1c0] sm:$0xff]  ;;  %v8001_v29 = vpack.c.bf16 %v3506_v31, %v3502_v2 }
 0x6f7   :  { %v7971_v23 = vpack.c.bf16 %v3481_v34, %v3477_v47  ;;  %v3489_v20 = vld [vmem:[#allocation6 + $0x170] sm:$0xff]  ;;  %v3503_v7 = vld [vmem:[#allocation6 + $0x1e0] sm:$0xff]  ;;  %v8029_v2 = vpack.c.bf16 %v3696_v3, %v3692_v40  ;;  %v3706_v3 = vld [vmem:[#allocation8 + $0xc8] sm:$0xff] }
 0x6f8   :  { %6363 = vtanh.f32 %v7914_v30  ;;  %v7983_v26 = vpack.c.bf16 %v3489_v20, %v3485_v35  ;;  %v3501_v39 = vld [vmem:[#allocation6 + $0x1d0] sm:$0xff]  ;;  %v8005_v47 = vpack.c.bf16 %v3503_v7, %v3499_v0  ;;  %v3685_v35 = vld [vmem:[#allocation8 + $0x20] sm:$0xff] }
 0x6f9   :  { %v3505_v18 = vld [vmem:[#allocation6 + $0x1f0] sm:$0xff]  ;;  %v8019_v54 = vpack.c.bf16 %v3685_v35, %v3681_v53  ;;  %v3689_v61 = vld [vmem:[#allocation8 + $0x40] sm:$0xff] }
 0x6fa   :  { %v8007_v34 = vpack.c.bf16 %v3505_v18, %v3501_v39  ;;  %v3693_v55 = vld [vmem:[#allocation8 + $0x60] sm:$0xff]  ;;  %v3691_v0 = vld [vmem:[#allocation8 + $0x50] sm:$0xff]  ;;  %v3698_v18 = vld [vmem:[#allocation8 + $0x88] sm:$0xff] }
 0x6fb   :  { %v8031_v31 = vpack.c.bf16 %v3693_v55, %v3689_v61  ;;  %v3695_v7 = vld [vmem:[#allocation8 + $0x70] sm:$0xff]  ;;  %v3697_v53 = vld [vmem:[#allocation8 + $0x80] sm:$0xff]  ;;  %v3710_v61 = vld [vmem:[#allocation8 + $0xe8] sm:$0xff] }
 0x6fc   :  { %v8034_v39 = vpack.c.bf16 %v3695_v7, %v3691_v0  ;;  %v3701_v35 = vld [vmem:[#allocation8 + $0xa0] sm:$0xff]  ;;  %v3708_v55 = vld [vmem:[#allocation8 + $0xd8] sm:$0xff]  ;;  %v8051_v0 = vpack.c.bf16 %v3710_v61, %v3706_v3  ;;  %v3718_v3 = vld [vmem:[#allocation8 + $0x128] sm:$0xff] }
 0x6fd   :  { %v8043_v58 = vpack.c.bf16 %v3701_v35, %v3697_v53  ;;  %v3712_v7 = vld [vmem:[#allocation8 + $0xf8] sm:$0xff]  ;;  %v3707_v53 = vld [vmem:[#allocation8 + $0xd0] sm:$0xff] }
 0x6fe   :  { %8899 = vst [vmem:[#allocation16_spill] sm:$0xff] %v8034_v39  ;;  %8904 = vst [vmem:[#allocation20_spill] sm:$0xff] %v8051_v0  ;;  %v3711_v35 = vld [vmem:[#allocation8 + $0xf0] sm:$0xff]  ;;  %v3716_v61 = vld [vmem:[#allocation8 + $0x118] sm:$0xff] }
 0x6ff   :  { %8902 = vst [vmem:[#allocation18_spill] sm:$0xff] %v8043_v58 }
 0x702   :  { %v6364_v19 = vpop.eup %6363 }
 0x703   :  { %v7921_v21 = vmul.f32 %v6364_v19, %v6362_v63  ;;  %v7975_v63 = vpack.c.bf16 %v3488_v32, %v3484_v16  ;;  %v7977_v19 = vpack.c.bf16 %v3490_v46, %v3486_v9  ;;  %v3682_v16 = vld [vmem:[#allocation8 + $0x8] sm:$0xff]  ;;  %v3684_v9 = vld [vmem:[#allocation8 + $0x18] sm:$0xff] }
 0x704   :  { %v3686_v32 = vld [vmem:[#allocation8 + $0x28] sm:$0xff]  ;;  %v8017_v20 = vpack.c.bf16 %v3688_v25, %v3684_v9  ;;  %v3704_v25 = vld [vmem:[#allocation8 + $0xb8] sm:$0xff] }
 0x705   :  { %3333 = vmatmul.mubr.f32.vlgmr.msra.gmra.mrb[22].mxu0 %v7921_v21  ;;  %3404 = vmatmul.mubr.f32.vlgmr.msra.gmra.mrb[22].mxu1 %v7921_v21  ;;  %v8015_v46 = vpack.c.bf16 %v3686_v32, %v3682_v16  ;;  %v3702_v16 = vld [vmem:[#allocation8 + $0xa8] sm:$0xff]  ;;  %v3700_v32 = vld [vmem:[#allocation8 + $0x98] sm:$0xff] }
 0x706   :  { %5802 = vmatpush1.bf16.msra.mxu0 %v7917_v27  ;;  %5834 = vmatpush1.bf16.msra.mxu1 %v7919_v12  ;;  %v8039_v9 = vpack.c.bf16 %v3702_v16, %v3698_v18  ;;  %v8041_v59 = vpack.c.bf16 %v3704_v25, %v3700_v32  ;;  %v3705_v18 = vld [vmem:[#allocation8 + $0xc0] sm:$0xff]  ;;  %v8053_v32 = vpack.c.bf16 %v3712_v7, %v3708_v55  ;;  %v3720_v55 = vld [vmem:[#allocation8 + $0x138] sm:$0xff] }
 0x707   :  { %5804 = vmatprep.subr.bf16.mxu0 %v7923_v22  ;;  %5836 = vmatprep.subr.bf16.mxu1 %v7925_v44  ;;  %v3709_v16 = vld [vmem:[#allocation8 + $0xe0] sm:$0xff] }
 0x708   :  { %3571 = vmatprep.mubr.f32.mxu0 %v8629_v56  ;;  %3642 = vmatprep.mubr.f32.mxu1 %v8629_v56  ;;  %8900 = vst [vmem:[#allocation14_spill] sm:$0xff] %v8039_v9  ;;  %8901 = vst [vmem:[#allocation17_spill] sm:$0xff] %v8041_v59  ;;  %v8055_v25 = vpack.c.bf16 %v3709_v16, %v3705_v18  ;;  %v3713_v7 = vld [vmem:[#allocation8 + $0x100] sm:$0xff]  ;;  %v8065_v16 = vpack.c.bf16 %v3720_v55, %v3716_v61  ;;  %v3724_v61 = vld [vmem:[#allocation8 + $0x158] sm:$0xff] }
 0x709   :  { %8905 = vst [vmem:[#allocation21_spill] sm:$0xff] %v8053_v32  ;;  %v3717_v18 = vld [vmem:[#allocation8 + $0x120] sm:$0xff]  ;;  %v3728_v55 = vld [vmem:[#allocation8 + $0x178] sm:$0xff] }
 0x70a   :  { %5806 = vmatpush1.bf16.msra.mxu0 %v7931_v6  ;;  %5838 = vmatpush1.bf16.msra.mxu1 %v7933_v36  ;;  %8906 = vst [vmem:[#allocation22_spill] sm:$0xff] %v8055_v25  ;;  %8909 = vst [vmem:[#allocation25_spill] sm:$0xff] %v8065_v16 }
 0x70b   :  { %5808 = vmatprep.subr.bf16.mxu0 %v7937_v43  ;;  %5840 = vmatprep.subr.bf16.mxu1 %v7939_v14 }
 0x70e   :  { %5810 = vmatpush1.bf16.msra.mxu0 %v7945_v17  ;;  %5842 = vmatpush1.bf16.msra.mxu1 %v7947_v24 }
 0x70f   :  { %5812 = vmatprep.subr.bf16.mxu0 %v7951_v49  ;;  %5844 = vmatprep.subr.bf16.mxu1 %v7953_v45 }
 0x712   :  { %5814 = vmatpush1.bf16.msra.mxu0 %v7957_v62  ;;  %5846 = vmatpush1.bf16.msra.mxu1 %v7959_v42 }
 0x713   :  { %5816 = vmatprep.subr.bf16.mxu0 %v7963_v38  ;;  %5848 = vmatprep.subr.bf16.mxu1 %v7965_v52 }
 0x716   :  { %5818 = vmatpush1.bf16.msra.mxu0 %v7969_v48  ;;  %5850 = vmatpush1.bf16.msra.mxu1 %v7971_v23 }
 0x717   :  { %5820 = vmatprep.subr.bf16.mxu0 %v7975_v63  ;;  %5852 = vmatprep.subr.bf16.mxu1 %v7977_v19 }
 0x71a   :  { %5822 = vmatpush1.bf16.msra.mxu0 %v7981_v5  ;;  %5854 = vmatpush1.bf16.msra.mxu1 %v7983_v26 }
 0x71b   :  { %5824 = vmatprep.subr.bf16.mxu0 %v7987_v10  ;;  %5856 = vmatprep.subr.bf16.mxu1 %v7989_v28 }
 0x71e   :  { %5826 = vmatpush1.bf16.msra.mxu0 %v7993_v41  ;;  %5858 = vmatpush1.bf16.msra.mxu1 %v7995_v50 }
 0x71f   :  { %5828 = vmatprep.subr.bf16.mxu0 %v7999_v4  ;;  %5860 = vmatprep.subr.bf16.mxu1 %v8001_v29 }
 0x722   :  { %5830 = vmatpush1.bf16.msra.mxu0 %v8005_v47  ;;  %5862 = vmatpush1.bf16.msra.mxu1 %v8007_v34 }
 0x723   :  { %5864 = vmatprep.subr.bf16.mxu0 %v8015_v46  ;;  %5928 = vmatprep.subr.bf16.mxu1 %v8017_v20 }
 0x725   :  { %3572 = vmatmul.mubr.f32.vlgmr.msra.gmra.mrb[24].mxu0 %v7921_v21  ;;  %3643 = vmatmul.mubr.f32.vlgmr.msra.gmra.mrb[24].mxu1 %v7921_v21  ;;  %v3690_v21 = vld [vmem:[#allocation8 + $0x48] sm:$0xff] }
 0x726   :  { %5866 = vmatpush1.bf16.msra.mxu0 %v8019_v54  ;;  %5930 = vmatpush1.bf16.msra.mxu1 %v8022_v60  ;;  %v8027_v13 = vpack.c.bf16 %v3694_v1, %v3690_v21  ;;  %v3699_v21 = vld [vmem:[#allocation8 + $0x90] sm:$0xff] }
 0x727   :  { %5932 = vmatprep.subr.bf16.mxu1 %v8029_v2  ;;  %v3703_v1 = vld [vmem:[#allocation8 + $0xb0] sm:$0xff] }
 0x728   :  { %5868 = vmatprep.subr.bf16.mxu0 %v8027_v13  ;;  %v8046_v40 = vpack.c.bf16 %v3703_v1, %v3699_v21  ;;  %v8058_v21 = vpack.c.bf16 %v3711_v35, %v3707_v53  ;;  %v3714_v1 = vld [vmem:[#allocation8 + $0x108] sm:$0xff]  ;;  %v3715_v53 = vld [vmem:[#allocation8 + $0x110] sm:$0xff] }
 0x729   :  { %v3719_v35 = vld [vmem:[#allocation8 + $0x130] sm:$0xff] }
 0x72a   :  { %5870 = vmatpush1.bf16.msra.mxu0 %v8031_v31  ;;  %5934 = vmatpush1.bf16.msra.mxu1 %v8034_v39  ;;  %8903 = vst [vmem:[#allocation19_spill] sm:$0xff] %v8046_v40  ;;  %8907 = vst [vmem:[#allocation23_spill] sm:$0xff] %v8058_v21 }
 0x72b   :  { %5872 = vmatprep.subr.bf16.mxu0 %v8039_v9  ;;  %5936 = vmatprep.subr.bf16.mxu1 %v8041_v59  ;;  %v3729_v59 = vld [vmem:[#allocation8 + $0x180] sm:$0xff] }
 0x72e   :  { %5874 = vmatpush1.bf16.msra.mxu0 %v8043_v58  ;;  %5938 = vmatpush1.bf16.msra.mxu1 %v8046_v40  ;;  %v8063_v40 = vpack.c.bf16 %v3718_v3, %v3714_v1  ;;  %v8067_v58 = vpack.c.bf16 %v3717_v18, %v3713_v7  ;;  %v3722_v1 = vld [vmem:[#allocation8 + $0x148] sm:$0xff]  ;;  %v3721_v7 = vld [vmem:[#allocation8 + $0x140] sm:$0xff] }
 0x72f   :  { %5876 = vmatprep.subr.bf16.mxu0 %v8051_v0  ;;  %5940 = vmatprep.subr.bf16.mxu1 %v8053_v32  ;;  %v8070_v32 = vpack.c.bf16 %v3719_v35, %v3715_v53  ;;  %v3726_v3 = vld [vmem:[#allocation8 + $0x168] sm:$0xff]  ;;  %v3725_v18 = vld [vmem:[#allocation8 + $0x160] sm:$0xff]  ;;  %v3723_v35 = vld [vmem:[#allocation8 + $0x150] sm:$0xff] }
 0x730   :  { %8908 = vst [vmem:[#allocation24_spill] sm:$0xff] %v8063_v40  ;;  %8910 = vst [vmem:[#allocation26_spill] sm:$0xff] %v8067_v58  ;;  %v8080_v53 = vpack.c.bf16 %v3725_v18, %v3721_v7  ;;  %v3732_v0 = vld [vmem:[#allocation8 + $0x198] sm:$0xff]  ;;  %v3735_v7 = vld [vmem:[#allocation8 + $0x1b0] sm:$0xff] }
 0x731   :  { %8911 = vst [vmem:[#allocation27_spill] sm:$0xff] %v8070_v32 }
 0x732   :  { %5878 = vmatpush1.bf16.msra.mxu0 %v8055_v25  ;;  %5942 = vmatpush1.bf16.msra.mxu1 %v8058_v21  ;;  %v8075_v21 = vpack.c.bf16 %v3726_v3, %v3722_v1  ;;  %v8078_v25 = vpack.c.bf16 %v3728_v55, %v3724_v61  ;;  %8914 = vst [vmem:[#allocation30_spill] sm:$0xff] %v8080_v53  ;;  %v3736_v3 = vld [vmem:[#allocation8 + $0x1b8] sm:$0xff] }
 0x733   :  { %5880 = vmatprep.subr.bf16.mxu0 %v8063_v40  ;;  %5944 = vmatprep.subr.bf16.mxu1 %v8065_v16  ;;  %v3727_v16 = vld [vmem:[#allocation8 + $0x170] sm:$0xff]  ;;  %v8089_v61 = vpack.c.bf16 %v3736_v3, %v3732_v0  ;;  %v3737_v0 = vld [vmem:[#allocation8 + $0x1c0] sm:$0xff] }
 0x734   :  { %8912 = vst [vmem:[#allocation28_spill] sm:$0xff] %v8075_v21  ;;  %8913 = vst [vmem:[#allocation29_spill] sm:$0xff] %v8078_v25  ;;  %v8082_v40 = vpack.c.bf16 %v3727_v16, %v3723_v35  ;;  %v3731_v16 = vld [vmem:[#allocation8 + $0x190] sm:$0xff]  ;;  %v3738_v35 = vld [vmem:[#allocation8 + $0x1c8] sm:$0xff] }
 0x735   :  { %8917 = vst [vmem:[#allocation33_spill] sm:$0xff] %v8089_v61  ;;  %v8094_v18 = vpack.c.bf16 %v3735_v7, %v3731_v16  ;;  %v3741_v3 = vld [vmem:[#allocation8 + $0x1e0] sm:$0xff]  ;;  %v3739_v16 = vld [vmem:[#allocation8 + $0x1d0] sm:$0xff] }
 0x736   :  { %5882 = vmatpush1.bf16.msra.mxu0 %v8067_v58  ;;  %5946 = vmatpush1.bf16.msra.mxu1 %v8070_v32  ;;  %8915 = vst [vmem:[#allocation31_spill] sm:$0xff] %v8082_v40  ;;  %v3730_v58 = vld [vmem:[#allocation8 + $0x188] sm:$0xff]  ;;  %v3743_v7 = vld [vmem:[#allocation8 + $0x1f0] sm:$0xff] }
 0x737   :  { %5884 = vmatprep.subr.bf16.mxu0 %v8075_v21  ;;  %v3734_v32 = vld [vmem:[#allocation8 + $0x1a8] sm:$0xff]  ;;  %5948 = vmatprep.subr.bf16.mxu1 %v8078_v25  ;;  %v3733_v21 = vld [vmem:[#allocation8 + $0x1a0] sm:$0xff]  ;;  %8919 = vst [vmem:[#allocation35_spill] sm:$0xff] %v8094_v18 }
 0x738   :  { %v8086_v1 = vpack.c.bf16 %v3734_v32, %v3730_v58  ;;  %v8091_v55 = vpack.c.bf16 %v3733_v21, %v3729_v59  ;;  %v3742_v58 = vld [vmem:[#allocation8 + $0x1e8] sm:$0xff]  ;;  %v3740_v32 = vld [vmem:[#allocation8 + $0x1d8] sm:$0xff]  ;;  %v8103_v21 = vpack.c.bf16 %v3741_v3, %v3737_v0 }
 0x739   :  { %v3798_v25 = vld [vmem:[#allocation8 + $0x3a8] sm:$0xff] }
 0x73a   :  { %5886 = vmatpush1.bf16.msra.mxu0 %v8080_v53  ;;  %8916 = vst [vmem:[#allocation32_spill] sm:$0xff] %v8086_v1  ;;  %5950 = vmatpush1.bf16.msra.mxu1 %v8082_v40  ;;  %8918 = vst [vmem:[#allocation34_spill] sm:$0xff] %v8091_v55  ;;  %v8098_v53 = vpack.c.bf16 %v3742_v58, %v3738_v35  ;;  %v3744_v40 = vld [vmem:[#allocation8 + $0x1f8] sm:$0xff]  ;;  %v3750_v35 = vld [vmem:[#allocation8 + $0x228] sm:$0xff] }
 0x73b   :  { %5888 = vmatprep.subr.bf16.mxu0 %v8086_v1  ;;  %5952 = vmatprep.subr.bf16.mxu1 %v8089_v61  ;;  %v8101_v59 = vpack.c.bf16 %v3744_v40, %v3740_v32  ;;  %8922 = vst [vmem:[#allocation38_spill] sm:$0xff] %v8103_v21  ;;  %v8106_v61 = vpack.c.bf16 %v3743_v7, %v3739_v16  ;;  %v3748_v58 = vld [vmem:[#allocation8 + $0x218] sm:$0xff]  ;;  %v3745_v40 = vld [vmem:[#allocation8 + $0x200] sm:$0xff]  ;;  %v3747_v16 = vld [vmem:[#allocation8 + $0x210] sm:$0xff] }
 0x73c   :  { %8920 = vst [vmem:[#allocation36_spill] sm:$0xff] %v8098_v53  ;;  %v3749_v32 = vld [vmem:[#allocation8 + $0x220] sm:$0xff]  ;;  %v3751_v7 = vld [vmem:[#allocation8 + $0x230] sm:$0xff] }
 0x73d   :  { %8921 = vst [vmem:[#allocation37_spill] sm:$0xff] %v8101_v59  ;;  %8923 = vst [vmem:[#allocation39_spill] sm:$0xff] %v8106_v61  ;;  %v8115_v3 = vpack.c.bf16 %v3749_v32, %v3745_v40 }
 0x73e   :  { %5890 = vmatpush1.bf16.msra.mxu0 %v8091_v55  ;;  %5954 = vmatpush1.bf16.msra.mxu1 %v8094_v18  ;;  %v3746_v55 = vld [vmem:[#allocation8 + $0x208] sm:$0xff]  ;;  %v3752_v18 = vld [vmem:[#allocation8 + $0x238] sm:$0xff] }
 0x73f   :  { %5892 = vmatprep.subr.bf16.mxu0 %v8098_v53  ;;  %5956 = vmatprep.subr.bf16.mxu1 %v8101_v59  ;;  %v8110_v1 = vpack.c.bf16 %v3750_v35, %v3746_v55  ;;  %v8113_v0 = vpack.c.bf16 %v3752_v18, %v3748_v58  ;;  %8926 = vst [vmem:[#allocation42_spill] sm:$0xff] %v8115_v3  ;;  %v3758_v55 = vld [vmem:[#allocation8 + $0x268] sm:$0xff]  ;;  %v3756_v35 = vld [vmem:[#allocation8 + $0x258] sm:$0xff]  ;;  %v3753_v18 = vld [vmem:[#allocation8 + $0x240] sm:$0xff] }
 0x740   :  { %v8118_v59 = vpack.c.bf16 %v3751_v7, %v3747_v16  ;;  %v3757_v58 = vld [vmem:[#allocation8 + $0x260] sm:$0xff]  ;;  %v3755_v16 = vld [vmem:[#allocation8 + $0x250] sm:$0xff] }
 0x741   :  { %8924 = vst [vmem:[#allocation40_spill] sm:$0xff] %v8110_v1  ;;  %8925 = vst [vmem:[#allocation41_spill] sm:$0xff] %v8113_v0  ;;  %v8127_v32 = vpack.c.bf16 %v3757_v58, %v3753_v18  ;;  %v3759_v7 = vld [vmem:[#allocation8 + $0x270] sm:$0xff] }
 0x742   :  { %5894 = vmatpush1.bf16.msra.mxu0 %v8103_v21  ;;  %5958 = vmatpush1.bf16.msra.mxu1 %v8106_v61  ;;  %8927 = vst [vmem:[#allocation43_spill] sm:$0xff] %v8118_v59  ;;  %v3754_v21 = vld [vmem:[#allocation8 + $0x248] sm:$0xff]  ;;  %v3760_v61 = vld [vmem:[#allocation8 + $0x278] sm:$0xff] }
 0x743   :  { %5896 = vmatprep.subr.bf16.mxu0 %v8110_v1  ;;  %5960 = vmatprep.subr.bf16.mxu1 %v8113_v0  ;;  %v8122_v53 = vpack.c.bf16 %v3758_v55, %v3754_v21  ;;  %v8125_v40 = vpack.c.bf16 %v3760_v61, %v3756_v35  ;;  %8930 = vst [vmem:[#allocation46_spill] sm:$0xff] %v8127_v32  ;;  %v3766_v21 = vld [vmem:[#allocation8 + $0x2a8] sm:$0xff]  ;;  %v3764_v55 = vld [vmem:[#allocation8 + $0x298] sm:$0xff]  ;;  %v3761_v61 = vld [vmem:[#allocation8 + $0x280] sm:$0xff] }
 0x744   :  { %v8130_v0 = vpack.c.bf16 %v3759_v7, %v3755_v16  ;;  %v3765_v35 = vld [vmem:[#allocation8 + $0x2a0] sm:$0xff]  ;;  %v3763_v16 = vld [vmem:[#allocation8 + $0x290] sm:$0xff] }
 0x745   :  { %8928 = vst [vmem:[#allocation44_spill] sm:$0xff] %v8122_v53  ;;  %8929 = vst [vmem:[#allocation45_spill] sm:$0xff] %v8125_v40  ;;  %v8139_v58 = vpack.c.bf16 %v3765_v35, %v3761_v61  ;;  %v3767_v7 = vld [vmem:[#allocation8 + $0x2b0] sm:$0xff] }
 0x746   :  { %5898 = vmatpush1.bf16.msra.mxu0 %v8115_v3  ;;  %5962 = vmatpush1.bf16.msra.mxu1 %v8118_v59  ;;  %8931 = vst [vmem:[#allocation47_spill] sm:$0xff] %v8130_v0  ;;  %v3762_v3 = vld [vmem:[#allocation8 + $0x288] sm:$0xff]  ;;  %v3768_v59 = vld [vmem:[#allocation8 + $0x2b8] sm:$0xff] }
 0x747   :  { %5900 = vmatprep.subr.bf16.mxu0 %v8122_v53  ;;  %5964 = vmatprep.subr.bf16.mxu1 %v8125_v40  ;;  %v8134_v1 = vpack.c.bf16 %v3766_v21, %v3762_v3  ;;  %v8137_v18 = vpack.c.bf16 %v3768_v59, %v3764_v55  ;;  %8934 = vst [vmem:[#allocation50_spill] sm:$0xff] %v8139_v58  ;;  %v3774_v3 = vld [vmem:[#allocation8 + $0x2e8] sm:$0xff]  ;;  %v3772_v21 = vld [vmem:[#allocation8 + $0x2d8] sm:$0xff]  ;;  %v3769_v59 = vld [vmem:[#allocation8 + $0x2c0] sm:$0xff] }
 0x748   :  { %v8142_v40 = vpack.c.bf16 %v3767_v7, %v3763_v16  ;;  %v3773_v55 = vld [vmem:[#allocation8 + $0x2e0] sm:$0xff]  ;;  %v3771_v16 = vld [vmem:[#allocation8 + $0x2d0] sm:$0xff] }
 0x749   :  { %8932 = vst [vmem:[#allocation48_spill] sm:$0xff] %v8134_v1  ;;  %8933 = vst [vmem:[#allocation49_spill] sm:$0xff] %v8137_v18  ;;  %v8151_v35 = vpack.c.bf16 %v3773_v55, %v3769_v59  ;;  %v3775_v7 = vld [vmem:[#allocation8 + $0x2f0] sm:$0xff] }
 0x74a   :  { %5902 = vmatpush1.bf16.msra.mxu0 %v8127_v32  ;;  %5966 = vmatpush1.bf16.msra.mxu1 %v8130_v0  ;;  %8935 = vst [vmem:[#allocation51_spill] sm:$0xff] %v8142_v40  ;;  %v3770_v32 = vld [vmem:[#allocation8 + $0x2c8] sm:$0xff]  ;;  %v3776_v0 = vld [vmem:[#allocation8 + $0x2f8] sm:$0xff] }
 0x74b   :  { %5904 = vmatprep.subr.bf16.mxu0 %v8134_v1  ;;  %5968 = vmatprep.subr.bf16.mxu1 %v8137_v18  ;;  %v8146_v53 = vpack.c.bf16 %v3774_v3, %v3770_v32  ;;  %v8149_v61 = vpack.c.bf16 %v3776_v0, %v3772_v21  ;;  %8938 = vst [vmem:[#allocation54_spill] sm:$0xff] %v8151_v35  ;;  %v3782_v32 = vld [vmem:[#allocation8 + $0x328] sm:$0xff]  ;;  %v3780_v3 = vld [vmem:[#allocation8 + $0x318] sm:$0xff]  ;;  %v3777_v0 = vld [vmem:[#allocation8 + $0x300] sm:$0xff] }
 0x74c   :  { %v8154_v18 = vpack.c.bf16 %v3775_v7, %v3771_v16  ;;  %v3781_v21 = vld [vmem:[#allocation8 + $0x320] sm:$0xff]  ;;  %v3779_v16 = vld [vmem:[#allocation8 + $0x310] sm:$0xff] }
 0x74d   :  { %8936 = vst [vmem:[#allocation52_spill] sm:$0xff] %v8146_v53  ;;  %8937 = vst [vmem:[#allocation53_spill] sm:$0xff] %v8149_v61  ;;  %v8163_v55 = vpack.c.bf16 %v3781_v21, %v3777_v0  ;;  %v3783_v7 = vld [vmem:[#allocation8 + $0x330] sm:$0xff] }
 0x74e   :  { %5906 = vmatpush1.bf16.msra.mxu0 %v8139_v58  ;;  %5970 = vmatpush1.bf16.msra.mxu1 %v8142_v40  ;;  %8939 = vst [vmem:[#allocation55_spill] sm:$0xff] %v8154_v18  ;;  %v3778_v58 = vld [vmem:[#allocation8 + $0x308] sm:$0xff]  ;;  %v3784_v40 = vld [vmem:[#allocation8 + $0x338] sm:$0xff] }
 0x74f   :  { %5908 = vmatprep.subr.bf16.mxu0 %v8146_v53  ;;  %5972 = vmatprep.subr.bf16.mxu1 %v8149_v61  ;;  %v8158_v1 = vpack.c.bf16 %v3782_v32, %v3778_v58  ;;  %v8161_v59 = vpack.c.bf16 %v3784_v40, %v3780_v3  ;;  %8942 = vst [vmem:[#allocation58_spill] sm:$0xff] %v8163_v55  ;;  %v3790_v58 = vld [vmem:[#allocation8 + $0x368] sm:$0xff]  ;;  %v3788_v32 = vld [vmem:[#allocation8 + $0x358] sm:$0xff]  ;;  %v3785_v40 = vld [vmem:[#allocation8 + $0x340] sm:$0xff] }
 0x750   :  { %v8166_v61 = vpack.c.bf16 %v3783_v7, %v3779_v16  ;;  %v3789_v3 = vld [vmem:[#allocation8 + $0x360] sm:$0xff]  ;;  %v3787_v16 = vld [vmem:[#allocation8 + $0x350] sm:$0xff] }
 0x751   :  { %8940 = vst [vmem:[#allocation56_spill] sm:$0xff] %v8158_v1  ;;  %8941 = vst [vmem:[#allocation57_spill] sm:$0xff] %v8161_v59  ;;  %v8175_v21 = vpack.c.bf16 %v3789_v3, %v3785_v40  ;;  %v3791_v7 = vld [vmem:[#allocation8 + $0x370] sm:$0xff] }
 0x752   :  { %5910 = vmatpush1.bf16.msra.mxu0 %v8151_v35  ;;  %5974 = vmatpush1.bf16.msra.mxu1 %v8154_v18  ;;  %8943 = vst [vmem:[#allocation59_spill] sm:$0xff] %v8166_v61  ;;  %v3786_v35 = vld [vmem:[#allocation8 + $0x348] sm:$0xff]  ;;  %v3792_v18 = vld [vmem:[#allocation8 + $0x378] sm:$0xff]  ;;  %v3795_v40 = vld [vmem:[#allocation8 + $0x390] sm:$0xff] }
 0x753   :  { %5912 = vmatprep.subr.bf16.mxu0 %v8158_v1  ;;  %5976 = vmatprep.subr.bf16.mxu1 %v8161_v59  ;;  %v8170_v53 = vpack.c.bf16 %v3790_v58, %v3786_v35  ;;  %v8173_v0 = vpack.c.bf16 %v3792_v18, %v3788_v32  ;;  %8946 = vst [vmem:[#allocation62_spill] sm:$0xff] %v8175_v21  ;;  %v3794_v1 = vld [vmem:[#allocation8 + $0x388] sm:$0xff]  ;;  %v3800_v35 = vld [vmem:[#allocation8 + $0x3b8] sm:$0xff]  ;;  %v3793_v18 = vld [vmem:[#allocation8 + $0x380] sm:$0xff] }
 0x754   :  { %v8178_v59 = vpack.c.bf16 %v3791_v7, %v3787_v16  ;;  %v8181_v58 = vpack.c.bf16 %v3798_v25, %v3794_v1  ;;  %v3797_v32 = vld [vmem:[#allocation8 + $0x3a0] sm:$0xff]  ;;  %v3806_v16 = vld [vmem:[#allocation8 + $0x3e8] sm:$0xff]  ;;  %v3804_v1 = vld [vmem:[#allocation8 + $0x3d8] sm:$0xff] }
 0x755   :  { %8944 = vst [vmem:[#allocation60_spill] sm:$0xff] %v8170_v53  ;;  %8945 = vst [vmem:[#allocation61_spill] sm:$0xff] %v8173_v0  ;;  %v8186_v3 = vpack.c.bf16 %v3797_v32, %v3793_v18  ;;  %v3805_v18 = vld [vmem:[#allocation8 + $0x3e0] sm:$0xff]  ;;  %v3803_v32 = vld [vmem:[#allocation8 + $0x3d0] sm:$0xff] }
 0x756   :  { %5914 = vmatpush1.bf16.msra.mxu0 %v8163_v55  ;;  %5978 = vmatpush1.bf16.msra.mxu1 %v8166_v61  ;;  %v3796_v55 = vld [vmem:[#allocation8 + $0x398] sm:$0xff]  ;;  %v3799_v61 = vld [vmem:[#allocation8 + $0x3b0] sm:$0xff] }
 0x757   :  { %5916 = vmatprep.subr.bf16.mxu0 %v8170_v53  ;;  %5980 = vmatprep.subr.bf16.mxu1 %v8173_v0  ;;  %v8183_v9 = vpack.c.bf16 %v3800_v35, %v3796_v55  ;;  %8947 = vst [vmem:[#allocation63_spill] sm:$0xff] %v8186_v3  ;;  %v3802_v53 = vld [vmem:[#allocation8 + $0x3c8] sm:$0xff]  ;;  %v8190_v7 = vpack.c.bf16 %v3799_v61, %v3795_v40  ;;  %v3808_v55 = vld [vmem:[#allocation8 + $0x3f8] sm:$0xff]  ;;  %v3801_v35 = vld [vmem:[#allocation8 + $0x3c0] sm:$0xff] }
 0x758   :  { %v8192_v25 = vpack.c.bf16 %v3806_v16, %v3802_v53  ;;  %v8195_v0 = vpack.c.bf16 %v3808_v55, %v3804_v1  ;;  %v8198_v39 = vpack.c.bf16 %v3805_v18, %v3801_v35  ;;  %v3246_v61 = vld [vmem:[#allocation10] sm:$0xf] }
 0x759   :  { %8948 = vst [vmem:[#allocation64_spill] sm:$0xff] %v8190_v7  ;;  %v3251_v40 = vrot.slane %v3246_v61, %v8897_v11  ;;  %v3255_v16 = vrot.slane %v3246_v61, %v8898_v33 }
 0x75a   :  { %5918 = vmatpush1.bf16.msra.mxu0 %v8175_v21  ;;  %5982 = vmatpush1.bf16.msra.mxu1 %v8178_v59  ;;  %8949 = vst [vmem:[#allocation65_spill] sm:$0xff] %v8192_v25  ;;  %8950 = vst [vmem:[#allocation66_spill] sm:$0xff] %v8195_v0  ;;  %v3807_v21 = vld [vmem:[#allocation8 + $0x3f0] sm:$0xff] }
 0x75b   :  { %5920 = vmatprep.subr.bf16.mxu0 %v8181_v58  ;;  %5984 = vmatprep.subr.bf16.mxu1 %v8183_v9  ;;  %8951 = vst [vmem:[#allocation67_spill] sm:$0xff] %v8198_v39  ;;  %v8202_v53 = vpack.c.bf16 %v3807_v21, %v3803_v32 }
 0x75d   :  { %8952 = vst [vmem:[#allocation68_spill] sm:$0xff] %v8202_v53 }
 0x75e   :  { %5922 = vmatpush1.bf16.msra.mxu0 %v8186_v3  ;;  %5986 = vmatpush1.bf16.msra.mxu1 %v8190_v7 }
 0x75f   :  { %5924 = vmatprep.subr.bf16.mxu0 %v8192_v25  ;;  %5988 = vmatprep.subr.bf16.mxu1 %v8195_v0 }
 0x762   :  { %5926 = vmatpush1.bf16.msra.mxu0 %v8198_v39  ;;  %5990 = vmatpush1.bf16.msra.mxu1 %v8202_v53  ;;  %v3263_v39 = vrot.slane %v3246_v61, %v7008_v8 }
 0x763   :  { %5992 = vmatprep.subr.bf16.mxu0 %v7887_v15  ;;  %6024 = vmatprep.subr.bf16.mxu1 %v7889_v57  ;;  %v3259_v57 = vrot.slane %v3246_v61, %v7011_v37 }
 0x7d8   :  { %v3334_v1 = vpop.f32.mrb[22].mxu0  ;;  %v3405_v55 = vpop.f32.mrb[22].mxu1 }
 0x7d9   :  { %v3335_v35 = vadd.f32 %v3334_v1, %v3251_v40  ;;  %v3336_v21 = vpop.f32.mrb[23].mxu0  ;;  %v3407_v18 = vpop.f32.mrb[23].mxu1  ;;  %v3406_v7 = vadd.f32 %v3405_v55, %v3259_v57  ;;  %v4630_v57 = vld [vmem:[%s8358_s0 + $0xd8] sm:$0xff] }
 0x7da   :  { %v3337_v32 = vadd.f32 %v3336_v21, %v3255_v16  ;;  %v3408_v15 = vadd.f32 %v3407_v18, %v3263_v39 }
 0x7db   :  { %v4624_v0 = vmul.f32 -1.442695, %v3335_v35 }
 0x7dc   :  { %v4625_v25 = vmul.f32 -1.442695, %v3337_v32  ;;  %v4626_v53 = vmul.f32 -1.442695, %v3408_v15 }
 0x7dd   :  { %6365 = vpow2.f32 %v4624_v0 }
 0x7de   :  { %6367 = vpow2.f32 %v4625_v25  ;;  %v4627_v25 = vld [vmem:[%s8358_s0 + $0xc0] sm:$0xff] }
 0x7df   :  { %6369 = vpow2.f32 %v4626_v53 }
 0x7e0   :  { %6371 = vtanh.f32 %v3406_v7 }
 0x7e7   :  { %v6366_v11 = vpop.eup %6365 }
 0x7e8   :  { %v6368_v3 = vpop.eup %6367  ;;  %v3416_v33 = vadd.f32 1.0, %v6366_v11  ;;  %v4628_v11 = vld [vmem:[%s8358_s0 + $0xc8] sm:$0xff] }
 0x7e9   :  { %v3417_v40 = vadd.f32 1.0, %v6368_v3  ;;  %v6370_v16 = vpop.eup %6369 }
 0x7ea   :  { %6373 = vrcp.f32 %v3416_v33  ;;  %v6372_v1 = vpop.eup %6371  ;;  %v3426_v0 = vadd.f32 1.0, %v6370_v16  ;;  %v4629_v16 = vld [vmem:[%s8358_s0 + $0xd0] sm:$0xff] }
 0x7eb   :  { %6375 = vrcp.f32 %v3417_v40 }
 0x7ec   :  { %6377 = vrcp.f32 %v3426_v0 }
 0x7f4   :  { %v6374_v35 = vpop.eup %6373 }
 0x7f5   :  { %v6376_v21 = vpop.eup %6375  ;;  %v3431_v32 = vmul.f32 %v6374_v35, %v6372_v1 }
 0x7f6   :  { %v3430_v39 = vmul.f32 %v6376_v21, %v7904_v51  ;;  %v6378_v1 = vpop.eup %6377 }
 0x7f8   :  { %v3573_v7 = vpop.f32.mrb[24].mxu0  ;;  %v3644_v3 = vpop.f32.mrb[24].mxu1  ;;  %v8220_v33 = vadd.f32 %v3431_v32, %v3430_v39 }
 0x7f9   :  { %v3649_v53 = vadd.f32 %v4627_v25, %v3573_v7  ;;  %v3575_v61 = vpop.f32.mrb[25].mxu0  ;;  %v3646_v55 = vpop.f32.mrb[25].mxu1  ;;  %v3651_v32 = vadd.f32 %v4629_v16, %v3644_v3 }
 0x7fa   :  { %v3650_v18 = vadd.f32 %v4628_v11, %v3575_v61  ;;  %6379 = vtanh.f32 %v8220_v33  ;;  %v3652_v40 = vadd.f32 %v4630_v57, %v3646_v55 }
 0x7fb   :  { %v4631_v51 = vmul.f32 -1.442695, %v3649_v53 }
 0x7fc   :  { %v4632_v15 = vmul.f32 -1.442695, %v3650_v18  ;;  %v4633_v21 = vmul.f32 -1.442695, %v3652_v40 }
 0x7fd   :  { %6381 = vpow2.f32 %v4631_v51 }
 0x7fe   :  { %6383 = vpow2.f32 %v4632_v15 }
 0x7ff   :  { %6385 = vpow2.f32 %v4633_v21  ;;  %v8993_v21 = vld [vmem:[#allocation55_spill] sm:$0xff] }
 0x800   :  { %6387 = vtanh.f32 %v3651_v32  ;;  %v8994_v32 = vld [vmem:[#allocation56_spill] sm:$0xff] }
 0x804   :  { %v6380_v35 = vpop.eup %6379 }
 0x805   :  { %v3434_v0 = vmul.f32 %v6380_v35, %v6378_v1  ;;  %v8992_v35 = vld [vmem:[#allocation54_spill] sm:$0xff] }
 0x807   :  { %v6382_v39 = vpop.eup %6381  ;;  %3895 = vmatprep.mubr.f32.mxu0 %v3434_v0  ;;  %3966 = vmatprep.mubr.f32.mxu1 %v3434_v0  ;;  %v8995_v0 = vld [vmem:[#allocation57_spill] sm:$0xff] }
 0x808   :  { %v6384_v25 = vpop.eup %6383  ;;  %v3659_v11 = vadd.f32 1.0, %v6382_v39  ;;  %v8996_v39 = vld [vmem:[#allocation58_spill] sm:$0xff] }
 0x809   :  { %v3660_v7 = vadd.f32 1.0, %v6384_v25  ;;  %v6386_v53 = vpop.eup %6385  ;;  %v8997_v25 = vld [vmem:[#allocation59_spill] sm:$0xff] }
 0x80a   :  { %6389 = vrcp.f32 %v3659_v11  ;;  %v6388_v61 = vpop.eup %6387  ;;  %v3669_v15 = vadd.f32 1.0, %v6386_v53  ;;  %v8998_v11 = vld [vmem:[#allocation60_spill] sm:$0xff]  ;;  %v9000_v53 = vld [vmem:[#allocation62_spill] sm:$0xff] }
 0x80b   :  { %6391 = vrcp.f32 %v3660_v7  ;;  %v8999_v7 = vld [vmem:[#allocation61_spill] sm:$0xff] }
 0x80c   :  { %6393 = vrcp.f32 %v3669_v15  ;;  %v9005_v15 = vld [vmem:[#allocation67_spill] sm:$0xff] }
 0x814   :  { %v6390_v55 = vpop.eup %6389 }
 0x815   :  { %v6392_v18 = vpop.eup %6391  ;;  %v3674_v51 = vmul.f32 %v6390_v55, %v6388_v61  ;;  %v9001_v61 = vld [vmem:[#allocation63_spill] sm:$0xff]  ;;  %v9002_v55 = vld [vmem:[#allocation64_spill] sm:$0xff] }
 0x816   :  { %v3673_v57 = vmul.f32 %v6392_v18, %v7914_v30  ;;  %v6394_v40 = vpop.eup %6393  ;;  %v8954_v30 = vld [vmem:[#allocation14_spill] sm:$0xff]  ;;  %v9003_v18 = vld [vmem:[#allocation65_spill] sm:$0xff] }
 0x818   :  { %v8230_v3 = vadd.f32 %v3674_v51, %v3673_v57  ;;  %v9004_v51 = vld [vmem:[#allocation66_spill] sm:$0xff]  ;;  %v9006_v57 = vld [vmem:[#allocation68_spill] sm:$0xff] }
 0x81a   :  { %6395 = vtanh.f32 %v8230_v3 }
 0x824   :  { %v6396_v16 = vpop.eup %6395 }
 0x825   :  { %v3677_v1 = vmul.f32 %v6396_v16, %v6394_v40  ;;  %v3809_v40 = vld [vmem:[#allocation10] sm:$0xf]  ;;  %v9007_v16 = vld [vmem:[#allocation15_spill] sm:$0xff] }
 0x827   :  { %3896 = vmatmul.mubr.f32.vlgmr.msra.gmra.mrb[26].mxu0 %v3677_v1  ;;  %3967 = vmatmul.mubr.f32.vlgmr.msra.gmra.mrb[26].mxu1 %v3677_v1 }
 0x828   :  { %5994 = vmatpush1.bf16.msra.mxu0 %v7917_v27  ;;  %6026 = vmatpush1.bf16.msra.mxu1 %v7919_v12  ;;  %v8955_v27 = vld [vmem:[#allocation17_spill] sm:$0xff]  ;;  %v8956_v12 = vld [vmem:[#allocation18_spill] sm:$0xff] }
 0x829   :  { %5996 = vmatprep.subr.bf16.mxu0 %v7923_v22  ;;  %6028 = vmatprep.subr.bf16.mxu1 %v7925_v44  ;;  %v8957_v22 = vld [vmem:[#allocation19_spill] sm:$0xff]  ;;  %v8958_v44 = vld [vmem:[#allocation20_spill] sm:$0xff] }
 0x82a   :  { %4134 = vmatprep.mubr.f32.mxu0 %v8629_v56  ;;  %4205 = vmatprep.mubr.f32.mxu1 %v8629_v56  ;;  %v8953_v56 = vld [vmem:[#allocation16_spill] sm:$0xff] }
 0x82c   :  { %5998 = vmatpush1.bf16.msra.mxu0 %v7931_v6  ;;  %6030 = vmatpush1.bf16.msra.mxu1 %v7933_v36  ;;  %v8959_v6 = vld [vmem:[#allocation21_spill] sm:$0xff]  ;;  %v8960_v36 = vld [vmem:[#allocation22_spill] sm:$0xff] }
 0x82d   :  { %6000 = vmatprep.subr.bf16.mxu0 %v7937_v43  ;;  %6032 = vmatprep.subr.bf16.mxu1 %v7939_v14  ;;  %v8961_v43 = vld [vmem:[#allocation23_spill] sm:$0xff]  ;;  %v8962_v14 = vld [vmem:[#allocation24_spill] sm:$0xff] }
 0x830   :  { %6002 = vmatpush1.bf16.msra.mxu0 %v7945_v17  ;;  %6034 = vmatpush1.bf16.msra.mxu1 %v7947_v24  ;;  %v8963_v17 = vld [vmem:[#allocation25_spill] sm:$0xff]  ;;  %v8964_v24 = vld [vmem:[#allocation26_spill] sm:$0xff] }
 0x831   :  { %6004 = vmatprep.subr.bf16.mxu0 %v7951_v49  ;;  %6036 = vmatprep.subr.bf16.mxu1 %v7953_v45  ;;  %v8965_v49 = vld [vmem:[#allocation27_spill] sm:$0xff]  ;;  %v8966_v45 = vld [vmem:[#allocation28_spill] sm:$0xff] }
 0x834   :  { %6006 = vmatpush1.bf16.msra.mxu0 %v7957_v62  ;;  %6038 = vmatpush1.bf16.msra.mxu1 %v7959_v42  ;;  %v8967_v62 = vld [vmem:[#allocation29_spill] sm:$0xff]  ;;  %v8968_v42 = vld [vmem:[#allocation30_spill] sm:$0xff] }
 0x835   :  { %6008 = vmatprep.subr.bf16.mxu0 %v7963_v38  ;;  %6040 = vmatprep.subr.bf16.mxu1 %v7965_v52  ;;  %v8969_v38 = vld [vmem:[#allocation31_spill] sm:$0xff]  ;;  %v8970_v52 = vld [vmem:[#allocation32_spill] sm:$0xff] }
 0x838   :  { %6010 = vmatpush1.bf16.msra.mxu0 %v7969_v48  ;;  %6042 = vmatpush1.bf16.msra.mxu1 %v7971_v23  ;;  %v8971_v48 = vld [vmem:[#allocation33_spill] sm:$0xff]  ;;  %v8972_v23 = vld [vmem:[#allocation34_spill] sm:$0xff] }
 0x839   :  { %6012 = vmatprep.subr.bf16.mxu0 %v7975_v63  ;;  %6044 = vmatprep.subr.bf16.mxu1 %v7977_v19  ;;  %v8973_v63 = vld [vmem:[#allocation35_spill] sm:$0xff]  ;;  %v8974_v19 = vld [vmem:[#allocation36_spill] sm:$0xff] }
 0x83c   :  { %6014 = vmatpush1.bf16.msra.mxu0 %v7981_v5  ;;  %6046 = vmatpush1.bf16.msra.mxu1 %v7983_v26  ;;  %v8975_v5 = vld [vmem:[#allocation37_spill] sm:$0xff]  ;;  %v8976_v26 = vld [vmem:[#allocation38_spill] sm:$0xff] }
 0x83d   :  { %6016 = vmatprep.subr.bf16.mxu0 %v7987_v10  ;;  %6048 = vmatprep.subr.bf16.mxu1 %v7989_v28  ;;  %v8977_v10 = vld [vmem:[#allocation39_spill] sm:$0xff]  ;;  %v8978_v28 = vld [vmem:[#allocation40_spill] sm:$0xff] }
 0x840   :  { %6018 = vmatpush1.bf16.msra.mxu0 %v7993_v41  ;;  %6050 = vmatpush1.bf16.msra.mxu1 %v7995_v50  ;;  %v8979_v41 = vld [vmem:[#allocation41_spill] sm:$0xff]  ;;  %v8980_v50 = vld [vmem:[#allocation42_spill] sm:$0xff] }
 0x841   :  { %6020 = vmatprep.subr.bf16.mxu0 %v7999_v4  ;;  %6052 = vmatprep.subr.bf16.mxu1 %v8001_v29  ;;  %v8981_v4 = vld [vmem:[#allocation43_spill] sm:$0xff]  ;;  %v8982_v29 = vld [vmem:[#allocation44_spill] sm:$0xff] }
 0x844   :  { %6022 = vmatpush1.bf16.msra.mxu0 %v8005_v47  ;;  %6054 = vmatpush1.bf16.msra.mxu1 %v8007_v34  ;;  %v8983_v47 = vld [vmem:[#allocation45_spill] sm:$0xff]  ;;  %v8984_v34 = vld [vmem:[#allocation46_spill] sm:$0xff] }
 0x845   :  { %6056 = vmatprep.subr.bf16.mxu0 %v8015_v46  ;;  %6120 = vmatprep.subr.bf16.mxu1 %v8017_v20  ;;  %v8985_v46 = vld [vmem:[#allocation47_spill] sm:$0xff]  ;;  %v8986_v20 = vld [vmem:[#allocation48_spill] sm:$0xff] }
 0x847   :  { %4135 = vmatmul.mubr.f32.vlgmr.msra.gmra.mrb[28].mxu0 %v3677_v1  ;;  %4206 = vmatmul.mubr.f32.vlgmr.msra.gmra.mrb[28].mxu1 %v3677_v1  ;;  %v3814_v1 = vrot.slane %v3809_v40, %v9007_v16 }
 0x848   :  { %6058 = vmatpush1.bf16.msra.mxu0 %v8019_v54  ;;  %6122 = vmatpush1.bf16.msra.mxu1 %v8022_v60  ;;  %v8987_v54 = vld [vmem:[#allocation49_spill] sm:$0xff]  ;;  %v8988_v60 = vld [vmem:[#allocation50_spill] sm:$0xff] }
 0x849   :  { %6060 = vmatprep.subr.bf16.mxu0 %v8027_v13  ;;  %6124 = vmatprep.subr.bf16.mxu1 %v8029_v2  ;;  %v8989_v13 = vld [vmem:[#allocation51_spill] sm:$0xff]  ;;  %v8990_v2 = vld [vmem:[#allocation52_spill] sm:$0xff] }
 0x84c   :  { %6062 = vmatpush1.bf16.msra.mxu0 %v8031_v31  ;;  %6126 = vmatpush1.bf16.msra.mxu1 %v8953_v56  ;;  %v8991_v31 = vld [vmem:[#allocation53_spill] sm:$0xff] }
 0x84d   :  { %6064 = vmatprep.subr.bf16.mxu0 %v8954_v30  ;;  %6128 = vmatprep.subr.bf16.mxu1 %v8955_v27 }
 0x850   :  { %6066 = vmatpush1.bf16.msra.mxu0 %v8956_v12  ;;  %6130 = vmatpush1.bf16.msra.mxu1 %v8957_v22 }
 0x851   :  { %6068 = vmatprep.subr.bf16.mxu0 %v8958_v44  ;;  %6132 = vmatprep.subr.bf16.mxu1 %v8959_v6 }
 0x854   :  { %6070 = vmatpush1.bf16.msra.mxu0 %v8960_v36  ;;  %6134 = vmatpush1.bf16.msra.mxu1 %v8961_v43  ;;  %v3826_v36 = vrot.slane %v3809_v40, %v7008_v8 }
 0x855   :  { %6072 = vmatprep.subr.bf16.mxu0 %v8962_v14  ;;  %6136 = vmatprep.subr.bf16.mxu1 %v8963_v17  ;;  %v3822_v14 = vrot.slane %v3809_v40, %v7011_v37 }
 0x858   :  { %6074 = vmatpush1.bf16.msra.mxu0 %v8964_v24  ;;  %6138 = vmatpush1.bf16.msra.mxu1 %v8965_v49 }
 0x859   :  { %6076 = vmatprep.subr.bf16.mxu0 %v8966_v45  ;;  %6140 = vmatprep.subr.bf16.mxu1 %v8967_v62 }
 0x85c   :  { %6078 = vmatpush1.bf16.msra.mxu0 %v8968_v42  ;;  %6142 = vmatpush1.bf16.msra.mxu1 %v8969_v38 }
 0x85d   :  { %6080 = vmatprep.subr.bf16.mxu0 %v8970_v52  ;;  %6144 = vmatprep.subr.bf16.mxu1 %v8971_v48 }
 0x860   :  { %6082 = vmatpush1.bf16.msra.mxu0 %v8972_v23  ;;  %6146 = vmatpush1.bf16.msra.mxu1 %v8973_v63 }
 0x861   :  { %6084 = vmatprep.subr.bf16.mxu0 %v8974_v19  ;;  %6148 = vmatprep.subr.bf16.mxu1 %v8975_v5 }
 0x864   :  { %6086 = vmatpush1.bf16.msra.mxu0 %v8976_v26  ;;  %6150 = vmatpush1.bf16.msra.mxu1 %v8977_v10  ;;  %v4637_v26 = vld [vmem:[%s8358_s0 + $0xe0] sm:$0xff]  ;;  %v4638_v10 = vld [vmem:[%s8358_s0 + $0xe8] sm:$0xff] }
 0x865   :  { %6088 = vmatprep.subr.bf16.mxu0 %v8978_v28  ;;  %6152 = vmatprep.subr.bf16.mxu1 %v8979_v41 }
 0x868   :  { %6090 = vmatpush1.bf16.msra.mxu0 %v8980_v50  ;;  %6154 = vmatpush1.bf16.msra.mxu1 %v8981_v4 }
 0x869   :  { %6092 = vmatprep.subr.bf16.mxu0 %v8982_v29  ;;  %6156 = vmatprep.subr.bf16.mxu1 %v8983_v47 }
 0x86c   :  { %6094 = vmatpush1.bf16.msra.mxu0 %v8984_v34  ;;  %6158 = vmatpush1.bf16.msra.mxu1 %v8985_v46 }
 0x86d   :  { %6096 = vmatprep.subr.bf16.mxu0 %v8986_v20  ;;  %6160 = vmatprep.subr.bf16.mxu1 %v8987_v54  ;;  %v4640_v20 = vld [vmem:[%s8358_s0 + $0xf8] sm:$0xff] }
 0x870   :  { %6098 = vmatpush1.bf16.msra.mxu0 %v8988_v60  ;;  %6162 = vmatpush1.bf16.msra.mxu1 %v8989_v13  ;;  %v4639_v60 = vld [vmem:[%s8358_s0 + $0xf0] sm:$0xff] }
 0x871   :  { %6100 = vmatprep.subr.bf16.mxu0 %v8990_v2  ;;  %6164 = vmatprep.subr.bf16.mxu1 %v8991_v31 }
 0x874   :  { %6102 = vmatpush1.bf16.msra.mxu0 %v8992_v35  ;;  %6166 = vmatpush1.bf16.msra.mxu1 %v8993_v21 }
 0x875   :  { %6104 = vmatprep.subr.bf16.mxu0 %v8994_v32  ;;  %6168 = vmatprep.subr.bf16.mxu1 %v8995_v0 }
 0x878   :  { %6106 = vmatpush1.bf16.msra.mxu0 %v8996_v39  ;;  %6170 = vmatpush1.bf16.msra.mxu1 %v8997_v25 }
 0x879   :  { %6108 = vmatprep.subr.bf16.mxu0 %v8998_v11  ;;  %6172 = vmatprep.subr.bf16.mxu1 %v8999_v7 }
 0x87c   :  { %6110 = vmatpush1.bf16.msra.mxu0 %v9000_v53  ;;  %6174 = vmatpush1.bf16.msra.mxu1 %v8178_v59  ;;  %v9008_v59 = vld [vmem:[#allocation13_spill] sm:$0xff] }
 0x87d   :  { %6112 = vmatprep.subr.bf16.mxu0 %v8181_v58  ;;  %6176 = vmatprep.subr.bf16.mxu1 %v8183_v9  ;;  %v3818_v56 = vrot.slane %v3809_v40, %v9008_v59 }
 0x880   :  { %6114 = vmatpush1.bf16.msra.mxu0 %v9001_v61  ;;  %6178 = vmatpush1.bf16.msra.mxu1 %v9002_v55 }
 0x881   :  { %6116 = vmatprep.subr.bf16.mxu0 %v9003_v18  ;;  %6180 = vmatprep.subr.bf16.mxu1 %v9004_v51 }
 0x884   :  { %6118 = vmatpush1.bf16.msra.mxu0 %v9005_v15  ;;  %6182 = vmatpush1.bf16.msra.mxu1 %v9006_v57 }
 0x8fa   :  { %v3897_v58 = vpop.f32.mrb[26].mxu0  ;;  %v3968_v30 = vpop.f32.mrb[26].mxu1 }
 0x8fb   :  { %v3898_v9 = vadd.f32 %v3897_v58, %v3814_v1  ;;  %v3899_v27 = vpop.f32.mrb[27].mxu0  ;;  %v3970_v12 = vpop.f32.mrb[27].mxu1  ;;  %v3969_v24 = vadd.f32 %v3968_v30, %v3822_v14 }
 0x8fc   :  { %v3900_v22 = vadd.f32 %v3899_v27, %v3818_v56  ;;  %v3971_v43 = vadd.f32 %v3970_v12, %v3826_v36  ;;  %v4372_v56 = vld [vmem:[#allocation10] sm:$0xf] }
 0x8fd   :  { %v4634_v44 = vmul.f32 -1.442695, %v3898_v9  ;;  %v4377_v58 = vrot.slane %v4372_v56, %v9007_v16  ;;  %v4381_v30 = vrot.slane %v4372_v56, %v9008_v59 }
 0x8fe   :  { %v4635_v6 = vmul.f32 -1.442695, %v3900_v22  ;;  %v4636_v17 = vmul.f32 -1.442695, %v3971_v43  ;;  %v4389_v43 = vrot.slane %v4372_v56, %v7008_v8 }
 0x8ff   :  { %6397 = vpow2.f32 %v4634_v44 }
 0x900   :  { %6399 = vpow2.f32 %v4635_v6 }
 0x901   :  { %6401 = vpow2.f32 %v4636_v17  ;;  %v4385_v17 = vrot.slane %v4372_v56, %v7011_v37 }
 0x902   :  { %6403 = vtanh.f32 %v3969_v24 }
 0x909   :  { %v6398_v49 = vpop.eup %6397 }
 0x90a   :  { %v6400_v45 = vpop.eup %6399  ;;  %v3979_v62 = vadd.f32 1.0, %v6398_v49 }
 0x90b   :  { %v3980_v42 = vadd.f32 1.0, %v6400_v45  ;;  %v6402_v38 = vpop.eup %6401 }
 0x90c   :  { %6405 = vrcp.f32 %v3979_v62  ;;  %v6404_v52 = vpop.eup %6403  ;;  %v3989_v19 = vadd.f32 1.0, %v6402_v38 }
 0x90d   :  { %6407 = vrcp.f32 %v3980_v42 }
 0x90e   :  { %6409 = vrcp.f32 %v3989_v19 }
 0x916   :  { %v6406_v48 = vpop.eup %6405 }
 0x917   :  { %v6408_v23 = vpop.eup %6407  ;;  %v3994_v63 = vmul.f32 %v6406_v48, %v6404_v52 }
 0x918   :  { %v3993_v5 = vmul.f32 %v6408_v23, %v8220_v33  ;;  %v6410_v13 = vpop.eup %6409 }
 0x91a   :  { %v4136_v28 = vpop.f32.mrb[28].mxu0  ;;  %v4207_v41 = vpop.f32.mrb[28].mxu1  ;;  %v8340_v50 = vadd.f32 %v3994_v63, %v3993_v5 }
 0x91b   :  { %v4212_v4 = vadd.f32 %v4637_v26, %v4136_v28  ;;  %v4138_v29 = vpop.f32.mrb[29].mxu0  ;;  %v4209_v47 = vpop.f32.mrb[29].mxu1  ;;  %v4214_v35 = vadd.f32 %v4639_v60, %v4207_v41 }
 0x91c   :  { %v4213_v34 = vadd.f32 %v4638_v10, %v4138_v29  ;;  %6411 = vtanh.f32 %v8340_v50  ;;  %v4215_v54 = vadd.f32 %v4640_v20, %v4209_v47 }
 0x91d   :  { %v4641_v33 = vmul.f32 -1.442695, %v4212_v4 }
 0x91e   :  { %v4642_v46 = vmul.f32 -1.442695, %v4213_v34  ;;  %v4643_v31 = vmul.f32 -1.442695, %v4215_v54 }
 0x91f   :  { %6413 = vpow2.f32 %v4641_v33 }
 0x920   :  { %6415 = vpow2.f32 %v4642_v46 }
 0x921   :  { %6417 = vpow2.f32 %v4643_v31 }
 0x922   :  { %6419 = vtanh.f32 %v4214_v35 }
 0x926   :  { %v6412_v2 = vpop.eup %6411 }
 0x927   :  { %v3997_v21 = vmul.f32 %v6412_v2, %v6410_v13 }
 0x929   :  { %v6414_v32 = vpop.eup %6413  ;;  %4458 = vmatprep.mubr.f32.mxu0 %v3997_v21  ;;  %4529 = vmatprep.mubr.f32.mxu1 %v3997_v21 }
 0x92a   :  { %v6416_v0 = vpop.eup %6415  ;;  %v4222_v39 = vadd.f32 1.0, %v6414_v32 }
 0x92b   :  { %v4223_v25 = vadd.f32 1.0, %v6416_v0  ;;  %v6418_v11 = vpop.eup %6417 }
 0x92c   :  { %6421 = vrcp.f32 %v4222_v39  ;;  %v6420_v7 = vpop.eup %6419  ;;  %v4232_v18 = vadd.f32 1.0, %v6418_v11 }
 0x92d   :  { %6423 = vrcp.f32 %v4223_v25 }
 0x92e   :  { %6425 = vrcp.f32 %v4232_v18 }
 0x936   :  { %v6422_v53 = vpop.eup %6421 }
 0x937   :  { %v6424_v61 = vpop.eup %6423  ;;  %v4237_v55 = vmul.f32 %v6422_v53, %v6420_v7 }
 0x938   :  { %v4236_v51 = vmul.f32 %v6424_v61, %v8230_v3  ;;  %v6426_v57 = vpop.eup %6425 }
 0x93a   :  { %v4238_v15 = vadd.f32 %v4237_v55, %v4236_v51 }
 0x93c   :  { %6427 = vtanh.f32 %v4238_v15 }
 0x946   :  { %v6428_v40 = vpop.eup %6427 }
 0x947   :  { %v4240_v1 = vmul.f32 %v6428_v40, %v6426_v57 }
 0x949   :  { %4459 = vmatmul.mubr.f32.vlgmr.msra.gmra.mrb[30].mxu0 %v4240_v1  ;;  %4530 = vmatmul.mubr.f32.vlgmr.msra.gmra.mrb[30].mxu1 %v4240_v1 }
 0xa1c   :  { %v4460_v9 = vpop.f32.mrb[30].mxu0  ;;  %v4531_v27 = vpop.f32.mrb[30].mxu1 }
 0xa1d   :  { %v4461_v12 = vadd.f32 %v4460_v9, %v4377_v58  ;;  %v4462_v22 = vpop.f32.mrb[31].mxu0  ;;  %v4533_v44 = vpop.f32.mrb[31].mxu1  ;;  %v4532_v49 = vadd.f32 %v4531_v27, %v4385_v17 }
 0xa1e   :  { %v4463_v6 = vadd.f32 %v4462_v22, %v4381_v30  ;;  %v4534_v14 = vadd.f32 %v4533_v44, %v4389_v43 }
 0xa1f   :  { %v4644_v3 = vmul.f32 -1.442695, %v4461_v12 }
 0xa20   :  { %v4645_v36 = vmul.f32 -1.442695, %v4463_v6  ;;  %v4646_v24 = vmul.f32 -1.442695, %v4534_v14 }
 0xa21   :  { %6429 = vpow2.f32 %v4644_v3 }
 0xa22   :  { %6431 = vpow2.f32 %v4645_v36 }
 0xa23   :  { %6433 = vpow2.f32 %v4646_v24 }
 0xa24   :  { %6435 = vtanh.f32 %v4532_v49 }
 0xa2b   :  { %v6430_v16 = vpop.eup %6429 }
 0xa2c   :  { %v6432_v45 = vpop.eup %6431  ;;  %v4542_v59 = vadd.f32 1.0, %v6430_v16 }
 0xa2d   :  { %v4543_v62 = vadd.f32 1.0, %v6432_v45  ;;  %v6434_v42 = vpop.eup %6433 }
 0xa2e   :  { %6437 = vrcp.f32 %v4542_v59  ;;  %v6436_v38 = vpop.eup %6435  ;;  %v4552_v23 = vadd.f32 1.0, %v6434_v42 }
 0xa2f   :  { %6439 = vrcp.f32 %v4543_v62 }
 0xa30   :  { %6441 = vrcp.f32 %v4552_v23 }
 0xa38   :  { %v6438_v52 = vpop.eup %6437 }
 0xa39   :  { %v6440_v48 = vpop.eup %6439  ;;  %v4557_v8 = vmul.f32 %v6438_v52, %v6436_v38 }
 0xa3a   :  { %v4556_v63 = vmul.f32 %v6440_v48, %v8340_v50  ;;  %v6442_v37 = vpop.eup %6441 }
 0xa3c   :  { %v4558_v19 = vadd.f32 %v4557_v8, %v4556_v63 }
 0xa3e   :  { %6443 = vtanh.f32 %v4558_v19 }
 0xa48   :  { %v6444_v5 = vpop.eup %6443 }
 0xa49   :  { %v4560_v26 = vmul.f32 %v6444_v5, %v6442_v37 }
 0xa4b   :  { %4564 = vst [vmem:[%s8362_s4] sm:$0xff] %v4560_v26 }
 0xa4c   :  { %4569 = vsyncpa [#allocation7], 1 }
 0xa4d   :  { %4570 = vsyncpa [#allocation9], 1 }

// kernel: simple_lstm_forward.3
= control target key start
LH: loop header
LB: loop body
LE: loop exit
PB: predicated region body
PF: predicated region fallthrough
CT: control target
= control target key end

     0   :  { %s11544_s24 = smov 0   ;;  %s12930_s0 = inlined_call_operand.vmem [shape: f32[8,128], index: 0, kind: input, shape index: {}]   ;;  %s12931_s1 = inlined_call_operand.vmem [shape: f32[8,32], index: 1, kind: input, shape index: {}]   ;;  %s12932_s2 = inlined_call_operand.vmem [shape: bf16[2,128,1024], index: 2, kind: input, shape index: {}]   ;;  %s12933_s3 = inlined_call_operand.vmem [shape: bf16[2,32,1024], index: 3, kind: input, shape index: {}]   ;;  %s12934_s4 = inlined_call_operand.vmem [shape: f32[2,1,1024], index: 4, kind: input, shape index: {}]   ;;  %s12935_s5 = inlined_call_operand.vmem [shape: bf16[2,1024,1024], index: 5, kind: input, shape index: {}]   ;;  %s12936_s6 = inlined_call_operand.vmem [shape: f32[2,1,1024], index: 6, kind: input, shape index: {}]   ;;  %s12937_s7 = inlined_call_operand.vmem [shape: bf16[2,1024,512], index: 7, kind: input, shape index: {}]   ;;  %s12938_s8 = inlined_call_operand.vmem [shape: f32[2,1,512], index: 8, kind: input, shape index: {}]   ;;  %s12939_s9 = inlined_call_operand.vmem [shape: bf16[2,512,512], index: 9, kind: input, shape index: {}]   ;;  %s12940_s10 = inlined_call_operand.vmem [shape: f32[2,1,512], index: 10, kind: input, shape index: {}]   ;;  %s12941_s11 = inlined_call_operand.vmem [shape: bf16[2,512,256], index: 11, kind: input, shape index: {}]   ;;  %s12942_s12 = inlined_call_operand.vmem [shape: f32[2,1,256], index: 12, kind: input, shape index: {}]   ;;  %s12943_s13 = inlined_call_operand.vmem [shape: bf16[2,256,128], index: 13, kind: input, shape index: {}]   ;;  %s12944_s14 = inlined_call_operand.vmem [shape: f32[2,1,128], index: 14, kind: input, shape index: {}]   ;;  %s12945_s15 = inlined_call_operand.vmem [shape: bf16[2,128,3], index: 15, kind: input, shape index: {}]   ;;  %s12946_s16 = inlined_call_operand.vmem [shape: f32[2,1,3], index: 16, kind: input, shape index: {}]   ;;  %s12947_s17 = inlined_call_operand.vmem [shape: f32[2,8,3], index: 17, kind: output, shape index: {}]  }
   0x1   :  { %12948 = sst [smem:[#allocation2_spill]] %s12930_s0 }
   0x2   :  { %12949 = sst [smem:[#allocation3_spill]] %s12931_s1 }
   0x3 LB: > { %s7266_s25 = sadd.s32 4294967295, %s11449_s24   ;;  %p7270_p0 = scmp.ge.s32.totalorder %s11449_s24, 1  ;;  %s11449_s24 = sphi %s11544_s24, %s27_s24  }
   0x4   : > { %p618_p1 = scmp.lt.s32.totalorder %s11449_s24, 3 }
   0x6   : > { %p619_p2 = pnand %p7270_p0, %p618_p1 }
   0x7   : > { %p730_p3 = scmp.lt.s32.totalorder (!%p619_p2), %s7266_s25, 1  ;;  %v11451_v0 = vmov (!%p619_p2), 0.0   ;;  %s12950_s21 = sld [smem:[#allocation3_spill]] (!%p619_p2)  ;;  %vm1042_vm0 = vcmask (!%p619_p2), 261120   ;;  %vm11453_vm1 = vmmov (!%p619_p2), 0   ;;  %vm7049_vm2 = vcmask (!%p619_p2), 23552  }
   0x8   : > { %622 = sbr.rel (%p619_p2) target bundleno = 2236 (0x8bc), region = 88  ;;  %1181 = vmatprep.mubr.f32.mxu1 (!%p619_p2), %v11451_v0  ;;  %1110 = vmatprep.mubr.f32.mxu0 (!%p619_p2), %v11451_v0  ;;  %s12951_s1 = sld [smem:[#allocation2_spill]] (!%p619_p2) }
   0xd   : > { %v11585_v17 = vld [vmem:[%s12950_s21] sm:$0xff] (!%p619_p2) }
   0xf   : > { %s12953_s25 = smov (!%p730_p3, %s7266_s25), 1 }
  0x10   : > { %s7302_s26 = sshll.u32 %s12953_s25, 7  ;;  %s7301_s0 = sshll.u32 %s12953_s25, 9 }
  0x11   : > { %s11562_s29 = scalar_lea.vmem %s12933_s3, %s7302_s26  ;;  %s11579_s19 = scalar_lea.vmem %s12932_s2, %s7301_s0 }
  0x12   : > { %v995_v1 = vld [vmem:[%s11562_s29 + $0x8] sm:$0xff]  ;;  %v997_v8 = vld [vmem:[%s11562_s29 + $0x18] sm:$0xff]  ;;  %v994_v14 = vld [vmem:[%s11562_s29] sm:$0xff]  ;;  %s7304_s22 = sshll.u32 %s12953_s25, 11  ;;  %s11790_s20 = sshll.u32 %s12953_s25, 3 }
  0x13   : > { %v999_v2 = vld [vmem:[%s11562_s29 + $0x28] sm:$0xff]  ;;  %v1001_v9 = vld [vmem:[%s11562_s29 + $0x38] sm:$0xff]  ;;  %v998_v15 = vld [vmem:[%s11562_s29 + $0x20] sm:$0xff]  ;;  %s11639_s28 = scalar_lea.vmem %s12937_s7, %s7304_s22  ;;  %s11798_s23 = scalar_lea.vmem %s12934_s4, %s11790_s20 }
  0x14   : > { %v1003_v3 = vld [vmem:[%s11562_s29 + $0x48] sm:$0xff]  ;;  %v9722_v4 = vcombine.high %v995_v1, %v999_v2  ;;  %v9723_v5 = vcombine.low %v995_v1, %v999_v2  ;;  %v9730_v11 = vcombine.high %v997_v8, %v1001_v9  ;;  %v1005_v12 = vld [vmem:[%s11562_s29 + $0x58] sm:$0xff]  ;;  %v9731_v16 = vcombine.low %v997_v8, %v1001_v9  ;;  %v1002_v20 = vld [vmem:[%s11562_s29 + $0x40] sm:$0xff]  ;;  %s12358_s30 = scalar_lea.vmem %s12936_s6, %s11790_s20  ;;  %s7308_s18 = sshll.u32 %s12953_s25, 6 }
  0x15   : > { %v1007_v6 = vld [vmem:[%s11562_s29 + $0x68] sm:$0xff]  ;;  %v1009_v13 = vld [vmem:[%s11562_s29 + $0x78] sm:$0xff]  ;;  %v9718_v18 = vcombine.high %v994_v14, %v998_v15  ;;  %v9719_v19 = vcombine.low %v994_v14, %v998_v15  ;;  %v1006_v21 = vld [vmem:[%s11562_s29 + $0x60] sm:$0xff] }
  0x16   : > { %v9724_v7 = vcombine.high %v1003_v3, %v1007_v6  ;;  %7523 = vmatprep.subr.bf16.mxu1 %v9722_v4  ;;  %v9725_v10 = vcombine.low %v1003_v3, %v1007_v6  ;;  %v9732_v22 = vcombine.high %v1005_v12, %v1009_v13  ;;  %v9720_v23 = vcombine.high %v1002_v20, %v1006_v21  ;;  %v801_v24 = vld [vmem:[%s11579_s19] sm:$0xff]  ;;  %v996_v35 = vld [vmem:[%s11562_s29 + $0x10] sm:$0xff] }
  0x17   : > { %7525 = vmatpush1.bf16.msra.mxu1 %v9723_v5  ;;  %v805_v25 = vld [vmem:[%s11579_s19 + $0x20] sm:$0xff]  ;;  %7515 = vmatprep.subr.bf16.mxu0 %v9718_v18  ;;  %v9721_v26 = vcombine.low %v1002_v20, %v1006_v21  ;;  %v9733_v27 = vcombine.low %v1005_v12, %v1009_v13  ;;  %v1000_v36 = vld [vmem:[%s11562_s29 + $0x30] sm:$0xff] }
  0x18   : > { %7527 = vmatprep.subr.bf16.mxu1 %v9724_v7  ;;  %7517 = vmatpush1.bf16.msra.mxu0 %v9719_v19  ;;  %v9734_v28 = vcombine.high %v801_v24, %v805_v25  ;;  %v809_v29 = vld [vmem:[%s11579_s19 + $0x40] sm:$0xff]  ;;  %v9735_v31 = vcombine.low %v801_v24, %v805_v25  ;;  %v9726_v38 = vcombine.high %v996_v35, %v1000_v36  ;;  %v1004_v39 = vld [vmem:[%s11562_s29 + $0x50] sm:$0xff]  ;;  %v806_v24 = vld [vmem:[%s11579_s19 + $0x28] sm:$0xff] }
  0x19   : > { %7519 = vmatprep.subr.bf16.mxu0 %v9720_v23  ;;  %v813_v30 = vld [vmem:[%s11579_s19 + $0x60] sm:$0xff]  ;;  %v9727_v41 = vcombine.low %v996_v35, %v1000_v36  ;;  %v1008_v42 = vld [vmem:[%s11562_s29 + $0x70] sm:$0xff]  ;;  %v802_v23 = vld [vmem:[%s11579_s19 + $0x8] sm:$0xff]  ;;  %s7303_s29 = sshll.u32 %s12953_s25, 12 }
  0x1a   : > { %v9736_v32 = vcombine.high %v809_v29, %v813_v30  ;;  %v817_v33 = vld [vmem:[%s11579_s19 + $0x80] sm:$0xff]  ;;  %v9737_v37 = vcombine.low %v809_v29, %v813_v30  ;;  %v803_v43 = vld [vmem:[%s11579_s19 + $0x10] sm:$0xff]  ;;  %v9728_v47 = vcombine.high %v1004_v39, %v1008_v42  ;;  %v9729_v48 = vcombine.low %v1004_v39, %v1008_v42  ;;  %s11656_s22 = scalar_lea.vmem %s12935_s5, %s7303_s29  ;;  %v822_v39 = vld [vmem:[%s11579_s19 + $0xa8] sm:$0xff] }
  0x1b   : > { %7529 = vmatpush1.bf16.msra.mxu1 %v9725_v10  ;;  %v821_v34 = vld [vmem:[%s11579_s19 + $0xa0] sm:$0xff]  ;;  %v807_v44 = vld [vmem:[%s11579_s19 + $0x30] sm:$0xff] }
  0x1c   : > { %7539 = vmatprep.subr.bf16.mxu1 %v9730_v11  ;;  %7521 = vmatpush1.bf16.msra.mxu0 %v9721_v26  ;;  %v9738_v40 = vcombine.high %v817_v33, %v821_v34  ;;  %v825_v45 = vld [vmem:[%s11579_s19 + $0xc0] sm:$0xff]  ;;  %v9739_v49 = vcombine.low %v817_v33, %v821_v34  ;;  %v9766_v50 = vcombine.high %v803_v43, %v807_v44  ;;  %v811_v52 = vld [vmem:[%s11579_s19 + $0x50] sm:$0xff] }
  0x1d   : > { %v829_v46 = vld [vmem:[%s11579_s19 + $0xe0] sm:$0xff]  ;;  %7531 = vmatprep.subr.bf16.mxu0 %v9726_v38  ;;  %v815_v53 = vld [vmem:[%s11579_s19 + $0x70] sm:$0xff]  ;;  %v9767_v56 = vcombine.low %v803_v43, %v807_v44  ;;  %v818_v38 = vld [vmem:[%s11579_s19 + $0x88] sm:$0xff] }
  0x1e   : > { %7294 = vmatmul.mubr.msk.f32.vlgmr.msra.gmra.mrb[0].mxu1 %vm1042_vm0, %v11585_v17  ;;  %v9740_v51 = vcombine.high %v825_v45, %v829_v46  ;;  %v833_v54 = vld [vmem:[%s11579_s19 + $0x100] sm:$0xff]  ;;  %v9741_v57 = vcombine.low %v825_v45, %v829_v46  ;;  %v9768_v58 = vcombine.high %v811_v52, %v815_v53  ;;  %v819_v60 = vld [vmem:[%s11579_s19 + $0x90] sm:$0xff]  ;;  %v9769_v1 = vcombine.low %v811_v52, %v815_v53  ;;  %v826_v46 = vld [vmem:[%s11579_s19 + $0xc8] sm:$0xff] }
  0x1f   : > { %7541 = vmatpush1.bf16.msra.mxu1 %v9731_v16  ;;  %1323 = vmatprep.mubr.f32.mxu1 %v11451_v0  ;;  %v837_v55 = vld [vmem:[%s11579_s19 + $0x120] sm:$0xff]  ;;  %v823_v61 = vld [vmem:[%s11579_s19 + $0xb0] sm:$0xff]  ;;  %v9755_v53 = vcombine.low %v818_v38, %v822_v39 }
  0x20   : > { %7543 = vmatprep.subr.bf16.mxu1 %v9732_v22  ;;  %7293 = vmatmul.mubr.msk.f32.vlgmr.msra.gmra.mrb[0].mxu0 %vm1042_vm0, %v11585_v17  ;;  %v9742_v59 = vcombine.high %v833_v54, %v837_v55  ;;  %v841_v62 = vld [vmem:[%s11579_s19 + $0x140] sm:$0xff]  ;;  %v9743_v2 = vcombine.low %v833_v54, %v837_v55  ;;  %v9770_v3 = vcombine.high %v819_v60, %v823_v61  ;;  %v827_v5 = vld [vmem:[%s11579_s19 + $0xd0] sm:$0xff]  ;;  %v834_v54 = vld [vmem:[%s11579_s19 + $0x108] sm:$0xff] }
  0x21   : > { %1252 = vmatprep.mubr.f32.mxu0 %v11451_v0  ;;  %7533 = vmatpush1.bf16.msra.mxu0 %v9727_v41  ;;  %v845_v63 = vld [vmem:[%s11579_s19 + $0x160] sm:$0xff]  ;;  %v831_v6 = vld [vmem:[%s11579_s19 + $0xf0] sm:$0xff]  ;;  %v9771_v9 = vcombine.low %v819_v60, %v823_v61  ;;  %v838_v55 = vld [vmem:[%s11579_s19 + $0x128] sm:$0xff] }
  0x22   : > { %7535 = vmatprep.subr.bf16.mxu0 %v9728_v47  ;;  %v9744_v4 = vcombine.high %v841_v62, %v845_v63  ;;  %v849_v7 = vld [vmem:[%s11579_s19 + $0x180] sm:$0xff]  ;;  %v9745_v10 = vcombine.low %v841_v62, %v845_v63  ;;  %v9772_v11 = vcombine.high %v827_v5, %v831_v6  ;;  %v835_v13 = vld [vmem:[%s11579_s19 + $0x110] sm:$0xff]  ;;  %v830_v47 = vld [vmem:[%s11579_s19 + $0xe8] sm:$0xff] }
  0x23   : > { %7545 = vmatpush1.bf16.msra.mxu1 %v9733_v27  ;;  %v853_v8 = vld [vmem:[%s11579_s19 + $0x1a0] sm:$0xff]  ;;  %v839_v14 = vld [vmem:[%s11579_s19 + $0x130] sm:$0xff]  ;;  %v810_v27 = vld [vmem:[%s11579_s19 + $0x48] sm:$0xff]  ;;  %v9757_v61 = vcombine.low %v826_v46, %v830_v47 }
  0x24   : > { %7547 = vmatprep.subr.bf16.mxu1 %v9734_v28  ;;  %v9746_v12 = vcombine.high %v849_v7, %v853_v8  ;;  %v857_v15 = vld [vmem:[%s11579_s19 + $0x1c0] sm:$0xff]  ;;  %v9747_v18 = vcombine.low %v849_v7, %v853_v8  ;;  %v9774_v19 = vcombine.high %v835_v13, %v839_v14  ;;  %v843_v21 = vld [vmem:[%s11579_s19 + $0x150] sm:$0xff]  ;;  %v9775_v25 = vcombine.low %v835_v13, %v839_v14  ;;  %v814_v28 = vld [vmem:[%s11579_s19 + $0x68] sm:$0xff] }
  0x25   : > { %7537 = vmatpush1.bf16.msra.mxu0 %v9729_v48  ;;  %v861_v16 = vld [vmem:[%s11579_s19 + $0x1e0] sm:$0xff]  ;;  %v847_v22 = vld [vmem:[%s11579_s19 + $0x170] sm:$0xff]  ;;  %v9753_v45 = vcombine.low %v810_v27, %v814_v28  ;;  %v842_v62 = vld [vmem:[%s11579_s19 + $0x148] sm:$0xff] }
  0x26   : > { %7296 = vmatmul.mubr.msk.f32.vlgmr.msra.gmra.mrb[2].mxu1 %vm1042_vm0, %v11585_v17  ;;  %7611 = vmatprep.subr.bf16.mxu0 %v9766_v50  ;;  %v9748_v20 = vcombine.high %v857_v15, %v861_v16  ;;  %v9749_v26 = vcombine.low %v857_v15, %v861_v16  ;;  %v9776_v29 = vcombine.high %v843_v21, %v847_v22  ;;  %v851_v30 = vld [vmem:[%s11579_s19 + $0x190] sm:$0xff]  ;;  %v11649_v33 = vld [vmem:[%s12951_s1] sm:$0xff]  ;;  %v846_v63 = vld [vmem:[%s11579_s19 + $0x168] sm:$0xff]  ;;  %s11787_s1 = scalar_lea.vmem %s12941_s11, %s7301_s0  ;;  %s787_s0 = scalar_lea.vmem %s12944_s14, %s12953_s25 }
  0x27   : > { %7549 = vmatpush1.bf16.msra.mxu1 %v9735_v31  ;;  %1394 = vmatprep.mubr.f32.mxu1 %v11451_v0  ;;  %v9750_v31 = vcombine.high %v802_v23, %v806_v24  ;;  %v9777_v34 = vcombine.low %v843_v21, %v847_v22  ;;  %v859_v35 = vld [vmem:[%s11579_s19 + $0x1d0] sm:$0xff]  ;;  %v1672_v43 = vld [vmem:[%s11656_s22] sm:$0xff]  ;;  %v850_v7 = vld [vmem:[%s11579_s19 + $0x188] sm:$0xff]  ;;  %v9761_v14 = vcombine.low %v842_v62, %v846_v63 }
  0x28   : > { %7551 = vmatprep.subr.bf16.mxu1 %v9736_v32  ;;  %7295 = vmatmul.mubr.msk.f32.vlgmr.msra.gmra.mrb[2].mxu0 %vm1042_vm0, %v11585_v17  ;;  %v9773_v17 = vcombine.low %v827_v5, %v831_v6  ;;  %v855_v32 = vld [vmem:[%s11579_s19 + $0x1b0] sm:$0xff]  ;;  %v1676_v44 = vld [vmem:[%s11656_s22 + $0x20] sm:$0xff]  ;;  %v9759_v6 = vcombine.low %v834_v54, %v838_v55  ;;  %v854_v8 = vld [vmem:[%s11579_s19 + $0x1a8] sm:$0xff] }
  0x29   : > { %7613 = vmatpush1.bf16.msra.mxu0 %v9767_v56  ;;  %1536 = vmatprep.mubr.f32.mxu0 %v11451_v0  ;;  %v863_v36 = vld [vmem:[%s11579_s19 + $0x1f0] sm:$0xff]  ;;  %v9778_v41 = vcombine.high %v851_v30, %v855_v32  ;;  %v9779_v42 = vcombine.low %v851_v30, %v855_v32  ;;  %v1684_v52 = vld [vmem:[%s11656_s22 + $0x60] sm:$0xff]  ;;  %v9798_v56 = vcombine.high %v1672_v43, %v1676_v44  ;;  %v858_v15 = vld [vmem:[%s11579_s19 + $0x1c8] sm:$0xff] }
  0x2a   : > { %7615 = vmatprep.subr.bf16.mxu0 %v9768_v58  ;;  %v9780_v48 = vcombine.high %v859_v35, %v863_v36  ;;  %v9781_v50 = vcombine.low %v859_v35, %v863_v36  ;;  %v9799_v58 = vcombine.low %v1672_v43, %v1676_v44  ;;  %v1692_v60 = vld [vmem:[%s11656_s22 + $0xa0] sm:$0xff]  ;;  %v862_v16 = vld [vmem:[%s11579_s19 + $0x1e8] sm:$0xff]  ;;  %v9763_v22 = vcombine.low %v850_v7, %v854_v8  ;;  %v816_v30 = vld [vmem:[%s11579_s19 + $0x78] sm:$0xff] }
  0x2b   : > { %7553 = vmatpush1.bf16.msra.mxu1 %v9737_v37  ;;  %v9751_v37 = vcombine.low %v802_v23, %v806_v24  ;;  %v1700_v5 = vld [vmem:[%s11656_s22 + $0xe0] sm:$0xff]  ;;  %v804_v23 = vld [vmem:[%s11579_s19 + $0x18] sm:$0xff] }
  0x2c   : > { %7555 = vmatprep.subr.bf16.mxu1 %v9738_v40  ;;  %v9752_v40 = vcombine.high %v810_v27, %v814_v28  ;;  %v1708_v13 = vld [vmem:[%s11656_s22 + $0x120] sm:$0xff]  ;;  %v808_v24 = vld [vmem:[%s11579_s19 + $0x38] sm:$0xff]  ;;  %v9765_v28 = vcombine.low %v858_v15, %v862_v16 }
  0x2d   : > { %7617 = vmatpush1.bf16.msra.mxu0 %v9769_v1  ;;  %v1716_v21 = vld [vmem:[%s11656_s22 + $0x160] sm:$0xff]  ;;  %v9782_v35 = vcombine.high %v804_v23, %v808_v24 }
  0x2e   : > { %7619 = vmatprep.subr.bf16.mxu0 %v9770_v3  ;;  %v1720_v32 = vld [vmem:[%s11656_s22 + $0x180] sm:$0xff] }
  0x2f   : > { %7557 = vmatpush1.bf16.msra.mxu1 %v9739_v49  ;;  %v9754_v49 = vcombine.high %v818_v38, %v822_v39  ;;  %v1732_v38 = vld [vmem:[%s11656_s22 + $0x1e0] sm:$0xff]  ;;  %v9783_v39 = vcombine.low %v804_v23, %v808_v24 }
  0x30   : > { %7559 = vmatprep.subr.bf16.mxu1 %v9740_v51  ;;  %v1680_v51 = vld [vmem:[%s11656_s22 + $0x40] sm:$0xff] }
  0x31   : > { %7621 = vmatpush1.bf16.msra.mxu0 %v9771_v9  ;;  %v9800_v1 = vcombine.high %v1680_v51, %v1684_v52  ;;  %v9801_v3 = vcombine.low %v1680_v51, %v1684_v52  ;;  %v1780_v23 = vld [vmem:[%s11656_s22 + $0x360] sm:$0xff] }
  0x32   : > { %7623 = vmatprep.subr.bf16.mxu0 %v9772_v11 }
  0x33   : > { %7561 = vmatpush1.bf16.msra.mxu1 %v9741_v57  ;;  %v9756_v57 = vcombine.high %v826_v46, %v830_v47  ;;  %v1740_v46 = vld [vmem:[%s11656_s22 + $0x220] sm:$0xff] }
  0x34   : > { %7563 = vmatprep.subr.bf16.mxu1 %v9742_v59  ;;  %v1688_v59 = vld [vmem:[%s11656_s22 + $0x80] sm:$0xff] }
  0x35   : > { %7625 = vmatpush1.bf16.msra.mxu0 %v9773_v17  ;;  %v9802_v9 = vcombine.high %v1688_v59, %v1692_v60  ;;  %v9803_v11 = vcombine.low %v1688_v59, %v1692_v60 }
  0x36   : > { %7627 = vmatprep.subr.bf16.mxu0 %v9774_v19 }
  0x37   : > { %7565 = vmatpush1.bf16.msra.mxu1 %v9743_v2  ;;  %v9758_v2 = vcombine.high %v834_v54, %v838_v55  ;;  %v1748_v54 = vld [vmem:[%s11656_s22 + $0x260] sm:$0xff] }
  0x38   : > { %7567 = vmatprep.subr.bf16.mxu1 %v9744_v4  ;;  %v1696_v4 = vld [vmem:[%s11656_s22 + $0xc0] sm:$0xff] }
  0x39   : > { %7629 = vmatpush1.bf16.msra.mxu0 %v9775_v25  ;;  %v9804_v17 = vcombine.high %v1696_v4, %v1700_v5  ;;  %v9805_v19 = vcombine.low %v1696_v4, %v1700_v5 }
  0x3a   : > { %7631 = vmatprep.subr.bf16.mxu0 %v9776_v29  ;;  %v812_v29 = vld [vmem:[%s11579_s19 + $0x58] sm:$0xff] }
  0x3b   : > { %7569 = vmatpush1.bf16.msra.mxu1 %v9745_v10  ;;  %v9760_v10 = vcombine.high %v842_v62, %v846_v63  ;;  %v9785_v47 = vcombine.low %v812_v29, %v816_v30  ;;  %v1756_v62 = vld [vmem:[%s11656_s22 + $0x2a0] sm:$0xff] }
  0x3c   : > { %7571 = vmatprep.subr.bf16.mxu1 %v9746_v12  ;;  %v1704_v12 = vld [vmem:[%s11656_s22 + $0x100] sm:$0xff] }
  0x3d   : > { %7633 = vmatpush1.bf16.msra.mxu0 %v9777_v34  ;;  %v9806_v25 = vcombine.high %v1704_v12, %v1708_v13  ;;  %v9807_v27 = vcombine.low %v1704_v12, %v1708_v13  ;;  %v1724_v34 = vld [vmem:[%s11656_s22 + $0x1a0] sm:$0xff] }
  0x3e   : > { %7635 = vmatprep.subr.bf16.mxu0 %v9778_v41  ;;  %v824_v41 = vld [vmem:[%s11579_s19 + $0xb8] sm:$0xff]  ;;  %v9810_v43 = vcombine.high %v1720_v32, %v1724_v34  ;;  %v9811_v44 = vcombine.low %v1720_v32, %v1724_v34  ;;  %v1685_v32 = vld [vmem:[%s11656_s22 + $0x68] sm:$0xff] }
  0x3f   : > { %7573 = vmatpush1.bf16.msra.mxu1 %v9747_v18  ;;  %v9762_v18 = vcombine.high %v850_v7, %v854_v8  ;;  %v1764_v7 = vld [vmem:[%s11656_s22 + $0x2e0] sm:$0xff] }
  0x40   : > { %7575 = vmatprep.subr.bf16.mxu1 %v9748_v20  ;;  %v1712_v20 = vld [vmem:[%s11656_s22 + $0x140] sm:$0xff] }
  0x41   : > { %7637 = vmatpush1.bf16.msra.mxu0 %v9779_v42  ;;  %v9809_v36 = vcombine.low %v1712_v20, %v1716_v21  ;;  %v9784_v42 = vcombine.high %v812_v29, %v816_v30 }
  0x42   : > { %7639 = vmatprep.subr.bf16.mxu0 %v9780_v48  ;;  %v828_v48 = vld [vmem:[%s11579_s19 + $0xd8] sm:$0xff] }
  0x43   : > { %7577 = vmatpush1.bf16.msra.mxu1 %v9749_v26  ;;  %v9764_v26 = vcombine.high %v858_v15, %v862_v16  ;;  %v1772_v15 = vld [vmem:[%s11656_s22 + $0x320] sm:$0xff] }
  0x44   : > { %7579 = vmatprep.subr.bf16.mxu1 %v9750_v31  ;;  %v9808_v31 = vcombine.high %v1712_v20, %v1716_v21 }
  0x45   : > { %7641 = vmatpush1.bf16.msra.mxu0 %v9781_v50 }
  0x46   : > { %1395 = vmatmul.mubr.f32.vlgmr.msra.gmra.mrb[4].mxu1 %v11649_v33  ;;  %7675 = vmatprep.subr.bf16.mxu0 %v9798_v56  ;;  %v836_v56 = vld [vmem:[%s11579_s19 + $0x118] sm:$0xff] }
  0x47   : > { %7581 = vmatpush1.bf16.msra.mxu1 %v9751_v37  ;;  %1465 = vmatprep.mubr.f32.mxu1 %v11451_v0  ;;  %v1728_v37 = vld [vmem:[%s11656_s22 + $0x1c0] sm:$0xff] }
  0x48   : > { %7583 = vmatprep.subr.bf16.mxu1 %v9752_v40  ;;  %1537 = vmatmul.mubr.f32.vlgmr.msra.gmra.mrb[2].mxu0 %v11649_v33  ;;  %v820_v40 = vld [vmem:[%s11579_s19 + $0x98] sm:$0xff]  ;;  %v9812_v50 = vcombine.high %v1728_v37, %v1732_v38  ;;  %v9813_v52 = vcombine.low %v1728_v37, %v1732_v38  ;;  %v1689_v38 = vld [vmem:[%s11656_s22 + $0x88] sm:$0xff] }
  0x49   : > { %7677 = vmatpush1.bf16.msra.mxu0 %v9799_v58  ;;  %v9786_v51 = vcombine.high %v820_v40, %v824_v41  ;;  %v9787_v55 = vcombine.low %v820_v40, %v824_v41 }
  0x4a   : > { %7679 = vmatprep.subr.bf16.mxu0 %v9800_v1  ;;  %v844_v1 = vld [vmem:[%s11579_s19 + $0x158] sm:$0xff] }
  0x4b   : > { %7585 = vmatpush1.bf16.msra.mxu1 %v9753_v45  ;;  %v1736_v45 = vld [vmem:[%s11656_s22 + $0x200] sm:$0xff] }
  0x4c   : > { %7587 = vmatprep.subr.bf16.mxu1 %v9754_v49  ;;  %v832_v49 = vld [vmem:[%s11579_s19 + $0xf8] sm:$0xff]  ;;  %v9814_v58 = vcombine.high %v1736_v45, %v1740_v46  ;;  %v9815_v60 = vcombine.low %v1736_v45, %v1740_v46  ;;  %v1705_v46 = vld [vmem:[%s11656_s22 + $0x108] sm:$0xff] }
  0x4d   : > { %7681 = vmatpush1.bf16.msra.mxu0 %v9801_v3  ;;  %v9788_v59 = vcombine.high %v828_v48, %v832_v49  ;;  %v9789_v63 = vcombine.low %v828_v48, %v832_v49  ;;  %v1713_v49 = vld [vmem:[%s11656_s22 + $0x148] sm:$0xff] }
  0x4e   : > { %7683 = vmatprep.subr.bf16.mxu0 %v9802_v9  ;;  %v852_v9 = vld [vmem:[%s11579_s19 + $0x198] sm:$0xff] }
  0x4f   : > { %7589 = vmatpush1.bf16.msra.mxu1 %v9755_v53  ;;  %v1744_v53 = vld [vmem:[%s11656_s22 + $0x240] sm:$0xff] }
  0x50   : > { %7591 = vmatprep.subr.bf16.mxu1 %v9756_v57  ;;  %v840_v57 = vld [vmem:[%s11579_s19 + $0x138] sm:$0xff]  ;;  %v9816_v3 = vcombine.high %v1744_v53, %v1748_v54  ;;  %v9817_v5 = vcombine.low %v1744_v53, %v1748_v54  ;;  %v1721_v53 = vld [vmem:[%s11656_s22 + $0x188] sm:$0xff] }
  0x51   : > { %7685 = vmatpush1.bf16.msra.mxu0 %v9803_v11  ;;  %v9790_v4 = vcombine.high %v836_v56, %v840_v57  ;;  %v9791_v8 = vcombine.low %v836_v56, %v840_v57  ;;  %v1725_v54 = vld [vmem:[%s11656_s22 + $0x1a8] sm:$0xff]  ;;  %v1784_v56 = vld [vmem:[%s11656_s22 + $0x380] sm:$0xff] }
  0x52   : > { %7687 = vmatprep.subr.bf16.mxu0 %v9804_v17  ;;  %v860_v17 = vld [vmem:[%s11579_s19 + $0x1d8] sm:$0xff]  ;;  %v1788_v57 = vld [vmem:[%s11656_s22 + $0x3a0] sm:$0xff] }
  0x53   : > { %7593 = vmatpush1.bf16.msra.mxu1 %v9757_v61  ;;  %v1752_v61 = vld [vmem:[%s11656_s22 + $0x280] sm:$0xff] }
  0x54   : > { %7595 = vmatprep.subr.bf16.mxu1 %v9758_v2  ;;  %v848_v2 = vld [vmem:[%s11579_s19 + $0x178] sm:$0xff]  ;;  %v9818_v11 = vcombine.high %v1752_v61, %v1756_v62  ;;  %v9819_v13 = vcombine.low %v1752_v61, %v1756_v62  ;;  %v9938_v61 = vcombine.high %v1721_v53, %v1725_v54  ;;  %v9827_v62 = vcombine.low %v1784_v56, %v1788_v57 }
  0x55   : > { %7689 = vmatpush1.bf16.msra.mxu0 %v9805_v19  ;;  %v9792_v12 = vcombine.high %v844_v1, %v848_v2  ;;  %v9793_v16 = vcombine.low %v844_v1, %v848_v2  ;;  %v1792_v1 = vld [vmem:[%s11656_s22 + $0x3c0] sm:$0xff] }
  0x56   : > { %7691 = vmatprep.subr.bf16.mxu0 %v9806_v25  ;;  %v1673_v25 = vld [vmem:[%s11656_s22 + $0x8] sm:$0xff]  ;;  %v1796_v2 = vld [vmem:[%s11656_s22 + $0x3e0] sm:$0xff] }
  0x57   : > { %7597 = vmatpush1.bf16.msra.mxu1 %v9759_v6  ;;  %v1760_v6 = vld [vmem:[%s11656_s22 + $0x2c0] sm:$0xff] }
  0x58   : > { %7599 = vmatprep.subr.bf16.mxu1 %v9760_v10  ;;  %v856_v10 = vld [vmem:[%s11579_s19 + $0x1b8] sm:$0xff]  ;;  %v9820_v19 = vcombine.high %v1760_v6, %v1764_v7  ;;  %v9821_v21 = vcombine.low %v1760_v6, %v1764_v7  ;;  %v9828_v6 = vcombine.high %v1792_v1, %v1796_v2 }
  0x59   : > { %7693 = vmatpush1.bf16.msra.mxu0 %v9807_v27  ;;  %v9794_v20 = vcombine.high %v852_v9, %v856_v10  ;;  %v9795_v24 = vcombine.low %v852_v9, %v856_v10  ;;  %v11749_v9 = vld [vmem:[%s11656_s22 + $0x400] sm:$0xff] }
  0x5a   : > { %7695 = vmatprep.subr.bf16.mxu0 %v9808_v31  ;;  %v1681_v31 = vld [vmem:[%s11656_s22 + $0x48] sm:$0xff]  ;;  %v11752_v10 = vld [vmem:[%s11656_s22 + $0x420] sm:$0xff] }
  0x5b   : > { %7601 = vmatpush1.bf16.msra.mxu1 %v9761_v14  ;;  %v1768_v14 = vld [vmem:[%s11656_s22 + $0x300] sm:$0xff]  ;;  %v9928_v40 = vcombine.high %v1681_v31, %v1685_v32  ;;  %v9929_v41 = vcombine.low %v1681_v31, %v1685_v32  ;;  %v1773_v31 = vld [vmem:[%s11656_s22 + $0x328] sm:$0xff] }
  0x5c   : > { %7603 = vmatprep.subr.bf16.mxu1 %v9762_v18  ;;  %v864_v18 = vld [vmem:[%s11579_s19 + $0x1f8] sm:$0xff]  ;;  %v9822_v27 = vcombine.high %v1768_v14, %v1772_v15  ;;  %v9823_v29 = vcombine.low %v1768_v14, %v1772_v15  ;;  %s7305_s19 = sshll.u32 %s12953_s25, 10  ;;  %v1749_v14 = vld [vmem:[%s11656_s22 + $0x268] sm:$0xff]  ;;  %v9830_v15 = vcombine.high %v11749_v9, %v11752_v10 }
  0x5d   : > { %7697 = vmatpush1.bf16.msra.mxu0 %v9809_v36  ;;  %v9797_v30 = vcombine.low %v860_v17, %v864_v18  ;;  %s11738_s29 = scalar_lea.vmem %s12939_s9, %s7305_s19  ;;  %s792_s19 = scalar_lea.vmem %s12945_s15, %s7308_s18 }
  0x5e   : > { %7699 = vmatprep.subr.bf16.mxu0 %v9810_v43  ;;  %v1701_v43 = vld [vmem:[%s11656_s22 + $0xe8] sm:$0xff]  ;;  %s799_s18 = scalar_lea.vmem %s12947_s17, %s11790_s20 }
  0x5f   : > { %7605 = vmatpush1.bf16.msra.mxu1 %v9763_v22  ;;  %v1776_v22 = vld [vmem:[%s11656_s22 + $0x340] sm:$0xff] }
  0x60   : > { %7607 = vmatprep.subr.bf16.mxu1 %v9764_v26  ;;  %v1677_v26 = vld [vmem:[%s11656_s22 + $0x28] sm:$0xff]  ;;  %v9824_v34 = vcombine.high %v1776_v22, %v1780_v23  ;;  %v9825_v36 = vcombine.low %v1776_v22, %v1780_v23 }
  0x61   : > { %7701 = vmatpush1.bf16.msra.mxu0 %v9811_v44  ;;  %v9927_v37 = vcombine.low %v1673_v25, %v1677_v26  ;;  %v1757_v23 = vld [vmem:[%s11656_s22 + $0x2a8] sm:$0xff] }
  0x62   : > { %7703 = vmatprep.subr.bf16.mxu0 %v9812_v50  ;;  %v1717_v50 = vld [vmem:[%s11656_s22 + $0x168] sm:$0xff] }
  0x63   : > { %7609 = vmatpush1.bf16.msra.mxu1 %v9765_v28  ;;  %v9796_v28 = vcombine.high %v860_v17, %v864_v18  ;;  %v9831_v18 = vcombine.low %v11749_v9, %v11752_v10  ;;  %v1825_v9 = vld [vmem:[%s11656_s22 + $0x4c8] sm:$0xff] }
  0x64   : > { %7643 = vmatprep.subr.bf16.mxu1 %v9782_v35  ;;  %v9926_v35 = vcombine.high %v1673_v25, %v1677_v26  ;;  %v1761_v25 = vld [vmem:[%s11656_s22 + $0x2c8] sm:$0xff] }
  0x65   : > { %7705 = vmatpush1.bf16.msra.mxu0 %v9813_v52  ;;  %v1829_v10 = vld [vmem:[%s11656_s22 + $0x4e8] sm:$0xff] }
  0x66   : > { %1466 = vmatmul.mubr.f32.vlgmr.msra.gmra.mrb[0].mxu1 %v11649_v33  ;;  %7707 = vmatprep.subr.bf16.mxu0 %v9814_v58  ;;  %v9937_v58 = vcombine.low %v1713_v49, %v1717_v50 }
  0x67   : > { %7645 = vmatpush1.bf16.msra.mxu1 %v9783_v39  ;;  %1607 = vmatprep.mubr.f32.mxu1 %v11451_v0  ;;  %v1693_v39 = vld [vmem:[%s11656_s22 + $0xa8] sm:$0xff] }
  0x68   : > { %7647 = vmatprep.subr.bf16.mxu1 %v9784_v42  ;;  %v1697_v42 = vld [vmem:[%s11656_s22 + $0xc8] sm:$0xff]  ;;  %v9930_v44 = vcombine.high %v1689_v38, %v1693_v39  ;;  %v9931_v45 = vcombine.low %v1689_v38, %v1693_v39 }
  0x69   : > { %7709 = vmatpush1.bf16.msra.mxu0 %v9815_v60  ;;  %v9932_v48 = vcombine.high %v1697_v42, %v1701_v43  ;;  %v9826_v60 = vcombine.high %v1784_v56, %v1788_v57  ;;  %v1785_v38 = vld [vmem:[%s11656_s22 + $0x388] sm:$0xff] }
  0x6a   : > { %7711 = vmatprep.subr.bf16.mxu0 %v9816_v3  ;;  %v9939_v3 = vcombine.low %v1721_v53, %v1725_v54  ;;  %v11804_v53 = vld [vmem:[%s11798_s23] sm:$0xff] }
  0x6b   : > { %7649 = vmatpush1.bf16.msra.mxu1 %v9785_v47  ;;  %v1709_v47 = vld [vmem:[%s11656_s22 + $0x128] sm:$0xff] }
  0x6c   : > { %7651 = vmatprep.subr.bf16.mxu1 %v9786_v51  ;;  %v9934_v51 = vcombine.high %v1705_v46, %v1709_v47  ;;  %v9935_v52 = vcombine.low %v1705_v46, %v1709_v47 }
  0x6d   : > { %7713 = vmatpush1.bf16.msra.mxu0 %v9817_v5  ;;  %v1741_v5 = vld [vmem:[%s11656_s22 + $0x228] sm:$0xff] }
  0x6e   : > { %7715 = vmatprep.subr.bf16.mxu0 %v9818_v11  ;;  %v11755_v11 = vld [vmem:[%s11656_s22 + $0x408] sm:$0xff] }
  0x6f   : > { %7653 = vmatpush1.bf16.msra.mxu1 %v9787_v55  ;;  %v9936_v55 = vcombine.high %v1713_v49, %v1717_v50  ;;  %v1616_v50 = vlaneseq }
  0x70   : > { %7655 = vmatprep.subr.bf16.mxu1 %v9788_v59  ;;  %v1729_v59 = vld [vmem:[%s11656_s22 + $0x1c8] sm:$0xff] }
  0x71   : > { %7717 = vmatpush1.bf16.msra.mxu0 %v9819_v13  ;;  %v1745_v13 = vld [vmem:[%s11656_s22 + $0x248] sm:$0xff] }
  0x72   : > { %7719 = vmatprep.subr.bf16.mxu0 %v9820_v19  ;;  %v9944_v22 = vcombine.high %v1745_v13, %v1749_v14 }
  0x73   : > { %7657 = vmatpush1.bf16.msra.mxu1 %v9789_v63  ;;  %v1733_v63 = vld [vmem:[%s11656_s22 + $0x1e8] sm:$0xff] }
  0x74   : > { %7659 = vmatprep.subr.bf16.mxu1 %v9790_v4  ;;  %v1737_v4 = vld [vmem:[%s11656_s22 + $0x208] sm:$0xff]  ;;  %v9940_v7 = vcombine.high %v1729_v59, %v1733_v63 }
  0x75   : > { %7721 = vmatpush1.bf16.msra.mxu0 %v9821_v21  ;;  %v9942_v17 = vcombine.high %v1737_v4, %v1741_v5  ;;  %v1753_v21 = vld [vmem:[%s11656_s22 + $0x288] sm:$0xff] }
  0x76   : > { %7723 = vmatprep.subr.bf16.mxu0 %v9822_v27  ;;  %v9946_v26 = vcombine.high %v1753_v21, %v1757_v23  ;;  %v1765_v27 = vld [vmem:[%s11656_s22 + $0x2e8] sm:$0xff] }
  0x77   : > { %7661 = vmatpush1.bf16.msra.mxu1 %v9791_v8  ;;  %v9829_v8 = vcombine.low %v1792_v1, %v1796_v2  ;;  %v9949_v32 = vcombine.low %v1761_v25, %v1765_v27  ;;  %v1812_v1 = vld [vmem:[%s11656_s22 + $0x460] sm:$0xff]  ;;  %v1809_v2 = vld [vmem:[%s11656_s22 + $0x448] sm:$0xff] }
  0x78   : > { %7663 = vmatprep.subr.bf16.mxu1 %v9792_v12  ;;  %v9941_v12 = vcombine.low %v1729_v59, %v1733_v63 }
  0x79   : > { %7725 = vmatpush1.bf16.msra.mxu0 %v9823_v29  ;;  %v1769_v29 = vld [vmem:[%s11656_s22 + $0x308] sm:$0xff] }
  0x7a   : > { %7727 = vmatprep.subr.bf16.mxu0 %v9824_v34  ;;  %v1777_v34 = vld [vmem:[%s11656_s22 + $0x348] sm:$0xff] }
  0x7b   : > { %7665 = vmatpush1.bf16.msra.mxu1 %v9793_v16  ;;  %v11762_v16 = vld [vmem:[%s11656_s22 + $0x428] sm:$0xff] }
  0x7c   : > { %7667 = vmatprep.subr.bf16.mxu1 %v9794_v20  ;;  %v9959_v19 = vcombine.low %v11755_v11, %v11762_v16  ;;  %v9943_v20 = vcombine.low %v1737_v4, %v1741_v5 }
  0x7d   : > { %7729 = vmatpush1.bf16.msra.mxu0 %v9825_v36  ;;  %v1781_v36 = vld [vmem:[%s11656_s22 + $0x368] sm:$0xff] }
  0x7e   : > { %7731 = vmatprep.subr.bf16.mxu0 %v9826_v60  ;;  %v9952_v39 = vcombine.high %v1777_v34, %v1781_v36 }
  0x7f   : > { %7669 = vmatpush1.bf16.msra.mxu1 %v9795_v24  ;;  %v9945_v24 = vcombine.low %v1745_v13, %v1749_v14  ;;  %v1817_v13 = vld [vmem:[%s11656_s22 + $0x488] sm:$0xff] }
  0x80   : > { %7671 = vmatprep.subr.bf16.mxu1 %v9796_v28  ;;  %v9947_v28 = vcombine.low %v1753_v21, %v1757_v23  ;;  %v1821_v14 = vld [vmem:[%s11656_s22 + $0x4a8] sm:$0xff] }
  0x81   : > { %7733 = vmatpush1.bf16.msra.mxu0 %v9827_v62  ;;  %v1808_v62 = vld [vmem:[%s11656_s22 + $0x440] sm:$0xff]  ;;  %v9962_v21 = vcombine.high %v1817_v13, %v1821_v14 }
  0x82   : > { %7735 = vmatprep.subr.bf16.mxu0 %v9828_v6  ;;  %v9832_v6 = vcombine.high %v1808_v62, %v1812_v1 }
  0x83   : > { %7673 = vmatpush1.bf16.msra.mxu1 %v9797_v30  ;;  %v9948_v30 = vcombine.high %v1761_v25, %v1765_v27  ;;  %v9964_v25 = vcombine.high %v1825_v9, %v1829_v10  ;;  %v1836_v27 = vld [vmem:[%s11656_s22 + $0x520] sm:$0xff] }
  0x84   : > { %7931 = vmatprep.subr.bf16.mxu1 %v9926_v35  ;;  %v9950_v35 = vcombine.high %v1769_v29, %v1773_v31 }
  0x85   : > { %7737 = vmatpush1.bf16.msra.mxu0 %v9829_v8  ;;  %v1816_v8 = vld [vmem:[%s11656_s22 + $0x480] sm:$0xff] }
  0x86   : > { %1608 = vmatmul.mubr.f32.vlgmr.msra.gmra.mrb[2].mxu1 %v11649_v33  ;;  %v9933_v33 = vcombine.low %v1697_v42, %v1701_v43  ;;  %7739 = vmatprep.subr.bf16.mxu0 %v9830_v15  ;;  %v1793_v42 = vld [vmem:[%s11656_s22 + $0x3c8] sm:$0xff]  ;;  %v9833_v15 = vcombine.low %v1808_v62, %v1812_v1 }
  0x87   : > { %7933 = vmatpush1.bf16.msra.mxu1 %v9927_v37  ;;  %v9951_v37 = vcombine.low %v1769_v29, %v1773_v31  ;;  %v1837_v29 = vld [vmem:[%s11656_s22 + $0x528] sm:$0xff]  ;;  %v9965_v31 = vcombine.low %v1825_v9, %v1829_v10 }
  0x88   : > { %7935 = vmatprep.subr.bf16.mxu1 %v9928_v40  ;;  %v1789_v40 = vld [vmem:[%s11656_s22 + $0x3a8] sm:$0xff] }
  0x89   : > { %v9954_v43 = vcombine.high %v1785_v38, %v1789_v40  ;;  %v1877_v9 = vld [vmem:[%s11656_s22 + $0x668] sm:$0xff] }
  0x8b   : > { %7937 = vmatpush1.bf16.msra.mxu1 %v9929_v41  ;;  %v9953_v41 = vcombine.low %v1777_v34, %v1781_v36  ;;  %v1844_v36 = vld [vmem:[%s11656_s22 + $0x560] sm:$0xff] }
  0x8c   : > { %7939 = vmatprep.subr.bf16.mxu1 %v9930_v44  ;;  %v1797_v44 = vld [vmem:[%s11656_s22 + $0x3e8] sm:$0xff] }
  0x8d   : > { %v9956_v46 = vcombine.high %v1793_v42, %v1797_v44  ;;  %v9957_v47 = vcombine.low %v1793_v42, %v1797_v44  ;;  %v1852_v44 = vld [vmem:[%s11656_s22 + $0x5a0] sm:$0xff] }
  0x8f   : > { %7941 = vmatpush1.bf16.msra.mxu1 %v9931_v45  ;;  %v9955_v45 = vcombine.low %v1785_v38, %v1789_v40  ;;  %v1845_v38 = vld [vmem:[%s11656_s22 + $0x568] sm:$0xff] }
  0x90   : > { %7943 = vmatprep.subr.bf16.mxu1 %v9932_v48  ;;  %v9958_v48 = vcombine.high %v11755_v11, %v11762_v16  ;;  %v9963_v16 = vcombine.low %v1817_v13, %v1821_v14 }
  0x93   : > { %7945 = vmatpush1.bf16.msra.mxu1 %v9933_v33 }
  0x94   : > { %7947 = vmatprep.subr.bf16.mxu1 %v9934_v51  ;;  %v11792_v51 = vshrl.u32 %v1616_v50, 7 }
  0x96   : > { %v11807_v54 = vsub.s32 1, %v11792_v51 }
  0x97   : > { %7949 = vmatpush1.bf16.msra.mxu1 %v9935_v52  ;;  %v11801_v52 = vsub.s32 0, %v11792_v51 }
  0x98   : > { %7951 = vmatprep.subr.bf16.mxu1 %v9936_v55  ;;  %v1623_v57 = vrot.slane %v11804_v53, %v11807_v54 }
  0x99   : > { %v1619_v55 = vrot.slane %v11804_v53, %v11801_v52 }
  0x9b   : > { %7953 = vmatpush1.bf16.msra.mxu1 %v9937_v58 }
  0x9c   : > { %7955 = vmatprep.subr.bf16.mxu1 %v9938_v61 }
  0x9f   : > { %7957 = vmatpush1.bf16.msra.mxu1 %v9939_v3  ;;  %v1813_v3 = vld [vmem:[%s11656_s22 + $0x468] sm:$0xff] }
  0xa0   : > { %7959 = vmatprep.subr.bf16.mxu1 %v9940_v7  ;;  %v9960_v7 = vcombine.high %v1809_v2, %v1813_v3 }
  0xa3   : > { %7961 = vmatpush1.bf16.msra.mxu1 %v9941_v12  ;;  %v1820_v12 = vld [vmem:[%s11656_s22 + $0x4a0] sm:$0xff] }
  0xa4   : > { %7963 = vmatprep.subr.bf16.mxu1 %v9942_v17  ;;  %v9961_v17 = vcombine.low %v1809_v2, %v1813_v3  ;;  %v9835_v11 = vcombine.low %v1816_v8, %v1820_v12  ;;  %v1864_v2 = vld [vmem:[%s11656_s22 + $0x600] sm:$0xff] }
  0xa7   : > { %7965 = vmatpush1.bf16.msra.mxu1 %v9943_v20  ;;  %v9834_v20 = vcombine.high %v1816_v8, %v1820_v12  ;;  %v1869_v8 = vld [vmem:[%s11656_s22 + $0x628] sm:$0xff] }
  0xa8   : > { %7967 = vmatprep.subr.bf16.mxu1 %v9944_v22  ;;  %v1824_v22 = vld [vmem:[%s11656_s22 + $0x4c0] sm:$0xff] }
  0xab   : > { %7969 = vmatpush1.bf16.msra.mxu1 %v9945_v24  ;;  %v1828_v24 = vld [vmem:[%s11656_s22 + $0x4e0] sm:$0xff] }
  0xac   : > { %7971 = vmatprep.subr.bf16.mxu1 %v9946_v26  ;;  %v1832_v26 = vld [vmem:[%s11656_s22 + $0x500] sm:$0xff] }
  0xaf   : > { %7973 = vmatpush1.bf16.msra.mxu1 %v9947_v28  ;;  %v1833_v28 = vld [vmem:[%s11656_s22 + $0x508] sm:$0xff] }
  0xb0   : > { %7975 = vmatprep.subr.bf16.mxu1 %v9948_v30  ;;  %v9837_v30 = vcombine.low %v1824_v22, %v1828_v24  ;;  %v9966_v34 = vcombine.high %v1833_v28, %v1837_v29  ;;  %v9967_v40 = vcombine.low %v1833_v28, %v1837_v29  ;;  %v1885_v28 = vld [vmem:[%s11656_s22 + $0x6a8] sm:$0xff] }
  0xb3   : > { %7977 = vmatpush1.bf16.msra.mxu1 %v9949_v32  ;;  %v9838_v32 = vcombine.high %v1832_v26, %v1836_v27 }
  0xb4   : > { %7979 = vmatprep.subr.bf16.mxu1 %v9950_v35  ;;  %v1840_v35 = vld [vmem:[%s11656_s22 + $0x540] sm:$0xff] }
  0xb7   : > { %7981 = vmatpush1.bf16.msra.mxu1 %v9951_v37  ;;  %v1841_v37 = vld [vmem:[%s11656_s22 + $0x548] sm:$0xff] }
  0xb8   : > { %7983 = vmatprep.subr.bf16.mxu1 %v9952_v39  ;;  %v9839_v39 = vcombine.low %v1832_v26, %v1836_v27  ;;  %v9968_v42 = vcombine.high %v1841_v37, %v1845_v38  ;;  %v1884_v26 = vld [vmem:[%s11656_s22 + $0x6a0] sm:$0xff]  ;;  %v1881_v27 = vld [vmem:[%s11656_s22 + $0x688] sm:$0xff] }
  0xbb   : > { %7985 = vmatpush1.bf16.msra.mxu1 %v9953_v41  ;;  %v9840_v41 = vcombine.high %v1840_v35, %v1844_v36 }
  0xbc   : > { %7987 = vmatprep.subr.bf16.mxu1 %v9954_v43  ;;  %v1848_v43 = vld [vmem:[%s11656_s22 + $0x580] sm:$0xff] }
  0xbf   : > { %7989 = vmatpush1.bf16.msra.mxu1 %v9955_v45  ;;  %v1849_v45 = vld [vmem:[%s11656_s22 + $0x588] sm:$0xff] }
  0xc0   : > { %7991 = vmatprep.subr.bf16.mxu1 %v9956_v46  ;;  %v1853_v46 = vld [vmem:[%s11656_s22 + $0x5a8] sm:$0xff] }
  0xc1   : > { %v9970_v50 = vcombine.high %v1849_v45, %v1853_v46 }
  0xc3   : > { %7993 = vmatpush1.bf16.msra.mxu1 %v9957_v47  ;;  %v9841_v47 = vcombine.low %v1840_v35, %v1844_v36  ;;  %v1892_v35 = vld [vmem:[%s11656_s22 + $0x6e0] sm:$0xff]  ;;  %v1889_v36 = vld [vmem:[%s11656_s22 + $0x6c8] sm:$0xff] }
  0xc4   : > { %7995 = vmatprep.subr.bf16.mxu1 %v9958_v48  ;;  %v9969_v48 = vcombine.low %v1841_v37, %v1845_v38  ;;  %v1893_v37 = vld [vmem:[%s11656_s22 + $0x6e8] sm:$0xff] }
  0xf3   : > { %v1112_v33 = vpop.f32.mrb[0].mxu0 }
  0xf4   : > { %v1114_v49 = vpop.f32.mrb[1].mxu0 }
 0x119   : > { %v1396_v56 = vpop.f32.mrb[4].mxu1 }
 0x11a   : > { %v1397_v58 = vadd.f32 %v1396_v56, %v1112_v33  ;;  %v1398_v59 = vpop.f32.mrb[5].mxu1  ;;  %v11856_v33 = vsub.s32 3, %v11792_v51  ;;  %v1860_v56 = vld [vmem:[%s11656_s22 + $0x5e0] sm:$0xff] }
 0x11b   : > { %v1399_v60 = vadd.f32 %v1398_v59, %v1114_v49  ;;  %v11836_v23 = vpop.f32.mrb[2].mxu0  ;;  %v9842_v49 = vcombine.high %v1848_v43, %v1852_v44  ;;  %v9843_v59 = vcombine.low %v1848_v43, %v1852_v44  ;;  %v1900_v43 = vld [vmem:[%s11656_s22 + $0x720] sm:$0xff]  ;;  %v1897_v44 = vld [vmem:[%s11656_s22 + $0x708] sm:$0xff] }
 0x11c   : > { %v1656_v61 = vadd.f32 %v1619_v55, %v1397_v58  ;;  %v1856_v55 = vld [vmem:[%s11656_s22 + $0x5c0] sm:$0xff]  ;;  %v1861_v58 = vld [vmem:[%s11656_s22 + $0x5e8] sm:$0xff] }
 0x11d   : > { %v1657_v63 = vadd.f32 %v1623_v57, %v1399_v60  ;;  %v1857_v57 = vld [vmem:[%s11656_s22 + $0x5c8] sm:$0xff]  ;;  %v9971_v60 = vcombine.low %v1849_v45, %v1853_v46  ;;  %v9844_v62 = vcombine.high %v1856_v55, %v1860_v56  ;;  %v9845_v13 = vcombine.low %v1856_v55, %v1860_v56  ;;  %v1908_v55 = vld [vmem:[%s11656_s22 + $0x760] sm:$0xff] }
 0x11e   : > { %v11819_v5 = vmax.f32 %v1656_v61, 0.0  ;;  %v1631_v61 = vrot.slane %v11804_v53, %v11856_v33  ;;  %v9973_v14 = vcombine.low %v1857_v57, %v1861_v58  ;;  %v1901_v45 = vld [vmem:[%s11656_s22 + $0x728] sm:$0xff] }
 0x11f   : > { %v11817_v4 = vmax.f32 %v1657_v63, 0.0  ;;  %v9972_v63 = vcombine.high %v1857_v57, %v1861_v58  ;;  %v1905_v56 = vld [vmem:[%s11656_s22 + $0x748] sm:$0xff] }
 0x120   : > { %v1909_v57 = vld [vmem:[%s11656_s22 + $0x768] sm:$0xff] }
 0x121   : > { %3314 = vmatprep.mubr.f32.mxu0 %v11817_v4  ;;  %3598 = vmatprep.mubr.f32.mxu1 %v11817_v4 }
 0x122   : > { %3315 = vmatmul.mubr.f32.vlgmr.msra.gmra.mrb[4].mxu0 %v11819_v5  ;;  %3599 = vmatmul.mubr.f32.vlgmr.msra.gmra.mrb[6].mxu1 %v11819_v5 }
 0x123   : > { %7741 = vmatpush1.bf16.msra.mxu0 %v9831_v18  ;;  %7997 = vmatpush1.bf16.msra.mxu1 %v9959_v19  ;;  %v11841_v18 = vpop.f32.mrb[3].mxu0  ;;  %v9836_v19 = vcombine.high %v1824_v22, %v1828_v24  ;;  %v1876_v22 = vld [vmem:[%s11656_s22 + $0x660] sm:$0xff]  ;;  %v1873_v24 = vld [vmem:[%s11656_s22 + $0x648] sm:$0xff] }
 0x124   : > { %7743 = vmatprep.subr.bf16.mxu0 %v9832_v6  ;;  %7999 = vmatprep.subr.bf16.mxu1 %v9960_v7  ;;  %v1868_v6 = vld [vmem:[%s11656_s22 + $0x620] sm:$0xff]  ;;  %v1865_v7 = vld [vmem:[%s11656_s22 + $0x608] sm:$0xff] }
 0x125   : > { %v9847_v10 = vcombine.low %v1864_v2, %v1868_v6 }
 0x127   : > { %7745 = vmatpush1.bf16.msra.mxu0 %v9833_v15  ;;  %8001 = vmatpush1.bf16.msra.mxu1 %v9961_v17  ;;  %v1872_v15 = vld [vmem:[%s11656_s22 + $0x640] sm:$0xff] }
 0x128   : > { %7747 = vmatprep.subr.bf16.mxu0 %v9834_v20  ;;  %8003 = vmatprep.subr.bf16.mxu1 %v9962_v21  ;;  %v9846_v20 = vcombine.high %v1864_v2, %v1868_v6  ;;  %v9974_v21 = vcombine.high %v1865_v7, %v1869_v8  ;;  %v9849_v29 = vcombine.low %v1872_v15, %v1876_v22  ;;  %v1913_v2 = vld [vmem:[%s11656_s22 + $0x788] sm:$0xff] }
 0x12b   : > { %7749 = vmatpush1.bf16.msra.mxu0 %v9835_v11  ;;  %8005 = vmatpush1.bf16.msra.mxu1 %v9963_v16  ;;  %v9975_v11 = vcombine.low %v1865_v7, %v1869_v8  ;;  %v9848_v16 = vcombine.high %v1872_v15, %v1876_v22  ;;  %v9985_v7 = vcombine.low %v1905_v56, %v1909_v57  ;;  %v11899_v8 = vsub.s32 2, %v11792_v51  ;;  %v1924_v15 = vld [vmem:[%s11656_s22 + $0x7e0] sm:$0xff] }
 0x12c   : > { %7751 = vmatprep.subr.bf16.mxu0 %v9836_v19  ;;  %8007 = vmatprep.subr.bf16.mxu1 %v9964_v25  ;;  %v9976_v19 = vcombine.high %v1873_v24, %v1877_v9  ;;  %v1880_v25 = vld [vmem:[%s11656_s22 + $0x680] sm:$0xff]  ;;  %v1638_v22 = vsub.s32 5, %v11792_v51 }
 0x12d   : > { %v9851_v38 = vcombine.low %v1880_v25, %v1884_v26 }
 0x12f   : > { %7753 = vmatpush1.bf16.msra.mxu0 %v9837_v30  ;;  %8009 = vmatpush1.bf16.msra.mxu1 %v9965_v31  ;;  %v9977_v30 = vcombine.low %v1873_v24, %v1877_v9  ;;  %v9850_v31 = vcombine.high %v1880_v25, %v1884_v26  ;;  %v1932_v26 = vld [vmem:[%s11656_s22 + $0x820] sm:$0xff] }
 0x130   : > { %7755 = vmatprep.subr.bf16.mxu0 %v9838_v32  ;;  %8011 = vmatprep.subr.bf16.mxu1 %v9966_v34  ;;  %v9978_v32 = vcombine.high %v1881_v27, %v1885_v28  ;;  %v1888_v34 = vld [vmem:[%s11656_s22 + $0x6c0] sm:$0xff] }
 0x131   : > { %v9853_v46 = vcombine.low %v1888_v34, %v1892_v35 }
 0x133   : > { %7757 = vmatpush1.bf16.msra.mxu0 %v9839_v39  ;;  %8013 = vmatpush1.bf16.msra.mxu1 %v9967_v40  ;;  %v9979_v39 = vcombine.low %v1881_v27, %v1885_v28  ;;  %v9852_v40 = vcombine.high %v1888_v34, %v1892_v35  ;;  %v1929_v27 = vld [vmem:[%s11656_s22 + $0x808] sm:$0xff] }
 0x134   : > { %7759 = vmatprep.subr.bf16.mxu0 %v9840_v41  ;;  %8015 = vmatprep.subr.bf16.mxu1 %v9968_v42  ;;  %v9980_v41 = vcombine.high %v1889_v36, %v1893_v37  ;;  %v1896_v42 = vld [vmem:[%s11656_s22 + $0x700] sm:$0xff]  ;;  %v1933_v28 = vld [vmem:[%s11656_s22 + $0x828] sm:$0xff] }
 0x135   : > { %v9855_v58 = vcombine.low %v1896_v42, %v1900_v43 }
 0x137   : > { %7761 = vmatpush1.bf16.msra.mxu0 %v9841_v47  ;;  %8017 = vmatpush1.bf16.msra.mxu1 %v9969_v48  ;;  %v9981_v47 = vcombine.low %v1889_v36, %v1893_v37  ;;  %v9854_v48 = vcombine.high %v1896_v42, %v1900_v43  ;;  %v9990_v36 = vcombine.high %v1929_v27, %v1933_v28  ;;  %v1936_v37 = vld [vmem:[%s11656_s22 + $0x840] sm:$0xff] }
 0x138   : > { %7763 = vmatprep.subr.bf16.mxu0 %v9842_v49  ;;  %8019 = vmatprep.subr.bf16.mxu1 %v9970_v50  ;;  %v9982_v49 = vcombine.high %v1897_v44, %v1901_v45  ;;  %v1904_v50 = vld [vmem:[%s11656_s22 + $0x740] sm:$0xff]  ;;  %v9991_v43 = vcombine.low %v1929_v27, %v1933_v28 }
 0x139   : > { %v11864_v1 = vpop.f32.mrb[0].mxu1  ;;  %v9857_v6 = vcombine.low %v1904_v50, %v1908_v55  ;;  %v1976_v28 = vld [vmem:[%s11656_s22 + $0x980] sm:$0xff] }
 0x13a   : > { %v1469_v3 = vpop.f32.mrb[1].mxu1 }
 0x13b   : > { %v1659_v12 = vadd.f32 %v1631_v61, %v1469_v3  ;;  %7765 = vmatpush1.bf16.msra.mxu0 %v9843_v59  ;;  %8021 = vmatpush1.bf16.msra.mxu1 %v9971_v60  ;;  %v9983_v59 = vcombine.low %v1897_v44, %v1901_v45  ;;  %v9856_v60 = vcombine.high %v1904_v50, %v1908_v55  ;;  %v1917_v3 = vld [vmem:[%s11656_s22 + $0x7a8] sm:$0xff] }
 0x13c   : > { %7767 = vmatprep.subr.bf16.mxu0 %v9844_v62  ;;  %8023 = vmatprep.subr.bf16.mxu1 %v9972_v63  ;;  %v9984_v61 = vcombine.high %v1905_v56, %v1909_v57  ;;  %v1912_v62 = vld [vmem:[%s11656_s22 + $0x780] sm:$0xff]  ;;  %v9987_v9 = vcombine.low %v1913_v2, %v1917_v3 }
 0x13d   : > { %v11871_v17 = vmax.f32 %v1659_v12, 0.0  ;;  %v1916_v63 = vld [vmem:[%s11656_s22 + $0x7a0] sm:$0xff] }
 0x13e   : > { %v9858_v12 = vcombine.high %v1912_v62, %v1916_v63  ;;  %v9859_v24 = vcombine.low %v1912_v62, %v1916_v63 }
 0x13f   : > { %7769 = vmatpush1.bf16.msra.mxu0 %v9845_v13  ;;  %8025 = vmatpush1.bf16.msra.mxu1 %v9973_v14  ;;  %v9986_v13 = vcombine.high %v1913_v2, %v1917_v3  ;;  %v1920_v14 = vld [vmem:[%s11656_s22 + $0x7c0] sm:$0xff] }
 0x140   : > { %3385 = vmatprep.mubr.f32.mxu0 %v11871_v17  ;;  %3669 = vmatprep.mubr.f32.mxu1 %v11871_v17 }
 0x141   : > { %7771 = vmatprep.subr.bf16.mxu0 %v9846_v20  ;;  %8027 = vmatprep.subr.bf16.mxu1 %v9974_v21  ;;  %v1921_v20 = vld [vmem:[%s11656_s22 + $0x7c8] sm:$0xff] }
 0x142   : > { %v1925_v21 = vld [vmem:[%s11656_s22 + $0x7e8] sm:$0xff] }
 0x143   : > { %7773 = vmatpush1.bf16.msra.mxu0 %v9847_v10  ;;  %8029 = vmatpush1.bf16.msra.mxu1 %v9975_v11  ;;  %v1627_v10 = vrot.slane %v11804_v53, %v11899_v8  ;;  %v9860_v11 = vcombine.high %v1920_v14, %v1924_v15 }
 0x144   : > { %7775 = vmatprep.subr.bf16.mxu0 %v9848_v16  ;;  %8031 = vmatprep.subr.bf16.mxu1 %v9976_v19  ;;  %v9988_v16 = vcombine.high %v1921_v20, %v1925_v21  ;;  %v1928_v19 = vld [vmem:[%s11656_s22 + $0x800] sm:$0xff] }
 0x145   : > { %v1658_v34 = vadd.f32 %v1627_v10, %v11864_v1  ;;  %v9862_v35 = vcombine.high %v1928_v19, %v1932_v26  ;;  %v9863_v42 = vcombine.low %v1928_v19, %v1932_v26  ;;  %v1969_v10 = vld [vmem:[%s11656_s22 + $0x948] sm:$0xff] }
 0x147   : > { %7777 = vmatpush1.bf16.msra.mxu0 %v9849_v29  ;;  %8033 = vmatpush1.bf16.msra.mxu1 %v9977_v30  ;;  %v1639_v29 = vrot.slane %v11804_v53, %v1638_v22  ;;  %v11925_v44 = vmax.f32 %v1658_v34, 0.0 }
 0x148   : > { %7779 = vmatprep.subr.bf16.mxu0 %v9850_v31  ;;  %8035 = vmatprep.subr.bf16.mxu1 %v9978_v32  ;;  %v9861_v31 = vcombine.low %v1920_v14, %v1924_v15  ;;  %v9989_v32 = vcombine.low %v1921_v20, %v1925_v21 }
 0x14b   : > { %7781 = vmatpush1.bf16.msra.mxu0 %v9851_v38  ;;  %8037 = vmatpush1.bf16.msra.mxu1 %v9979_v39  ;;  %v1940_v38 = vld [vmem:[%s11656_s22 + $0x860] sm:$0xff]  ;;  %v1937_v39 = vld [vmem:[%s11656_s22 + $0x848] sm:$0xff] }
 0x14c   : > { %7783 = vmatprep.subr.bf16.mxu0 %v9852_v40  ;;  %8039 = vmatprep.subr.bf16.mxu1 %v9980_v41  ;;  %v1941_v40 = vld [vmem:[%s11656_s22 + $0x868] sm:$0xff]  ;;  %v1661_v41 = vadd.f32 %v1639_v29, %v11841_v18  ;;  %v9864_v1 = vcombine.high %v1936_v37, %v1940_v38  ;;  %v9865_v18 = vcombine.low %v1936_v37, %v1940_v38  ;;  %v1980_v29 = vld [vmem:[%s11656_s22 + $0x9a0] sm:$0xff] }
 0x14d   : > { %v9992_v45 = vcombine.high %v1937_v39, %v1941_v40  ;;  %v9993_v55 = vcombine.low %v1937_v39, %v1941_v40  ;;  %v1984_v38 = vld [vmem:[%s11656_s22 + $0x9c0] sm:$0xff]  ;;  %v1985_v40 = vld [vmem:[%s11656_s22 + $0x9c8] sm:$0xff] }
 0x14e   : > { %v11931_v50 = vmax.f32 %v1661_v41, 0.0  ;;  %v1988_v39 = vld [vmem:[%s11656_s22 + $0x9e0] sm:$0xff]  ;;  %v1989_v41 = vld [vmem:[%s11656_s22 + $0x9e8] sm:$0xff] }
 0x14f   : > { %7785 = vmatpush1.bf16.msra.mxu0 %v9853_v46  ;;  %8041 = vmatpush1.bf16.msra.mxu1 %v9981_v47  ;;  %v1944_v46 = vld [vmem:[%s11656_s22 + $0x880] sm:$0xff] }
 0x150   : > { %7787 = vmatprep.subr.bf16.mxu0 %v9854_v48  ;;  %8043 = vmatprep.subr.bf16.mxu1 %v9982_v49  ;;  %v1948_v47 = vld [vmem:[%s11656_s22 + $0x8a0] sm:$0xff]  ;;  %v1945_v48 = vld [vmem:[%s11656_s22 + $0x888] sm:$0xff] }
 0x151   : > { %v1949_v49 = vld [vmem:[%s11656_s22 + $0x8a8] sm:$0xff]  ;;  %v9866_v56 = vcombine.high %v1944_v46, %v1948_v47  ;;  %v9867_v62 = vcombine.low %v1944_v46, %v1948_v47  ;;  %v1992_v46 = vld [vmem:[%s11656_s22 + $0xa00] sm:$0xff] }
 0x152   : > { %v9994_v57 = vcombine.high %v1945_v48, %v1949_v49  ;;  %v9995_v63 = vcombine.low %v1945_v48, %v1949_v49  ;;  %v1996_v47 = vld [vmem:[%s11656_s22 + $0xa20] sm:$0xff]  ;;  %v1993_v48 = vld [vmem:[%s11656_s22 + $0xa08] sm:$0xff] }
 0x153   : > { %7789 = vmatpush1.bf16.msra.mxu0 %v9855_v58  ;;  %8045 = vmatpush1.bf16.msra.mxu1 %v9983_v59  ;;  %v1952_v58 = vld [vmem:[%s11656_s22 + $0x8c0] sm:$0xff]  ;;  %v1997_v49 = vld [vmem:[%s11656_s22 + $0xa28] sm:$0xff] }
 0x154   : > { %7791 = vmatprep.subr.bf16.mxu0 %v9856_v60  ;;  %8047 = vmatprep.subr.bf16.mxu1 %v9984_v61  ;;  %v1956_v59 = vld [vmem:[%s11656_s22 + $0x8e0] sm:$0xff]  ;;  %v1953_v60 = vld [vmem:[%s11656_s22 + $0x8c8] sm:$0xff] }
 0x155   : > { %v1957_v61 = vld [vmem:[%s11656_s22 + $0x8e8] sm:$0xff]  ;;  %v9868_v2 = vcombine.high %v1952_v58, %v1956_v59  ;;  %v9869_v14 = vcombine.low %v1952_v58, %v1956_v59  ;;  %v2000_v58 = vld [vmem:[%s11656_s22 + $0xa40] sm:$0xff] }
 0x156   : > { %v9996_v3 = vcombine.high %v1953_v60, %v1957_v61  ;;  %v9997_v15 = vcombine.low %v1953_v60, %v1957_v61  ;;  %v2004_v59 = vld [vmem:[%s11656_s22 + $0xa60] sm:$0xff]  ;;  %v2001_v60 = vld [vmem:[%s11656_s22 + $0xa48] sm:$0xff] }
 0x157   : > { %7793 = vmatpush1.bf16.msra.mxu0 %v9857_v6  ;;  %8049 = vmatpush1.bf16.msra.mxu1 %v9985_v7  ;;  %v1960_v6 = vld [vmem:[%s11656_s22 + $0x900] sm:$0xff]  ;;  %v2005_v61 = vld [vmem:[%s11656_s22 + $0xa68] sm:$0xff] }
 0x158   : > { %7795 = vmatprep.subr.bf16.mxu0 %v9858_v12  ;;  %8051 = vmatprep.subr.bf16.mxu1 %v9986_v13  ;;  %v1964_v7 = vld [vmem:[%s11656_s22 + $0x920] sm:$0xff]  ;;  %v1961_v12 = vld [vmem:[%s11656_s22 + $0x908] sm:$0xff] }
 0x159   : > { %v11909_v25 = vpop.f32.mrb[2].mxu1  ;;  %v1965_v13 = vld [vmem:[%s11656_s22 + $0x928] sm:$0xff]  ;;  %v9870_v20 = vcombine.high %v1960_v6, %v1964_v7 }
 0x15a   : > { %v11917_v30 = vpop.f32.mrb[3].mxu1  ;;  %v9998_v21 = vcombine.high %v1961_v12, %v1965_v13  ;;  %v9999_v19 = vcombine.low %v1961_v12, %v1965_v13  ;;  %v2009_v12 = vld [vmem:[%s11656_s22 + $0xa88] sm:$0xff] }
 0x15b   : > { %7797 = vmatpush1.bf16.msra.mxu0 %v9859_v24  ;;  %8053 = vmatpush1.bf16.msra.mxu1 %v9987_v9  ;;  %v1968_v24 = vld [vmem:[%s11656_s22 + $0x940] sm:$0xff]  ;;  %v2013_v13 = vld [vmem:[%s11656_s22 + $0xaa8] sm:$0xff] }
 0x15c   : > { %7799 = vmatprep.subr.bf16.mxu0 %v9860_v11  ;;  %8055 = vmatprep.subr.bf16.mxu1 %v9988_v16  ;;  %v1972_v9 = vld [vmem:[%s11656_s22 + $0x960] sm:$0xff]  ;;  %v1973_v11 = vld [vmem:[%s11656_s22 + $0x968] sm:$0xff]  ;;  %v9871_v16 = vcombine.low %v1960_v6, %v1964_v7 }
 0x15d   : > { %v9872_v26 = vcombine.high %v1968_v24, %v1972_v9  ;;  %v10000_v27 = vcombine.high %v1969_v10, %v1973_v11  ;;  %v9873_v34 = vcombine.low %v1968_v24, %v1972_v9  ;;  %v2008_v6 = vld [vmem:[%s11656_s22 + $0xa80] sm:$0xff] }
 0x15e   : > { %v2012_v7 = vld [vmem:[%s11656_s22 + $0xaa0] sm:$0xff] }
 0x15f   : > { %7801 = vmatpush1.bf16.msra.mxu0 %v9861_v31  ;;  %8057 = vmatpush1.bf16.msra.mxu1 %v9989_v32  ;;  %v1977_v31 = vld [vmem:[%s11656_s22 + $0x988] sm:$0xff]  ;;  %v2016_v24 = vld [vmem:[%s11656_s22 + $0xac0] sm:$0xff] }
 0x160   : > { %7803 = vmatprep.subr.bf16.mxu0 %v9862_v35  ;;  %8059 = vmatprep.subr.bf16.mxu1 %v9990_v36  ;;  %v1981_v32 = vld [vmem:[%s11656_s22 + $0x9a8] sm:$0xff]  ;;  %v10001_v35 = vcombine.low %v1969_v10, %v1973_v11  ;;  %v9874_v36 = vcombine.high %v1976_v28, %v1980_v29  ;;  %v2020_v9 = vld [vmem:[%s11656_s22 + $0xae0] sm:$0xff] }
 0x161   : > { %v10002_v37 = vcombine.high %v1977_v31, %v1981_v32  ;;  %v2017_v10 = vld [vmem:[%s11656_s22 + $0xac8] sm:$0xff] }
 0x162   : > { %3386 = vmatmul.mubr.f32.vlgmr.msra.gmra.mrb[4].mxu0 %v11925_v44  ;;  %3670 = vmatmul.mubr.f32.vlgmr.msra.gmra.mrb[6].mxu1 %v11925_v44  ;;  %v2021_v11 = vld [vmem:[%s11656_s22 + $0xae8] sm:$0xff] }
 0x163   : > { %7805 = vmatpush1.bf16.msra.mxu0 %v9863_v42  ;;  %8061 = vmatpush1.bf16.msra.mxu1 %v9991_v43  ;;  %v9875_v42 = vcombine.low %v1976_v28, %v1980_v29  ;;  %v10003_v43 = vcombine.low %v1977_v31, %v1981_v32  ;;  %v2024_v28 = vld [vmem:[%s11656_s22 + $0xb00] sm:$0xff]  ;;  %v2025_v31 = vld [vmem:[%s11656_s22 + $0xb08] sm:$0xff] }
 0x164   : > { %7807 = vmatprep.subr.bf16.mxu0 %v9864_v1  ;;  %8063 = vmatprep.subr.bf16.mxu1 %v9992_v45  ;;  %v9876_v1 = vcombine.high %v1984_v38, %v1988_v39  ;;  %v10004_v45 = vcombine.high %v1985_v40, %v1989_v41  ;;  %v2028_v29 = vld [vmem:[%s11656_s22 + $0xb20] sm:$0xff]  ;;  %v2029_v32 = vld [vmem:[%s11656_s22 + $0xb28] sm:$0xff] }
 0x165   : > { %3456 = vmatprep.mubr.f32.mxu0 %v11931_v50  ;;  %3740 = vmatprep.mubr.f32.mxu1 %v11931_v50 }
 0x167   : > { %7809 = vmatpush1.bf16.msra.mxu0 %v9865_v18  ;;  %8065 = vmatpush1.bf16.msra.mxu1 %v9993_v55  ;;  %v9877_v18 = vcombine.low %v1984_v38, %v1988_v39  ;;  %v10005_v55 = vcombine.low %v1985_v40, %v1989_v41  ;;  %v2032_v38 = vld [vmem:[%s11656_s22 + $0xb40] sm:$0xff]  ;;  %v2033_v40 = vld [vmem:[%s11656_s22 + $0xb48] sm:$0xff] }
 0x168   : > { %7811 = vmatprep.subr.bf16.mxu0 %v9866_v56  ;;  %8067 = vmatprep.subr.bf16.mxu1 %v9994_v57  ;;  %v9878_v56 = vcombine.high %v1992_v46, %v1996_v47  ;;  %v10006_v57 = vcombine.high %v1993_v48, %v1997_v49  ;;  %v2036_v39 = vld [vmem:[%s11656_s22 + $0xb60] sm:$0xff]  ;;  %v2037_v41 = vld [vmem:[%s11656_s22 + $0xb68] sm:$0xff] }
 0x16b   : > { %7813 = vmatpush1.bf16.msra.mxu0 %v9867_v62  ;;  %8069 = vmatpush1.bf16.msra.mxu1 %v9995_v63  ;;  %v9879_v62 = vcombine.low %v1992_v46, %v1996_v47  ;;  %v10007_v63 = vcombine.low %v1993_v48, %v1997_v49  ;;  %v2040_v46 = vld [vmem:[%s11656_s22 + $0xb80] sm:$0xff]  ;;  %v2041_v48 = vld [vmem:[%s11656_s22 + $0xb88] sm:$0xff] }
 0x16c   : > { %7815 = vmatprep.subr.bf16.mxu0 %v9868_v2  ;;  %8071 = vmatprep.subr.bf16.mxu1 %v9996_v3  ;;  %v9880_v2 = vcombine.high %v2000_v58, %v2004_v59  ;;  %v10008_v3 = vcombine.high %v2001_v60, %v2005_v61  ;;  %v2044_v47 = vld [vmem:[%s11656_s22 + $0xba0] sm:$0xff]  ;;  %v2045_v49 = vld [vmem:[%s11656_s22 + $0xba8] sm:$0xff] }
 0x16f   : > { %7817 = vmatpush1.bf16.msra.mxu0 %v9869_v14  ;;  %8073 = vmatpush1.bf16.msra.mxu1 %v9997_v15  ;;  %v9881_v14 = vcombine.low %v2000_v58, %v2004_v59  ;;  %v10009_v15 = vcombine.low %v2001_v60, %v2005_v61  ;;  %v10018_v58 = vcombine.high %v2041_v48, %v2045_v49  ;;  %v2048_v59 = vld [vmem:[%s11656_s22 + $0xbc0] sm:$0xff]  ;;  %v1646_v60 = vsub.s32 7, %v11792_v51 }
 0x170   : > { %7819 = vmatprep.subr.bf16.mxu0 %v9870_v20  ;;  %8075 = vmatprep.subr.bf16.mxu1 %v9998_v21  ;;  %v9882_v20 = vcombine.high %v2008_v6, %v2012_v7  ;;  %v10010_v21 = vcombine.high %v2009_v12, %v2013_v13  ;;  %v2052_v61 = vld [vmem:[%s11656_s22 + $0xbe0] sm:$0xff] }
 0x173   : > { %7821 = vmatpush1.bf16.msra.mxu0 %v9871_v16  ;;  %8077 = vmatpush1.bf16.msra.mxu1 %v9999_v19  ;;  %v9883_v16 = vcombine.low %v2008_v6, %v2012_v7  ;;  %v10011_v19 = vcombine.low %v2009_v12, %v2013_v13  ;;  %v9892_v7 = vcombine.high %v2048_v59, %v2052_v61  ;;  %v2056_v13 = vld [vmem:[%s11656_s22 + $0xc00] sm:$0xff] }
 0x174   : > { %7823 = vmatprep.subr.bf16.mxu0 %v9872_v26  ;;  %8079 = vmatprep.subr.bf16.mxu1 %v10000_v27  ;;  %v9884_v26 = vcombine.high %v2016_v24, %v2020_v9  ;;  %v10012_v27 = vcombine.high %v2017_v10, %v2021_v11 }
 0x177   : > { %7825 = vmatpush1.bf16.msra.mxu0 %v9873_v34  ;;  %8081 = vmatpush1.bf16.msra.mxu1 %v10001_v35  ;;  %v9885_v34 = vcombine.low %v2016_v24, %v2020_v9  ;;  %v10013_v35 = vcombine.low %v2017_v10, %v2021_v11  ;;  %v9893_v24 = vcombine.low %v2048_v59, %v2052_v61  ;;  %v2093_v59 = vld [vmem:[%s11656_s22 + $0xd28] sm:$0xff] }
 0x178   : > { %7827 = vmatprep.subr.bf16.mxu0 %v9874_v36  ;;  %8083 = vmatprep.subr.bf16.mxu1 %v10002_v37  ;;  %v9886_v36 = vcombine.high %v2024_v28, %v2028_v29  ;;  %v10014_v37 = vcombine.high %v2025_v31, %v2029_v32 }
 0x17b   : > { %7829 = vmatpush1.bf16.msra.mxu0 %v9875_v42  ;;  %8085 = vmatpush1.bf16.msra.mxu1 %v10003_v43  ;;  %v9887_v42 = vcombine.low %v2024_v28, %v2028_v29  ;;  %v10015_v43 = vcombine.low %v2025_v31, %v2029_v32  ;;  %v2069_v28 = vld [vmem:[%s11656_s22 + $0xc68] sm:$0xff] }
 0x17c   : > { %7831 = vmatprep.subr.bf16.mxu0 %v9876_v1  ;;  %8087 = vmatprep.subr.bf16.mxu1 %v10004_v45  ;;  %v9888_v1 = vcombine.high %v2032_v38, %v2036_v39  ;;  %v10016_v45 = vcombine.high %v2033_v40, %v2037_v41 }
 0x17f   : > { %7833 = vmatpush1.bf16.msra.mxu0 %v9877_v18  ;;  %8089 = vmatpush1.bf16.msra.mxu1 %v10005_v55  ;;  %v9889_v18 = vcombine.low %v2032_v38, %v2036_v39  ;;  %v10017_v55 = vcombine.low %v2033_v40, %v2037_v41  ;;  %v2077_v38 = vld [vmem:[%s11656_s22 + $0xca8] sm:$0xff] }
 0x180   : > { %7835 = vmatprep.subr.bf16.mxu0 %v9878_v56  ;;  %8091 = vmatprep.subr.bf16.mxu1 %v10006_v57  ;;  %v1634_v56 = vsub.s32 4, %v11792_v51  ;;  %v9890_v57 = vcombine.high %v2040_v46, %v2044_v47 }
 0x182   : > { %v1635_v6 = vrot.slane %v11804_v53, %v1634_v56 }
 0x183   : > { %7837 = vmatpush1.bf16.msra.mxu0 %v9879_v62  ;;  %8093 = vmatpush1.bf16.msra.mxu1 %v10007_v63  ;;  %v2049_v62 = vld [vmem:[%s11656_s22 + $0xbc8] sm:$0xff] }
 0x184   : > { %7839 = vmatprep.subr.bf16.mxu0 %v9880_v2  ;;  %8095 = vmatprep.subr.bf16.mxu1 %v10008_v3  ;;  %v2053_v63 = vld [vmem:[%s11656_s22 + $0xbe8] sm:$0xff]  ;;  %v9891_v2 = vcombine.low %v2040_v46, %v2044_v47  ;;  %v10019_v3 = vcombine.low %v2041_v48, %v2045_v49  ;;  %v1660_v10 = vadd.f32 %v1635_v6, %v11836_v23  ;;  %v2100_v6 = vld [vmem:[%s11656_s22 + $0xd60] sm:$0xff] }
 0x185   : > { %v10020_v12 = vcombine.high %v2049_v62, %v2053_v63  ;;  %v10021_v9 = vcombine.low %v2049_v62, %v2053_v63  ;;  %v2085_v46 = vld [vmem:[%s11656_s22 + $0xce8] sm:$0xff] }
 0x186   : > { %v12007_v31 = vmax.f32 %v1660_v10, 0.0  ;;  %v2109_v10 = vld [vmem:[%s11656_s22 + $0xda8] sm:$0xff] }
 0x187   : > { %7841 = vmatpush1.bf16.msra.mxu0 %v9881_v14  ;;  %8097 = vmatpush1.bf16.msra.mxu1 %v10009_v15  ;;  %v1647_v14 = vrot.slane %v11804_v53, %v1646_v60  ;;  %v2060_v15 = vld [vmem:[%s11656_s22 + $0xc20] sm:$0xff] }
 0x188   : > { %7843 = vmatprep.subr.bf16.mxu0 %v9882_v20  ;;  %8099 = vmatprep.subr.bf16.mxu1 %v10010_v21  ;;  %v2057_v20 = vld [vmem:[%s11656_s22 + $0xc08] sm:$0xff]  ;;  %v9894_v11 = vcombine.high %v2056_v13, %v2060_v15  ;;  %v2064_v53 = vld [vmem:[%s11656_s22 + $0xc40] sm:$0xff]  ;;  %v9895_v29 = vcombine.low %v2056_v13, %v2060_v15 }
 0x189   : > { %v2061_v21 = vld [vmem:[%s11656_s22 + $0xc28] sm:$0xff] }
 0x18a   : > { %v10023_v23 = vcombine.low %v2057_v20, %v2061_v21 }
 0x18b   : > { %7845 = vmatpush1.bf16.msra.mxu0 %v9883_v16  ;;  %8101 = vmatpush1.bf16.msra.mxu1 %v10011_v19  ;;  %v10022_v16 = vcombine.high %v2057_v20, %v2061_v21  ;;  %v1663_v19 = vadd.f32 %v1647_v14, %v11917_v30  ;;  %v2072_v30 = vld [vmem:[%s11656_s22 + $0xc80] sm:$0xff] }
 0x18c   : > { %7847 = vmatprep.subr.bf16.mxu0 %v9884_v26  ;;  %8103 = vmatprep.subr.bf16.mxu1 %v10012_v27  ;;  %v2068_v26 = vld [vmem:[%s11656_s22 + $0xc60] sm:$0xff]  ;;  %v2065_v27 = vld [vmem:[%s11656_s22 + $0xc48] sm:$0xff] }
 0x18d   : > { %v12009_v32 = vmax.f32 %v1663_v19, 0.0  ;;  %v9897_v39 = vcombine.low %v2064_v53, %v2068_v26  ;;  %v10025_v40 = vcombine.low %v2065_v27, %v2069_v28  ;;  %v2104_v21 = vld [vmem:[%s11656_s22 + $0xd80] sm:$0xff] }
 0x18f   : > { %7849 = vmatpush1.bf16.msra.mxu0 %v9885_v34  ;;  %8105 = vmatpush1.bf16.msra.mxu1 %v10013_v35  ;;  %v9896_v34 = vcombine.high %v2064_v53, %v2068_v26  ;;  %v10024_v35 = vcombine.high %v2065_v27, %v2069_v28  ;;  %v2112_v26 = vld [vmem:[%s11656_s22 + $0xdc0] sm:$0xff]  ;;  %v2113_v28 = vld [vmem:[%s11656_s22 + $0xdc8] sm:$0xff] }
 0x190   : > { %7851 = vmatprep.subr.bf16.mxu0 %v9886_v36  ;;  %8107 = vmatprep.subr.bf16.mxu1 %v10014_v37  ;;  %v2076_v36 = vld [vmem:[%s11656_s22 + $0xca0] sm:$0xff]  ;;  %v2073_v37 = vld [vmem:[%s11656_s22 + $0xc88] sm:$0xff] }
 0x191   : > { %v9898_v41 = vcombine.high %v2072_v30, %v2076_v36  ;;  %v9899_v47 = vcombine.low %v2072_v30, %v2076_v36  ;;  %v10027_v48 = vcombine.low %v2073_v37, %v2077_v38  ;;  %v2116_v27 = vld [vmem:[%s11656_s22 + $0xde0] sm:$0xff] }
 0x192   : > { %v2120_v36 = vld [vmem:[%s11656_s22 + $0xe00] sm:$0xff] }
 0x193   : > { %7853 = vmatpush1.bf16.msra.mxu0 %v9887_v42  ;;  %8109 = vmatpush1.bf16.msra.mxu1 %v10015_v43  ;;  %v10026_v42 = vcombine.high %v2073_v37, %v2077_v38  ;;  %v2080_v43 = vld [vmem:[%s11656_s22 + $0xcc0] sm:$0xff]  ;;  %v2121_v38 = vld [vmem:[%s11656_s22 + $0xe08] sm:$0xff] }
 0x194   : > { %7855 = vmatprep.subr.bf16.mxu0 %v9888_v1  ;;  %8111 = vmatprep.subr.bf16.mxu1 %v10016_v45  ;;  %v2084_v1 = vld [vmem:[%s11656_s22 + $0xce0] sm:$0xff]  ;;  %v2081_v45 = vld [vmem:[%s11656_s22 + $0xcc8] sm:$0xff] }
 0x195   : > { %v9900_v49 = vcombine.high %v2080_v43, %v2084_v1  ;;  %v9901_v61 = vcombine.low %v2080_v43, %v2084_v1  ;;  %v10029_v62 = vcombine.low %v2081_v45, %v2085_v46  ;;  %v2124_v37 = vld [vmem:[%s11656_s22 + $0xe20] sm:$0xff] }
 0x196   : > { %v2128_v1 = vld [vmem:[%s11656_s22 + $0xe40] sm:$0xff] }
 0x197   : > { %7857 = vmatpush1.bf16.msra.mxu0 %v9889_v18  ;;  %8113 = vmatpush1.bf16.msra.mxu1 %v10017_v55  ;;  %v10028_v18 = vcombine.high %v2081_v45, %v2085_v46  ;;  %v2088_v55 = vld [vmem:[%s11656_s22 + $0xd00] sm:$0xff]  ;;  %v2129_v46 = vld [vmem:[%s11656_s22 + $0xe48] sm:$0xff] }
 0x198   : > { %7859 = vmatprep.subr.bf16.mxu0 %v9890_v57  ;;  %8115 = vmatprep.subr.bf16.mxu1 %v10018_v58  ;;  %v2092_v57 = vld [vmem:[%s11656_s22 + $0xd20] sm:$0xff]  ;;  %v2089_v58 = vld [vmem:[%s11656_s22 + $0xd08] sm:$0xff] }
 0x199   : > { %v9902_v63 = vcombine.high %v2088_v55, %v2092_v57  ;;  %v9903_v13 = vcombine.low %v2088_v55, %v2092_v57  ;;  %v10031_v14 = vcombine.low %v2089_v58, %v2093_v59  ;;  %v2132_v45 = vld [vmem:[%s11656_s22 + $0xe60] sm:$0xff] }
 0x19a   : > { %v2136_v57 = vld [vmem:[%s11656_s22 + $0xe80] sm:$0xff] }
 0x19b   : > { %7861 = vmatpush1.bf16.msra.mxu0 %v9891_v2  ;;  %8117 = vmatpush1.bf16.msra.mxu1 %v10019_v3  ;;  %v10030_v2 = vcombine.high %v2089_v58, %v2093_v59  ;;  %v2096_v3 = vld [vmem:[%s11656_s22 + $0xd40] sm:$0xff]  ;;  %v2137_v59 = vld [vmem:[%s11656_s22 + $0xe88] sm:$0xff] }
 0x19c   : > { %7863 = vmatprep.subr.bf16.mxu0 %v9892_v7  ;;  %8119 = vmatprep.subr.bf16.mxu1 %v10020_v12  ;;  %v2097_v7 = vld [vmem:[%s11656_s22 + $0xd48] sm:$0xff]  ;;  %v9904_v15 = vcombine.high %v2096_v3, %v2100_v6  ;;  %v2140_v58 = vld [vmem:[%s11656_s22 + $0xea0] sm:$0xff] }
 0x19d   : > { %v2101_v12 = vld [vmem:[%s11656_s22 + $0xd68] sm:$0xff] }
 0x19e   : > { %v10032_v20 = vcombine.high %v2097_v7, %v2101_v12 }
 0x19f   : > { %7865 = vmatpush1.bf16.msra.mxu0 %v9893_v24  ;;  %8121 = vmatpush1.bf16.msra.mxu1 %v10021_v9  ;;  %v2108_v24 = vld [vmem:[%s11656_s22 + $0xda0] sm:$0xff]  ;;  %v2105_v9 = vld [vmem:[%s11656_s22 + $0xd88] sm:$0xff] }
 0x1a0   : > { %7867 = vmatprep.subr.bf16.mxu0 %v9894_v11  ;;  %8123 = vmatprep.subr.bf16.mxu1 %v10022_v16  ;;  %v9905_v11 = vcombine.low %v2096_v3, %v2100_v6  ;;  %v10033_v16 = vcombine.low %v2097_v7, %v2101_v12  ;;  %v9906_v19 = vcombine.high %v2104_v21, %v2108_v24  ;;  %v2144_v6 = vld [vmem:[%s11656_s22 + $0xec0] sm:$0xff]  ;;  %v2145_v12 = vld [vmem:[%s11656_s22 + $0xec8] sm:$0xff] }
 0x1a1   : > { %v10034_v53 = vcombine.high %v2105_v9, %v2109_v10  ;;  %v2148_v7 = vld [vmem:[%s11656_s22 + $0xee0] sm:$0xff] }
 0x1a2   : > { %3457 = vmatmul.mubr.f32.vlgmr.msra.gmra.mrb[4].mxu0 %v12007_v31  ;;  %3741 = vmatmul.mubr.f32.vlgmr.msra.gmra.mrb[6].mxu1 %v12007_v31 }
 0x1a3   : > { %7869 = vmatpush1.bf16.msra.mxu0 %v9895_v29  ;;  %3527 = vmatprep.mubr.f32.mxu0 %v12009_v32  ;;  %v2117_v29 = vld [vmem:[%s11656_s22 + $0xde8] sm:$0xff] }
 0x1a4   : > { %8125 = vmatpush1.bf16.msra.mxu1 %v10023_v23  ;;  %3811 = vmatprep.mubr.f32.mxu1 %v12009_v32  ;;  %v9907_v23 = vcombine.low %v2104_v21, %v2108_v24  ;;  %v10036_v30 = vcombine.high %v2113_v28, %v2117_v29  ;;  %v2152_v24 = vld [vmem:[%s11656_s22 + $0xf00] sm:$0xff] }
 0x1a5   : > { %7871 = vmatprep.subr.bf16.mxu0 %v9896_v34  ;;  %8127 = vmatprep.subr.bf16.mxu1 %v10024_v35  ;;  %v10035_v34 = vcombine.low %v2105_v9, %v2109_v10  ;;  %v9908_v35 = vcombine.high %v2112_v26, %v2116_v27  ;;  %v2156_v9 = vld [vmem:[%s11656_s22 + $0xf20] sm:$0xff]  ;;  %v2153_v10 = vld [vmem:[%s11656_s22 + $0xf08] sm:$0xff] }
 0x1a7   : > { %7873 = vmatpush1.bf16.msra.mxu0 %v9897_v39  ;;  %v2125_v39 = vld [vmem:[%s11656_s22 + $0xe28] sm:$0xff] }
 0x1a8   : > { %8129 = vmatpush1.bf16.msra.mxu1 %v10025_v40  ;;  %7875 = vmatprep.subr.bf16.mxu0 %v9898_v41  ;;  %v9909_v40 = vcombine.low %v2112_v26, %v2116_v27  ;;  %v10037_v41 = vcombine.low %v2113_v28, %v2117_v29  ;;  %v10038_v43 = vcombine.high %v2121_v38, %v2125_v39  ;;  %v2160_v27 = vld [vmem:[%s11656_s22 + $0xf40] sm:$0xff]  ;;  %v2161_v29 = vld [vmem:[%s11656_s22 + $0xf48] sm:$0xff] }
 0x1a9   : > { %8131 = vmatprep.subr.bf16.mxu1 %v10026_v42  ;;  %v9910_v42 = vcombine.high %v2120_v36, %v2124_v37  ;;  %v2164_v28 = vld [vmem:[%s11656_s22 + $0xf60] sm:$0xff] }
 0x1ab   : > { %7877 = vmatpush1.bf16.msra.mxu0 %v9899_v47  ;;  %v2133_v47 = vld [vmem:[%s11656_s22 + $0xe68] sm:$0xff] }
 0x1ac   : > { %8133 = vmatpush1.bf16.msra.mxu1 %v10027_v48  ;;  %7879 = vmatprep.subr.bf16.mxu0 %v9900_v49  ;;  %v9911_v48 = vcombine.low %v2120_v36, %v2124_v37  ;;  %v10039_v49 = vcombine.low %v2121_v38, %v2125_v39  ;;  %v10040_v55 = vcombine.high %v2129_v46, %v2133_v47  ;;  %v2168_v37 = vld [vmem:[%s11656_s22 + $0xf80] sm:$0xff]  ;;  %v2169_v39 = vld [vmem:[%s11656_s22 + $0xf88] sm:$0xff] }
 0x1ad   : > { %8135 = vmatprep.subr.bf16.mxu1 %v10028_v18  ;;  %v9912_v18 = vcombine.high %v2128_v1, %v2132_v45  ;;  %v2172_v38 = vld [vmem:[%s11656_s22 + $0xfa0] sm:$0xff] }
 0x1af   : > { %7881 = vmatpush1.bf16.msra.mxu0 %v9901_v61  ;;  %v2141_v61 = vld [vmem:[%s11656_s22 + $0xea8] sm:$0xff] }
 0x1b0   : > { %8137 = vmatpush1.bf16.msra.mxu1 %v10029_v62  ;;  %7883 = vmatprep.subr.bf16.mxu0 %v9902_v63  ;;  %v9913_v62 = vcombine.low %v2128_v1, %v2132_v45  ;;  %v10041_v63 = vcombine.low %v2129_v46, %v2133_v47  ;;  %v10042_v3 = vcombine.high %v2137_v59, %v2141_v61  ;;  %v2176_v46 = vld [vmem:[%s11656_s22 + $0xfc0] sm:$0xff] }
 0x1b1   : > { %8139 = vmatprep.subr.bf16.mxu1 %v10030_v2  ;;  %v9914_v2 = vcombine.high %v2136_v57, %v2140_v58  ;;  %v9922_v1 = vcombine.high %v2168_v37, %v2172_v38  ;;  %v2180_v47 = vld [vmem:[%s11656_s22 + $0xfe0] sm:$0xff] }
 0x1b3   : > { %7885 = vmatpush1.bf16.msra.mxu0 %v9903_v13  ;;  %v2149_v13 = vld [vmem:[%s11656_s22 + $0xee8] sm:$0xff] }
 0x1b4   : > { %8141 = vmatpush1.bf16.msra.mxu1 %v10031_v14  ;;  %7887 = vmatprep.subr.bf16.mxu0 %v9904_v15  ;;  %v9915_v14 = vcombine.low %v2136_v57, %v2140_v58  ;;  %v10043_v15 = vcombine.low %v2137_v59, %v2141_v61  ;;  %v10044_v21 = vcombine.high %v2145_v12, %v2149_v13 }
 0x1b5   : > { %8143 = vmatprep.subr.bf16.mxu1 %v10032_v20  ;;  %v9916_v20 = vcombine.high %v2144_v6, %v2148_v7  ;;  %v9924_v59 = vcombine.high %v2176_v46, %v2180_v47 }
 0x1b7   : > { %7889 = vmatpush1.bf16.msra.mxu0 %v9905_v11  ;;  %v2157_v11 = vld [vmem:[%s11656_s22 + $0xf28] sm:$0xff] }
 0x1b8   : > { %8145 = vmatpush1.bf16.msra.mxu1 %v10033_v16  ;;  %7891 = vmatprep.subr.bf16.mxu0 %v9906_v19  ;;  %v9917_v16 = vcombine.low %v2144_v6, %v2148_v7  ;;  %v10045_v19 = vcombine.low %v2145_v12, %v2149_v13  ;;  %v10046_v26 = vcombine.high %v2153_v10, %v2157_v11 }
 0x1b9   : > { %8147 = vmatprep.subr.bf16.mxu1 %v10034_v53  ;;  %v9918_v53 = vcombine.high %v2152_v24, %v2156_v9  ;;  %v9925_v6 = vcombine.low %v2176_v46, %v2180_v47 }
 0x1bb   : > { %7893 = vmatpush1.bf16.msra.mxu0 %v9907_v23  ;;  %v2165_v23 = vld [vmem:[%s11656_s22 + $0xf68] sm:$0xff] }
 0x1bc   : > { %8149 = vmatpush1.bf16.msra.mxu1 %v10035_v34  ;;  %7895 = vmatprep.subr.bf16.mxu0 %v9908_v35  ;;  %v9919_v34 = vcombine.low %v2152_v24, %v2156_v9  ;;  %v10047_v35 = vcombine.low %v2153_v10, %v2157_v11  ;;  %v10048_v36 = vcombine.high %v2161_v29, %v2165_v23  ;;  %v1683_v24 = vld [vmem:[%s11656_s22 + $0x58] sm:$0xff] }
 0x1bd   : > { %8151 = vmatprep.subr.bf16.mxu1 %v10036_v30  ;;  %v9920_v30 = vcombine.high %v2160_v27, %v2164_v28  ;;  %v1687_v9 = vld [vmem:[%s11656_s22 + $0x78] sm:$0xff] }
 0x1bf   : > { %7897 = vmatpush1.bf16.msra.mxu0 %v9909_v40  ;;  %v2173_v40 = vld [vmem:[%s11656_s22 + $0xfa8] sm:$0xff] }
 0x1c0   : > { %8153 = vmatpush1.bf16.msra.mxu1 %v10037_v41  ;;  %7899 = vmatprep.subr.bf16.mxu0 %v9910_v42  ;;  %v9921_v41 = vcombine.low %v2160_v27, %v2164_v28  ;;  %v1642_v42 = vsub.s32 6, %v11792_v51  ;;  %v10050_v45 = vcombine.high %v2169_v39, %v2173_v40  ;;  %v10051_v58 = vcombine.low %v2169_v39, %v2173_v40  ;;  %v1695_v27 = vld [vmem:[%s11656_s22 + $0xb8] sm:$0xff] }
 0x1c1   : > { %8155 = vmatprep.subr.bf16.mxu1 %v10038_v43  ;;  %v10049_v43 = vcombine.low %v2161_v29, %v2165_v23  ;;  %v10185_v29 = vcombine.low %v1683_v24, %v1687_v9  ;;  %v11156_v51 = vld [vmem:[%s11738_s29 + $0xc] ss:$16 sps:$4 sm:$0xff]  }
 0x1c3   : > { %7901 = vmatpush1.bf16.msra.mxu0 %v9911_v48  ;;  %v2177_v48 = vld [vmem:[%s11656_s22 + $0xfc8] sm:$0xff] }
 0x1c4   : > { %8157 = vmatpush1.bf16.msra.mxu1 %v10039_v49  ;;  %7903 = vmatprep.subr.bf16.mxu0 %v9912_v18  ;;  %v2181_v49 = vld [vmem:[%s11656_s22 + $0xfe8] sm:$0xff]  ;;  %v9923_v18 = vcombine.low %v2168_v37, %v2172_v38  ;;  %v1703_v37 = vld [vmem:[%s11656_s22 + $0xf8] sm:$0xff] }
 0x1c5   : > { %8159 = vmatprep.subr.bf16.mxu1 %v10040_v55  ;;  %v11441_v55 = vld [vmem:[%s11798_s23] sm:$0xff]  ;;  %v10052_v61 = vcombine.high %v2177_v48, %v2181_v49  ;;  %v10053_v12 = vcombine.low %v2177_v48, %v2181_v49  ;;  %s12837_s23 = scalar_lea.vmem %s12943_s13, %s7302_s26 }
 0x1c6   : > { %v1643_v57 = vrot.slane %v11441_v55, %v1642_v42  ;;  %v1718_v55 = vld [vmem:[%s11656_s22 + $0x170] sm:$0xff] }
 0x1c7   : > { %7905 = vmatpush1.bf16.msra.mxu0 %v9913_v62  ;;  %v1674_v62 = vld [vmem:[%s11656_s22 + $0x10] sm:$0xff] }
 0x1c8   : > { %8161 = vmatpush1.bf16.msra.mxu1 %v10041_v63  ;;  %7907 = vmatprep.subr.bf16.mxu0 %v9914_v2  ;;  %v1678_v63 = vld [vmem:[%s11656_s22 + $0x30] sm:$0xff]  ;;  %v1675_v2 = vld [vmem:[%s11656_s22 + $0x18] sm:$0xff]  ;;  %v1662_v7 = vadd.f32 %v1643_v57, %v11909_v25 }
 0x1c9   : > { %8163 = vmatprep.subr.bf16.mxu1 %v10042_v3  ;;  %v1679_v3 = vld [vmem:[%s11656_s22 + $0x38] sm:$0xff]  ;;  %v10054_v13 = vcombine.high %v1674_v62, %v1678_v63 }
 0x1ca   : > { %v12084_v10 = vmax.f32 %v1662_v7, 0.0  ;;  %v10183_v25 = vcombine.low %v1675_v2, %v1679_v3  ;;  %v1715_v57 = vld [vmem:[%s11656_s22 + $0x158] sm:$0xff] }
 0x1cb   : > { %7909 = vmatpush1.bf16.msra.mxu0 %v9915_v14  ;;  %v10182_v14 = vcombine.high %v1675_v2, %v1679_v3  ;;  %v1722_v2 = vld [vmem:[%s11656_s22 + $0x190] sm:$0xff]  ;;  %v1727_v7 = vld [vmem:[%s11656_s22 + $0x1b8] sm:$0xff] }
 0x1cc   : > { %8165 = vmatpush1.bf16.msra.mxu1 %v10043_v15  ;;  %7911 = vmatprep.subr.bf16.mxu0 %v9916_v20  ;;  %v1682_v15 = vld [vmem:[%s11656_s22 + $0x50] sm:$0xff] }
 0x1cd   : > { %8167 = vmatprep.subr.bf16.mxu1 %v10044_v21  ;;  %v1686_v20 = vld [vmem:[%s11656_s22 + $0x70] sm:$0xff]  ;;  %v10055_v21 = vcombine.low %v1674_v62, %v1678_v63 }
 0x1ce   : > { %v10056_v11 = vcombine.high %v1682_v15, %v1686_v20  ;;  %v10057_v28 = vcombine.low %v1682_v15, %v1686_v20  ;;  %v1726_v3 = vld [vmem:[%s11656_s22 + $0x1b0] sm:$0xff] }
 0x1cf   : > { %7913 = vmatpush1.bf16.msra.mxu0 %v9917_v16  ;;  %v1690_v16 = vld [vmem:[%s11656_s22 + $0x90] sm:$0xff] }
 0x1d0   : > { %8169 = vmatpush1.bf16.msra.mxu1 %v10045_v19  ;;  %7915 = vmatprep.subr.bf16.mxu0 %v9918_v53  ;;  %v1694_v19 = vld [vmem:[%s11656_s22 + $0xb0] sm:$0xff]  ;;  %v10184_v53 = vcombine.high %v1683_v24, %v1687_v9  ;;  %v1731_v24 = vld [vmem:[%s11656_s22 + $0x1d8] sm:$0xff] }
 0x1d1   : > { %8171 = vmatprep.subr.bf16.mxu1 %v10046_v26  ;;  %v1691_v26 = vld [vmem:[%s11656_s22 + $0x98] sm:$0xff]  ;;  %v10058_v23 = vcombine.high %v1690_v16, %v1694_v19  ;;  %v10059_v38 = vcombine.low %v1690_v16, %v1694_v19  ;;  %v1730_v20 = vld [vmem:[%s11656_s22 + $0x1d0] sm:$0xff] }
 0x1d2   : > { %v10187_v39 = vcombine.low %v1691_v26, %v1695_v27  ;;  %v1735_v9 = vld [vmem:[%s11656_s22 + $0x1f8] sm:$0xff] }
 0x1d3   : > { %7917 = vmatpush1.bf16.msra.mxu0 %v9919_v34  ;;  %v10186_v34 = vcombine.high %v1691_v26, %v1695_v27  ;;  %v10196_v19 = vcombine.high %v1731_v24, %v1735_v9  ;;  %v1742_v26 = vld [vmem:[%s11656_s22 + $0x230] sm:$0xff]  ;;  %v1739_v27 = vld [vmem:[%s11656_s22 + $0x218] sm:$0xff] }
 0x1d4   : > { %8173 = vmatpush1.bf16.msra.mxu1 %v10047_v35  ;;  %7919 = vmatprep.subr.bf16.mxu0 %v9920_v30  ;;  %v1698_v35 = vld [vmem:[%s11656_s22 + $0xd0] sm:$0xff] }
 0x1d5   : > { %8175 = vmatprep.subr.bf16.mxu1 %v10048_v36  ;;  %v1702_v30 = vld [vmem:[%s11656_s22 + $0xf0] sm:$0xff]  ;;  %v1699_v36 = vld [vmem:[%s11656_s22 + $0xd8] sm:$0xff] }
 0x1d6   : > { %v10060_v40 = vcombine.high %v1698_v35, %v1702_v30  ;;  %v10061_v46 = vcombine.low %v1698_v35, %v1702_v30  ;;  %v10189_v47 = vcombine.low %v1699_v36, %v1703_v37  ;;  %v1746_v30 = vld [vmem:[%s11656_s22 + $0x250] sm:$0xff] }
 0x1d7   : > { %7921 = vmatpush1.bf16.msra.mxu0 %v9921_v41  ;;  %v1706_v41 = vld [vmem:[%s11656_s22 + $0x110] sm:$0xff] }
 0x1d8   : > { %8177 = vmatpush1.bf16.msra.mxu1 %v10049_v43  ;;  %7923 = vmatprep.subr.bf16.mxu0 %v9922_v1  ;;  %v1710_v43 = vld [vmem:[%s11656_s22 + $0x130] sm:$0xff]  ;;  %v1707_v1 = vld [vmem:[%s11656_s22 + $0x118] sm:$0xff] }
 0x1d9   : > { %8179 = vmatprep.subr.bf16.mxu1 %v10050_v45  ;;  %v1711_v45 = vld [vmem:[%s11656_s22 + $0x138] sm:$0xff]  ;;  %v10062_v48 = vcombine.high %v1706_v41, %v1710_v43 }
 0x1da   : > { %v10190_v49 = vcombine.high %v1707_v1, %v1711_v45 }
 0x1db   : > { %7925 = vmatpush1.bf16.msra.mxu0 %v9923_v18  ;;  %v1714_v18 = vld [vmem:[%s11656_s22 + $0x150] sm:$0xff] }
 0x1dc   : > { %8181 = vmatpush1.bf16.msra.mxu1 %v10051_v58  ;;  %7927 = vmatprep.subr.bf16.mxu0 %v9924_v59  ;;  %v1719_v58 = vld [vmem:[%s11656_s22 + $0x178] sm:$0xff]  ;;  %v10063_v59 = vcombine.low %v1706_v41, %v1710_v43  ;;  %v10064_v62 = vcombine.high %v1714_v18, %v1718_v55  ;;  %v1754_v43 = vld [vmem:[%s11656_s22 + $0x290] sm:$0xff] }
 0x1dd   : > { %8183 = vmatprep.subr.bf16.mxu1 %v10052_v61  ;;  %v10191_v61 = vcombine.low %v1707_v1, %v1711_v45  ;;  %v10192_v63 = vcombine.high %v1715_v57, %v1719_v58  ;;  %v1758_v1 = vld [vmem:[%s11656_s22 + $0x2b0] sm:$0xff]  ;;  %v1755_v45 = vld [vmem:[%s11656_s22 + $0x298] sm:$0xff] }
 0x1df   : > { %7929 = vmatpush1.bf16.msra.mxu0 %v9925_v6  ;;  %v1723_v6 = vld [vmem:[%s11656_s22 + $0x198] sm:$0xff] }
 0x1e0   : > { %8185 = vmatpush1.bf16.msra.mxu1 %v10053_v12  ;;  %8187 = vmatprep.subr.bf16.mxu0 %v10054_v13  ;;  %v10065_v12 = vcombine.low %v1714_v18, %v1718_v55  ;;  %v10193_v13 = vcombine.low %v1715_v57, %v1719_v58  ;;  %v10194_v15 = vcombine.high %v1723_v6, %v1727_v7  ;;  %v1762_v55 = vld [vmem:[%s11656_s22 + $0x2d0] sm:$0xff]  ;;  %v1763_v58 = vld [vmem:[%s11656_s22 + $0x2d8] sm:$0xff] }
 0x1e1   : > { %8443 = vmatprep.subr.bf16.mxu1 %v10182_v14  ;;  %v10066_v14 = vcombine.high %v1722_v2, %v1726_v3  ;;  %v1766_v57 = vld [vmem:[%s11656_s22 + $0x2f0] sm:$0xff] }
 0x1e2   : > { %3528 = vmatmul.mubr.f32.vlgmr.msra.gmra.mrb[4].mxu0 %v12084_v10 }
 0x1e3   : > { %3812 = vmatmul.mubr.f32.vlgmr.msra.gmra.mrb[6].mxu1 %v12084_v10  ;;  %8189 = vmatpush1.bf16.msra.mxu0 %v10055_v21  ;;  %v1734_v21 = vld [vmem:[%s11656_s22 + $0x1f0] sm:$0xff] }
 0x1e4   : > { %3882 = vmatprep.mubr.f32.mxu0 %v11817_v4  ;;  %8445 = vmatpush1.bf16.msra.mxu1 %v10183_v25  ;;  %v10067_v25 = vcombine.low %v1722_v2, %v1726_v3  ;;  %v10068_v16 = vcombine.high %v1730_v20, %v1734_v21  ;;  %v1770_v3 = vld [vmem:[%s11656_s22 + $0x310] sm:$0xff] }
 0x1e5   : > { %4166 = vmatprep.mubr.f32.mxu1 %v11817_v4  ;;  %8191 = vmatprep.subr.bf16.mxu0 %v10056_v11  ;;  %v10188_v4 = vcombine.high %v1699_v36, %v1703_v37  ;;  %v10195_v11 = vcombine.low %v1723_v6, %v1727_v7  ;;  %v1750_v36 = vld [vmem:[%s11656_s22 + $0x270] sm:$0xff]  ;;  %v1747_v37 = vld [vmem:[%s11656_s22 + $0x258] sm:$0xff] }
 0x1e6   : > { %8447 = vmatprep.subr.bf16.mxu1 %v10184_v53  ;;  %v1738_v53 = vld [vmem:[%s11656_s22 + $0x210] sm:$0xff]  ;;  %v1771_v7 = vld [vmem:[%s11656_s22 + $0x318] sm:$0xff] }
 0x1e7   : > { %8193 = vmatpush1.bf16.msra.mxu0 %v10057_v28  ;;  %v1743_v28 = vld [vmem:[%s11656_s22 + $0x238] sm:$0xff]  ;;  %v1774_v6 = vld [vmem:[%s11656_s22 + $0x330] sm:$0xff] }
 0x1e8   : > { %8449 = vmatpush1.bf16.msra.mxu1 %v10185_v29  ;;  %8195 = vmatprep.subr.bf16.mxu0 %v10058_v23  ;;  %v10069_v29 = vcombine.low %v1730_v20, %v1734_v21  ;;  %v10197_v23 = vcombine.low %v1731_v24, %v1735_v9  ;;  %v10198_v35 = vcombine.high %v1739_v27, %v1743_v28  ;;  %v1778_v21 = vld [vmem:[%s11656_s22 + $0x350] sm:$0xff]  ;;  %v1779_v9 = vld [vmem:[%s11656_s22 + $0x358] sm:$0xff] }
 0x1e9   : > { %8451 = vmatprep.subr.bf16.mxu1 %v10186_v34  ;;  %v10070_v34 = vcombine.high %v1738_v53, %v1742_v26  ;;  %v1782_v24 = vld [vmem:[%s11656_s22 + $0x370] sm:$0xff] }
 0x1eb   : > { %8197 = vmatpush1.bf16.msra.mxu0 %v10059_v38  ;;  %v1751_v38 = vld [vmem:[%s11656_s22 + $0x278] sm:$0xff] }
 0x1ec   : > { %8453 = vmatpush1.bf16.msra.mxu1 %v10187_v39  ;;  %8199 = vmatprep.subr.bf16.mxu0 %v10060_v40  ;;  %v10071_v39 = vcombine.low %v1738_v53, %v1742_v26  ;;  %v10199_v40 = vcombine.low %v1739_v27, %v1743_v28  ;;  %v10200_v41 = vcombine.high %v1747_v37, %v1751_v38  ;;  %v1786_v26 = vld [vmem:[%s11656_s22 + $0x390] sm:$0xff]  ;;  %v1787_v28 = vld [vmem:[%s11656_s22 + $0x398] sm:$0xff] }
 0x1ed   : > { %8455 = vmatprep.subr.bf16.mxu1 %v10188_v4  ;;  %v10072_v4 = vcombine.high %v1746_v30, %v1750_v36  ;;  %v1790_v27 = vld [vmem:[%s11656_s22 + $0x3b0] sm:$0xff] }
 0x1ef   : > { %8201 = vmatpush1.bf16.msra.mxu0 %v10061_v46  ;;  %v1759_v46 = vld [vmem:[%s11656_s22 + $0x2b8] sm:$0xff] }
 0x1f0   : > { %8457 = vmatpush1.bf16.msra.mxu1 %v10189_v47  ;;  %8203 = vmatprep.subr.bf16.mxu0 %v10062_v48  ;;  %v10073_v47 = vcombine.low %v1746_v30, %v1750_v36  ;;  %v10201_v48 = vcombine.low %v1747_v37, %v1751_v38  ;;  %v10202_v18 = vcombine.high %v1755_v45, %v1759_v46  ;;  %v1794_v36 = vld [vmem:[%s11656_s22 + $0x3d0] sm:$0xff]  ;;  %v1795_v38 = vld [vmem:[%s11656_s22 + $0x3d8] sm:$0xff] }
 0x1f1   : > { %8459 = vmatprep.subr.bf16.mxu1 %v10190_v49  ;;  %v10074_v49 = vcombine.high %v1754_v43, %v1758_v1  ;;  %v1798_v37 = vld [vmem:[%s11656_s22 + $0x3f0] sm:$0xff] }
 0x1f3   : > { %8205 = vmatpush1.bf16.msra.mxu0 %v10063_v59  ;;  %v1767_v59 = vld [vmem:[%s11656_s22 + $0x2f8] sm:$0xff] }
 0x1f4   : > { %8461 = vmatpush1.bf16.msra.mxu1 %v10191_v61  ;;  %8207 = vmatprep.subr.bf16.mxu0 %v10064_v62  ;;  %v10075_v61 = vcombine.low %v1754_v43, %v1758_v1  ;;  %v10203_v62 = vcombine.low %v1755_v45, %v1759_v46  ;;  %v10204_v2 = vcombine.high %v1763_v58, %v1767_v59  ;;  %v1802_v1 = vld [vmem:[%s11656_s22 + $0x410] sm:$0xff]  ;;  %v1803_v46 = vld [vmem:[%s11656_s22 + $0x418] sm:$0xff] }
 0x1f5   : > { %8463 = vmatprep.subr.bf16.mxu1 %v10192_v63  ;;  %v10076_v63 = vcombine.high %v1762_v55, %v1766_v57  ;;  %v1806_v45 = vld [vmem:[%s11656_s22 + $0x430] sm:$0xff] }
 0x1f7   : > { %8209 = vmatpush1.bf16.msra.mxu0 %v10065_v12  ;;  %v1775_v12 = vld [vmem:[%s11656_s22 + $0x338] sm:$0xff] }
 0x1f8   : > { %8465 = vmatpush1.bf16.msra.mxu1 %v10193_v13  ;;  %8211 = vmatprep.subr.bf16.mxu0 %v10066_v14  ;;  %v10077_v13 = vcombine.low %v1762_v55, %v1766_v57  ;;  %v10205_v14 = vcombine.low %v1763_v58, %v1767_v59  ;;  %v10206_v20 = vcombine.high %v1771_v7, %v1775_v12  ;;  %v1810_v57 = vld [vmem:[%s11656_s22 + $0x450] sm:$0xff] }
 0x1f9   : > { %8467 = vmatprep.subr.bf16.mxu1 %v10194_v15  ;;  %v10078_v15 = vcombine.high %v1770_v3, %v1774_v6  ;;  %v1814_v58 = vld [vmem:[%s11656_s22 + $0x470] sm:$0xff]  ;;  %v10087_v59 = vcombine.low %v1802_v1, %v1806_v45 }
 0x1fb   : > { %8213 = vmatpush1.bf16.msra.mxu0 %v10067_v25  ;;  %v1783_v25 = vld [vmem:[%s11656_s22 + $0x378] sm:$0xff] }
 0x1fc   : > { %8469 = vmatpush1.bf16.msra.mxu1 %v10195_v11  ;;  %8215 = vmatprep.subr.bf16.mxu0 %v10068_v16  ;;  %v10079_v11 = vcombine.low %v1770_v3, %v1774_v6  ;;  %v10207_v16 = vcombine.low %v1771_v7, %v1775_v12  ;;  %v10208_v53 = vcombine.high %v1779_v9, %v1783_v25  ;;  %v1818_v3 = vld [vmem:[%s11656_s22 + $0x490] sm:$0xff]  ;;  %v1819_v12 = vld [vmem:[%s11656_s22 + $0x498] sm:$0xff] }
 0x1fd   : > { %8471 = vmatprep.subr.bf16.mxu1 %v10196_v19  ;;  %v10080_v19 = vcombine.high %v1778_v21, %v1782_v24  ;;  %v1822_v6 = vld [vmem:[%s11656_s22 + $0x4b0] sm:$0xff] }
 0x1ff   : > { %8217 = vmatpush1.bf16.msra.mxu0 %v10069_v29  ;;  %v1791_v29 = vld [vmem:[%s11656_s22 + $0x3b8] sm:$0xff] }
 0x200   : > { %8473 = vmatpush1.bf16.msra.mxu1 %v10197_v23  ;;  %8219 = vmatprep.subr.bf16.mxu0 %v10070_v34  ;;  %v10081_v23 = vcombine.low %v1778_v21, %v1782_v24  ;;  %v10209_v34 = vcombine.low %v1779_v9, %v1783_v25  ;;  %v10210_v30 = vcombine.high %v1787_v28, %v1791_v29  ;;  %v1826_v24 = vld [vmem:[%s11656_s22 + $0x4d0] sm:$0xff]  ;;  %v1827_v25 = vld [vmem:[%s11656_s22 + $0x4d8] sm:$0xff] }
 0x201   : > { %8475 = vmatprep.subr.bf16.mxu1 %v10198_v35  ;;  %v10082_v35 = vcombine.high %v1786_v26, %v1790_v27  ;;  %v1830_v9 = vld [vmem:[%s11656_s22 + $0x4f0] sm:$0xff] }
 0x203   : > { %8221 = vmatpush1.bf16.msra.mxu0 %v10071_v39  ;;  %v1799_v39 = vld [vmem:[%s11656_s22 + $0x3f8] sm:$0xff] }
 0x204   : > { %8477 = vmatpush1.bf16.msra.mxu1 %v10199_v40  ;;  %8223 = vmatprep.subr.bf16.mxu0 %v10072_v4  ;;  %v10083_v40 = vcombine.low %v1786_v26, %v1790_v27  ;;  %v10211_v4 = vcombine.low %v1787_v28, %v1791_v29  ;;  %v10212_v43 = vcombine.high %v1795_v38, %v1799_v39  ;;  %v1838_v26 = vld [vmem:[%s11656_s22 + $0x530] sm:$0xff]  ;;  %v1835_v27 = vld [vmem:[%s11656_s22 + $0x518] sm:$0xff] }
 0x205   : > { %8479 = vmatprep.subr.bf16.mxu1 %v10200_v41  ;;  %v10084_v41 = vcombine.high %v1794_v36, %v1798_v37  ;;  %v1839_v28 = vld [vmem:[%s11656_s22 + $0x538] sm:$0xff]  ;;  %v10093_v29 = vcombine.low %v1826_v24, %v1830_v9 }
 0x207   : > { %8225 = vmatpush1.bf16.msra.mxu0 %v10073_v47  ;;  %v1807_v47 = vld [vmem:[%s11656_s22 + $0x438] sm:$0xff] }
 0x208   : > { %8481 = vmatpush1.bf16.msra.mxu1 %v10201_v48  ;;  %8227 = vmatprep.subr.bf16.mxu0 %v10074_v49  ;;  %v10085_v48 = vcombine.low %v1794_v36, %v1798_v37  ;;  %v10213_v49 = vcombine.low %v1795_v38, %v1799_v39  ;;  %v10214_v55 = vcombine.high %v1803_v46, %v1807_v47  ;;  %v1846_v36 = vld [vmem:[%s11656_s22 + $0x570] sm:$0xff]  ;;  %v1843_v37 = vld [vmem:[%s11656_s22 + $0x558] sm:$0xff] }
 0x209   : > { %8483 = vmatprep.subr.bf16.mxu1 %v10202_v18  ;;  %v10086_v18 = vcombine.high %v1802_v1, %v1806_v45  ;;  %v1847_v38 = vld [vmem:[%s11656_s22 + $0x578] sm:$0xff]  ;;  %v1854_v1 = vld [vmem:[%s11656_s22 + $0x5b0] sm:$0xff] }
 0x20a   : > { %v1851_v45 = vld [vmem:[%s11656_s22 + $0x598] sm:$0xff] }
 0x20b   : > { %8229 = vmatpush1.bf16.msra.mxu0 %v10075_v61  ;;  %v1811_v61 = vld [vmem:[%s11656_s22 + $0x458] sm:$0xff] }
 0x20c   : > { %8485 = vmatpush1.bf16.msra.mxu1 %v10203_v62  ;;  %8231 = vmatprep.subr.bf16.mxu0 %v10076_v63  ;;  %v1815_v62 = vld [vmem:[%s11656_s22 + $0x478] sm:$0xff]  ;;  %v10215_v63 = vcombine.low %v1803_v46, %v1807_v47 }
 0x20d   : > { %8487 = vmatprep.subr.bf16.mxu1 %v10204_v2  ;;  %v10088_v2 = vcombine.high %v1810_v57, %v1814_v58  ;;  %v10216_v7 = vcombine.high %v1811_v61, %v1815_v62  ;;  %v1855_v46 = vld [vmem:[%s11656_s22 + $0x5b8] sm:$0xff] }
 0x20f   : > { %8233 = vmatpush1.bf16.msra.mxu0 %v10077_v13  ;;  %v1823_v13 = vld [vmem:[%s11656_s22 + $0x4b8] sm:$0xff] }
 0x210   : > { %8489 = vmatpush1.bf16.msra.mxu1 %v10205_v14  ;;  %8235 = vmatprep.subr.bf16.mxu0 %v10078_v15  ;;  %v10089_v14 = vcombine.low %v1810_v57, %v1814_v58  ;;  %v10217_v15 = vcombine.low %v1811_v61, %v1815_v62  ;;  %v10218_v21 = vcombine.high %v1819_v12, %v1823_v13  ;;  %v1862_v57 = vld [vmem:[%s11656_s22 + $0x5f0] sm:$0xff]  ;;  %v1859_v58 = vld [vmem:[%s11656_s22 + $0x5d8] sm:$0xff] }
 0x211   : > { %8491 = vmatprep.subr.bf16.mxu1 %v10206_v20  ;;  %v10090_v20 = vcombine.high %v1818_v3, %v1822_v6  ;;  %v10227_v62 = vcombine.low %v1851_v45, %v1855_v46 }
 0x213   : > { %8237 = vmatpush1.bf16.msra.mxu0 %v10079_v11  ;;  %v10091_v11 = vcombine.low %v1818_v3, %v1822_v6  ;;  %v1866_v3 = vld [vmem:[%s11656_s22 + $0x610] sm:$0xff] }
 0x214   : > { %8493 = vmatpush1.bf16.msra.mxu1 %v10207_v16  ;;  %8239 = vmatprep.subr.bf16.mxu0 %v10080_v19  ;;  %v10219_v16 = vcombine.low %v1819_v12, %v1823_v13  ;;  %v10092_v19 = vcombine.high %v1826_v24, %v1830_v9  ;;  %v1870_v6 = vld [vmem:[%s11656_s22 + $0x630] sm:$0xff]  ;;  %v1871_v12 = vld [vmem:[%s11656_s22 + $0x638] sm:$0xff] }
 0x215   : > { %8495 = vmatprep.subr.bf16.mxu1 %v10208_v53  ;;  %v1834_v53 = vld [vmem:[%s11656_s22 + $0x510] sm:$0xff]  ;;  %v1875_v9 = vld [vmem:[%s11656_s22 + $0x658] sm:$0xff] }
 0x216   : > { %v10095_v39 = vcombine.low %v1834_v53, %v1838_v26  ;;  %v1878_v24 = vld [vmem:[%s11656_s22 + $0x670] sm:$0xff] }
 0x217   : > { %8241 = vmatpush1.bf16.msra.mxu0 %v10081_v23 }
 0x218   : > { %8497 = vmatpush1.bf16.msra.mxu1 %v10209_v34  ;;  %8243 = vmatprep.subr.bf16.mxu0 %v10082_v35  ;;  %v10094_v34 = vcombine.high %v1834_v53, %v1838_v26  ;;  %v10222_v35 = vcombine.high %v1835_v27, %v1839_v28  ;;  %v1886_v53 = vld [vmem:[%s11656_s22 + $0x6b0] sm:$0xff]  ;;  %v1883_v26 = vld [vmem:[%s11656_s22 + $0x698] sm:$0xff] }
 0x219   : > { %8499 = vmatprep.subr.bf16.mxu1 %v10210_v30  ;;  %v1842_v30 = vld [vmem:[%s11656_s22 + $0x550] sm:$0xff] }
 0x21a   : > { %v10097_v47 = vcombine.low %v1842_v30, %v1846_v36 }
 0x21b   : > { %8245 = vmatpush1.bf16.msra.mxu0 %v10083_v40  ;;  %v10223_v40 = vcombine.low %v1835_v27, %v1839_v28  ;;  %v1887_v27 = vld [vmem:[%s11656_s22 + $0x6b8] sm:$0xff] }
 0x21c   : > { %8501 = vmatpush1.bf16.msra.mxu1 %v10211_v4  ;;  %8247 = vmatprep.subr.bf16.mxu0 %v10084_v41  ;;  %v10096_v4 = vcombine.high %v1842_v30, %v1846_v36  ;;  %v10224_v41 = vcombine.high %v1843_v37, %v1847_v38  ;;  %v1894_v30 = vld [vmem:[%s11656_s22 + $0x6f0] sm:$0xff]  ;;  %v1891_v36 = vld [vmem:[%s11656_s22 + $0x6d8] sm:$0xff] }
 0x21d   : > { %8503 = vmatprep.subr.bf16.mxu1 %v10212_v43  ;;  %v1850_v43 = vld [vmem:[%s11656_s22 + $0x590] sm:$0xff] }
 0x21e   : > { %v10099_v61 = vcombine.low %v1850_v43, %v1854_v1 }
 0x21f   : > { %8249 = vmatpush1.bf16.msra.mxu0 %v10085_v48  ;;  %v10225_v48 = vcombine.low %v1843_v37, %v1847_v38  ;;  %v1895_v37 = vld [vmem:[%s11656_s22 + $0x6f8] sm:$0xff] }
 0x220   : > { %8505 = vmatpush1.bf16.msra.mxu1 %v10213_v49  ;;  %8251 = vmatprep.subr.bf16.mxu0 %v10086_v18  ;;  %v10098_v49 = vcombine.high %v1850_v43, %v1854_v1  ;;  %v10226_v18 = vcombine.high %v1851_v45, %v1855_v46  ;;  %v1902_v43 = vld [vmem:[%s11656_s22 + $0x730] sm:$0xff]  ;;  %v1899_v1 = vld [vmem:[%s11656_s22 + $0x718] sm:$0xff] }
 0x221   : > { %8507 = vmatprep.subr.bf16.mxu1 %v10214_v55  ;;  %v1858_v55 = vld [vmem:[%s11656_s22 + $0x5d0] sm:$0xff]  ;;  %v1903_v45 = vld [vmem:[%s11656_s22 + $0x738] sm:$0xff] }
 0x222   : > { %3883 = vmatmul.mubr.f32.vlgmr.msra.gmra.mrb[6].mxu0 %v11819_v5  ;;  %v10101_v13 = vcombine.low %v1858_v55, %v1862_v57 }
 0x223   : > { %4167 = vmatmul.mubr.f32.vlgmr.msra.gmra.mrb[8].mxu1 %v11819_v5  ;;  %8253 = vmatpush1.bf16.msra.mxu0 %v10087_v59  ;;  %v1831_v5 = vld [vmem:[%s11656_s22 + $0x4f8] sm:$0xff] }
 0x224   : > { %3953 = vmatprep.mubr.f32.mxu0 %v11871_v17  ;;  %8509 = vmatpush1.bf16.msra.mxu1 %v10215_v63  ;;  %v10221_v23 = vcombine.low %v1827_v25, %v1831_v5  ;;  %v1863_v59 = vld [vmem:[%s11656_s22 + $0x5f8] sm:$0xff]  ;;  %v10100_v63 = vcombine.high %v1858_v55, %v1862_v57  ;;  %v1910_v55 = vld [vmem:[%s11656_s22 + $0x770] sm:$0xff] }
 0x225   : > { %4237 = vmatprep.mubr.f32.mxu1 %v11871_v17  ;;  %8255 = vmatprep.subr.bf16.mxu0 %v10088_v2  ;;  %v10220_v17 = vcombine.high %v1827_v25, %v1831_v5  ;;  %v10228_v2 = vcombine.high %v1859_v58, %v1863_v59  ;;  %v1879_v25 = vld [vmem:[%s11656_s22 + $0x678] sm:$0xff]  ;;  %v10103_v5 = vcombine.low %v1866_v3, %v1870_v6 }
 0x226   : > { %8511 = vmatprep.subr.bf16.mxu1 %v10216_v7  ;;  %v1867_v7 = vld [vmem:[%s11656_s22 + $0x618] sm:$0xff] }
 0x227   : > { %8257 = vmatpush1.bf16.msra.mxu0 %v10089_v14  ;;  %v10229_v14 = vcombine.low %v1859_v58, %v1863_v59  ;;  %v1907_v57 = vld [vmem:[%s11656_s22 + $0x758] sm:$0xff] }
 0x228   : > { %8513 = vmatpush1.bf16.msra.mxu1 %v10217_v15  ;;  %8259 = vmatprep.subr.bf16.mxu0 %v10090_v20  ;;  %v10102_v15 = vcombine.high %v1866_v3, %v1870_v6  ;;  %v10230_v20 = vcombine.high %v1867_v7, %v1871_v12  ;;  %v1911_v58 = vld [vmem:[%s11656_s22 + $0x778] sm:$0xff]  ;;  %v1918_v3 = vld [vmem:[%s11656_s22 + $0x7b0] sm:$0xff] }
 0x229   : > { %8515 = vmatprep.subr.bf16.mxu1 %v10218_v21  ;;  %v1874_v21 = vld [vmem:[%s11656_s22 + $0x650] sm:$0xff]  ;;  %v1915_v6 = vld [vmem:[%s11656_s22 + $0x798] sm:$0xff] }
 0x22a   : > { %v10105_v28 = vcombine.low %v1874_v21, %v1878_v24 }
 0x22b   : > { %8261 = vmatpush1.bf16.msra.mxu0 %v10091_v11  ;;  %v10231_v11 = vcombine.low %v1867_v7, %v1871_v12  ;;  %v1919_v7 = vld [vmem:[%s11656_s22 + $0x7b8] sm:$0xff] }
 0x22c   : > { %8517 = vmatpush1.bf16.msra.mxu1 %v10219_v16  ;;  %8263 = vmatprep.subr.bf16.mxu0 %v10092_v19  ;;  %v10104_v16 = vcombine.high %v1874_v21, %v1878_v24  ;;  %v10232_v19 = vcombine.high %v1875_v9, %v1879_v25  ;;  %v1926_v21 = vld [vmem:[%s11656_s22 + $0x7f0] sm:$0xff]  ;;  %v1923_v24 = vld [vmem:[%s11656_s22 + $0x7d8] sm:$0xff] }
 0x22d   : > { %8519 = vmatprep.subr.bf16.mxu1 %v10220_v17  ;;  %v1882_v17 = vld [vmem:[%s11656_s22 + $0x690] sm:$0xff] }
 0x22e   : > { %v10107_v38 = vcombine.low %v1882_v17, %v1886_v53 }
 0x22f   : > { %8265 = vmatpush1.bf16.msra.mxu0 %v10093_v29  ;;  %v10233_v29 = vcombine.low %v1875_v9, %v1879_v25  ;;  %v1927_v9 = vld [vmem:[%s11656_s22 + $0x7f8] sm:$0xff] }
 0x230   : > { %8521 = vmatpush1.bf16.msra.mxu1 %v10221_v23  ;;  %8267 = vmatprep.subr.bf16.mxu0 %v10094_v34  ;;  %v10106_v23 = vcombine.high %v1882_v17, %v1886_v53  ;;  %v10234_v34 = vcombine.high %v1883_v26, %v1887_v27  ;;  %v1934_v17 = vld [vmem:[%s11656_s22 + $0x830] sm:$0xff]  ;;  %v1931_v53 = vld [vmem:[%s11656_s22 + $0x818] sm:$0xff] }
 0x231   : > { %8523 = vmatprep.subr.bf16.mxu1 %v10222_v35  ;;  %v1890_v35 = vld [vmem:[%s11656_s22 + $0x6d0] sm:$0xff] }
 0x232   : > { %v10109_v46 = vcombine.low %v1890_v35, %v1894_v30 }
 0x233   : > { %8269 = vmatpush1.bf16.msra.mxu0 %v10095_v39  ;;  %v10235_v39 = vcombine.low %v1883_v26, %v1887_v27  ;;  %v1935_v26 = vld [vmem:[%s11656_s22 + $0x838] sm:$0xff] }
 0x234   : > { %8525 = vmatpush1.bf16.msra.mxu1 %v10223_v40  ;;  %8271 = vmatprep.subr.bf16.mxu0 %v10096_v4  ;;  %v10108_v40 = vcombine.high %v1890_v35, %v1894_v30  ;;  %v10236_v4 = vcombine.high %v1891_v36, %v1895_v37  ;;  %v1942_v35 = vld [vmem:[%s11656_s22 + $0x870] sm:$0xff] }
 0x235   : > { %8527 = vmatprep.subr.bf16.mxu1 %v10224_v41  ;;  %v1898_v41 = vld [vmem:[%s11656_s22 + $0x710] sm:$0xff] }
 0x236   : > { %v10111_v59 = vcombine.low %v1898_v41, %v1902_v43 }
 0x237   : > { %8273 = vmatpush1.bf16.msra.mxu0 %v10097_v47  ;;  %v10237_v47 = vcombine.low %v1891_v36, %v1895_v37  ;;  %v1939_v36 = vld [vmem:[%s11656_s22 + $0x858] sm:$0xff] }
 0x238   : > { %8529 = vmatpush1.bf16.msra.mxu1 %v10225_v48  ;;  %8275 = vmatprep.subr.bf16.mxu0 %v10098_v49  ;;  %v10110_v48 = vcombine.high %v1898_v41, %v1902_v43  ;;  %v10238_v49 = vcombine.high %v1899_v1, %v1903_v45  ;;  %v1943_v37 = vld [vmem:[%s11656_s22 + $0x878] sm:$0xff] }
 0x239   : > { %8531 = vmatprep.subr.bf16.mxu1 %v10226_v18  ;;  %v1906_v18 = vld [vmem:[%s11656_s22 + $0x750] sm:$0xff]  ;;  %v10248_v41 = vcombine.high %v1939_v36, %v1943_v37  ;;  %v1947_v43 = vld [vmem:[%s11656_s22 + $0x898] sm:$0xff] }
 0x23a   : > { %v10113_v12 = vcombine.low %v1906_v18, %v1910_v55 }
 0x23b   : > { %8277 = vmatpush1.bf16.msra.mxu0 %v10099_v61  ;;  %v10239_v61 = vcombine.low %v1899_v1, %v1903_v45  ;;  %v1951_v1 = vld [vmem:[%s11656_s22 + $0x8b8] sm:$0xff] }
 0x23c   : > { %8533 = vmatpush1.bf16.msra.mxu1 %v10227_v62  ;;  %8279 = vmatprep.subr.bf16.mxu0 %v10100_v63  ;;  %v10112_v62 = vcombine.high %v1906_v18, %v1910_v55  ;;  %v10240_v63 = vcombine.high %v1907_v57, %v1911_v58  ;;  %v1958_v18 = vld [vmem:[%s11656_s22 + $0x8f0] sm:$0xff]  ;;  %v1955_v55 = vld [vmem:[%s11656_s22 + $0x8d8] sm:$0xff] }
 0x23d   : > { %8535 = vmatprep.subr.bf16.mxu1 %v10228_v2  ;;  %v1914_v2 = vld [vmem:[%s11656_s22 + $0x790] sm:$0xff] }
 0x23e   : > { %v10115_v25 = vcombine.low %v1914_v2, %v1918_v3 }
 0x23f   : > { %8281 = vmatpush1.bf16.msra.mxu0 %v10101_v13  ;;  %v10241_v13 = vcombine.low %v1907_v57, %v1911_v58  ;;  %v10251_v58 = vcombine.low %v1947_v43, %v1951_v1 }
 0x240   : > { %8537 = vmatpush1.bf16.msra.mxu1 %v10229_v14  ;;  %8283 = vmatprep.subr.bf16.mxu0 %v10102_v15  ;;  %v10114_v14 = vcombine.high %v1914_v2, %v1918_v3  ;;  %v10242_v15 = vcombine.high %v1915_v6, %v1919_v7  ;;  %v1967_v2 = vld [vmem:[%s11656_s22 + $0x938] sm:$0xff] }
 0x241   : > { %8539 = vmatprep.subr.bf16.mxu1 %v10230_v20  ;;  %v1922_v20 = vld [vmem:[%s11656_s22 + $0x7d0] sm:$0xff] }
 0x242   : > { %v10117_v27 = vcombine.low %v1922_v20, %v1926_v21 }
 0x243   : > { %8285 = vmatpush1.bf16.msra.mxu0 %v10103_v5  ;;  %v10243_v5 = vcombine.low %v1915_v6, %v1919_v7 }
 0x244   : > { %8541 = vmatpush1.bf16.msra.mxu1 %v10231_v11  ;;  %8287 = vmatprep.subr.bf16.mxu0 %v10104_v16  ;;  %v10116_v11 = vcombine.high %v1922_v20, %v1926_v21  ;;  %v10244_v16 = vcombine.high %v1923_v24, %v1927_v9  ;;  %v1975_v20 = vld [vmem:[%s11656_s22 + $0x978] sm:$0xff] }
 0x245   : > { %8543 = vmatprep.subr.bf16.mxu1 %v10232_v19  ;;  %v1930_v19 = vld [vmem:[%s11656_s22 + $0x810] sm:$0xff] }
 0x246   : > { %v10119_v30 = vcombine.low %v1930_v19, %v1934_v17 }
 0x247   : > { %8289 = vmatpush1.bf16.msra.mxu0 %v10105_v28  ;;  %v10245_v28 = vcombine.low %v1923_v24, %v1927_v9 }
 0x248   : > { %8545 = vmatpush1.bf16.msra.mxu1 %v10233_v29  ;;  %8291 = vmatprep.subr.bf16.mxu0 %v10106_v23  ;;  %v10118_v29 = vcombine.high %v1930_v19, %v1934_v17  ;;  %v10246_v23 = vcombine.high %v1931_v53, %v1935_v26  ;;  %v1983_v19 = vld [vmem:[%s11656_s22 + $0x9b8] sm:$0xff] }
 0x249   : > { %8547 = vmatprep.subr.bf16.mxu1 %v10234_v34  ;;  %v1938_v34 = vld [vmem:[%s11656_s22 + $0x850] sm:$0xff] }
 0x24a   : > { %v10121_v45 = vcombine.low %v1938_v34, %v1942_v35 }
 0x24b   : > { %8293 = vmatpush1.bf16.msra.mxu0 %v10107_v38  ;;  %v10247_v38 = vcombine.low %v1931_v53, %v1935_v26 }
 0x24c   : > { %8549 = vmatpush1.bf16.msra.mxu1 %v10235_v39  ;;  %8295 = vmatprep.subr.bf16.mxu0 %v10108_v40  ;;  %v10120_v39 = vcombine.high %v1938_v34, %v1942_v35  ;;  %v1946_v40 = vld [vmem:[%s11656_s22 + $0x890] sm:$0xff]  ;;  %v1991_v34 = vld [vmem:[%s11656_s22 + $0x9f8] sm:$0xff] }
 0x24d   : > { %8551 = vmatprep.subr.bf16.mxu1 %v10236_v4  ;;  %v1950_v4 = vld [vmem:[%s11656_s22 + $0x8b0] sm:$0xff] }
 0x24e   : > { %v10123_v57 = vcombine.low %v1946_v40, %v1950_v4 }
 0x24f   : > { %8297 = vmatpush1.bf16.msra.mxu0 %v10109_v46  ;;  %v10249_v46 = vcombine.low %v1939_v36, %v1943_v37 }
 0x250   : > { %8553 = vmatpush1.bf16.msra.mxu1 %v10237_v47  ;;  %8299 = vmatprep.subr.bf16.mxu0 %v10110_v48  ;;  %v10122_v47 = vcombine.high %v1946_v40, %v1950_v4  ;;  %v10250_v48 = vcombine.high %v1947_v43, %v1951_v1  ;;  %v1995_v40 = vld [vmem:[%s11656_s22 + $0xa18] sm:$0xff] }
 0x251   : > { %8555 = vmatprep.subr.bf16.mxu1 %v10238_v49  ;;  %v1954_v49 = vld [vmem:[%s11656_s22 + $0x8d0] sm:$0xff]  ;;  %v1999_v4 = vld [vmem:[%s11656_s22 + $0xa38] sm:$0xff] }
 0x252   : > { %v10125_v3 = vcombine.low %v1954_v49, %v1958_v18 }
 0x253   : > { %8301 = vmatpush1.bf16.msra.mxu0 %v10111_v59  ;;  %v10124_v59 = vcombine.high %v1954_v49, %v1958_v18  ;;  %v2007_v49 = vld [vmem:[%s11656_s22 + $0xa78] sm:$0xff] }
 0x254   : > { %8557 = vmatpush1.bf16.msra.mxu1 %v10239_v61  ;;  %8303 = vmatprep.subr.bf16.mxu0 %v10112_v62  ;;  %v1962_v61 = vld [vmem:[%s11656_s22 + $0x910] sm:$0xff] }
 0x255   : > { %8559 = vmatprep.subr.bf16.mxu1 %v10240_v63  ;;  %v1966_v62 = vld [vmem:[%s11656_s22 + $0x930] sm:$0xff]  ;;  %v1963_v63 = vld [vmem:[%s11656_s22 + $0x918] sm:$0xff] }
 0x256   : > { %v10126_v7 = vcombine.high %v1962_v61, %v1966_v62  ;;  %v10127_v21 = vcombine.low %v1962_v61, %v1966_v62  ;;  %v10255_v24 = vcombine.low %v1963_v63, %v1967_v2  ;;  %v2015_v61 = vld [vmem:[%s11656_s22 + $0xab8] sm:$0xff] }
 0x257   : > { %8305 = vmatpush1.bf16.msra.mxu0 %v10113_v12  ;;  %v10254_v12 = vcombine.high %v1963_v63, %v1967_v2 }
 0x258   : > { %8561 = vmatpush1.bf16.msra.mxu1 %v10241_v13  ;;  %8307 = vmatprep.subr.bf16.mxu0 %v10114_v14  ;;  %v1970_v13 = vld [vmem:[%s11656_s22 + $0x950] sm:$0xff] }
 0x259   : > { %8563 = vmatprep.subr.bf16.mxu1 %v10242_v15  ;;  %v1974_v14 = vld [vmem:[%s11656_s22 + $0x970] sm:$0xff]  ;;  %v1971_v15 = vld [vmem:[%s11656_s22 + $0x958] sm:$0xff] }
 0x25a   : > { %v10128_v9 = vcombine.high %v1970_v13, %v1974_v14  ;;  %v10129_v17 = vcombine.low %v1970_v13, %v1974_v14  ;;  %v10257_v53 = vcombine.low %v1971_v15, %v1975_v20  ;;  %v2023_v13 = vld [vmem:[%s11656_s22 + $0xaf8] sm:$0xff] }
 0x25b   : > { %8309 = vmatpush1.bf16.msra.mxu0 %v10115_v25  ;;  %v10256_v25 = vcombine.high %v1971_v15, %v1975_v20 }
 0x25c   : > { %8565 = vmatpush1.bf16.msra.mxu1 %v10243_v5  ;;  %8311 = vmatprep.subr.bf16.mxu0 %v10116_v11  ;;  %v1978_v5 = vld [vmem:[%s11656_s22 + $0x990] sm:$0xff] }
 0x25d   : > { %8567 = vmatprep.subr.bf16.mxu1 %v10244_v16  ;;  %v1982_v11 = vld [vmem:[%s11656_s22 + $0x9b0] sm:$0xff]  ;;  %v1979_v16 = vld [vmem:[%s11656_s22 + $0x998] sm:$0xff] }
 0x25e   : > { %v10130_v26 = vcombine.high %v1978_v5, %v1982_v11  ;;  %v10131_v35 = vcombine.low %v1978_v5, %v1982_v11  ;;  %v2031_v5 = vld [vmem:[%s11656_s22 + $0xb38] sm:$0xff] }
 0x25f   : > { %8313 = vmatpush1.bf16.msra.mxu0 %v10117_v27  ;;  %v10258_v27 = vcombine.high %v1979_v16, %v1983_v19 }
 0x260   : > { %8569 = vmatpush1.bf16.msra.mxu1 %v10245_v28  ;;  %8315 = vmatprep.subr.bf16.mxu0 %v10118_v29  ;;  %v1986_v28 = vld [vmem:[%s11656_s22 + $0x9d0] sm:$0xff] }
 0x261   : > { %8571 = vmatprep.subr.bf16.mxu1 %v10246_v23  ;;  %v1990_v29 = vld [vmem:[%s11656_s22 + $0x9f0] sm:$0xff]  ;;  %v1987_v23 = vld [vmem:[%s11656_s22 + $0x9d8] sm:$0xff] }
 0x262   : > { %3954 = vmatmul.mubr.f32.vlgmr.msra.gmra.mrb[6].mxu0 %v11925_v44  ;;  %v10132_v36 = vcombine.high %v1986_v28, %v1990_v29  ;;  %v10260_v37 = vcombine.high %v1987_v23, %v1991_v34  ;;  %v10261_v43 = vcombine.low %v1987_v23, %v1991_v34 }
 0x263   : > { %4238 = vmatmul.mubr.f32.vlgmr.msra.gmra.mrb[8].mxu1 %v11925_v44  ;;  %8317 = vmatpush1.bf16.msra.mxu0 %v10119_v30  ;;  %v1959_v44 = vld [vmem:[%s11656_s22 + $0x8f8] sm:$0xff]  ;;  %v10259_v30 = vcombine.low %v1979_v16, %v1983_v19 }
 0x264   : > { %4024 = vmatprep.mubr.f32.mxu0 %v11931_v50  ;;  %8573 = vmatpush1.bf16.msra.mxu1 %v10247_v38  ;;  %v10253_v6 = vcombine.low %v1955_v55, %v1959_v44  ;;  %v1994_v38 = vld [vmem:[%s11656_s22 + $0xa10] sm:$0xff] }
 0x265   : > { %4308 = vmatprep.mubr.f32.mxu1 %v11931_v50  ;;  %8319 = vmatprep.subr.bf16.mxu0 %v10120_v39  ;;  %v10252_v50 = vcombine.high %v1955_v55, %v1959_v44  ;;  %v1998_v39 = vld [vmem:[%s11656_s22 + $0xa30] sm:$0xff]  ;;  %v10263_v55 = vcombine.low %v1995_v40, %v1999_v4 }
 0x266   : > { %8575 = vmatprep.subr.bf16.mxu1 %v10248_v41  ;;  %v10133_v41 = vcombine.low %v1986_v28, %v1990_v29  ;;  %v10134_v1 = vcombine.high %v1994_v38, %v1998_v39  ;;  %v10135_v18 = vcombine.low %v1994_v38, %v1998_v39  ;;  %v2039_v28 = vld [vmem:[%s11656_s22 + $0xb78] sm:$0xff] }
 0x267   : > { %8321 = vmatpush1.bf16.msra.mxu0 %v10121_v45  ;;  %v10262_v45 = vcombine.high %v1995_v40, %v1999_v4  ;;  %v2047_v38 = vld [vmem:[%s11656_s22 + $0xbb8] sm:$0xff] }
 0x268   : > { %8577 = vmatpush1.bf16.msra.mxu1 %v10249_v46  ;;  %8323 = vmatprep.subr.bf16.mxu0 %v10122_v47  ;;  %v2002_v46 = vld [vmem:[%s11656_s22 + $0xa50] sm:$0xff] }
 0x269   : > { %8579 = vmatprep.subr.bf16.mxu1 %v10250_v48  ;;  %v2006_v47 = vld [vmem:[%s11656_s22 + $0xa70] sm:$0xff]  ;;  %v2003_v48 = vld [vmem:[%s11656_s22 + $0xa58] sm:$0xff] }
 0x26a   : > { %v10136_v44 = vcombine.high %v2002_v46, %v2006_v47  ;;  %v10137_v62 = vcombine.low %v2002_v46, %v2006_v47  ;;  %v10265_v63 = vcombine.low %v2003_v48, %v2007_v49  ;;  %v2055_v46 = vld [vmem:[%s11656_s22 + $0xbf8] sm:$0xff] }
 0x26b   : > { %8325 = vmatpush1.bf16.msra.mxu0 %v10123_v57  ;;  %v10264_v57 = vcombine.high %v2003_v48, %v2007_v49 }
 0x26c   : > { %8581 = vmatpush1.bf16.msra.mxu1 %v10251_v58  ;;  %8327 = vmatprep.subr.bf16.mxu0 %v10124_v59  ;;  %v2010_v58 = vld [vmem:[%s11656_s22 + $0xa90] sm:$0xff] }
 0x26d   : > { %8583 = vmatprep.subr.bf16.mxu1 %v10252_v50  ;;  %v2014_v59 = vld [vmem:[%s11656_s22 + $0xab0] sm:$0xff]  ;;  %v2011_v50 = vld [vmem:[%s11656_s22 + $0xa98] sm:$0xff] }
 0x26e   : > { %v10138_v2 = vcombine.high %v2010_v58, %v2014_v59  ;;  %v10139_v14 = vcombine.low %v2010_v58, %v2014_v59  ;;  %v10267_v15 = vcombine.low %v2011_v50, %v2015_v61  ;;  %v2063_v58 = vld [vmem:[%s11656_s22 + $0xc38] sm:$0xff] }
 0x26f   : > { %8329 = vmatpush1.bf16.msra.mxu0 %v10125_v3  ;;  %v10266_v3 = vcombine.high %v2011_v50, %v2015_v61 }
 0x270   : > { %8585 = vmatpush1.bf16.msra.mxu1 %v10253_v6  ;;  %8331 = vmatprep.subr.bf16.mxu0 %v10126_v7  ;;  %v2018_v6 = vld [vmem:[%s11656_s22 + $0xad0] sm:$0xff] }
 0x271   : > { %8587 = vmatprep.subr.bf16.mxu1 %v10254_v12  ;;  %v2022_v7 = vld [vmem:[%s11656_s22 + $0xaf0] sm:$0xff]  ;;  %v2019_v12 = vld [vmem:[%s11656_s22 + $0xad8] sm:$0xff] }
 0x272   : > { %v10140_v20 = vcombine.high %v2018_v6, %v2022_v7  ;;  %v10141_v11 = vcombine.low %v2018_v6, %v2022_v7  ;;  %v10269_v16 = vcombine.low %v2019_v12, %v2023_v13  ;;  %v2067_v6 = vld [vmem:[%s11656_s22 + $0xc58] sm:$0xff] }
 0x273   : > { %8333 = vmatpush1.bf16.msra.mxu0 %v10127_v21  ;;  %v10268_v21 = vcombine.high %v2019_v12, %v2023_v13  ;;  %v2071_v7 = vld [vmem:[%s11656_s22 + $0xc78] sm:$0xff] }
 0x274   : > { %8589 = vmatpush1.bf16.msra.mxu1 %v10255_v24  ;;  %8335 = vmatprep.subr.bf16.mxu0 %v10128_v9  ;;  %v2026_v24 = vld [vmem:[%s11656_s22 + $0xb10] sm:$0xff] }
 0x275   : > { %8591 = vmatprep.subr.bf16.mxu1 %v10256_v25  ;;  %v2030_v9 = vld [vmem:[%s11656_s22 + $0xb30] sm:$0xff]  ;;  %v2027_v25 = vld [vmem:[%s11656_s22 + $0xb18] sm:$0xff] }
 0x276   : > { %v10142_v19 = vcombine.high %v2026_v24, %v2030_v9  ;;  %v10143_v29 = vcombine.low %v2026_v24, %v2030_v9  ;;  %v10271_v23 = vcombine.low %v2027_v25, %v2031_v5  ;;  %v2079_v24 = vld [vmem:[%s11656_s22 + $0xcb8] sm:$0xff] }
 0x277   : > { %8337 = vmatpush1.bf16.msra.mxu0 %v10129_v17  ;;  %v10270_v17 = vcombine.high %v2027_v25, %v2031_v5  ;;  %v10281_v25 = vcombine.low %v2067_v6, %v2071_v7 }
 0x278   : > { %8593 = vmatpush1.bf16.msra.mxu1 %v10257_v53  ;;  %8339 = vmatprep.subr.bf16.mxu0 %v10130_v26  ;;  %v2034_v53 = vld [vmem:[%s11656_s22 + $0xb50] sm:$0xff] }
 0x279   : > { %8595 = vmatprep.subr.bf16.mxu1 %v10258_v27  ;;  %v2038_v26 = vld [vmem:[%s11656_s22 + $0xb70] sm:$0xff]  ;;  %v2035_v27 = vld [vmem:[%s11656_s22 + $0xb58] sm:$0xff] }
 0x27a   : > { %v10144_v34 = vcombine.high %v2034_v53, %v2038_v26  ;;  %v10145_v39 = vcombine.low %v2034_v53, %v2038_v26  ;;  %v10273_v40 = vcombine.low %v2035_v27, %v2039_v28 }
 0x27b   : > { %8341 = vmatpush1.bf16.msra.mxu0 %v10131_v35  ;;  %v10272_v35 = vcombine.high %v2035_v27, %v2039_v28  ;;  %v2090_v28 = vld [vmem:[%s11656_s22 + $0xd10] sm:$0xff] }
 0x27c   : > { %8597 = vmatpush1.bf16.msra.mxu1 %v10259_v30  ;;  %8343 = vmatprep.subr.bf16.mxu0 %v10132_v36  ;;  %v2042_v30 = vld [vmem:[%s11656_s22 + $0xb90] sm:$0xff] }
 0x27d   : > { %8599 = vmatprep.subr.bf16.mxu1 %v10260_v37  ;;  %v2046_v36 = vld [vmem:[%s11656_s22 + $0xbb0] sm:$0xff]  ;;  %v2043_v37 = vld [vmem:[%s11656_s22 + $0xb98] sm:$0xff] }
 0x27e   : > { %v10146_v4 = vcombine.high %v2042_v30, %v2046_v36  ;;  %v10147_v47 = vcombine.low %v2042_v30, %v2046_v36  ;;  %v10275_v48 = vcombine.low %v2043_v37, %v2047_v38 }
 0x27f   : > { %8345 = vmatpush1.bf16.msra.mxu0 %v10133_v41  ;;  %v10274_v41 = vcombine.high %v2043_v37, %v2047_v38  ;;  %v2098_v38 = vld [vmem:[%s11656_s22 + $0xd50] sm:$0xff] }
 0x280   : > { %8601 = vmatpush1.bf16.msra.mxu1 %v10261_v43  ;;  %8347 = vmatprep.subr.bf16.mxu0 %v10134_v1  ;;  %v2050_v43 = vld [vmem:[%s11656_s22 + $0xbd0] sm:$0xff] }
 0x281   : > { %8603 = vmatprep.subr.bf16.mxu1 %v10262_v45  ;;  %v2054_v1 = vld [vmem:[%s11656_s22 + $0xbf0] sm:$0xff]  ;;  %v2051_v45 = vld [vmem:[%s11656_s22 + $0xbd8] sm:$0xff] }
 0x282   : > { %v10148_v49 = vcombine.high %v2050_v43, %v2054_v1  ;;  %v10149_v59 = vcombine.low %v2050_v43, %v2054_v1  ;;  %v10277_v50 = vcombine.low %v2051_v45, %v2055_v46 }
 0x283   : > { %8349 = vmatpush1.bf16.msra.mxu0 %v10135_v18  ;;  %v10276_v18 = vcombine.high %v2051_v45, %v2055_v46  ;;  %v2106_v46 = vld [vmem:[%s11656_s22 + $0xd90] sm:$0xff] }
 0x284   : > { %8605 = vmatpush1.bf16.msra.mxu1 %v10263_v55  ;;  %8351 = vmatprep.subr.bf16.mxu0 %v10136_v44  ;;  %v2058_v55 = vld [vmem:[%s11656_s22 + $0xc10] sm:$0xff] }
 0x285   : > { %8607 = vmatprep.subr.bf16.mxu1 %v10264_v57  ;;  %v2062_v44 = vld [vmem:[%s11656_s22 + $0xc30] sm:$0xff]  ;;  %v2059_v57 = vld [vmem:[%s11656_s22 + $0xc18] sm:$0xff] }
 0x286   : > { %v10150_v61 = vcombine.high %v2058_v55, %v2062_v44  ;;  %v10279_v12 = vcombine.low %v2059_v57, %v2063_v58 }
 0x287   : > { %8353 = vmatpush1.bf16.msra.mxu0 %v10137_v62  ;;  %v10278_v62 = vcombine.high %v2059_v57, %v2063_v58 }
 0x288   : > { %8609 = vmatpush1.bf16.msra.mxu1 %v10265_v63  ;;  %8355 = vmatprep.subr.bf16.mxu0 %v10138_v2  ;;  %v2066_v63 = vld [vmem:[%s11656_s22 + $0xc50] sm:$0xff] }
 0x289   : > { %8611 = vmatprep.subr.bf16.mxu1 %v10266_v3  ;;  %v2070_v2 = vld [vmem:[%s11656_s22 + $0xc70] sm:$0xff]  ;;  %v10151_v3 = vcombine.low %v2058_v55, %v2062_v44 }
 0x28a   : > { %v10152_v13 = vcombine.high %v2066_v63, %v2070_v2  ;;  %v10153_v9 = vcombine.low %v2066_v63, %v2070_v2  ;;  %v2115_v63 = vld [vmem:[%s11656_s22 + $0xdd8] sm:$0xff] }
 0x28b   : > { %8357 = vmatpush1.bf16.msra.mxu0 %v10139_v14  ;;  %v2074_v14 = vld [vmem:[%s11656_s22 + $0xc90] sm:$0xff]  ;;  %v2119_v2 = vld [vmem:[%s11656_s22 + $0xdf8] sm:$0xff] }
 0x28c   : > { %8613 = vmatpush1.bf16.msra.mxu1 %v10267_v15  ;;  %8359 = vmatprep.subr.bf16.mxu0 %v10140_v20  ;;  %v2078_v15 = vld [vmem:[%s11656_s22 + $0xcb0] sm:$0xff]  ;;  %v10280_v20 = vcombine.high %v2067_v6, %v2071_v7 }
 0x28d   : > { %8615 = vmatprep.subr.bf16.mxu1 %v10268_v21  ;;  %v2075_v21 = vld [vmem:[%s11656_s22 + $0xc98] sm:$0xff]  ;;  %v10154_v5 = vcombine.high %v2074_v14, %v2078_v15  ;;  %v10155_v53 = vcombine.low %v2074_v14, %v2078_v15  ;;  %v2122_v14 = vld [vmem:[%s11656_s22 + $0xe10] sm:$0xff] }
 0x28e   : > { %v10283_v26 = vcombine.low %v2075_v21, %v2079_v24  ;;  %v2126_v15 = vld [vmem:[%s11656_s22 + $0xe30] sm:$0xff] }
 0x28f   : > { %8361 = vmatpush1.bf16.msra.mxu0 %v10141_v11  ;;  %v10282_v11 = vcombine.high %v2075_v21, %v2079_v24  ;;  %v2127_v21 = vld [vmem:[%s11656_s22 + $0xe38] sm:$0xff] }
 0x290   : > { %8617 = vmatpush1.bf16.msra.mxu1 %v10269_v16  ;;  %8363 = vmatprep.subr.bf16.mxu0 %v10142_v19  ;;  %v2082_v16 = vld [vmem:[%s11656_s22 + $0xcd0] sm:$0xff] }
 0x291   : > { %8619 = vmatprep.subr.bf16.mxu1 %v10270_v17  ;;  %v2086_v19 = vld [vmem:[%s11656_s22 + $0xcf0] sm:$0xff]  ;;  %v2083_v17 = vld [vmem:[%s11656_s22 + $0xcd8] sm:$0xff] }
 0x292   : > { %v10156_v27 = vcombine.high %v2082_v16, %v2086_v19 }
 0x293   : > { %8365 = vmatpush1.bf16.msra.mxu0 %v10143_v29  ;;  %v2094_v29 = vld [vmem:[%s11656_s22 + $0xd30] sm:$0xff] }
 0x294   : > { %8621 = vmatpush1.bf16.msra.mxu1 %v10271_v23  ;;  %8367 = vmatprep.subr.bf16.mxu0 %v10144_v34  ;;  %v2091_v23 = vld [vmem:[%s11656_s22 + $0xd18] sm:$0xff]  ;;  %v10158_v36 = vcombine.high %v2090_v28, %v2094_v29 }
 0x295   : > { %8623 = vmatprep.subr.bf16.mxu1 %v10272_v35  ;;  %v2095_v34 = vld [vmem:[%s11656_s22 + $0xd38] sm:$0xff]  ;;  %v10157_v35 = vcombine.low %v2082_v16, %v2086_v19  ;;  %v2134_v16 = vld [vmem:[%s11656_s22 + $0xe70] sm:$0xff] }
 0x296   : > { %v10286_v37 = vcombine.high %v2091_v23, %v2095_v34  ;;  %v10287_v43 = vcombine.low %v2091_v23, %v2095_v34  ;;  %v2131_v19 = vld [vmem:[%s11656_s22 + $0xe58] sm:$0xff] }
 0x297   : > { %8369 = vmatpush1.bf16.msra.mxu0 %v10145_v39  ;;  %v2102_v39 = vld [vmem:[%s11656_s22 + $0xd70] sm:$0xff]  ;;  %v2143_v23 = vld [vmem:[%s11656_s22 + $0xeb8] sm:$0xff] }
 0x298   : > { %8625 = vmatpush1.bf16.msra.mxu1 %v10273_v40  ;;  %8371 = vmatprep.subr.bf16.mxu0 %v10146_v4  ;;  %v2099_v40 = vld [vmem:[%s11656_s22 + $0xd58] sm:$0xff]  ;;  %v10160_v1 = vcombine.high %v2098_v38, %v2102_v39 }
 0x299   : > { %8627 = vmatprep.subr.bf16.mxu1 %v10274_v41  ;;  %v2103_v4 = vld [vmem:[%s11656_s22 + $0xd78] sm:$0xff]  ;;  %v10159_v41 = vcombine.low %v2090_v28, %v2094_v29  ;;  %v2142_v28 = vld [vmem:[%s11656_s22 + $0xeb0] sm:$0xff] }
 0x29a   : > { %v10288_v45 = vcombine.high %v2099_v40, %v2103_v4  ;;  %v10289_v55 = vcombine.low %v2099_v40, %v2103_v4  ;;  %v2139_v29 = vld [vmem:[%s11656_s22 + $0xe98] sm:$0xff] }
 0x29b   : > { %8373 = vmatpush1.bf16.msra.mxu0 %v10147_v47  ;;  %v2110_v47 = vld [vmem:[%s11656_s22 + $0xdb0] sm:$0xff]  ;;  %v2151_v40 = vld [vmem:[%s11656_s22 + $0xef8] sm:$0xff] }
 0x29c   : > { %8629 = vmatpush1.bf16.msra.mxu1 %v10275_v48  ;;  %8375 = vmatprep.subr.bf16.mxu0 %v10148_v49  ;;  %v2107_v48 = vld [vmem:[%s11656_s22 + $0xd98] sm:$0xff]  ;;  %v10162_v44 = vcombine.high %v2106_v46, %v2110_v47  ;;  %v10163_v6 = vcombine.low %v2106_v46, %v2110_v47  ;;  %v2158_v46 = vld [vmem:[%s11656_s22 + $0xf30] sm:$0xff] }
 0x29d   : > { %8631 = vmatprep.subr.bf16.mxu1 %v10276_v18  ;;  %v2111_v49 = vld [vmem:[%s11656_s22 + $0xdb8] sm:$0xff]  ;;  %v10161_v18 = vcombine.low %v2098_v38, %v2102_v39  ;;  %v2150_v38 = vld [vmem:[%s11656_s22 + $0xef0] sm:$0xff] }
 0x29e   : > { %v10290_v58 = vcombine.high %v2107_v48, %v2111_v49  ;;  %v10291_v7 = vcombine.low %v2107_v48, %v2111_v49  ;;  %v2147_v39 = vld [vmem:[%s11656_s22 + $0xed8] sm:$0xff] }
 0x29f   : > { %8377 = vmatpush1.bf16.msra.mxu0 %v10149_v59  ;;  %v2114_v59 = vld [vmem:[%s11656_s22 + $0xdd0] sm:$0xff]  ;;  %v2155_v47 = vld [vmem:[%s11656_s22 + $0xf18] sm:$0xff] }
 0x2a0   : > { %8633 = vmatpush1.bf16.msra.mxu1 %v10277_v50  ;;  %8379 = vmatprep.subr.bf16.mxu0 %v10150_v61  ;;  %v2118_v50 = vld [vmem:[%s11656_s22 + $0xdf0] sm:$0xff]  ;;  %v2159_v48 = vld [vmem:[%s11656_s22 + $0xf38] sm:$0xff] }
 0x2a1   : > { %8635 = vmatprep.subr.bf16.mxu1 %v10278_v62  ;;  %v10165_v24 = vcombine.low %v2114_v59, %v2118_v50 }
 0x2a2   : > { %4025 = vmatmul.mubr.f32.vlgmr.msra.gmra.mrb[6].mxu0 %v12007_v31 }
 0x2a3   : > { %4309 = vmatmul.mubr.f32.vlgmr.msra.gmra.mrb[8].mxu1 %v12007_v31  ;;  %8381 = vmatpush1.bf16.msra.mxu0 %v10151_v3  ;;  %v2087_v31 = vld [vmem:[%s11656_s22 + $0xcf8] sm:$0xff] }
 0x2a4   : > { %4095 = vmatprep.mubr.f32.mxu0 %v12009_v32  ;;  %8637 = vmatpush1.bf16.msra.mxu1 %v10279_v12  ;;  %v10285_v30 = vcombine.low %v2083_v17, %v2087_v31  ;;  %v10164_v12 = vcombine.high %v2114_v59, %v2118_v50  ;;  %v2166_v59 = vld [vmem:[%s11656_s22 + $0xf70] sm:$0xff]  ;;  %v2163_v50 = vld [vmem:[%s11656_s22 + $0xf58] sm:$0xff] }
 0x2a5   : > { %4379 = vmatprep.mubr.f32.mxu1 %v12009_v32  ;;  %8383 = vmatprep.subr.bf16.mxu0 %v10152_v13  ;;  %v10284_v32 = vcombine.high %v2083_v17, %v2087_v31  ;;  %v10292_v13 = vcombine.high %v2115_v63, %v2119_v2  ;;  %v2135_v17 = vld [vmem:[%s11656_s22 + $0xe78] sm:$0xff]  ;;  %v10167_v31 = vcombine.low %v2122_v14, %v2126_v15 }
 0x2a6   : > { %8639 = vmatprep.subr.bf16.mxu1 %v10280_v20  ;;  %v2123_v20 = vld [vmem:[%s11656_s22 + $0xe18] sm:$0xff] }
 0x2a7   : > { %8385 = vmatpush1.bf16.msra.mxu0 %v10153_v9  ;;  %v10293_v9 = vcombine.low %v2115_v63, %v2119_v2  ;;  %v2167_v63 = vld [vmem:[%s11656_s22 + $0xf78] sm:$0xff] }
 0x2a8   : > { %8641 = vmatpush1.bf16.msra.mxu1 %v10281_v25  ;;  %8387 = vmatprep.subr.bf16.mxu0 %v10154_v5  ;;  %v10166_v25 = vcombine.high %v2122_v14, %v2126_v15  ;;  %v10294_v5 = vcombine.high %v2123_v20, %v2127_v21  ;;  %v2174_v14 = vld [vmem:[%s11656_s22 + $0xfb0] sm:$0xff]  ;;  %v2171_v15 = vld [vmem:[%s11656_s22 + $0xf98] sm:$0xff] }
 0x2a9   : > { %8643 = vmatprep.subr.bf16.mxu1 %v10282_v11  ;;  %v2130_v11 = vld [vmem:[%s11656_s22 + $0xe50] sm:$0xff] }
 0x2aa   : > { %v10169_v34 = vcombine.low %v2130_v11, %v2134_v16 }
 0x2ab   : > { %8389 = vmatpush1.bf16.msra.mxu0 %v10155_v53  ;;  %v10295_v53 = vcombine.low %v2123_v20, %v2127_v21  ;;  %v2175_v20 = vld [vmem:[%s11656_s22 + $0xfb8] sm:$0xff] }
 0x2ac   : > { %8645 = vmatpush1.bf16.msra.mxu1 %v10283_v26  ;;  %8391 = vmatprep.subr.bf16.mxu0 %v10156_v27  ;;  %v10168_v26 = vcombine.high %v2130_v11, %v2134_v16  ;;  %v10296_v27 = vcombine.high %v2131_v19, %v2135_v17  ;;  %v2182_v11 = vld [vmem:[%s11656_s22 + $0xff0] sm:$0xff]  ;;  %v2179_v16 = vld [vmem:[%s11656_s22 + $0xfd8] sm:$0xff] }
 0x2ad   : > { %8647 = vmatprep.subr.bf16.mxu1 %v10284_v32  ;;  %v2138_v32 = vld [vmem:[%s11656_s22 + $0xe90] sm:$0xff] }
 0x2ae   : > { %v10171_v4 = vcombine.low %v2138_v32, %v2142_v28 }
 0x2af   : > { %8393 = vmatpush1.bf16.msra.mxu0 %v10157_v35  ;;  %v10297_v35 = vcombine.low %v2131_v19, %v2135_v17  ;;  %v2183_v19 = vld [vmem:[%s11656_s22 + $0xff8] sm:$0xff]  ;;  %v12365_v17 = vld [vmem:[%s12358_s30] sm:$0xff] }
 0x2b0   : > { %8649 = vmatpush1.bf16.msra.mxu1 %v10285_v30  ;;  %8395 = vmatprep.subr.bf16.mxu0 %v10158_v36  ;;  %v10170_v30 = vcombine.high %v2138_v32, %v2142_v28  ;;  %v10298_v36 = vcombine.high %v2139_v29, %v2143_v23  ;;  %v3217_v32 = vrot.slane %v12365_v17, %v11807_v54 }
 0x2b1   : > { %8651 = vmatprep.subr.bf16.mxu1 %v10286_v37  ;;  %v2146_v37 = vld [vmem:[%s11656_s22 + $0xed0] sm:$0xff] }
 0x2b2   : > { %v10173_v49 = vcombine.low %v2146_v37, %v2150_v38 }
 0x2b3   : > { %8397 = vmatpush1.bf16.msra.mxu0 %v10159_v41  ;;  %v10299_v41 = vcombine.low %v2139_v29, %v2143_v23  ;;  %v10309_v29 = vcombine.low %v2179_v16, %v2183_v19  ;;  %v10769_v23 = vld [vmem:[%s11639_s28 + $0x4] ss:$16 sps:$4 sm:$0xff]  }
 0x2b4   : > { %8653 = vmatpush1.bf16.msra.mxu1 %v10287_v43  ;;  %8399 = vmatprep.subr.bf16.mxu0 %v10160_v1  ;;  %v10172_v43 = vcombine.high %v2146_v37, %v2150_v38  ;;  %v10300_v1 = vcombine.high %v2147_v39, %v2151_v40  ;;  %v10775_v37 = vld [vmem:[%s11639_s28 + $0x24] ss:$16 sps:$4 sm:$0xff]  }
 0x2b5   : > { %v12314_v57 = vpop.f32.mrb[4].mxu0  ;;  %8655 = vmatprep.subr.bf16.mxu1 %v10288_v45  ;;  %v2154_v45 = vld [vmem:[%s11656_s22 + $0xf10] sm:$0xff] }
 0x2b6   : > { %v12318_v61 = vpop.f32.mrb[6].mxu1  ;;  %v12320_v62 = vpop.f32.mrb[5].mxu0  ;;  %v10175_v2 = vcombine.low %v2154_v45, %v2158_v46 }
 0x2b7   : > { %v12324_v3 = vpop.f32.mrb[7].mxu1  ;;  %8401 = vmatpush1.bf16.msra.mxu0 %v10161_v18  ;;  %v10301_v18 = vcombine.low %v2147_v39, %v2151_v40  ;;  %v10778_v39 = vld [vmem:[%s11639_s28 + $0x2c] ss:$16 sps:$4 sm:$0xff]   ;;  %v10780_v40 = vld [vmem:[%s11639_s28 + $0x28] ss:$16 sps:$4 sm:$0xff]  }
 0x2b8   : > { %8657 = vmatpush1.bf16.msra.mxu1 %v10289_v55  ;;  %8403 = vmatprep.subr.bf16.mxu0 %v10162_v44  ;;  %v10174_v55 = vcombine.high %v2154_v45, %v2158_v46  ;;  %v10302_v44 = vcombine.high %v2155_v47, %v2159_v48  ;;  %v10790_v45 = vld [vmem:[%s11639_s28 + $0x6c] ss:$16 sps:$4 sm:$0xff]   ;;  %v10789_v46 = vld [vmem:[%s11639_s28 + $0x60] ss:$16 sps:$4 sm:$0xff]  }
 0x2b9   : > { %8659 = vmatprep.subr.bf16.mxu1 %v10290_v58  ;;  %v2162_v58 = vld [vmem:[%s11656_s22 + $0xf50] sm:$0xff] }
 0x2ba   : > { %v10177_v21 = vcombine.low %v2162_v58, %v2166_v59 }
 0x2bb   : > { %8405 = vmatpush1.bf16.msra.mxu0 %v10163_v6  ;;  %v10303_v6 = vcombine.low %v2155_v47, %v2159_v48  ;;  %v10792_v47 = vld [vmem:[%s11639_s28 + $0x68] ss:$16 sps:$4 sm:$0xff]   ;;  %v10793_v48 = vld [vmem:[%s11639_s28 + $0x84] ss:$16 sps:$4 sm:$0xff]  }
 0x2bc   : > { %8661 = vmatpush1.bf16.msra.mxu1 %v10291_v7  ;;  %8407 = vmatprep.subr.bf16.mxu0 %v10164_v12  ;;  %v10176_v7 = vcombine.high %v2162_v58, %v2166_v59  ;;  %v10304_v12 = vcombine.high %v2163_v50, %v2167_v63  ;;  %v10802_v58 = vld [vmem:[%s11639_s28 + $0xac] ss:$16 sps:$4 sm:$0xff]   ;;  %v10801_v59 = vld [vmem:[%s11639_s28 + $0xa0] ss:$16 sps:$4 sm:$0xff]  }
 0x2bd   : > { %8663 = vmatprep.subr.bf16.mxu1 %v10292_v13  ;;  %v2170_v13 = vld [vmem:[%s11656_s22 + $0xf90] sm:$0xff] }
 0x2bf   : > { %8409 = vmatpush1.bf16.msra.mxu0 %v10165_v24  ;;  %v10305_v24 = vcombine.low %v2163_v50, %v2167_v63  ;;  %v10804_v50 = vld [vmem:[%s11639_s28 + $0xa8] ss:$16 sps:$4 sm:$0xff]   ;;  %v10805_v63 = vld [vmem:[%s11639_s28 + $0xc4] ss:$16 sps:$4 sm:$0xff]  }
 0x2c0   : > { %8665 = vmatpush1.bf16.msra.mxu1 %v10293_v9  ;;  %8411 = vmatprep.subr.bf16.mxu0 %v10166_v25  ;;  %v10178_v9 = vcombine.high %v2170_v13, %v2174_v14  ;;  %v10306_v25 = vcombine.high %v2171_v15, %v2175_v20 }
 0x2c1   : > { %8667 = vmatprep.subr.bf16.mxu1 %v10294_v5  ;;  %v2178_v5 = vld [vmem:[%s11656_s22 + $0xfd0] sm:$0xff] }
 0x2c2   : > { %v10181_v28 = vcombine.low %v2178_v5, %v2182_v11 }
 0x2c3   : > { %8413 = vmatpush1.bf16.msra.mxu0 %v10167_v31  ;;  %v10179_v31 = vcombine.low %v2170_v13, %v2174_v14  ;;  %v10814_v13 = vld [vmem:[%s11639_s28 + $0xec] ss:$16 sps:$4 sm:$0xff]   ;;  %v10813_v14 = vld [vmem:[%s11639_s28 + $0xe0] ss:$16 sps:$4 sm:$0xff]  }
 0x2c4   : > { %8669 = vmatpush1.bf16.msra.mxu1 %v10295_v53  ;;  %8415 = vmatprep.subr.bf16.mxu0 %v10168_v26  ;;  %v10307_v53 = vcombine.low %v2171_v15, %v2175_v20  ;;  %v10180_v26 = vcombine.high %v2178_v5, %v2182_v11  ;;  %v10816_v15 = vld [vmem:[%s11639_s28 + $0xe8] ss:$16 sps:$4 sm:$0xff]   ;;  %v10817_v20 = vld [vmem:[%s11639_s28 + $0x104] ss:$16 sps:$4 sm:$0xff]   ;;  %v10826_v5 = vld [vmem:[%s11639_s28 + $0x12c] ss:$16 sps:$4 sm:$0xff]  }
 0x2c5   : > { %8671 = vmatprep.subr.bf16.mxu1 %v10296_v27  ;;  %v10308_v27 = vcombine.high %v2179_v16, %v2183_v19  ;;  %v10825_v11 = vld [vmem:[%s11639_s28 + $0x120] ss:$16 sps:$4 sm:$0xff]   ;;  %v10828_v16 = vld [vmem:[%s11639_s28 + $0x128] ss:$16 sps:$4 sm:$0xff]   ;;  %v10829_v19 = vld [vmem:[%s11639_s28 + $0x144] ss:$16 sps:$4 sm:$0xff]  }
 0x2c7   : > { %8417 = vmatpush1.bf16.msra.mxu0 %v10169_v34  ;;  %v10772_v34 = vld [vmem:[%s11639_s28 + $0xc] ss:$16 sps:$4 sm:$0xff]  }
 0x2c8   : > { %8673 = vmatpush1.bf16.msra.mxu1 %v10297_v35  ;;  %8419 = vmatprep.subr.bf16.mxu0 %v10170_v30  ;;  %v9653_v35 = vadd.f32 %v12320_v62, %v3217_v32  ;;  %v10771_v30 = vld [vmem:[%s11639_s28] ss:$16 sps:$4 sm:$0xff]   ;;  %v10838_v32 = vld [vmem:[%s11639_s28 + $0x16c] ss:$16 sps:$4 sm:$0xff]  }
 0x2c9   : > { %8675 = vmatprep.subr.bf16.mxu1 %v10298_v36  ;;  %v10774_v36 = vld [vmem:[%s11639_s28 + $0x8] ss:$16 sps:$4 sm:$0xff]   ;;  %v10777_v62 = vld [vmem:[%s11639_s28 + $0x20] ss:$16 sps:$4 sm:$0xff]  }
 0x2ca   : > { %v4387_v38 = vmax.f32 %v9653_v35, 0.0  ;;  %v10843_v35 = vld [vmem:[%s11639_s28 + $0x180] ss:$16 sps:$4 sm:$0xff]  }
 0x2cb   : > { %8421 = vmatpush1.bf16.msra.mxu0 %v10171_v4  ;;  %v10781_v4 = vld [vmem:[%s11639_s28 + $0x44] ss:$16 sps:$4 sm:$0xff]  }
 0x2cc   : > { %8677 = vmatpush1.bf16.msra.mxu1 %v10299_v41  ;;  %8423 = vmatprep.subr.bf16.mxu0 %v10172_v43  ;;  %v10784_v41 = vld [vmem:[%s11639_s28 + $0x4c] ss:$16 sps:$4 sm:$0xff]   ;;  %v10783_v43 = vld [vmem:[%s11639_s28 + $0x40] ss:$16 sps:$4 sm:$0xff]  }
 0x2cd   : > { %8679 = vmatprep.subr.bf16.mxu1 %v10300_v1  ;;  %v10787_v1 = vld [vmem:[%s11639_s28 + $0x64] ss:$16 sps:$4 sm:$0xff]  }
 0x2cf   : > { %8425 = vmatpush1.bf16.msra.mxu0 %v10173_v49  ;;  %v10796_v49 = vld [vmem:[%s11639_s28 + $0x8c] ss:$16 sps:$4 sm:$0xff]  }
 0x2d0   : > { %8681 = vmatpush1.bf16.msra.mxu1 %v10301_v18  ;;  %8427 = vmatprep.subr.bf16.mxu0 %v10174_v55  ;;  %v10795_v18 = vld [vmem:[%s11639_s28 + $0x80] ss:$16 sps:$4 sm:$0xff]   ;;  %v10798_v55 = vld [vmem:[%s11639_s28 + $0x88] ss:$16 sps:$4 sm:$0xff]  }
 0x2d1   : > { %8683 = vmatprep.subr.bf16.mxu1 %v10302_v44  ;;  %v10799_v44 = vld [vmem:[%s11639_s28 + $0xa4] ss:$16 sps:$4 sm:$0xff]  }
 0x2d3   : > { %8429 = vmatpush1.bf16.msra.mxu0 %v10175_v2  ;;  %v10808_v2 = vld [vmem:[%s11639_s28 + $0xcc] ss:$16 sps:$4 sm:$0xff]  }
 0x2d4   : > { %8685 = vmatpush1.bf16.msra.mxu1 %v10303_v6  ;;  %8431 = vmatprep.subr.bf16.mxu0 %v10176_v7  ;;  %v10807_v6 = vld [vmem:[%s11639_s28 + $0xc0] ss:$16 sps:$4 sm:$0xff]   ;;  %v10810_v7 = vld [vmem:[%s11639_s28 + $0xc8] ss:$16 sps:$4 sm:$0xff]  }
 0x2d5   : > { %8687 = vmatprep.subr.bf16.mxu1 %v10304_v12  ;;  %v10811_v12 = vld [vmem:[%s11639_s28 + $0xe4] ss:$16 sps:$4 sm:$0xff]  }
 0x2d7   : > { %8433 = vmatpush1.bf16.msra.mxu0 %v10177_v21  ;;  %v10820_v21 = vld [vmem:[%s11639_s28 + $0x10c] ss:$16 sps:$4 sm:$0xff]  }
 0x2d8   : > { %8689 = vmatpush1.bf16.msra.mxu1 %v10305_v24  ;;  %8435 = vmatprep.subr.bf16.mxu0 %v10178_v9  ;;  %v10819_v24 = vld [vmem:[%s11639_s28 + $0x100] ss:$16 sps:$4 sm:$0xff]   ;;  %v10822_v9 = vld [vmem:[%s11639_s28 + $0x108] ss:$16 sps:$4 sm:$0xff]  }
 0x2d9   : > { %8691 = vmatprep.subr.bf16.mxu1 %v10306_v25  ;;  %v10823_v25 = vld [vmem:[%s11639_s28 + $0x124] ss:$16 sps:$4 sm:$0xff]  }
 0x2db   : > { %8437 = vmatpush1.bf16.msra.mxu0 %v10179_v31  ;;  %v10832_v31 = vld [vmem:[%s11639_s28 + $0x14c] ss:$16 sps:$4 sm:$0xff]  }
 0x2dc   : > { %8693 = vmatpush1.bf16.msra.mxu1 %v10307_v53  ;;  %8439 = vmatprep.subr.bf16.mxu0 %v10180_v26  ;;  %v10831_v53 = vld [vmem:[%s11639_s28 + $0x140] ss:$16 sps:$4 sm:$0xff]   ;;  %v10834_v26 = vld [vmem:[%s11639_s28 + $0x148] ss:$16 sps:$4 sm:$0xff]  }
 0x2dd   : > { %8695 = vmatprep.subr.bf16.mxu1 %v10308_v27  ;;  %v10835_v27 = vld [vmem:[%s11639_s28 + $0x164] ss:$16 sps:$4 sm:$0xff]  }
 0x2df   : > { %8441 = vmatpush1.bf16.msra.mxu0 %v10181_v28  ;;  %v10837_v28 = vld [vmem:[%s11639_s28 + $0x160] ss:$16 sps:$4 sm:$0xff]  }
 0x2e0   : > { %8697 = vmatpush1.bf16.msra.mxu1 %v10309_v29  ;;  %8699 = vmatprep.subr.bf16.mxu0 %v10769_v23  ;;  %v10840_v29 = vld [vmem:[%s11639_s28 + $0x168] ss:$16 sps:$4 sm:$0xff]   ;;  %v10841_v23 = vld [vmem:[%s11639_s28 + $0x184] ss:$16 sps:$4 sm:$0xff]  }
 0x2e1   : > { %8955 = vmatprep.subr.bf16.mxu1 %v10772_v34  ;;  %v10844_v34 = vld [vmem:[%s11639_s28 + $0x18c] ss:$16 sps:$4 sm:$0xff]  }
 0x2e2   : > { %4096 = vmatmul.mubr.f32.vlgmr.msra.gmra.mrb[6].mxu0 %v12084_v10 }
 0x2e3   : > { %4380 = vmatmul.mubr.f32.vlgmr.msra.gmra.mrb[8].mxu1 %v12084_v10  ;;  %8701 = vmatpush1.bf16.msra.mxu0 %v10771_v30  ;;  %v10786_v10 = vld [vmem:[%s11639_s28 + $0x48] ss:$16 sps:$4 sm:$0xff]  }
 0x2e4   : > { %5248 = vmatprep.mubr.f32.mxu0 %v4387_v38  ;;  %8957 = vmatpush1.bf16.msra.mxu1 %v10774_v36  ;;  %v10846_v30 = vld [vmem:[%s11639_s28 + $0x188] ss:$16 sps:$4 sm:$0xff]   ;;  %v10847_v36 = vld [vmem:[%s11639_s28 + $0x1a4] ss:$16 sps:$4 sm:$0xff]  }
 0x2e5   : > { %5532 = vmatprep.mubr.f32.mxu1 %v4387_v38  ;;  %8703 = vmatprep.subr.bf16.mxu0 %v10775_v37  ;;  %v10850_v37 = vld [vmem:[%s11639_s28 + $0x1ac] ss:$16 sps:$4 sm:$0xff]   ;;  %v10849_v38 = vld [vmem:[%s11639_s28 + $0x1a0] ss:$16 sps:$4 sm:$0xff]  }
 0x2e6   : > { %8959 = vmatprep.subr.bf16.mxu1 %v10778_v39  ;;  %v10852_v39 = vld [vmem:[%s11639_s28 + $0x1a8] ss:$16 sps:$4 sm:$0xff]  }
 0x2e7   : > { %8705 = vmatpush1.bf16.msra.mxu0 %v10777_v62  ;;  %v10853_v62 = vld [vmem:[%s11639_s28 + $0x1c4] ss:$16 sps:$4 sm:$0xff]  }
 0x2e8   : > { %8961 = vmatpush1.bf16.msra.mxu1 %v10780_v40  ;;  %8707 = vmatprep.subr.bf16.mxu0 %v10781_v4  ;;  %v10856_v40 = vld [vmem:[%s11639_s28 + $0x1cc] ss:$16 sps:$4 sm:$0xff]   ;;  %v10855_v4 = vld [vmem:[%s11639_s28 + $0x1c0] ss:$16 sps:$4 sm:$0xff]  }
 0x2e9   : > { %8963 = vmatprep.subr.bf16.mxu1 %v10784_v41  ;;  %v3213_v41 = vrot.slane %v12365_v17, %v11801_v52 }
 0x2eb   : > { %8709 = vmatpush1.bf16.msra.mxu0 %v10783_v43  ;;  %v10858_v43 = vld [vmem:[%s11639_s28 + $0x1c8] ss:$16 sps:$4 sm:$0xff]  }
 0x2ec   : > { %8965 = vmatpush1.bf16.msra.mxu1 %v10786_v10  ;;  %8711 = vmatprep.subr.bf16.mxu0 %v10787_v1  ;;  %v10859_v10 = vld [vmem:[%s11639_s28 + $0x1e4] ss:$16 sps:$4 sm:$0xff]   ;;  %v10862_v1 = vld [vmem:[%s11639_s28 + $0x1ec] ss:$16 sps:$4 sm:$0xff]  }
 0x2ed   : > { %8967 = vmatprep.subr.bf16.mxu1 %v10790_v45  ;;  %v3225_v45 = vrot.slane %v12365_v17, %v11856_v33 }
 0x2ef   : > { %8713 = vmatpush1.bf16.msra.mxu0 %v10789_v46  ;;  %v10861_v46 = vld [vmem:[%s11639_s28 + $0x1e0] ss:$16 sps:$4 sm:$0xff]  }
 0x2f0   : > { %8969 = vmatpush1.bf16.msra.mxu1 %v10792_v47  ;;  %8715 = vmatprep.subr.bf16.mxu0 %v10793_v48  ;;  %v9652_v47 = vadd.f32 %v12314_v57, %v3213_v41  ;;  %v10864_v48 = vld [vmem:[%s11639_s28 + $0x1e8] ss:$16 sps:$4 sm:$0xff]   ;;  %v10871_v57 = vld [vmem:[%s11639_s28 + $0x224] ss:$16 sps:$4 sm:$0xff]   ;;  %v10928_v41 = vld [vmem:[%s11639_s28 + $0x34c] ss:$16 sps:$4 sm:$0xff]  }
 0x2f1   : > { %8971 = vmatprep.subr.bf16.mxu1 %v10796_v49  ;;  %v10865_v49 = vld [vmem:[%s11639_s28 + $0x204] ss:$16 sps:$4 sm:$0xff]  }
 0x2f3   : > { %8717 = vmatpush1.bf16.msra.mxu0 %v10795_v18  ;;  %v10868_v18 = vld [vmem:[%s11639_s28 + $0x20c] ss:$16 sps:$4 sm:$0xff]  }
 0x2f4   : > { %8973 = vmatpush1.bf16.msra.mxu1 %v10798_v55  ;;  %8719 = vmatprep.subr.bf16.mxu0 %v10799_v44  ;;  %v9655_v55 = vadd.f32 %v12324_v3, %v3225_v45  ;;  %v10867_v44 = vld [vmem:[%s11639_s28 + $0x200] ss:$16 sps:$4 sm:$0xff]   ;;  %v10934_v45 = vld [vmem:[%s11639_s28 + $0x36c] ss:$16 sps:$4 sm:$0xff]  }
 0x2f5   : > { %8975 = vmatprep.subr.bf16.mxu1 %v10802_v58  ;;  %v4386_v58 = vmax.f32 %v9652_v47, 0.0  ;;  %v10873_v3 = vld [vmem:[%s11639_s28 + $0x220] ss:$16 sps:$4 sm:$0xff]   ;;  %v10936_v47 = vld [vmem:[%s11639_s28 + $0x368] ss:$16 sps:$4 sm:$0xff]  }
 0x2f7   : > { %8721 = vmatpush1.bf16.msra.mxu0 %v10801_v59  ;;  %v10870_v59 = vld [vmem:[%s11639_s28 + $0x208] ss:$16 sps:$4 sm:$0xff]  }
 0x2f8   : > { %8977 = vmatpush1.bf16.msra.mxu1 %v10804_v50  ;;  %8723 = vmatprep.subr.bf16.mxu0 %v10805_v63  ;;  %v4389_v50 = vmax.f32 %v9655_v55, 0.0  ;;  %v10874_v63 = vld [vmem:[%s11639_s28 + $0x22c] ss:$16 sps:$4 sm:$0xff]   ;;  %v10942_v55 = vld [vmem:[%s11639_s28 + $0x388] ss:$16 sps:$4 sm:$0xff]  }
 0x2f9   : > { %8979 = vmatprep.subr.bf16.mxu1 %v10808_v2  ;;  %v10876_v2 = vld [vmem:[%s11639_s28 + $0x228] ss:$16 sps:$4 sm:$0xff]  }
 0x2fb   : > { %8725 = vmatpush1.bf16.msra.mxu0 %v10807_v6  ;;  %v10877_v6 = vld [vmem:[%s11639_s28 + $0x244] ss:$16 sps:$4 sm:$0xff]  }
 0x2fc   : > { %8981 = vmatpush1.bf16.msra.mxu1 %v10810_v7  ;;  %8727 = vmatprep.subr.bf16.mxu0 %v10811_v12  ;;  %v10880_v7 = vld [vmem:[%s11639_s28 + $0x24c] ss:$16 sps:$4 sm:$0xff]   ;;  %v10879_v12 = vld [vmem:[%s11639_s28 + $0x240] ss:$16 sps:$4 sm:$0xff]  }
 0x2fd   : > { %8983 = vmatprep.subr.bf16.mxu1 %v10814_v13  ;;  %v10882_v13 = vld [vmem:[%s11639_s28 + $0x248] ss:$16 sps:$4 sm:$0xff]  }
 0x2ff   : > { %8729 = vmatpush1.bf16.msra.mxu0 %v10813_v14  ;;  %v10883_v14 = vld [vmem:[%s11639_s28 + $0x264] ss:$16 sps:$4 sm:$0xff]  }
 0x300   : > { %8985 = vmatpush1.bf16.msra.mxu1 %v10816_v15  ;;  %8731 = vmatprep.subr.bf16.mxu0 %v10817_v20  ;;  %v10886_v15 = vld [vmem:[%s11639_s28 + $0x26c] ss:$16 sps:$4 sm:$0xff]   ;;  %v10885_v20 = vld [vmem:[%s11639_s28 + $0x260] ss:$16 sps:$4 sm:$0xff]  }
 0x301   : > { %8987 = vmatprep.subr.bf16.mxu1 %v10820_v21  ;;  %v10888_v21 = vld [vmem:[%s11639_s28 + $0x268] ss:$16 sps:$4 sm:$0xff]  }
 0x303   : > { %8733 = vmatpush1.bf16.msra.mxu0 %v10819_v24  ;;  %v10889_v24 = vld [vmem:[%s11639_s28 + $0x284] ss:$16 sps:$4 sm:$0xff]  }
 0x304   : > { %8989 = vmatpush1.bf16.msra.mxu1 %v10822_v9  ;;  %8735 = vmatprep.subr.bf16.mxu0 %v10823_v25  ;;  %v10892_v9 = vld [vmem:[%s11639_s28 + $0x28c] ss:$16 sps:$4 sm:$0xff]   ;;  %v10891_v25 = vld [vmem:[%s11639_s28 + $0x280] ss:$16 sps:$4 sm:$0xff]  }
 0x305   : > { %8991 = vmatprep.subr.bf16.mxu1 %v10826_v5  ;;  %v10894_v5 = vld [vmem:[%s11639_s28 + $0x288] ss:$16 sps:$4 sm:$0xff]  }
 0x307   : > { %8737 = vmatpush1.bf16.msra.mxu0 %v10825_v11  ;;  %v10895_v11 = vld [vmem:[%s11639_s28 + $0x2a4] ss:$16 sps:$4 sm:$0xff]  }
 0x308   : > { %8993 = vmatpush1.bf16.msra.mxu1 %v10828_v16  ;;  %8739 = vmatprep.subr.bf16.mxu0 %v10829_v19  ;;  %v10898_v16 = vld [vmem:[%s11639_s28 + $0x2ac] ss:$16 sps:$4 sm:$0xff]   ;;  %v10897_v19 = vld [vmem:[%s11639_s28 + $0x2a0] ss:$16 sps:$4 sm:$0xff]  }
 0x309   : > { %8995 = vmatprep.subr.bf16.mxu1 %v10832_v31  ;;  %v10900_v31 = vld [vmem:[%s11639_s28 + $0x2a8] ss:$16 sps:$4 sm:$0xff]  }
 0x30b   : > { %8741 = vmatpush1.bf16.msra.mxu0 %v10831_v53  ;;  %v10901_v53 = vld [vmem:[%s11639_s28 + $0x2c4] ss:$16 sps:$4 sm:$0xff]  }
 0x30c   : > { %8997 = vmatpush1.bf16.msra.mxu1 %v10834_v26  ;;  %8743 = vmatprep.subr.bf16.mxu0 %v10835_v27  ;;  %v10904_v26 = vld [vmem:[%s11639_s28 + $0x2cc] ss:$16 sps:$4 sm:$0xff]   ;;  %v10903_v27 = vld [vmem:[%s11639_s28 + $0x2c0] ss:$16 sps:$4 sm:$0xff]  }
 0x30d   : > { %8999 = vmatprep.subr.bf16.mxu1 %v10838_v32  ;;  %v10906_v32 = vld [vmem:[%s11639_s28 + $0x2c8] ss:$16 sps:$4 sm:$0xff]  }
 0x30f   : > { %8745 = vmatpush1.bf16.msra.mxu0 %v10837_v28  ;;  %v10907_v28 = vld [vmem:[%s11639_s28 + $0x2e4] ss:$16 sps:$4 sm:$0xff]  }
 0x310   : > { %9001 = vmatpush1.bf16.msra.mxu1 %v10840_v29  ;;  %8747 = vmatprep.subr.bf16.mxu0 %v10841_v23  ;;  %v10910_v29 = vld [vmem:[%s11639_s28 + $0x2ec] ss:$16 sps:$4 sm:$0xff]   ;;  %v10909_v23 = vld [vmem:[%s11639_s28 + $0x2e0] ss:$16 sps:$4 sm:$0xff]  }
 0x311   : > { %9003 = vmatprep.subr.bf16.mxu1 %v10844_v34  ;;  %v10912_v34 = vld [vmem:[%s11639_s28 + $0x2e8] ss:$16 sps:$4 sm:$0xff]  }
 0x313   : > { %8749 = vmatpush1.bf16.msra.mxu0 %v10843_v35  ;;  %v10913_v35 = vld [vmem:[%s11639_s28 + $0x304] ss:$16 sps:$4 sm:$0xff]  }
 0x314   : > { %9005 = vmatpush1.bf16.msra.mxu1 %v10846_v30  ;;  %8751 = vmatprep.subr.bf16.mxu0 %v10847_v36  ;;  %v10916_v30 = vld [vmem:[%s11639_s28 + $0x30c] ss:$16 sps:$4 sm:$0xff]   ;;  %v10915_v36 = vld [vmem:[%s11639_s28 + $0x300] ss:$16 sps:$4 sm:$0xff]  }
 0x315   : > { %9007 = vmatprep.subr.bf16.mxu1 %v10850_v37  ;;  %v10918_v37 = vld [vmem:[%s11639_s28 + $0x308] ss:$16 sps:$4 sm:$0xff]  }
 0x317   : > { %8753 = vmatpush1.bf16.msra.mxu0 %v10849_v38  ;;  %v10919_v38 = vld [vmem:[%s11639_s28 + $0x324] ss:$16 sps:$4 sm:$0xff]  }
 0x318   : > { %9009 = vmatpush1.bf16.msra.mxu1 %v10852_v39  ;;  %8755 = vmatprep.subr.bf16.mxu0 %v10853_v62  ;;  %v10922_v39 = vld [vmem:[%s11639_s28 + $0x32c] ss:$16 sps:$4 sm:$0xff]   ;;  %v10921_v62 = vld [vmem:[%s11639_s28 + $0x320] ss:$16 sps:$4 sm:$0xff]  }
 0x319   : > { %9011 = vmatprep.subr.bf16.mxu1 %v10856_v40  ;;  %v10924_v40 = vld [vmem:[%s11639_s28 + $0x328] ss:$16 sps:$4 sm:$0xff]  }
 0x31b   : > { %8757 = vmatpush1.bf16.msra.mxu0 %v10855_v4  ;;  %v10925_v4 = vld [vmem:[%s11639_s28 + $0x344] ss:$16 sps:$4 sm:$0xff]  }
 0x31c   : > { %9013 = vmatpush1.bf16.msra.mxu1 %v10858_v43  ;;  %8759 = vmatprep.subr.bf16.mxu0 %v10859_v10  ;;  %v10927_v43 = vld [vmem:[%s11639_s28 + $0x340] ss:$16 sps:$4 sm:$0xff]   ;;  %v10930_v10 = vld [vmem:[%s11639_s28 + $0x348] ss:$16 sps:$4 sm:$0xff]  }
 0x31d   : > { %9015 = vmatprep.subr.bf16.mxu1 %v10862_v1  ;;  %v10931_v1 = vld [vmem:[%s11639_s28 + $0x364] ss:$16 sps:$4 sm:$0xff]  }
 0x31f   : > { %8761 = vmatpush1.bf16.msra.mxu0 %v10861_v46  ;;  %v10933_v46 = vld [vmem:[%s11639_s28 + $0x360] ss:$16 sps:$4 sm:$0xff]  }
 0x320   : > { %9017 = vmatpush1.bf16.msra.mxu1 %v10864_v48  ;;  %8763 = vmatprep.subr.bf16.mxu0 %v10865_v49  ;;  %v10937_v48 = vld [vmem:[%s11639_s28 + $0x384] ss:$16 sps:$4 sm:$0xff]   ;;  %v10940_v49 = vld [vmem:[%s11639_s28 + $0x38c] ss:$16 sps:$4 sm:$0xff]  }
 0x321   : > { %9019 = vmatprep.subr.bf16.mxu1 %v10868_v18  ;;  %v10939_v18 = vld [vmem:[%s11639_s28 + $0x380] ss:$16 sps:$4 sm:$0xff]  }
 0x322   : > { %5249 = vmatmul.mubr.f32.vlgmr.msra.gmra.mrb[8].mxu0 %v4386_v58 }
 0x323   : > { %5533 = vmatmul.mubr.f32.vlgmr.msra.gmra.mrb[10].mxu1 %v4386_v58  ;;  %8765 = vmatpush1.bf16.msra.mxu0 %v10867_v44  ;;  %v10943_v44 = vld [vmem:[%s11639_s28 + $0x3a4] ss:$16 sps:$4 sm:$0xff]   ;;  %v10946_v58 = vld [vmem:[%s11639_s28 + $0x3ac] ss:$16 sps:$4 sm:$0xff]  }
 0x324   : > { %5319 = vmatprep.mubr.f32.mxu0 %v4389_v50  ;;  %9021 = vmatpush1.bf16.msra.mxu1 %v10870_v59  ;;  %v10945_v59 = vld [vmem:[%s11639_s28 + $0x3a0] ss:$16 sps:$4 sm:$0xff]  }
 0x325   : > { %5603 = vmatprep.mubr.f32.mxu1 %v4389_v50  ;;  %8767 = vmatprep.subr.bf16.mxu0 %v10871_v57  ;;  %v10948_v57 = vld [vmem:[%s11639_s28 + $0x3a8] ss:$16 sps:$4 sm:$0xff]   ;;  %v10949_v50 = vld [vmem:[%s11639_s28 + $0x3c4] ss:$16 sps:$4 sm:$0xff]  }
 0x326   : > { %9023 = vmatprep.subr.bf16.mxu1 %v10874_v63  ;;  %v10952_v63 = vld [vmem:[%s11639_s28 + $0x3cc] ss:$16 sps:$4 sm:$0xff]  }
 0x327   : > { %8769 = vmatpush1.bf16.msra.mxu0 %v10873_v3  ;;  %v10951_v3 = vld [vmem:[%s11639_s28 + $0x3c0] ss:$16 sps:$4 sm:$0xff]  }
 0x328   : > { %9025 = vmatpush1.bf16.msra.mxu1 %v10876_v2  ;;  %8771 = vmatprep.subr.bf16.mxu0 %v10877_v6  ;;  %v3221_v2 = vrot.slane %v12365_v17, %v11899_v8  ;;  %v10954_v6 = vld [vmem:[%s11639_s28 + $0x3c8] ss:$16 sps:$4 sm:$0xff]  }
 0x329   : > { %9027 = vmatprep.subr.bf16.mxu1 %v10880_v7  ;;  %v10955_v7 = vld [vmem:[%s11639_s28 + $0x3e4] ss:$16 sps:$4 sm:$0xff]  }
 0x32b   : > { %8773 = vmatpush1.bf16.msra.mxu0 %v10879_v12  ;;  %v10958_v12 = vld [vmem:[%s11639_s28 + $0x3ec] ss:$16 sps:$4 sm:$0xff]  }
 0x32c   : > { %9029 = vmatpush1.bf16.msra.mxu1 %v10882_v13  ;;  %8775 = vmatprep.subr.bf16.mxu0 %v10883_v14  ;;  %v10957_v13 = vld [vmem:[%s11639_s28 + $0x3e0] ss:$16 sps:$4 sm:$0xff]   ;;  %v9654_v14 = vadd.f32 %v12318_v61, %v3221_v2  ;;  %v10970_v61 = vld [vmem:[%s11639_s28 + $0x42c] ss:$16 sps:$4 sm:$0xff]  }
 0x32d   : > { %9031 = vmatprep.subr.bf16.mxu1 %v10886_v15  ;;  %v10960_v15 = vld [vmem:[%s11639_s28 + $0x3e8] ss:$16 sps:$4 sm:$0xff]   ;;  %v11030_v2 = vld [vmem:[%s11639_s28 + $0x56c] ss:$16 sps:$4 sm:$0xff]  }
 0x32f   : > { %8777 = vmatpush1.bf16.msra.mxu0 %v10885_v20  ;;  %v10961_v20 = vld [vmem:[%s11639_s28 + $0x404] ss:$16 sps:$4 sm:$0xff]  }
 0x330   : > { %9033 = vmatpush1.bf16.msra.mxu1 %v10888_v21  ;;  %8779 = vmatprep.subr.bf16.mxu0 %v10889_v24  ;;  %v10964_v21 = vld [vmem:[%s11639_s28 + $0x40c] ss:$16 sps:$4 sm:$0xff]   ;;  %v10963_v24 = vld [vmem:[%s11639_s28 + $0x400] ss:$16 sps:$4 sm:$0xff]  }
 0x331   : > { %9035 = vmatprep.subr.bf16.mxu1 %v10892_v9  ;;  %v4388_v9 = vmax.f32 %v9654_v14, 0.0  ;;  %v11035_v14 = vld [vmem:[%s11639_s28 + $0x580] ss:$16 sps:$4 sm:$0xff]  }
 0x333   : > { %8781 = vmatpush1.bf16.msra.mxu0 %v10891_v25  ;;  %v10966_v25 = vld [vmem:[%s11639_s28 + $0x408] ss:$16 sps:$4 sm:$0xff]  }
 0x334   : > { %9037 = vmatpush1.bf16.msra.mxu1 %v10894_v5  ;;  %8783 = vmatprep.subr.bf16.mxu0 %v10895_v11  ;;  %v10967_v5 = vld [vmem:[%s11639_s28 + $0x424] ss:$16 sps:$4 sm:$0xff]   ;;  %v10969_v11 = vld [vmem:[%s11639_s28 + $0x420] ss:$16 sps:$4 sm:$0xff]  }
 0x335   : > { %9039 = vmatprep.subr.bf16.mxu1 %v10898_v16  ;;  %v10972_v16 = vld [vmem:[%s11639_s28 + $0x428] ss:$16 sps:$4 sm:$0xff]  }
 0x337   : > { %8785 = vmatpush1.bf16.msra.mxu0 %v10897_v19  ;;  %v10973_v19 = vld [vmem:[%s11639_s28 + $0x444] ss:$16 sps:$4 sm:$0xff]  }
 0x338   : > { %9041 = vmatpush1.bf16.msra.mxu1 %v10900_v31  ;;  %8787 = vmatprep.subr.bf16.mxu0 %v10901_v53  ;;  %v10976_v31 = vld [vmem:[%s11639_s28 + $0x44c] ss:$16 sps:$4 sm:$0xff]   ;;  %v10975_v53 = vld [vmem:[%s11639_s28 + $0x440] ss:$16 sps:$4 sm:$0xff]  }
 0x339   : > { %9043 = vmatprep.subr.bf16.mxu1 %v10904_v26  ;;  %v10978_v26 = vld [vmem:[%s11639_s28 + $0x448] ss:$16 sps:$4 sm:$0xff]  }
 0x33b   : > { %8789 = vmatpush1.bf16.msra.mxu0 %v10903_v27  ;;  %v10979_v27 = vld [vmem:[%s11639_s28 + $0x464] ss:$16 sps:$4 sm:$0xff]  }
 0x33c   : > { %9045 = vmatpush1.bf16.msra.mxu1 %v10906_v32  ;;  %8791 = vmatprep.subr.bf16.mxu0 %v10907_v28  ;;  %v10982_v32 = vld [vmem:[%s11639_s28 + $0x46c] ss:$16 sps:$4 sm:$0xff]   ;;  %v10981_v28 = vld [vmem:[%s11639_s28 + $0x460] ss:$16 sps:$4 sm:$0xff]  }
 0x33d   : > { %9047 = vmatprep.subr.bf16.mxu1 %v10910_v29  ;;  %v10984_v29 = vld [vmem:[%s11639_s28 + $0x468] ss:$16 sps:$4 sm:$0xff]  }
 0x33f   : > { %8793 = vmatpush1.bf16.msra.mxu0 %v10909_v23  ;;  %v10985_v23 = vld [vmem:[%s11639_s28 + $0x484] ss:$16 sps:$4 sm:$0xff]  }
 0x340   : > { %9049 = vmatpush1.bf16.msra.mxu1 %v10912_v34  ;;  %8795 = vmatprep.subr.bf16.mxu0 %v10913_v35  ;;  %v10988_v34 = vld [vmem:[%s11639_s28 + $0x48c] ss:$16 sps:$4 sm:$0xff]   ;;  %v10987_v35 = vld [vmem:[%s11639_s28 + $0x480] ss:$16 sps:$4 sm:$0xff]  }
 0x341   : > { %9051 = vmatprep.subr.bf16.mxu1 %v10916_v30  ;;  %v10990_v30 = vld [vmem:[%s11639_s28 + $0x488] ss:$16 sps:$4 sm:$0xff]  }
 0x343   : > { %8797 = vmatpush1.bf16.msra.mxu0 %v10915_v36  ;;  %v10991_v36 = vld [vmem:[%s11639_s28 + $0x4a4] ss:$16 sps:$4 sm:$0xff]  }
 0x344   : > { %9053 = vmatpush1.bf16.msra.mxu1 %v10918_v37  ;;  %8799 = vmatprep.subr.bf16.mxu0 %v10919_v38  ;;  %v10994_v37 = vld [vmem:[%s11639_s28 + $0x4ac] ss:$16 sps:$4 sm:$0xff]   ;;  %v10993_v38 = vld [vmem:[%s11639_s28 + $0x4a0] ss:$16 sps:$4 sm:$0xff]  }
 0x345   : > { %9055 = vmatprep.subr.bf16.mxu1 %v10922_v39  ;;  %v10996_v39 = vld [vmem:[%s11639_s28 + $0x4a8] ss:$16 sps:$4 sm:$0xff]  }
 0x347   : > { %8801 = vmatpush1.bf16.msra.mxu0 %v10921_v62  ;;  %v10997_v62 = vld [vmem:[%s11639_s28 + $0x4c4] ss:$16 sps:$4 sm:$0xff]  }
 0x348   : > { %9057 = vmatpush1.bf16.msra.mxu1 %v10924_v40  ;;  %8803 = vmatprep.subr.bf16.mxu0 %v10925_v4  ;;  %v11000_v40 = vld [vmem:[%s11639_s28 + $0x4cc] ss:$16 sps:$4 sm:$0xff]   ;;  %v10999_v4 = vld [vmem:[%s11639_s28 + $0x4c0] ss:$16 sps:$4 sm:$0xff]  }
 0x349   : > { %9059 = vmatprep.subr.bf16.mxu1 %v10928_v41  ;;  %v11002_v41 = vld [vmem:[%s11639_s28 + $0x4c8] ss:$16 sps:$4 sm:$0xff]  }
 0x34b   : > { %8805 = vmatpush1.bf16.msra.mxu0 %v10927_v43  ;;  %v11003_v43 = vld [vmem:[%s11639_s28 + $0x4e4] ss:$16 sps:$4 sm:$0xff]  }
 0x34c   : > { %9061 = vmatpush1.bf16.msra.mxu1 %v10930_v10  ;;  %8807 = vmatprep.subr.bf16.mxu0 %v10931_v1  ;;  %v11006_v10 = vld [vmem:[%s11639_s28 + $0x4ec] ss:$16 sps:$4 sm:$0xff]   ;;  %v11005_v1 = vld [vmem:[%s11639_s28 + $0x4e0] ss:$16 sps:$4 sm:$0xff]  }
 0x34d   : > { %9063 = vmatprep.subr.bf16.mxu1 %v10934_v45  ;;  %v11008_v45 = vld [vmem:[%s11639_s28 + $0x4e8] ss:$16 sps:$4 sm:$0xff]  }
 0x34f   : > { %8809 = vmatpush1.bf16.msra.mxu0 %v10933_v46  ;;  %v11009_v46 = vld [vmem:[%s11639_s28 + $0x504] ss:$16 sps:$4 sm:$0xff]  }
 0x350   : > { %9065 = vmatpush1.bf16.msra.mxu1 %v10936_v47  ;;  %8811 = vmatprep.subr.bf16.mxu0 %v10937_v48  ;;  %v11012_v47 = vld [vmem:[%s11639_s28 + $0x50c] ss:$16 sps:$4 sm:$0xff]   ;;  %v11011_v48 = vld [vmem:[%s11639_s28 + $0x500] ss:$16 sps:$4 sm:$0xff]  }
 0x351   : > { %9067 = vmatprep.subr.bf16.mxu1 %v10940_v49  ;;  %v11014_v49 = vld [vmem:[%s11639_s28 + $0x508] ss:$16 sps:$4 sm:$0xff]  }
 0x353   : > { %8813 = vmatpush1.bf16.msra.mxu0 %v10939_v18  ;;  %v11015_v18 = vld [vmem:[%s11639_s28 + $0x524] ss:$16 sps:$4 sm:$0xff]  }
 0x354   : > { %9069 = vmatpush1.bf16.msra.mxu1 %v10942_v55  ;;  %8815 = vmatprep.subr.bf16.mxu0 %v10943_v44  ;;  %v11018_v55 = vld [vmem:[%s11639_s28 + $0x52c] ss:$16 sps:$4 sm:$0xff]   ;;  %v11017_v44 = vld [vmem:[%s11639_s28 + $0x520] ss:$16 sps:$4 sm:$0xff]  }
 0x355   : > { %9071 = vmatprep.subr.bf16.mxu1 %v10946_v58  ;;  %v11020_v58 = vld [vmem:[%s11639_s28 + $0x528] ss:$16 sps:$4 sm:$0xff]  }
 0x357   : > { %8817 = vmatpush1.bf16.msra.mxu0 %v10945_v59  ;;  %v11021_v59 = vld [vmem:[%s11639_s28 + $0x544] ss:$16 sps:$4 sm:$0xff]  }
 0x358   : > { %9073 = vmatpush1.bf16.msra.mxu1 %v10948_v57  ;;  %8819 = vmatprep.subr.bf16.mxu0 %v10949_v50  ;;  %v11024_v57 = vld [vmem:[%s11639_s28 + $0x54c] ss:$16 sps:$4 sm:$0xff]   ;;  %v11023_v50 = vld [vmem:[%s11639_s28 + $0x540] ss:$16 sps:$4 sm:$0xff]  }
 0x359   : > { %9075 = vmatprep.subr.bf16.mxu1 %v10952_v63  ;;  %v11026_v63 = vld [vmem:[%s11639_s28 + $0x548] ss:$16 sps:$4 sm:$0xff]  }
 0x35b   : > { %8821 = vmatpush1.bf16.msra.mxu0 %v10951_v3  ;;  %v11027_v3 = vld [vmem:[%s11639_s28 + $0x564] ss:$16 sps:$4 sm:$0xff]  }
 0x35c   : > { %9077 = vmatpush1.bf16.msra.mxu1 %v10954_v6  ;;  %8823 = vmatprep.subr.bf16.mxu0 %v10955_v7  ;;  %v11029_v6 = vld [vmem:[%s11639_s28 + $0x560] ss:$16 sps:$4 sm:$0xff]   ;;  %v11032_v7 = vld [vmem:[%s11639_s28 + $0x568] ss:$16 sps:$4 sm:$0xff]  }
 0x35d   : > { %9079 = vmatprep.subr.bf16.mxu1 %v10958_v12  ;;  %v11033_v12 = vld [vmem:[%s11639_s28 + $0x584] ss:$16 sps:$4 sm:$0xff]  }
 0x35f   : > { %8825 = vmatpush1.bf16.msra.mxu0 %v10957_v13  ;;  %v11036_v13 = vld [vmem:[%s11639_s28 + $0x58c] ss:$16 sps:$4 sm:$0xff]  }
 0x360   : > { %9081 = vmatpush1.bf16.msra.mxu1 %v10960_v15  ;;  %8827 = vmatprep.subr.bf16.mxu0 %v10961_v20  ;;  %v11038_v15 = vld [vmem:[%s11639_s28 + $0x588] ss:$16 sps:$4 sm:$0xff]   ;;  %v11039_v20 = vld [vmem:[%s11639_s28 + $0x5a4] ss:$16 sps:$4 sm:$0xff]  }
 0x361   : > { %9083 = vmatprep.subr.bf16.mxu1 %v10964_v21  ;;  %v11042_v21 = vld [vmem:[%s11639_s28 + $0x5ac] ss:$16 sps:$4 sm:$0xff]  }
 0x362   : > { %5320 = vmatmul.mubr.f32.vlgmr.msra.gmra.mrb[8].mxu0 %v4388_v9 }
 0x363   : > { %5604 = vmatmul.mubr.f32.vlgmr.msra.gmra.mrb[10].mxu1 %v4388_v9  ;;  %8829 = vmatpush1.bf16.msra.mxu0 %v10963_v24  ;;  %v11041_v24 = vld [vmem:[%s11639_s28 + $0x5a0] ss:$16 sps:$4 sm:$0xff]   ;;  %v11044_v9 = vld [vmem:[%s11639_s28 + $0x5a8] ss:$16 sps:$4 sm:$0xff]  }
 0x364   : > { %9085 = vmatpush1.bf16.msra.mxu1 %v10966_v25  ;;  %8831 = vmatprep.subr.bf16.mxu0 %v10967_v5  ;;  %v11045_v25 = vld [vmem:[%s11639_s28 + $0x5c4] ss:$16 sps:$4 sm:$0xff]   ;;  %v11048_v5 = vld [vmem:[%s11639_s28 + $0x5cc] ss:$16 sps:$4 sm:$0xff]  }
 0x365   : > { %9087 = vmatprep.subr.bf16.mxu1 %v10970_v61  ;;  %v11047_v61 = vld [vmem:[%s11639_s28 + $0x5c0] ss:$16 sps:$4 sm:$0xff]  }
 0x367   : > { %8833 = vmatpush1.bf16.msra.mxu0 %v10969_v11  ;;  %v11050_v11 = vld [vmem:[%s11639_s28 + $0x5c8] ss:$16 sps:$4 sm:$0xff]  }
 0x368   : > { %9089 = vmatpush1.bf16.msra.mxu1 %v10972_v16  ;;  %8835 = vmatprep.subr.bf16.mxu0 %v10973_v19  ;;  %v11051_v16 = vld [vmem:[%s11639_s28 + $0x5e4] ss:$16 sps:$4 sm:$0xff]   ;;  %v11054_v19 = vld [vmem:[%s11639_s28 + $0x5ec] ss:$16 sps:$4 sm:$0xff]  }
 0x369   : > { %9091 = vmatprep.subr.bf16.mxu1 %v10976_v31  ;;  %v11053_v31 = vld [vmem:[%s11639_s28 + $0x5e0] ss:$16 sps:$4 sm:$0xff]  }
 0x36b   : > { %8837 = vmatpush1.bf16.msra.mxu0 %v10975_v53  ;;  %v11056_v53 = vld [vmem:[%s11639_s28 + $0x5e8] ss:$16 sps:$4 sm:$0xff]  }
 0x36c   : > { %9093 = vmatpush1.bf16.msra.mxu1 %v10978_v26  ;;  %8839 = vmatprep.subr.bf16.mxu0 %v10979_v27  ;;  %v11057_v26 = vld [vmem:[%s11639_s28 + $0x604] ss:$16 sps:$4 sm:$0xff]   ;;  %v11060_v27 = vld [vmem:[%s11639_s28 + $0x60c] ss:$16 sps:$4 sm:$0xff]  }
 0x36d   : > { %9095 = vmatprep.subr.bf16.mxu1 %v10982_v32  ;;  %v3229_v32 = vrot.slane %v12365_v17, %v1634_v56 }
 0x36f   : > { %8841 = vmatpush1.bf16.msra.mxu0 %v10981_v28  ;;  %v3233_v28 = vrot.slane %v12365_v17, %v1638_v22 }
 0x370   : > { %9097 = vmatpush1.bf16.msra.mxu1 %v10984_v29  ;;  %8843 = vmatprep.subr.bf16.mxu0 %v10985_v23  ;;  %v3241_v29 = vrot.slane %v12365_v17, %v1646_v60  ;;  %v11066_v60 = vld [vmem:[%s11639_s28 + $0x62c] ss:$16 sps:$4 sm:$0xff]  }
 0x371   : > { %9099 = vmatprep.subr.bf16.mxu1 %v10988_v34 }
 0x373   : > { %8845 = vmatpush1.bf16.msra.mxu0 %v10987_v35 }
 0x374   : > { %9101 = vmatpush1.bf16.msra.mxu1 %v10990_v30  ;;  %8847 = vmatprep.subr.bf16.mxu0 %v10991_v36 }
 0x375   : > { %9103 = vmatprep.subr.bf16.mxu1 %v10994_v37 }
 0x377   : > { %8849 = vmatpush1.bf16.msra.mxu0 %v10993_v38 }
 0x378   : > { %9105 = vmatpush1.bf16.msra.mxu1 %v10996_v39  ;;  %8851 = vmatprep.subr.bf16.mxu0 %v10997_v62  ;;  %v11059_v39 = vld [vmem:[%s11639_s28 + $0x600] ss:$16 sps:$4 sm:$0xff]   ;;  %v11062_v62 = vld [vmem:[%s11639_s28 + $0x608] ss:$16 sps:$4 sm:$0xff]  }
 0x379   : > { %9107 = vmatprep.subr.bf16.mxu1 %v11000_v40  ;;  %v11063_v40 = vld [vmem:[%s11639_s28 + $0x624] ss:$16 sps:$4 sm:$0xff]  }
 0x37b   : > { %8853 = vmatpush1.bf16.msra.mxu0 %v10999_v4  ;;  %v11065_v4 = vld [vmem:[%s11639_s28 + $0x620] ss:$16 sps:$4 sm:$0xff]  }
 0x37c   : > { %9109 = vmatpush1.bf16.msra.mxu1 %v11002_v41  ;;  %8855 = vmatprep.subr.bf16.mxu0 %v11003_v43  ;;  %v11068_v41 = vld [vmem:[%s11639_s28 + $0x628] ss:$16 sps:$4 sm:$0xff]   ;;  %v11069_v43 = vld [vmem:[%s11639_s28 + $0x644] ss:$16 sps:$4 sm:$0xff]  }
 0x37d   : > { %9111 = vmatprep.subr.bf16.mxu1 %v11006_v10  ;;  %v11072_v10 = vld [vmem:[%s11639_s28 + $0x64c] ss:$16 sps:$4 sm:$0xff]  }
 0x37f   : > { %8857 = vmatpush1.bf16.msra.mxu0 %v11005_v1  ;;  %v11071_v1 = vld [vmem:[%s11639_s28 + $0x640] ss:$16 sps:$4 sm:$0xff]  }
 0x380   : > { %9113 = vmatpush1.bf16.msra.mxu1 %v11008_v45  ;;  %8859 = vmatprep.subr.bf16.mxu0 %v11009_v46  ;;  %v11074_v45 = vld [vmem:[%s11639_s28 + $0x648] ss:$16 sps:$4 sm:$0xff]   ;;  %v11075_v46 = vld [vmem:[%s11639_s28 + $0x664] ss:$16 sps:$4 sm:$0xff]  }
 0x381   : > { %9115 = vmatprep.subr.bf16.mxu1 %v11012_v47  ;;  %v11078_v47 = vld [vmem:[%s11639_s28 + $0x66c] ss:$16 sps:$4 sm:$0xff]  }
 0x383   : > { %8861 = vmatpush1.bf16.msra.mxu0 %v11011_v48  ;;  %v11077_v48 = vld [vmem:[%s11639_s28 + $0x660] ss:$16 sps:$4 sm:$0xff]  }
 0x384   : > { %9117 = vmatpush1.bf16.msra.mxu1 %v11014_v49  ;;  %8863 = vmatprep.subr.bf16.mxu0 %v11015_v18  ;;  %v11080_v49 = vld [vmem:[%s11639_s28 + $0x668] ss:$16 sps:$4 sm:$0xff]   ;;  %v11081_v18 = vld [vmem:[%s11639_s28 + $0x684] ss:$16 sps:$4 sm:$0xff]  }
 0x385   : > { %9119 = vmatprep.subr.bf16.mxu1 %v11018_v55  ;;  %v11084_v55 = vld [vmem:[%s11639_s28 + $0x68c] ss:$16 sps:$4 sm:$0xff]  }
 0x387   : > { %8865 = vmatpush1.bf16.msra.mxu0 %v11017_v44  ;;  %v11083_v44 = vld [vmem:[%s11639_s28 + $0x680] ss:$16 sps:$4 sm:$0xff]  }
 0x388   : > { %9121 = vmatpush1.bf16.msra.mxu1 %v11020_v58  ;;  %8867 = vmatprep.subr.bf16.mxu0 %v11021_v59  ;;  %v11086_v58 = vld [vmem:[%s11639_s28 + $0x688] ss:$16 sps:$4 sm:$0xff]   ;;  %v11087_v59 = vld [vmem:[%s11639_s28 + $0x6a4] ss:$16 sps:$4 sm:$0xff]  }
 0x389   : > { %9123 = vmatprep.subr.bf16.mxu1 %v11024_v57  ;;  %v11090_v57 = vld [vmem:[%s11639_s28 + $0x6ac] ss:$16 sps:$4 sm:$0xff]  }
 0x38b   : > { %8869 = vmatpush1.bf16.msra.mxu0 %v11023_v50  ;;  %v11089_v50 = vld [vmem:[%s11639_s28 + $0x6a0] ss:$16 sps:$4 sm:$0xff]  }
 0x38c   : > { %9125 = vmatpush1.bf16.msra.mxu1 %v11026_v63  ;;  %8871 = vmatprep.subr.bf16.mxu0 %v11027_v3  ;;  %v11092_v63 = vld [vmem:[%s11639_s28 + $0x6a8] ss:$16 sps:$4 sm:$0xff]   ;;  %v11093_v3 = vld [vmem:[%s11639_s28 + $0x6c4] ss:$16 sps:$4 sm:$0xff]  }
 0x38d   : > { %9127 = vmatprep.subr.bf16.mxu1 %v11030_v2  ;;  %v11096_v2 = vld [vmem:[%s11639_s28 + $0x6cc] ss:$16 sps:$4 sm:$0xff]  }
 0x38f   : > { %8873 = vmatpush1.bf16.msra.mxu0 %v11029_v6  ;;  %v11095_v6 = vld [vmem:[%s11639_s28 + $0x6c0] ss:$16 sps:$4 sm:$0xff]  }
 0x390   : > { %9129 = vmatpush1.bf16.msra.mxu1 %v11032_v7  ;;  %8875 = vmatprep.subr.bf16.mxu0 %v11033_v12  ;;  %v11098_v7 = vld [vmem:[%s11639_s28 + $0x6c8] ss:$16 sps:$4 sm:$0xff]   ;;  %v11099_v12 = vld [vmem:[%s11639_s28 + $0x6e4] ss:$16 sps:$4 sm:$0xff]  }
 0x391   : > { %9131 = vmatprep.subr.bf16.mxu1 %v11036_v13  ;;  %v11102_v13 = vld [vmem:[%s11639_s28 + $0x6ec] ss:$16 sps:$4 sm:$0xff]  }
 0x393   : > { %8877 = vmatpush1.bf16.msra.mxu0 %v11035_v14  ;;  %v11101_v14 = vld [vmem:[%s11639_s28 + $0x6e0] ss:$16 sps:$4 sm:$0xff]  }
 0x394   : > { %9133 = vmatpush1.bf16.msra.mxu1 %v11038_v15  ;;  %8879 = vmatprep.subr.bf16.mxu0 %v11039_v20  ;;  %v11104_v15 = vld [vmem:[%s11639_s28 + $0x6e8] ss:$16 sps:$4 sm:$0xff]   ;;  %v11105_v20 = vld [vmem:[%s11639_s28 + $0x704] ss:$16 sps:$4 sm:$0xff]  }
 0x395   : > { %9135 = vmatprep.subr.bf16.mxu1 %v11042_v21  ;;  %v11108_v21 = vld [vmem:[%s11639_s28 + $0x70c] ss:$16 sps:$4 sm:$0xff]  }
 0x397   : > { %8881 = vmatpush1.bf16.msra.mxu0 %v11041_v24  ;;  %v11107_v24 = vld [vmem:[%s11639_s28 + $0x700] ss:$16 sps:$4 sm:$0xff]  }
 0x398   : > { %9137 = vmatpush1.bf16.msra.mxu1 %v11044_v9  ;;  %8883 = vmatprep.subr.bf16.mxu0 %v11045_v25  ;;  %v11110_v9 = vld [vmem:[%s11639_s28 + $0x708] ss:$16 sps:$4 sm:$0xff]   ;;  %v11111_v25 = vld [vmem:[%s11639_s28 + $0x724] ss:$16 sps:$4 sm:$0xff]  }
 0x399   : > { %9139 = vmatprep.subr.bf16.mxu1 %v11048_v5  ;;  %v11114_v5 = vld [vmem:[%s11639_s28 + $0x72c] ss:$16 sps:$4 sm:$0xff]  }
 0x39b   : > { %8885 = vmatpush1.bf16.msra.mxu0 %v11047_v61  ;;  %v11113_v61 = vld [vmem:[%s11639_s28 + $0x720] ss:$16 sps:$4 sm:$0xff]  }
 0x39c   : > { %9141 = vmatpush1.bf16.msra.mxu1 %v11050_v11  ;;  %8887 = vmatprep.subr.bf16.mxu0 %v11051_v16  ;;  %v11116_v11 = vld [vmem:[%s11639_s28 + $0x728] ss:$16 sps:$4 sm:$0xff]   ;;  %v11117_v16 = vld [vmem:[%s11639_s28 + $0x744] ss:$16 sps:$4 sm:$0xff]  }
 0x39d   : > { %9143 = vmatprep.subr.bf16.mxu1 %v11054_v19  ;;  %v11120_v19 = vld [vmem:[%s11639_s28 + $0x74c] ss:$16 sps:$4 sm:$0xff]  }
 0x39f   : > { %8889 = vmatpush1.bf16.msra.mxu0 %v11053_v31  ;;  %v11119_v31 = vld [vmem:[%s11639_s28 + $0x740] ss:$16 sps:$4 sm:$0xff]  }
 0x3a0   : > { %9145 = vmatpush1.bf16.msra.mxu1 %v11056_v53  ;;  %8891 = vmatprep.subr.bf16.mxu0 %v11057_v26  ;;  %v11122_v53 = vld [vmem:[%s11639_s28 + $0x748] ss:$16 sps:$4 sm:$0xff]   ;;  %v11123_v26 = vld [vmem:[%s11639_s28 + $0x764] ss:$16 sps:$4 sm:$0xff]  }
 0x3a1   : > { %9147 = vmatprep.subr.bf16.mxu1 %v11060_v27  ;;  %v11126_v27 = vld [vmem:[%s11639_s28 + $0x76c] ss:$16 sps:$4 sm:$0xff]  }
 0x3b5   : > { %v4097_v23 = vpop.f32.mrb[6].mxu0 }
 0x3b6   : > { %v9656_v34 = vadd.f32 %v4097_v23, %v3229_v32  ;;  %v12584_v35 = vpop.f32.mrb[8].mxu1  ;;  %v4099_v30 = vpop.f32.mrb[7].mxu0  ;;  %v11125_v32 = vld [vmem:[%s11639_s28 + $0x760] ss:$16 sps:$4 sm:$0xff]   ;;  %v11132_v23 = vld [vmem:[%s11639_s28 + $0x78c] ss:$16 sps:$4 sm:$0xff]  }
 0x3b7   : > { %v9657_v36 = vadd.f32 %v4099_v30, %v3233_v28  ;;  %v4383_v37 = vpop.f32.mrb[9].mxu1  ;;  %v11128_v28 = vld [vmem:[%s11639_s28 + $0x768] ss:$16 sps:$4 sm:$0xff]  }
 0x3b8   : > { %v9659_v56 = vadd.f32 %v4383_v37, %v3241_v29  ;;  %v4390_v22 = vmax.f32 %v9656_v34, 0.0  ;;  %v11129_v29 = vld [vmem:[%s11639_s28 + $0x784] ss:$16 sps:$4 sm:$0xff]   ;;  %v11131_v34 = vld [vmem:[%s11639_s28 + $0x780] ss:$16 sps:$4 sm:$0xff]  }
 0x3b9   : > { %v4391_v38 = vmax.f32 %v9657_v36, 0.0  ;;  %v11134_v30 = vld [vmem:[%s11639_s28 + $0x788] ss:$16 sps:$4 sm:$0xff]   ;;  %v11135_v36 = vld [vmem:[%s11639_s28 + $0x7a4] ss:$16 sps:$4 sm:$0xff]  }
 0x3ba   : > { %v4393_v17 = vmax.f32 %v9659_v56, 0.0  ;;  %v11138_v37 = vld [vmem:[%s11639_s28 + $0x7ac] ss:$16 sps:$4 sm:$0xff]   ;;  %v11137_v56 = vld [vmem:[%s11639_s28 + $0x7a0] ss:$16 sps:$4 sm:$0xff]  }
 0x3bb   : > { %5390 = vmatprep.mubr.f32.mxu0 %v4391_v38  ;;  %5674 = vmatprep.mubr.f32.mxu1 %v4391_v38  ;;  %v11140_v38 = vld [vmem:[%s11639_s28 + $0x7a8] ss:$16 sps:$4 sm:$0xff]  }
 0x3bc   : > { %5391 = vmatmul.mubr.f32.vlgmr.msra.gmra.mrb[8].mxu0 %v4390_v22  ;;  %5675 = vmatmul.mubr.f32.vlgmr.msra.gmra.mrb[10].mxu1 %v4390_v22  ;;  %v11143_v22 = vld [vmem:[%s11639_s28 + $0x7c0] ss:$16 sps:$4 sm:$0xff]  }
 0x3bd   : > { %8893 = vmatpush1.bf16.msra.mxu0 %v11059_v39  ;;  %9149 = vmatpush1.bf16.msra.mxu1 %v11062_v62  ;;  %v11141_v39 = vld [vmem:[%s11639_s28 + $0x7c4] ss:$16 sps:$4 sm:$0xff]   ;;  %v11144_v62 = vld [vmem:[%s11639_s28 + $0x7cc] ss:$16 sps:$4 sm:$0xff]  }
 0x3be   : > { %5461 = vmatprep.mubr.f32.mxu0 %v4393_v17  ;;  %5745 = vmatprep.mubr.f32.mxu1 %v4393_v17 }
 0x3bf   : > { %8895 = vmatprep.subr.bf16.mxu0 %v11063_v40  ;;  %9151 = vmatprep.subr.bf16.mxu1 %v11066_v60  ;;  %v11146_v40 = vld [vmem:[%s11639_s28 + $0x7c8] ss:$16 sps:$4 sm:$0xff]   ;;  %v11442_v60 = vld [vmem:[%s12358_s30] sm:$0xff]  ;;  %s7287_s30 = sshll.u32 %s12953_s25, 1 }
 0x3c0   : > { %v3237_v17 = vrot.slane %v11442_v60, %v1642_v42  ;;  %v11155_v42 = vld [vmem:[%s11738_s29] ss:$16 sps:$4 sm:$0xff]   ;;  %v11230_v60 = vld [vmem:[%s11738_s29 + $0x188] ss:$16 sps:$4 sm:$0xff]  }
 0x3c1   : > { %8897 = vmatpush1.bf16.msra.mxu0 %v11065_v4  ;;  %9153 = vmatpush1.bf16.msra.mxu1 %v11068_v41  ;;  %v11147_v4 = vld [vmem:[%s11639_s28 + $0x7e4] ss:$16 sps:$4 sm:$0xff]   ;;  %v11150_v41 = vld [vmem:[%s11639_s28 + $0x7ec] ss:$16 sps:$4 sm:$0xff]  }
 0x3c2   : > { %8899 = vmatprep.subr.bf16.mxu0 %v11069_v43  ;;  %9155 = vmatprep.subr.bf16.mxu1 %v11072_v10  ;;  %v11149_v43 = vld [vmem:[%s11639_s28 + $0x7e0] ss:$16 sps:$4 sm:$0xff]   ;;  %v11152_v10 = vld [vmem:[%s11639_s28 + $0x7e8] ss:$16 sps:$4 sm:$0xff]   ;;  %s7281_s28 = sshll.u32 %s12953_s25, 2 }
 0x3c3   : > { %s761_s21 = scalar_lea.vmem %s12938_s8, %s7281_s28  ;;  %s770_s27 = scalar_lea.vmem %s12940_s10, %s7281_s28 }
 0x3c4   : > { %s795_s28 = scalar_lea.vmem %s12946_s16, %s12953_s25 }
 0x3c5   : > { %8901 = vmatpush1.bf16.msra.mxu0 %v11071_v1  ;;  %9157 = vmatpush1.bf16.msra.mxu1 %v11074_v45  ;;  %v9658_v1 = vadd.f32 %v12584_v35, %v3237_v17  ;;  %v11153_v45 = vld [vmem:[%s11738_s29 + $0x4] ss:$16 sps:$4 sm:$0xff]   ;;  %v11161_v35 = vld [vmem:[%s11738_s29 + $0x20] ss:$16 sps:$4 sm:$0xff]  }
 0x3c6   : > { %8903 = vmatprep.subr.bf16.mxu0 %v11075_v46  ;;  %9159 = vmatprep.subr.bf16.mxu1 %v11078_v47  ;;  %v11158_v46 = vld [vmem:[%s11738_s29 + $0x8] ss:$16 sps:$4 sm:$0xff]   ;;  %v11231_v17 = vld [vmem:[%s11738_s29 + $0x1a4] ss:$16 sps:$4 sm:$0xff]  }
 0x3c7   : > { %v4392_v47 = vmax.f32 %v9658_v1, 0.0  ;;  %v11240_v1 = vld [vmem:[%s11738_s29 + $0x1cc] ss:$16 sps:$4 sm:$0xff]  }
 0x3c9   : > { %8905 = vmatpush1.bf16.msra.mxu0 %v11077_v48  ;;  %9161 = vmatpush1.bf16.msra.mxu1 %v11080_v49  ;;  %v11159_v48 = vld [vmem:[%s11738_s29 + $0x24] ss:$16 sps:$4 sm:$0xff]   ;;  %v11162_v49 = vld [vmem:[%s11738_s29 + $0x2c] ss:$16 sps:$4 sm:$0xff]  }
 0x3ca   : > { %8907 = vmatprep.subr.bf16.mxu0 %v11081_v18  ;;  %9163 = vmatprep.subr.bf16.mxu1 %v11084_v55  ;;  %v11164_v18 = vld [vmem:[%s11738_s29 + $0x28] ss:$16 sps:$4 sm:$0xff]   ;;  %v11165_v55 = vld [vmem:[%s11738_s29 + $0x44] ss:$16 sps:$4 sm:$0xff]  }
 0x3cd   : > { %8909 = vmatpush1.bf16.msra.mxu0 %v11083_v44  ;;  %9165 = vmatpush1.bf16.msra.mxu1 %v11086_v58  ;;  %v11168_v44 = vld [vmem:[%s11738_s29 + $0x4c] ss:$16 sps:$4 sm:$0xff]   ;;  %v11167_v58 = vld [vmem:[%s11738_s29 + $0x40] ss:$16 sps:$4 sm:$0xff]  }
 0x3ce   : > { %8911 = vmatprep.subr.bf16.mxu0 %v11087_v59  ;;  %9167 = vmatprep.subr.bf16.mxu1 %v11090_v57  ;;  %v11170_v59 = vld [vmem:[%s11738_s29 + $0x48] ss:$16 sps:$4 sm:$0xff]   ;;  %v11171_v57 = vld [vmem:[%s11738_s29 + $0x64] ss:$16 sps:$4 sm:$0xff]  }
 0x3d1   : > { %8913 = vmatpush1.bf16.msra.mxu0 %v11089_v50  ;;  %9169 = vmatpush1.bf16.msra.mxu1 %v11092_v63  ;;  %v11174_v50 = vld [vmem:[%s11738_s29 + $0x6c] ss:$16 sps:$4 sm:$0xff]   ;;  %v11173_v63 = vld [vmem:[%s11738_s29 + $0x60] ss:$16 sps:$4 sm:$0xff]  }
 0x3d2   : > { %8915 = vmatprep.subr.bf16.mxu0 %v11093_v3  ;;  %9171 = vmatprep.subr.bf16.mxu1 %v11096_v2  ;;  %v11176_v3 = vld [vmem:[%s11738_s29 + $0x68] ss:$16 sps:$4 sm:$0xff]   ;;  %v11177_v2 = vld [vmem:[%s11738_s29 + $0x84] ss:$16 sps:$4 sm:$0xff]  }
 0x3d5   : > { %8917 = vmatpush1.bf16.msra.mxu0 %v11095_v6  ;;  %9173 = vmatpush1.bf16.msra.mxu1 %v11098_v7  ;;  %v11180_v6 = vld [vmem:[%s11738_s29 + $0x8c] ss:$16 sps:$4 sm:$0xff]   ;;  %v11179_v7 = vld [vmem:[%s11738_s29 + $0x80] ss:$16 sps:$4 sm:$0xff]  }
 0x3d6   : > { %8919 = vmatprep.subr.bf16.mxu0 %v11099_v12  ;;  %9175 = vmatprep.subr.bf16.mxu1 %v11102_v13  ;;  %v11182_v12 = vld [vmem:[%s11738_s29 + $0x88] ss:$16 sps:$4 sm:$0xff]   ;;  %v11183_v13 = vld [vmem:[%s11738_s29 + $0xa4] ss:$16 sps:$4 sm:$0xff]  }
 0x3d9   : > { %8921 = vmatpush1.bf16.msra.mxu0 %v11101_v14  ;;  %9177 = vmatpush1.bf16.msra.mxu1 %v11104_v15  ;;  %v11186_v14 = vld [vmem:[%s11738_s29 + $0xac] ss:$16 sps:$4 sm:$0xff]   ;;  %v11185_v15 = vld [vmem:[%s11738_s29 + $0xa0] ss:$16 sps:$4 sm:$0xff]  }
 0x3da   : > { %8923 = vmatprep.subr.bf16.mxu0 %v11105_v20  ;;  %9179 = vmatprep.subr.bf16.mxu1 %v11108_v21  ;;  %v11188_v20 = vld [vmem:[%s11738_s29 + $0xa8] ss:$16 sps:$4 sm:$0xff]   ;;  %v11189_v21 = vld [vmem:[%s11738_s29 + $0xc4] ss:$16 sps:$4 sm:$0xff]  }
 0x3dd   : > { %8925 = vmatpush1.bf16.msra.mxu0 %v11107_v24  ;;  %9181 = vmatpush1.bf16.msra.mxu1 %v11110_v9  ;;  %v11192_v24 = vld [vmem:[%s11738_s29 + $0xcc] ss:$16 sps:$4 sm:$0xff]   ;;  %v11191_v9 = vld [vmem:[%s11738_s29 + $0xc0] ss:$16 sps:$4 sm:$0xff]  }
 0x3de   : > { %8927 = vmatprep.subr.bf16.mxu0 %v11111_v25  ;;  %9183 = vmatprep.subr.bf16.mxu1 %v11114_v5  ;;  %v11194_v25 = vld [vmem:[%s11738_s29 + $0xc8] ss:$16 sps:$4 sm:$0xff]   ;;  %v11195_v5 = vld [vmem:[%s11738_s29 + $0xe4] ss:$16 sps:$4 sm:$0xff]  }
 0x3e1   : > { %8929 = vmatpush1.bf16.msra.mxu0 %v11113_v61  ;;  %9185 = vmatpush1.bf16.msra.mxu1 %v11116_v11  ;;  %v11198_v61 = vld [vmem:[%s11738_s29 + $0xec] ss:$16 sps:$4 sm:$0xff]   ;;  %v11197_v11 = vld [vmem:[%s11738_s29 + $0xe0] ss:$16 sps:$4 sm:$0xff]  }
 0x3e2   : > { %8931 = vmatprep.subr.bf16.mxu0 %v11117_v16  ;;  %9187 = vmatprep.subr.bf16.mxu1 %v11120_v19  ;;  %v11200_v16 = vld [vmem:[%s11738_s29 + $0xe8] ss:$16 sps:$4 sm:$0xff]   ;;  %v11201_v19 = vld [vmem:[%s11738_s29 + $0x104] ss:$16 sps:$4 sm:$0xff]  }
 0x3e5   : > { %8933 = vmatpush1.bf16.msra.mxu0 %v11119_v31  ;;  %9189 = vmatpush1.bf16.msra.mxu1 %v11122_v53  ;;  %v11204_v31 = vld [vmem:[%s11738_s29 + $0x10c] ss:$16 sps:$4 sm:$0xff]   ;;  %v11203_v53 = vld [vmem:[%s11738_s29 + $0x100] ss:$16 sps:$4 sm:$0xff]  }
 0x3e6   : > { %8935 = vmatprep.subr.bf16.mxu0 %v11123_v26  ;;  %9191 = vmatprep.subr.bf16.mxu1 %v11126_v27  ;;  %v11206_v26 = vld [vmem:[%s11738_s29 + $0x108] ss:$16 sps:$4 sm:$0xff]   ;;  %v11207_v27 = vld [vmem:[%s11738_s29 + $0x124] ss:$16 sps:$4 sm:$0xff]  }
 0x3e9   : > { %8937 = vmatpush1.bf16.msra.mxu0 %v11125_v32  ;;  %9193 = vmatpush1.bf16.msra.mxu1 %v11128_v28  ;;  %v11210_v32 = vld [vmem:[%s11738_s29 + $0x12c] ss:$16 sps:$4 sm:$0xff]   ;;  %v11209_v28 = vld [vmem:[%s11738_s29 + $0x120] ss:$16 sps:$4 sm:$0xff]  }
 0x3ea   : > { %8939 = vmatprep.subr.bf16.mxu0 %v11129_v29  ;;  %9195 = vmatprep.subr.bf16.mxu1 %v11132_v23  ;;  %v11212_v29 = vld [vmem:[%s11738_s29 + $0x128] ss:$16 sps:$4 sm:$0xff]   ;;  %v11213_v23 = vld [vmem:[%s11738_s29 + $0x144] ss:$16 sps:$4 sm:$0xff]  }
 0x3ed   : > { %8941 = vmatpush1.bf16.msra.mxu0 %v11131_v34  ;;  %9197 = vmatpush1.bf16.msra.mxu1 %v11134_v30  ;;  %v11216_v34 = vld [vmem:[%s11738_s29 + $0x14c] ss:$16 sps:$4 sm:$0xff]   ;;  %v11215_v30 = vld [vmem:[%s11738_s29 + $0x140] ss:$16 sps:$4 sm:$0xff]  }
 0x3ee   : > { %8943 = vmatprep.subr.bf16.mxu0 %v11135_v36  ;;  %9199 = vmatprep.subr.bf16.mxu1 %v11138_v37  ;;  %v11218_v36 = vld [vmem:[%s11738_s29 + $0x148] ss:$16 sps:$4 sm:$0xff]   ;;  %v11219_v37 = vld [vmem:[%s11738_s29 + $0x164] ss:$16 sps:$4 sm:$0xff]  }
 0x3f1   : > { %8945 = vmatpush1.bf16.msra.mxu0 %v11137_v56  ;;  %9201 = vmatpush1.bf16.msra.mxu1 %v11140_v38  ;;  %v11222_v56 = vld [vmem:[%s11738_s29 + $0x16c] ss:$16 sps:$4 sm:$0xff]   ;;  %v11221_v38 = vld [vmem:[%s11738_s29 + $0x160] ss:$16 sps:$4 sm:$0xff]  }
 0x3f2   : > { %8947 = vmatprep.subr.bf16.mxu0 %v11141_v39  ;;  %9203 = vmatprep.subr.bf16.mxu1 %v11144_v62  ;;  %v11224_v39 = vld [vmem:[%s11738_s29 + $0x168] ss:$16 sps:$4 sm:$0xff]   ;;  %v11225_v62 = vld [vmem:[%s11738_s29 + $0x184] ss:$16 sps:$4 sm:$0xff]  }
 0x3f5   : > { %8949 = vmatpush1.bf16.msra.mxu0 %v11143_v22  ;;  %9205 = vmatpush1.bf16.msra.mxu1 %v11146_v40  ;;  %v11228_v22 = vld [vmem:[%s11738_s29 + $0x18c] ss:$16 sps:$4 sm:$0xff]   ;;  %v11227_v40 = vld [vmem:[%s11738_s29 + $0x180] ss:$16 sps:$4 sm:$0xff]  }
 0x3f6   : > { %8951 = vmatprep.subr.bf16.mxu0 %v11147_v4  ;;  %9207 = vmatprep.subr.bf16.mxu1 %v11150_v41  ;;  %v11234_v4 = vld [vmem:[%s11738_s29 + $0x1ac] ss:$16 sps:$4 sm:$0xff]   ;;  %v11233_v41 = vld [vmem:[%s11738_s29 + $0x1a0] ss:$16 sps:$4 sm:$0xff]  }
 0x3f9   : > { %8953 = vmatpush1.bf16.msra.mxu0 %v11149_v43  ;;  %9209 = vmatpush1.bf16.msra.mxu1 %v11152_v10  ;;  %v11236_v43 = vld [vmem:[%s11738_s29 + $0x1a8] ss:$16 sps:$4 sm:$0xff]   ;;  %v11237_v10 = vld [vmem:[%s11738_s29 + $0x1c4] ss:$16 sps:$4 sm:$0xff]  }
 0x3fa   : > { %9211 = vmatprep.subr.bf16.mxu0 %v11153_v45  ;;  %9339 = vmatprep.subr.bf16.mxu1 %v11156_v51  ;;  %v11239_v45 = vld [vmem:[%s11738_s29 + $0x1c0] ss:$16 sps:$4 sm:$0xff]   ;;  %v11242_v51 = vld [vmem:[%s11738_s29 + $0x1c8] ss:$16 sps:$4 sm:$0xff]  }
 0x3fc   : > { %5462 = vmatmul.mubr.f32.vlgmr.msra.gmra.mrb[8].mxu0 %v4392_v47  ;;  %5746 = vmatmul.mubr.f32.vlgmr.msra.gmra.mrb[10].mxu1 %v4392_v47  ;;  %v11245_v47 = vld [vmem:[%s11738_s29 + $0x1e0] ss:$16 sps:$4 sm:$0xff]  }
 0x3fd   : > { %9213 = vmatpush1.bf16.msra.mxu0 %v11155_v42  ;;  %9341 = vmatpush1.bf16.msra.mxu1 %v11158_v46  ;;  %v11243_v42 = vld [vmem:[%s11738_s29 + $0x1e4] ss:$16 sps:$4 sm:$0xff]   ;;  %v11246_v46 = vld [vmem:[%s11738_s29 + $0x1ec] ss:$16 sps:$4 sm:$0xff]  }
 0x3fe   : > { %9215 = vmatprep.subr.bf16.mxu0 %v11159_v48  ;;  %9343 = vmatprep.subr.bf16.mxu1 %v11162_v49  ;;  %v11248_v48 = vld [vmem:[%s11738_s29 + $0x1e8] ss:$16 sps:$4 sm:$0xff]   ;;  %v11249_v49 = vld [vmem:[%s11738_s29 + $0x204] ss:$16 sps:$4 sm:$0xff]  }
 0x401   : > { %9217 = vmatpush1.bf16.msra.mxu0 %v11161_v35  ;;  %9345 = vmatpush1.bf16.msra.mxu1 %v11164_v18  ;;  %v11252_v35 = vld [vmem:[%s11738_s29 + $0x20c] ss:$16 sps:$4 sm:$0xff]   ;;  %v12724_v18 = vld [vmem:[%s761_s21] sm:$0xf] }
 0x402   : > { %9219 = vmatprep.subr.bf16.mxu0 %v11165_v55  ;;  %9347 = vmatprep.subr.bf16.mxu1 %v11168_v44  ;;  %v5167_v55 = vrot.slane %v12724_v18, %v11801_v52  ;;  %v5171_v44 = vrot.slane %v12724_v18, %v11807_v54 }
 0x405   : > { %9221 = vmatpush1.bf16.msra.mxu0 %v11167_v58  ;;  %9349 = vmatpush1.bf16.msra.mxu1 %v11170_v59  ;;  %v5179_v58 = vrot.slane %v12724_v18, %v11856_v33 }
 0x406   : > { %9223 = vmatprep.subr.bf16.mxu0 %v11171_v57  ;;  %9351 = vmatprep.subr.bf16.mxu1 %v11174_v50 }
 0x409   : > { %9225 = vmatpush1.bf16.msra.mxu0 %v11173_v63  ;;  %9353 = vmatpush1.bf16.msra.mxu1 %v11176_v3 }
 0x40a   : > { %9227 = vmatprep.subr.bf16.mxu0 %v11177_v2  ;;  %9355 = vmatprep.subr.bf16.mxu1 %v11180_v6 }
 0x40d   : > { %9229 = vmatpush1.bf16.msra.mxu0 %v11179_v7  ;;  %9357 = vmatpush1.bf16.msra.mxu1 %v11182_v12  ;;  %v11251_v12 = vld [vmem:[%s11738_s29 + $0x200] ss:$16 sps:$4 sm:$0xff]  }
 0x40e   : > { %9231 = vmatprep.subr.bf16.mxu0 %v11183_v13  ;;  %9359 = vmatprep.subr.bf16.mxu1 %v11186_v14  ;;  %v11254_v13 = vld [vmem:[%s11738_s29 + $0x208] ss:$16 sps:$4 sm:$0xff]  }
 0x411   : > { %9233 = vmatpush1.bf16.msra.mxu0 %v11185_v15  ;;  %9361 = vmatpush1.bf16.msra.mxu1 %v11188_v20  ;;  %v11255_v15 = vld [vmem:[%s11738_s29 + $0x224] ss:$16 sps:$4 sm:$0xff]   ;;  %v11258_v20 = vld [vmem:[%s11738_s29 + $0x22c] ss:$16 sps:$4 sm:$0xff]  }
 0x412   : > { %9235 = vmatprep.subr.bf16.mxu0 %v11189_v21  ;;  %9363 = vmatprep.subr.bf16.mxu1 %v11192_v24  ;;  %v11257_v24 = vld [vmem:[%s11738_s29 + $0x220] ss:$16 sps:$4 sm:$0xff]  }
 0x415   : > { %9237 = vmatpush1.bf16.msra.mxu0 %v11191_v9  ;;  %9365 = vmatpush1.bf16.msra.mxu1 %v11194_v25  ;;  %v11260_v9 = vld [vmem:[%s11738_s29 + $0x228] ss:$16 sps:$4 sm:$0xff]   ;;  %v11261_v25 = vld [vmem:[%s11738_s29 + $0x244] ss:$16 sps:$4 sm:$0xff]  }
 0x416   : > { %9239 = vmatprep.subr.bf16.mxu0 %v11195_v5  ;;  %9367 = vmatprep.subr.bf16.mxu1 %v11198_v61  ;;  %v11264_v5 = vld [vmem:[%s11738_s29 + $0x24c] ss:$16 sps:$4 sm:$0xff]   ;;  %v11263_v61 = vld [vmem:[%s11738_s29 + $0x240] ss:$16 sps:$4 sm:$0xff]  }
 0x419   : > { %9241 = vmatpush1.bf16.msra.mxu0 %v11197_v11  ;;  %9369 = vmatpush1.bf16.msra.mxu1 %v11200_v16  ;;  %v11266_v11 = vld [vmem:[%s11738_s29 + $0x248] ss:$16 sps:$4 sm:$0xff]   ;;  %v11267_v16 = vld [vmem:[%s11738_s29 + $0x264] ss:$16 sps:$4 sm:$0xff]  }
 0x41a   : > { %9243 = vmatprep.subr.bf16.mxu0 %v11201_v19  ;;  %9371 = vmatprep.subr.bf16.mxu1 %v11204_v31  ;;  %v11270_v19 = vld [vmem:[%s11738_s29 + $0x26c] ss:$16 sps:$4 sm:$0xff]   ;;  %v11269_v31 = vld [vmem:[%s11738_s29 + $0x260] ss:$16 sps:$4 sm:$0xff]  }
 0x41d   : > { %9245 = vmatpush1.bf16.msra.mxu0 %v11203_v53  ;;  %9373 = vmatpush1.bf16.msra.mxu1 %v11206_v26  ;;  %v11272_v53 = vld [vmem:[%s11738_s29 + $0x268] ss:$16 sps:$4 sm:$0xff]   ;;  %v11273_v26 = vld [vmem:[%s11738_s29 + $0x284] ss:$16 sps:$4 sm:$0xff]  }
 0x41e   : > { %9247 = vmatprep.subr.bf16.mxu0 %v11207_v27  ;;  %9375 = vmatprep.subr.bf16.mxu1 %v11210_v32  ;;  %v11276_v27 = vld [vmem:[%s11738_s29 + $0x28c] ss:$16 sps:$4 sm:$0xff]   ;;  %v11275_v32 = vld [vmem:[%s11738_s29 + $0x280] ss:$16 sps:$4 sm:$0xff]  }
 0x421   : > { %9249 = vmatpush1.bf16.msra.mxu0 %v11209_v28  ;;  %9377 = vmatpush1.bf16.msra.mxu1 %v11212_v29  ;;  %v11278_v28 = vld [vmem:[%s11738_s29 + $0x288] ss:$16 sps:$4 sm:$0xff]   ;;  %v11279_v29 = vld [vmem:[%s11738_s29 + $0x2a4] ss:$16 sps:$4 sm:$0xff]  }
 0x422   : > { %9251 = vmatprep.subr.bf16.mxu0 %v11213_v23  ;;  %9379 = vmatprep.subr.bf16.mxu1 %v11216_v34  ;;  %v11282_v23 = vld [vmem:[%s11738_s29 + $0x2ac] ss:$16 sps:$4 sm:$0xff]   ;;  %v11281_v34 = vld [vmem:[%s11738_s29 + $0x2a0] ss:$16 sps:$4 sm:$0xff]  }
 0x425   : > { %9253 = vmatpush1.bf16.msra.mxu0 %v11215_v30  ;;  %9381 = vmatpush1.bf16.msra.mxu1 %v11218_v36  ;;  %v11284_v30 = vld [vmem:[%s11738_s29 + $0x2a8] ss:$16 sps:$4 sm:$0xff]   ;;  %v11285_v36 = vld [vmem:[%s11738_s29 + $0x2c4] ss:$16 sps:$4 sm:$0xff]  }
 0x426   : > { %9255 = vmatprep.subr.bf16.mxu0 %v11219_v37  ;;  %9383 = vmatprep.subr.bf16.mxu1 %v11222_v56  ;;  %v11288_v37 = vld [vmem:[%s11738_s29 + $0x2cc] ss:$16 sps:$4 sm:$0xff]   ;;  %v11287_v56 = vld [vmem:[%s11738_s29 + $0x2c0] ss:$16 sps:$4 sm:$0xff]  }
 0x429   : > { %9257 = vmatpush1.bf16.msra.mxu0 %v11221_v38  ;;  %9385 = vmatpush1.bf16.msra.mxu1 %v11224_v39  ;;  %v11290_v38 = vld [vmem:[%s11738_s29 + $0x2c8] ss:$16 sps:$4 sm:$0xff]   ;;  %v11291_v39 = vld [vmem:[%s11738_s29 + $0x2e4] ss:$16 sps:$4 sm:$0xff]  }
 0x42a   : > { %9259 = vmatprep.subr.bf16.mxu0 %v11225_v62  ;;  %9387 = vmatprep.subr.bf16.mxu1 %v11228_v22  ;;  %v11294_v62 = vld [vmem:[%s11738_s29 + $0x2ec] ss:$16 sps:$4 sm:$0xff]   ;;  %v11293_v22 = vld [vmem:[%s11738_s29 + $0x2e0] ss:$16 sps:$4 sm:$0xff]  }
 0x42d   : > { %9261 = vmatpush1.bf16.msra.mxu0 %v11227_v40  ;;  %9389 = vmatpush1.bf16.msra.mxu1 %v11230_v60  ;;  %v11296_v40 = vld [vmem:[%s11738_s29 + $0x2e8] ss:$16 sps:$4 sm:$0xff]   ;;  %v11297_v60 = vld [vmem:[%s11738_s29 + $0x304] ss:$16 sps:$4 sm:$0xff]  }
 0x42e   : > { %9263 = vmatprep.subr.bf16.mxu0 %v11231_v17  ;;  %9391 = vmatprep.subr.bf16.mxu1 %v11234_v4  ;;  %v11300_v17 = vld [vmem:[%s11738_s29 + $0x30c] ss:$16 sps:$4 sm:$0xff]   ;;  %v11299_v4 = vld [vmem:[%s11738_s29 + $0x300] ss:$16 sps:$4 sm:$0xff]  }
 0x431   : > { %9265 = vmatpush1.bf16.msra.mxu0 %v11233_v41  ;;  %9393 = vmatpush1.bf16.msra.mxu1 %v11236_v43  ;;  %v11302_v41 = vld [vmem:[%s11738_s29 + $0x308] ss:$16 sps:$4 sm:$0xff]   ;;  %v11303_v43 = vld [vmem:[%s11738_s29 + $0x324] ss:$16 sps:$4 sm:$0xff]  }
 0x432   : > { %9267 = vmatprep.subr.bf16.mxu0 %v11237_v10  ;;  %9395 = vmatprep.subr.bf16.mxu1 %v11240_v1  ;;  %v11306_v10 = vld [vmem:[%s11738_s29 + $0x32c] ss:$16 sps:$4 sm:$0xff]   ;;  %v11305_v1 = vld [vmem:[%s11738_s29 + $0x320] ss:$16 sps:$4 sm:$0xff]  }
 0x435   : > { %9269 = vmatpush1.bf16.msra.mxu0 %v11239_v45  ;;  %9397 = vmatpush1.bf16.msra.mxu1 %v11242_v51  ;;  %v11308_v45 = vld [vmem:[%s11738_s29 + $0x328] ss:$16 sps:$4 sm:$0xff]   ;;  %v11309_v51 = vld [vmem:[%s11738_s29 + $0x344] ss:$16 sps:$4 sm:$0xff]  }
 0x436   : > { %9271 = vmatprep.subr.bf16.mxu0 %v11243_v42  ;;  %9399 = vmatprep.subr.bf16.mxu1 %v11246_v46  ;;  %v11312_v42 = vld [vmem:[%s11738_s29 + $0x34c] ss:$16 sps:$4 sm:$0xff]   ;;  %v11311_v46 = vld [vmem:[%s11738_s29 + $0x340] ss:$16 sps:$4 sm:$0xff]  }
 0x439   : > { %9273 = vmatpush1.bf16.msra.mxu0 %v11245_v47  ;;  %9401 = vmatpush1.bf16.msra.mxu1 %v11248_v48  ;;  %v11314_v47 = vld [vmem:[%s11738_s29 + $0x348] ss:$16 sps:$4 sm:$0xff]   ;;  %v11315_v48 = vld [vmem:[%s11738_s29 + $0x364] ss:$16 sps:$4 sm:$0xff]  }
 0x43a   : > { %9275 = vmatprep.subr.bf16.mxu0 %v11249_v49  ;;  %9403 = vmatprep.subr.bf16.mxu1 %v11252_v35  ;;  %v11318_v49 = vld [vmem:[%s11738_s29 + $0x36c] ss:$16 sps:$4 sm:$0xff]   ;;  %v11317_v35 = vld [vmem:[%s11738_s29 + $0x360] ss:$16 sps:$4 sm:$0xff]  }
 0x4cf   : > { %v5463_v59 = vpop.f32.mrb[8].mxu0  ;;  %v12732_v57 = vpop.f32.mrb[10].mxu1 }
 0x4d0   : > { %v9660_v50 = vadd.f32 %v5463_v59, %v5167_v55  ;;  %v5465_v63 = vpop.f32.mrb[9].mxu0  ;;  %v5749_v3 = vpop.f32.mrb[11].mxu1  ;;  %v11320_v55 = vld [vmem:[%s11738_s29 + $0x368] ss:$16 sps:$4 sm:$0xff]   ;;  %v11323_v59 = vld [vmem:[%s11738_s29 + $0x380] ss:$16 sps:$4 sm:$0xff]  }
 0x4d1   : > { %v9661_v2 = vadd.f32 %v5465_v63, %v5171_v44  ;;  %v9663_v6 = vadd.f32 %v5749_v3, %v5179_v58  ;;  %v11321_v44 = vld [vmem:[%s11738_s29 + $0x384] ss:$16 sps:$4 sm:$0xff]   ;;  %v11324_v58 = vld [vmem:[%s11738_s29 + $0x38c] ss:$16 sps:$4 sm:$0xff]  }
 0x4d2   : > { %v5752_v14 = vmax.f32 %v9660_v50, 0.0  ;;  %v11326_v50 = vld [vmem:[%s11738_s29 + $0x388] ss:$16 sps:$4 sm:$0xff]   ;;  %v11327_v63 = vld [vmem:[%s11738_s29 + $0x3a4] ss:$16 sps:$4 sm:$0xff]  }
 0x4d3   : > { %v5753_v7 = vmax.f32 %v9661_v2, 0.0  ;;  %v5755_v21 = vmax.f32 %v9663_v6, 0.0  ;;  %v11330_v3 = vld [vmem:[%s11738_s29 + $0x3ac] ss:$16 sps:$4 sm:$0xff]   ;;  %v11329_v2 = vld [vmem:[%s11738_s29 + $0x3a0] ss:$16 sps:$4 sm:$0xff]  }
 0x4d4   : > { %v11332_v6 = vld [vmem:[%s11738_s29 + $0x3a8] ss:$16 sps:$4 sm:$0xff]  }
 0x4d5   : > { %6226 = vmatprep.mubr.f32.mxu0 %v5753_v7  ;;  %6368 = vmatprep.mubr.f32.mxu1 %v5753_v7  ;;  %v11333_v7 = vld [vmem:[%s11738_s29 + $0x3c4] ss:$16 sps:$4 sm:$0xff]  }
 0x4d6   : > { %6227 = vmatmul.mubr.f32.vlgmr.msra.gmra.mrb[10].mxu0 %v5752_v14  ;;  %6369 = vmatmul.mubr.f32.vlgmr.msra.gmra.mrb[12].mxu1 %v5752_v14  ;;  %v11338_v14 = vld [vmem:[%s11738_s29 + $0x3c8] ss:$16 sps:$4 sm:$0xff]  }
 0x4d7   : > { %9277 = vmatpush1.bf16.msra.mxu0 %v11251_v12  ;;  %9405 = vmatpush1.bf16.msra.mxu1 %v11254_v13  ;;  %v11336_v12 = vld [vmem:[%s11738_s29 + $0x3cc] ss:$16 sps:$4 sm:$0xff]   ;;  %v11335_v13 = vld [vmem:[%s11738_s29 + $0x3c0] ss:$16 sps:$4 sm:$0xff]  }
 0x4d8   : > { %6297 = vmatprep.mubr.f32.mxu0 %v5755_v21  ;;  %6439 = vmatprep.mubr.f32.mxu1 %v5755_v21  ;;  %v11342_v21 = vld [vmem:[%s11738_s29 + $0x3ec] ss:$16 sps:$4 sm:$0xff]  }
 0x4d9   : > { %9279 = vmatprep.subr.bf16.mxu0 %v11255_v15  ;;  %9407 = vmatprep.subr.bf16.mxu1 %v11258_v20  ;;  %v5175_v15 = vrot.slane %v12724_v18, %v11899_v8  ;;  %v11339_v20 = vld [vmem:[%s11738_s29 + $0x3e4] ss:$16 sps:$4 sm:$0xff]   ;;  %v11347_v18 = vld [vmem:[%s11787_s1] ss:$8 sps:$4 sm:$0xff]  }
 0x4db   : > { %9281 = vmatpush1.bf16.msra.mxu0 %v11257_v24  ;;  %9409 = vmatpush1.bf16.msra.mxu1 %v11260_v9  ;;  %v11341_v24 = vld [vmem:[%s11738_s29 + $0x3e0] ss:$16 sps:$4 sm:$0xff]   ;;  %v11344_v9 = vld [vmem:[%s11738_s29 + $0x3e8] ss:$16 sps:$4 sm:$0xff]  }
 0x4dc   : > { %9283 = vmatprep.subr.bf16.mxu0 %v11261_v25  ;;  %9411 = vmatprep.subr.bf16.mxu1 %v11264_v5  ;;  %v9662_v25 = vadd.f32 %v12732_v57, %v5175_v15  ;;  %v11345_v5 = vld [vmem:[%s11787_s1 + $0x4] ss:$8 sps:$4 sm:$0xff]  }
 0x4dd   : > { %v11351_v57 = vld [vmem:[%s11787_s1 + $0x24] ss:$8 sps:$4 sm:$0xff]  }
 0x4df   : > { %9285 = vmatpush1.bf16.msra.mxu0 %v11263_v61  ;;  %9413 = vmatpush1.bf16.msra.mxu1 %v11266_v11  ;;  %v5754_v61 = vmax.f32 %v9662_v25, 0.0  ;;  %v11348_v11 = vld [vmem:[%s11787_s1 + $0x14] ss:$8 sps:$4 sm:$0xff]  }
 0x4e0   : > { %9287 = vmatprep.subr.bf16.mxu0 %v11267_v16  ;;  %9415 = vmatprep.subr.bf16.mxu1 %v11270_v19  ;;  %v11350_v16 = vld [vmem:[%s11787_s1 + $0x10] ss:$8 sps:$4 sm:$0xff]   ;;  %v11353_v19 = vld [vmem:[%s11787_s1 + $0x20] ss:$8 sps:$4 sm:$0xff]  }
 0x4e3   : > { %9289 = vmatpush1.bf16.msra.mxu0 %v11269_v31  ;;  %9417 = vmatpush1.bf16.msra.mxu1 %v11272_v53  ;;  %v11354_v31 = vld [vmem:[%s11787_s1 + $0x34] ss:$8 sps:$4 sm:$0xff]   ;;  %v11356_v53 = vld [vmem:[%s11787_s1 + $0x30] ss:$8 sps:$4 sm:$0xff]  }
 0x4e4   : > { %9291 = vmatprep.subr.bf16.mxu0 %v11273_v26  ;;  %9419 = vmatprep.subr.bf16.mxu1 %v11276_v27  ;;  %v11357_v26 = vld [vmem:[%s11787_s1 + $0x44] ss:$8 sps:$4 sm:$0xff]   ;;  %v11359_v27 = vld [vmem:[%s11787_s1 + $0x40] ss:$8 sps:$4 sm:$0xff]  }
 0x4e7   : > { %9293 = vmatpush1.bf16.msra.mxu0 %v11275_v32  ;;  %9421 = vmatpush1.bf16.msra.mxu1 %v11278_v28  ;;  %v11360_v32 = vld [vmem:[%s11787_s1 + $0x54] ss:$8 sps:$4 sm:$0xff]   ;;  %v11362_v28 = vld [vmem:[%s11787_s1 + $0x50] ss:$8 sps:$4 sm:$0xff]  }
 0x4e8   : > { %9295 = vmatprep.subr.bf16.mxu0 %v11279_v29  ;;  %9423 = vmatprep.subr.bf16.mxu1 %v11282_v23  ;;  %v11363_v29 = vld [vmem:[%s11787_s1 + $0x64] ss:$8 sps:$4 sm:$0xff]   ;;  %v11365_v23 = vld [vmem:[%s11787_s1 + $0x60] ss:$8 sps:$4 sm:$0xff]  }
 0x4eb   : > { %9297 = vmatpush1.bf16.msra.mxu0 %v11281_v34  ;;  %9425 = vmatpush1.bf16.msra.mxu1 %v11284_v30  ;;  %v11366_v34 = vld [vmem:[%s11787_s1 + $0x74] ss:$8 sps:$4 sm:$0xff]   ;;  %v11368_v30 = vld [vmem:[%s11787_s1 + $0x70] ss:$8 sps:$4 sm:$0xff]  }
 0x4ec   : > { %9299 = vmatprep.subr.bf16.mxu0 %v11285_v36  ;;  %9427 = vmatprep.subr.bf16.mxu1 %v11288_v37  ;;  %v11369_v36 = vld [vmem:[%s11787_s1 + $0x84] ss:$8 sps:$4 sm:$0xff]   ;;  %v11371_v37 = vld [vmem:[%s11787_s1 + $0x80] ss:$8 sps:$4 sm:$0xff]  }
 0x4ef   : > { %9301 = vmatpush1.bf16.msra.mxu0 %v11287_v56  ;;  %9429 = vmatpush1.bf16.msra.mxu1 %v11290_v38  ;;  %v11372_v56 = vld [vmem:[%s11787_s1 + $0x94] ss:$8 sps:$4 sm:$0xff]   ;;  %v11374_v38 = vld [vmem:[%s11787_s1 + $0x90] ss:$8 sps:$4 sm:$0xff]  }
 0x4f0   : > { %9303 = vmatprep.subr.bf16.mxu0 %v11291_v39  ;;  %9431 = vmatprep.subr.bf16.mxu1 %v11294_v62  ;;  %v11375_v39 = vld [vmem:[%s11787_s1 + $0xa4] ss:$8 sps:$4 sm:$0xff]   ;;  %v11377_v62 = vld [vmem:[%s11787_s1 + $0xa0] ss:$8 sps:$4 sm:$0xff]  }
 0x4f3   : > { %9305 = vmatpush1.bf16.msra.mxu0 %v11293_v22  ;;  %9433 = vmatpush1.bf16.msra.mxu1 %v11296_v40  ;;  %v11378_v22 = vld [vmem:[%s11787_s1 + $0xb4] ss:$8 sps:$4 sm:$0xff]   ;;  %v11380_v40 = vld [vmem:[%s11787_s1 + $0xb0] ss:$8 sps:$4 sm:$0xff]  }
 0x4f4   : > { %9307 = vmatprep.subr.bf16.mxu0 %v11297_v60  ;;  %9435 = vmatprep.subr.bf16.mxu1 %v11300_v17  ;;  %v11381_v60 = vld [vmem:[%s11787_s1 + $0xc4] ss:$8 sps:$4 sm:$0xff]   ;;  %v11383_v17 = vld [vmem:[%s11787_s1 + $0xc0] ss:$8 sps:$4 sm:$0xff]  }
 0x4f7   : > { %9309 = vmatpush1.bf16.msra.mxu0 %v11299_v4  ;;  %9437 = vmatpush1.bf16.msra.mxu1 %v11302_v41  ;;  %v11384_v4 = vld [vmem:[%s11787_s1 + $0xd4] ss:$8 sps:$4 sm:$0xff]   ;;  %v11386_v41 = vld [vmem:[%s11787_s1 + $0xd0] ss:$8 sps:$4 sm:$0xff]  }
 0x4f8   : > { %9311 = vmatprep.subr.bf16.mxu0 %v11303_v43  ;;  %9439 = vmatprep.subr.bf16.mxu1 %v11306_v10  ;;  %v11387_v43 = vld [vmem:[%s11787_s1 + $0xe4] ss:$8 sps:$4 sm:$0xff]   ;;  %v11389_v10 = vld [vmem:[%s11787_s1 + $0xe0] ss:$8 sps:$4 sm:$0xff]  }
 0x4fb   : > { %9313 = vmatpush1.bf16.msra.mxu0 %v11305_v1  ;;  %9441 = vmatpush1.bf16.msra.mxu1 %v11308_v45  ;;  %v11390_v1 = vld [vmem:[%s11787_s1 + $0xf4] ss:$8 sps:$4 sm:$0xff]   ;;  %v11392_v45 = vld [vmem:[%s11787_s1 + $0xf0] ss:$8 sps:$4 sm:$0xff]  }
 0x4fc   : > { %9315 = vmatprep.subr.bf16.mxu0 %v11309_v51  ;;  %9443 = vmatprep.subr.bf16.mxu1 %v11312_v42  ;;  %v11393_v51 = vld [vmem:[%s11787_s1 + $0x104] ss:$8 sps:$4 sm:$0xff]  }
 0x4fd   : > { %v7412_v42 = vld [vmem:[%s12837_s23 + $0x40] sm:$0xff]  }
 0x4ff   : > { %9317 = vmatpush1.bf16.msra.mxu0 %v11311_v46  ;;  %9445 = vmatpush1.bf16.msra.mxu1 %v11314_v47  ;;  %v7310_v46 = vld [vmem:[%s12837_s23] sm:$0xff]   ;;  %v7413_v47 = vld [vmem:[%s12837_s23 + $0x48] sm:$0xff]  }
 0x500   : > { %9319 = vmatprep.subr.bf16.mxu0 %v11315_v48  ;;  %9447 = vmatprep.subr.bf16.mxu1 %v11318_v49  ;;  %v7405_v48 = vld [vmem:[%s12837_s23 + $0x8] sm:$0xff]   ;;  %v7414_v49 = vld [vmem:[%s12837_s23 + $0x50] sm:$0xff]  }
 0x503   : > { %9321 = vmatpush1.bf16.msra.mxu0 %v11317_v35  ;;  %9449 = vmatpush1.bf16.msra.mxu1 %v11320_v55  ;;  %v7406_v35 = vld [vmem:[%s12837_s23 + $0x10] sm:$0xff]   ;;  %v7415_v55 = vld [vmem:[%s12837_s23 + $0x58] sm:$0xff]  }
 0x504   : > { %9323 = vmatprep.subr.bf16.mxu0 %v11321_v44  ;;  %9451 = vmatprep.subr.bf16.mxu1 %v11324_v58  ;;  %v7407_v44 = vld [vmem:[%s12837_s23 + $0x18] sm:$0xff]   ;;  %v7416_v58 = vld [vmem:[%s12837_s23 + $0x60] sm:$0xff]  }
 0x507   : > { %9325 = vmatpush1.bf16.msra.mxu0 %v11323_v59  ;;  %9453 = vmatpush1.bf16.msra.mxu1 %v11326_v50  ;;  %v7408_v59 = vld [vmem:[%s12837_s23 + $0x20] sm:$0xff]   ;;  %v7417_v50 = vld [vmem:[%s12837_s23 + $0x68] sm:$0xff]  }
 0x508   : > { %9327 = vmatprep.subr.bf16.mxu0 %v11327_v63  ;;  %9455 = vmatprep.subr.bf16.mxu1 %v11330_v3  ;;  %v7409_v63 = vld [vmem:[%s12837_s23 + $0x28] sm:$0xff]   ;;  %v7418_v3 = vld [vmem:[%s12837_s23 + $0x70] sm:$0xff]  }
 0x50b   : > { %9329 = vmatpush1.bf16.msra.mxu0 %v11329_v2  ;;  %9457 = vmatpush1.bf16.msra.mxu1 %v11332_v6  ;;  %v12857_v2 = vld [vmem:[%s770_s27] sm:$0xf] }
 0x50c   : > { %9331 = vmatprep.subr.bf16.mxu0 %v11333_v7  ;;  %9459 = vmatprep.subr.bf16.mxu1 %v11336_v12  ;;  %v6145_v6 = vrot.slane %v12857_v2, %v11801_v52  ;;  %v6149_v7 = vrot.slane %v12857_v2, %v11807_v54  ;;  %v6157_v12 = vrot.slane %v12857_v2, %v11856_v33  ;;  %v11398_v33 = vld [vmem:[%s11787_s1 + $0x110] ss:$8 sps:$4 sm:$0xff]  }
 0x50f   : > { %9333 = vmatpush1.bf16.msra.mxu0 %v11335_v13  ;;  %9461 = vmatpush1.bf16.msra.mxu1 %v11338_v14 }
 0x510   : > { %9335 = vmatprep.subr.bf16.mxu0 %v11339_v20  ;;  %9463 = vmatprep.subr.bf16.mxu1 %v11342_v21 }
 0x513   : > { %9337 = vmatpush1.bf16.msra.mxu0 %v11341_v24  ;;  %9465 = vmatpush1.bf16.msra.mxu1 %v11344_v9 }
 0x514   : > { %9467 = vmatprep.subr.bf16.mxu0 %v11345_v5  ;;  %9595 = vmatprep.subr.bf16.mxu1 %v7412_v42  ;;  %v11395_v5 = vld [vmem:[%s11787_s1 + $0x100] ss:$8 sps:$4 sm:$0xff]  }
 0x516   : > { %6298 = vmatmul.mubr.f32.vlgmr.msra.gmra.mrb[10].mxu0 %v5754_v61  ;;  %6440 = vmatmul.mubr.f32.vlgmr.msra.gmra.mrb[12].mxu1 %v5754_v61  ;;  %v11396_v61 = vld [vmem:[%s11787_s1 + $0x114] ss:$8 sps:$4 sm:$0xff]  }
 0x517   : > { %9469 = vmatpush1.bf16.msra.mxu0 %v11347_v18  ;;  %9597 = vmatpush3.bf16.msra.mxu1 %v7310_v46  ;;  %v7410_v46 = vld [vmem:[%s12837_s23 + $0x30] sm:$0xff]  }
 0x518   : > { %9471 = vmatprep.subr.bf16.mxu0 %v11348_v11  ;;  %9599 = vmatprep.subr.bf16.mxu1 %v7413_v47  ;;  %v7419_v47 = vld [vmem:[%s12837_s23 + $0x78] sm:$0xff]  }
 0x51b   : > { %9473 = vmatpush1.bf16.msra.mxu0 %v11350_v16  ;;  %9601 = vmatpush3.bf16.msra.mxu1 %v7405_v48  ;;  %v11399_v16 = vld [vmem:[%s11787_s1 + $0x124] ss:$8 sps:$4 sm:$0xff]   ;;  %v7411_v48 = vld [vmem:[%s12837_s23 + $0x38] sm:$0xff]  }
 0x51c   : > { %9475 = vmatprep.subr.bf16.mxu0 %v11351_v57  ;;  %9603 = vmatprep.subr.bf16.mxu1 %v7414_v49  ;;  %v11401_v57 = vld [vmem:[%s11787_s1 + $0x120] ss:$8 sps:$4 sm:$0xff]   ;;  %v11452_v49 = vmov 0.0|0.0  }
 0x51f   : > { %9477 = vmatpush1.bf16.msra.mxu0 %v11353_v19  ;;  %9605 = vmatpush3.bf16.msra.mxu1 %v7406_v35  ;;  %v11402_v19 = vld [vmem:[%s11787_s1 + $0x134] ss:$8 sps:$4 sm:$0xff]  }
 0x520   : > { %9479 = vmatprep.subr.bf16.mxu0 %v11354_v31  ;;  %9607 = vmatprep.subr.bf16.mxu1 %v7415_v55  ;;  %v11404_v31 = vld [vmem:[%s11787_s1 + $0x130] ss:$8 sps:$4 sm:$0xff]  }
 0x523   : > { %9481 = vmatpush1.bf16.msra.mxu0 %v11356_v53  ;;  %9609 = vmatpush3.bf16.msra.mxu1 %v7407_v44  ;;  %v11405_v53 = vld [vmem:[%s11787_s1 + $0x144] ss:$8 sps:$4 sm:$0xff]  }
 0x524   : > { %9483 = vmatprep.subr.bf16.mxu0 %v11357_v26  ;;  %9611 = vmatprep.subr.bf16.mxu1 %v7416_v58  ;;  %v11407_v26 = vld [vmem:[%s11787_s1 + $0x140] ss:$8 sps:$4 sm:$0xff]  }
 0x527   : > { %9485 = vmatpush1.bf16.msra.mxu0 %v11359_v27  ;;  %9613 = vmatpush3.bf16.msra.mxu1 %v7408_v59  ;;  %v11408_v27 = vld [vmem:[%s11787_s1 + $0x154] ss:$8 sps:$4 sm:$0xff]  }
 0x528   : > { %9487 = vmatprep.subr.bf16.mxu0 %v11360_v32  ;;  %9615 = vmatprep.subr.bf16.mxu1 %v7417_v50  ;;  %v11410_v32 = vld [vmem:[%s11787_s1 + $0x150] ss:$8 sps:$4 sm:$0xff]  }
 0x52b   : > { %9489 = vmatpush1.bf16.msra.mxu0 %v11362_v28  ;;  %9617 = vmatpush3.bf16.msra.mxu1 %v7409_v63  ;;  %v11411_v28 = vld [vmem:[%s11787_s1 + $0x164] ss:$8 sps:$4 sm:$0xff]  }
 0x52c   : > { %9491 = vmatprep.subr.bf16.mxu0 %v11363_v29  ;;  %9619 = vmatprep.subr.bf16.mxu1 %v7418_v3  ;;  %v11413_v29 = vld [vmem:[%s11787_s1 + $0x160] ss:$8 sps:$4 sm:$0xff]  }
 0x52f   : > { %9493 = vmatpush1.bf16.msra.mxu0 %v11365_v23  ;;  %v11414_v23 = vld [vmem:[%s11787_s1 + $0x174] ss:$8 sps:$4 sm:$0xff]   ;;  %9621 = vmatpush3.bf16.msra.mxu1 %v7410_v46 }
 0x530   : > { %9495 = vmatprep.subr.bf16.mxu0 %v11366_v34  ;;  %v11416_v34 = vld [vmem:[%s11787_s1 + $0x170] ss:$8 sps:$4 sm:$0xff]   ;;  %9623 = vmatprep.subr.bf16.mxu1 %v7419_v47 }
 0x533   : > { %9497 = vmatpush1.bf16.msra.mxu0 %v11368_v30  ;;  %v11417_v30 = vld [vmem:[%s11787_s1 + $0x184] ss:$8 sps:$4 sm:$0xff]   ;;  %9625 = vmatpush3.bf16.msra.mxu1 %v7411_v48 }
 0x534   : > { %9499 = vmatprep.subr.bf16.mxu0 %v11369_v36  ;;  %v11419_v36 = vld [vmem:[%s11787_s1 + $0x180] ss:$8 sps:$4 sm:$0xff]   ;;  %9626 = vmatprep.subr.bf16.mxu1 %v11452_v49 }
 0x537   : > { %9501 = vmatpush1.bf16.msra.mxu0 %v11371_v37  ;;  %v11420_v37 = vld [vmem:[%s11787_s1 + $0x194] ss:$8 sps:$4 sm:$0xff]  }
 0x538   : > { %9503 = vmatprep.subr.bf16.mxu0 %v11372_v56  ;;  %v11422_v56 = vld [vmem:[%s11787_s1 + $0x190] ss:$8 sps:$4 sm:$0xff]  }
 0x53b   : > { %9505 = vmatpush1.bf16.msra.mxu0 %v11374_v38  ;;  %v11423_v38 = vld [vmem:[%s11787_s1 + $0x1a4] ss:$8 sps:$4 sm:$0xff]  }
 0x53c   : > { %9507 = vmatprep.subr.bf16.mxu0 %v11375_v39  ;;  %v11425_v39 = vld [vmem:[%s11787_s1 + $0x1a0] ss:$8 sps:$4 sm:$0xff]  }
 0x53f   : > { %9509 = vmatpush1.bf16.msra.mxu0 %v11377_v62  ;;  %v11426_v62 = vld [vmem:[%s11787_s1 + $0x1b4] ss:$8 sps:$4 sm:$0xff]  }
 0x540   : > { %9511 = vmatprep.subr.bf16.mxu0 %v11378_v22  ;;  %v11428_v22 = vld [vmem:[%s11787_s1 + $0x1b0] ss:$8 sps:$4 sm:$0xff]  }
 0x543   : > { %9513 = vmatpush1.bf16.msra.mxu0 %v11380_v40  ;;  %v11429_v40 = vld [vmem:[%s11787_s1 + $0x1c4] ss:$8 sps:$4 sm:$0xff]  }
 0x544   : > { %9515 = vmatprep.subr.bf16.mxu0 %v11381_v60  ;;  %v11431_v60 = vld [vmem:[%s11787_s1 + $0x1c0] ss:$8 sps:$4 sm:$0xff]  }
 0x547   : > { %9517 = vmatpush1.bf16.msra.mxu0 %v11383_v17  ;;  %v11432_v17 = vld [vmem:[%s11787_s1 + $0x1d4] ss:$8 sps:$4 sm:$0xff]  }
 0x548   : > { %9519 = vmatprep.subr.bf16.mxu0 %v11384_v4  ;;  %v11434_v4 = vld [vmem:[%s11787_s1 + $0x1d0] ss:$8 sps:$4 sm:$0xff]  }
 0x54b   : > { %9521 = vmatpush1.bf16.msra.mxu0 %v11386_v41  ;;  %v11435_v41 = vld [vmem:[%s11787_s1 + $0x1e4] ss:$8 sps:$4 sm:$0xff]  }
 0x54c   : > { %9523 = vmatprep.subr.bf16.mxu0 %v11387_v43  ;;  %v11437_v43 = vld [vmem:[%s11787_s1 + $0x1e0] ss:$8 sps:$4 sm:$0xff]  }
 0x54f   : > { %9525 = vmatpush1.bf16.msra.mxu0 %v11389_v10  ;;  %v6153_v10 = vrot.slane %v12857_v2, %v11899_v8  ;;  %v7374_v2 = vld [vmem:[%s792_s19] sm:$0xff]  }
 0x550   : > { %9527 = vmatprep.subr.bf16.mxu0 %v11390_v1  ;;  %v11438_v1 = vld [vmem:[%s11787_s1 + $0x1f4] ss:$8 sps:$4 sm:$0xff]  }
 0x553   : > { %9529 = vmatpush1.bf16.msra.mxu0 %v11392_v45  ;;  %v11440_v45 = vld [vmem:[%s11787_s1 + $0x1f0] ss:$8 sps:$4 sm:$0xff]   ;;  %s779_s1 = scalar_lea.vmem %s12942_s12, %s7287_s30 }
 0x554   : > { %9531 = vmatprep.subr.bf16.mxu0 %v11393_v51  ;;  %v6642_v8 = vld [vmem:[%s779_s1] sm:$0x3] }
 0x555   : > { %v6647_v35 = vrot.slane %v6642_v8, %v11801_v52  ;;  %v6651_v55 = vrot.slane %v6642_v8, %v11807_v54  ;;  %v7421_v52 = vld [vmem:[%s792_s19 + $0x10] sm:$0xff]   ;;  %v7422_v54 = vld [vmem:[%s792_s19 + $0x18] sm:$0xff]  }
 0x5e9   : > { %v6299_v13 = vpop.f32.mrb[10].mxu0  ;;  %v12865_v14 = vpop.f32.mrb[12].mxu1 }
 0x5ea   : > { %v9664_v15 = vadd.f32 %v6299_v13, %v6145_v6  ;;  %v6301_v20 = vpop.f32.mrb[11].mxu0  ;;  %v6443_v21 = vpop.f32.mrb[13].mxu1  ;;  %v9666_v51 = vadd.f32 %v12865_v14, %v6153_v10  ;;  %v7420_v6 = vld [vmem:[%s792_s19 + $0x8] sm:$0xff]   ;;  %v7425_v13 = vld [vmem:[%s792_s19 + $0x30] sm:$0xff]   ;;  %v7426_v14 = vld [vmem:[%s792_s19 + $0x38] sm:$0xff]  }
 0x5eb   : > { %v9665_v24 = vadd.f32 %v6301_v20, %v6149_v7  ;;  %v9667_v9 = vadd.f32 %v6443_v21, %v6157_v12  ;;  %v7423_v7 = vld [vmem:[%s792_s19 + $0x20] sm:$0xff]   ;;  %v7424_v12 = vld [vmem:[%s792_s19 + $0x28] sm:$0xff]  }
 0x5ec   : > { %v6446_v18 = vmax.f32 %v9664_v15, 0.0  ;;  %v6448_v42 = vmax.f32 %v9666_v51, 0.0  ;;  %v7297_v20 = vld [vmem:[%s787_s0] ss:$0 sm:$0xff] }
 0x5ed   : > { %v6447_v25 = vmax.f32 %v9665_v24, 0.0  ;;  %v6449_v11 = vmax.f32 %v9667_v9, 0.0 }
 0x5ef   : > { %6718 = vmatprep.mubr.f32.mxu0 %v6447_v25 }
 0x5f0   : > { %6719 = vmatmul.mubr.f32.vlgmr.msra.gmra.mrb[12].mxu0 %v6446_v18 }
 0x5f1   : > { %9533 = vmatpush1.bf16.msra.mxu0 %v11395_v5  ;;  %6789 = vmatprep.mubr.f32.mxu0 %v6449_v11  ;;  %v7298_v5 = vld [vmem:[%s795_s28] ss:$0 sm:$0xff] }
 0x5f2   : > { %9535 = vmatprep.subr.bf16.mxu0 %v11396_v61 }
 0x5f5   : > { %9537 = vmatpush1.bf16.msra.mxu0 %v11398_v33 }
 0x5f6   : > { %9539 = vmatprep.subr.bf16.mxu0 %v11399_v16 }
 0x5f9   : > { %9541 = vmatpush1.bf16.msra.mxu0 %v11401_v57 }
 0x5fa   : > { %9543 = vmatprep.subr.bf16.mxu0 %v11402_v19 }
 0x5fd   : > { %9545 = vmatpush1.bf16.msra.mxu0 %v11404_v31 }
 0x5fe   : > { %9547 = vmatprep.subr.bf16.mxu0 %v11405_v53 }
 0x601   : > { %9549 = vmatpush1.bf16.msra.mxu0 %v11407_v26 }
 0x602   : > { %9551 = vmatprep.subr.bf16.mxu0 %v11408_v27 }
 0x605   : > { %9553 = vmatpush1.bf16.msra.mxu0 %v11410_v32 }
 0x606   : > { %9555 = vmatprep.subr.bf16.mxu0 %v11411_v28 }
 0x609   : > { %9557 = vmatpush1.bf16.msra.mxu0 %v11413_v29 }
 0x60a   : > { %9559 = vmatprep.subr.bf16.mxu0 %v11414_v23 }
 0x60d   : > { %9561 = vmatpush1.bf16.msra.mxu0 %v11416_v34 }
 0x60e   : > { %9563 = vmatprep.subr.bf16.mxu0 %v11417_v30 }
 0x611   : > { %9565 = vmatpush1.bf16.msra.mxu0 %v11419_v36 }
 0x612   : > { %9567 = vmatprep.subr.bf16.mxu0 %v11420_v37 }
 0x615   : > { %9569 = vmatpush1.bf16.msra.mxu0 %v11422_v56 }
 0x616   : > { %9571 = vmatprep.subr.bf16.mxu0 %v11423_v38 }
 0x619   : > { %9573 = vmatpush1.bf16.msra.mxu0 %v11425_v39 }
 0x61a   : > { %9575 = vmatprep.subr.bf16.mxu0 %v11426_v62 }
 0x61d   : > { %9577 = vmatpush1.bf16.msra.mxu0 %v11428_v22 }
 0x61e   : > { %9579 = vmatprep.subr.bf16.mxu0 %v11429_v40 }
 0x621   : > { %9581 = vmatpush1.bf16.msra.mxu0 %v11431_v60 }
 0x622   : > { %9583 = vmatprep.subr.bf16.mxu0 %v11432_v17 }
 0x625   : > { %9585 = vmatpush1.bf16.msra.mxu0 %v11434_v4 }
 0x626   : > { %9587 = vmatprep.subr.bf16.mxu0 %v11435_v41 }
 0x629   : > { %9589 = vmatpush1.bf16.msra.mxu0 %v11437_v43 }
 0x62a   : > { %9591 = vmatprep.subr.bf16.mxu0 %v11438_v1 }
 0x62d   : > { %9593 = vmatpush1.bf16.msra.mxu0 %v11440_v45 }
 0x630   : > { %6790 = vmatmul.mubr.f32.vlgmr.msra.gmra.mrb[12].mxu0 %v6448_v42 }
 0x703   : > { %v6791_v44 = vpop.f32.mrb[12].mxu0 }
 0x704   : > { %v9668_v58 = vadd.f32 %v6791_v44, %v6647_v35  ;;  %v6793_v59 = vpop.f32.mrb[13].mxu0 }
 0x705   : > { %v9669_v50 = vadd.f32 %v6793_v59, %v6651_v55 }
 0x706   : > { %v6796_v3 = vmax.f32 %v9668_v58, 0.0 }
 0x707   : > { %v6797_v63 = vmax.f32 %v9669_v50, 0.0 }
 0x709   : > { %6933 = vmatprep.mubr.f32.mxu1 %v6797_v63 }
 0x70a   : > { %6934 = vmatmul.mubr.f32.vlgmr.msra.gmra.mrb[14].mxu1 %v6796_v3 }
 0x70b   : > { %9628 = vmatpush3.bf16.msra.mxu1 %v7374_v2  ;;  %7511 = vmatprep.mubr.msk.f32.mxu1 %vm11453_vm1, %v11451_v0 }
 0x70c   : > { %9629 = vmatprep.subr.bf16.mxu1 %v11452_v49 }
 0x70f   : > { %9631 = vmatpush3.bf16.msra.mxu1 %v7420_v6 }
 0x710   : > { %9632 = vmatprep.subr.bf16.mxu1 %v11452_v49 }
 0x713   : > { %9634 = vmatpush3.bf16.msra.mxu1 %v7421_v52 }
 0x714   : > { %9635 = vmatprep.subr.bf16.mxu1 %v11452_v49 }
 0x717   : > { %9637 = vmatpush3.bf16.msra.mxu1 %v7422_v54 }
 0x718   : > { %9638 = vmatprep.subr.bf16.mxu1 %v11452_v49 }
 0x71b   : > { %9640 = vmatpush3.bf16.msra.mxu1 %v7423_v7 }
 0x71c   : > { %9641 = vmatprep.subr.bf16.mxu1 %v11452_v49 }
 0x71f   : > { %9643 = vmatpush3.bf16.msra.mxu1 %v7424_v12 }
 0x720   : > { %9644 = vmatprep.subr.bf16.mxu1 %v11452_v49 }
 0x723   : > { %9646 = vmatpush3.bf16.msra.mxu1 %v7425_v13 }
 0x724   : > { %9647 = vmatprep.subr.bf16.mxu1 %v11452_v49 }
 0x727   : > { %9649 = vmatpush3.bf16.msra.mxu1 %v7426_v14 }
 0x7dd   : > { %v7459_v15 = vpop.f32.mrb[14].mxu1 }
 0x7de   : > { %v7460_v21 = vpop.f32.mrb[15].mxu1 }
 0x7df   : > { %v7461_v24 = vadd.f32 %v7460_v21, %v7459_v15 }
 0x7e1   : > { %v6936_v9 = vadd.f32 %v7461_v24, %v7297_v20 }
 0x7e3   : > { %v6939_v25 = vmax.f32 %v6936_v9, 0.0 }
 0x7e5   : > { %7512 = vmatmul.mubr.f32.vlgmr.msra.gmra.mrb[16].mxu1 %v6939_v25 }
 0x8b8   : > { %v7045_v0 = vpop.f32.mrb[16].mxu1 }
 0x8b9   : > { %v7046_v18 = vadd.f32 %v7298_v5, %v7045_v0  ;;  %v7513_v61 = vpop.f32.mrb[17].mxu1 }
 0x8bb   : > { %7050 = vst.msk [vmem:[%s799_s18] sm:$0xff] %vm7049_vm2, %v7046_v18 }
 0x8bc PF: > { %s27_s24 = sadd.s32 1, %s11449_s24  }
 0x8bd   : > { %p24_p4 = scmp.ge.s32.totalorder %s27_s24, 4  }
 0x8bf   :  { %26 = sbr.rel (!%p24_p4) target bundleno = 3 (0x3), region = 160 }

</bundles_post_ra>
